<compile_context>
chip_gen: v6e
topology: v6e:2x2x1
jax: 0.10.0
libtpu: 0.0.40
codegen_flags: <defaults>
</compile_context>

<pallas_src>
import numpy as np
import jax
import jax.numpy as jnp
from jax.experimental import pallas as pl
from jax.experimental.pallas import tpu as pltpu

EPS = 1e-5  # nn.InstanceNorm2d default eps (affine=False, track_running_stats=False)


def _resblock_kernel(xp_ref, w1_ref, b1_ref, w2_ref, b2_ref, out_ref, pad_ref):
    # xp_ref:  (1, H+2, W+2, C) f32   reflection-padded input, channels-last
    # w1_ref:  (3, 3, C, C)     bf16  conv1 weights [kh, kw, cin, cout]
    # b1_ref:  (1, C)           f32
    # w2_ref:  (3, 3, C, C)     bf16  conv2 weights
    # b2_ref:  (1, C)           f32
    # out_ref: (1, H*W, C)      f32
    # pad_ref: (H+2, W+2, C)    bf16  shared VMEM slab (padded input, then padded act)
    Hp, Wp, C = xp_ref.shape[1], xp_ref.shape[2], xp_ref.shape[3]
    H, W = Hp - 2, Wp - 2
    HW = H * W
    inv_hw = 1.0 / float(HW)

    def conv3x3(w_ref, b_ref):
        # 9 accumulated MXU matmuls: (HW, C)bf16 @ (C, C)bf16 -> f32.
        # Bias is folded into the accumulator init (single broadcast, hoisted).
        acc = jnp.broadcast_to(b_ref[...], (HW, C))
        for kh in range(3):
            for kw in range(3):
                tap = pad_ref[kh:kh + H, kw:kw + W, :].reshape(HW, C)   # bf16
                acc = acc + jnp.dot(tap, w_ref[kh, kw],
                                    preferred_element_type=jnp.float32)
        return acc                                                      # (HW, C) f32

    def instance_norm(y):
        # One-pass per-channel stats over spatial positions (biased variance,
        # matching PyTorch), fused normalization; rsqrt goes to the EUP.
        s = jnp.sum(y, axis=0, keepdims=True)            # (1, C)
        ss = jnp.sum(y * y, axis=0, keepdims=True)       # (1, C)
        mean = s * inv_hw
        var = ss * inv_hw - mean * mean
        return (y - mean) * jax.lax.rsqrt(var + EPS)

    # ---- stage 0: single bf16 cast of the padded input into the shared slab
    pad_ref[...] = xp_ref[0].astype(jnp.bfloat16)

    # ---- conv1 -> InstanceNorm -> ReLU -------------------------------------
    h = jnp.maximum(instance_norm(conv3x3(w1_ref, b1_ref)), 0.0)       # (HW, C) f32

    # ---- reflection-pad the activation into the SAME slab for conv2 --------
    hb = h.reshape(H, W, C).astype(jnp.bfloat16)
    rows = jnp.concatenate([hb[1:2], hb, hb[H - 2:H - 1]], axis=0)         # (H+2, W, C)
    hp = jnp.concatenate([rows[:, 1:2], rows, rows[:, W - 2:W - 1]], axis=1)  # (H+2, W+2, C)
    pad_ref[...] = hp

    # ---- conv2 -> InstanceNorm ---------------------------------------------
    y2 = instance_norm(conv3x3(w2_ref, b2_ref))                          # (HW, C) f32

    # ---- residual add with exact f32 input (center of the padded block) ----
    x_c = xp_ref[0, 1:1 + H, 1:1 + W, :].reshape(HW, C)
    out_ref[0, :, :] = x_c + y2


def residual_block_forward(x, w1, b1, w2, b2):
    """x: (N,C,H,W) f32; w1,w2: (C,C,3,3) PyTorch OIHW; b1,b2: (C,)."""
    N, C, H, W = x.shape
    HW = H * W

    # ---- glue: NCHW -> padded NHWC once, weights -> (kh,kw,cin,cout) bf16 ---
    x_nhwc = jnp.transpose(x, (0, 2, 3, 1)).astype(jnp.float32)
    xp = jnp.pad(x_nhwc, ((0, 0), (1, 1), (1, 1), (0, 0)), mode="reflect")
    w1t = jnp.transpose(w1, (2, 3, 1, 0)).astype(jnp.bfloat16)
    w2t = jnp.transpose(w2, (2, 3, 1, 0)).astype(jnp.bfloat16)
    b1r = b1.reshape(1, C).astype(jnp.float32)
    b2r = b2.reshape(1, C).astype(jnp.float32)

    y = pl.pallas_call(
        _resblock_kernel,
        out_shape=jax.ShapeDtypeStruct((N, HW, C), jnp.float32),
        grid=(N,),
        in_specs=[
            pl.BlockSpec((1, H + 2, W + 2, C), lambda n: (n, 0, 0, 0)),
            pl.BlockSpec((3, 3, C, C), lambda n: (0, 0, 0, 0)),   # VMEM-resident
            pl.BlockSpec((1, C), lambda n: (0, 0)),
            pl.BlockSpec((3, 3, C, C), lambda n: (0, 0, 0, 0)),   # VMEM-resident
            pl.BlockSpec((1, C), lambda n: (0, 0)),
        ],
        out_specs=pl.BlockSpec((1, HW, C), lambda n: (n, 0, 0)),
        scratch_shapes=[pltpu.VMEM((H + 2, W + 2, C), jnp.bfloat16)],
        compiler_params=pltpu.CompilerParams(dimension_semantics=("parallel",)),
    )(xp, w1t, b1r, w2t, b2r)

    # ---- glue: back to the module's NCHW contract ---------------------------
    return jnp.transpose(y.reshape(N, H, W, C), (0, 3, 1, 2))


def _numpy_reference(x, w1, b1, w2, b2):
    x = np.asarray(x, np.float64)
    w1, b1, w2, b2 = (np.asarray(a, np.float64) for a in (w1, b1, w2, b2))

    def conv3x3(a, w, b):
        n, c, hh, ww = a.shape
        ap = np.pad(a, ((0, 0), (0, 0), (1, 1), (1, 1)), mode="reflect")
        out = np.zeros((n, w.shape[0], hh, ww), np.float64)
        for kh in range(3):
            for kw in range(3):
                out += np.einsum("nchw,oc->nohw",
                                 ap[:, :, kh:kh + hh, kw:kw + ww], w[:, :, kh, kw])
        return out + b.reshape(1, -1, 1, 1)

    def instance_norm(a):
        mean = a.mean(axis=(2, 3), keepdims=True)
        var = a.var(axis=(2, 3), keepdims=True)
        return (a - mean) / np.sqrt(var + EPS)

    h = np.maximum(instance_norm(conv3x3(x, w1, b1)), 0.0)
    y = instance_norm(conv3x3(h, w2, b2))
    return (x + y).astype(np.float32)


if __name__ == "__main__":
    N, C, H, W = 2, 4, 16, 16
    key = jax.random.PRNGKey(0)
    kx, k1, kb1, k2, kb2 = jax.random.split(key, 5)
    x = jax.random.normal(kx, (N, C, H, W), jnp.float32)
    w1 = 0.2 * jax.random.normal(k1, (C, C, 3, 3), jnp.float32)   # Conv2d weight (OIHW)
    b1 = 0.1 * jax.random.normal(kb1, (C,), jnp.float32)          # Conv2d bias
    w2 = 0.2 * jax.random.normal(k2, (C, C, 3, 3), jnp.float32)
    b2 = 0.1 * jax.random.normal(kb2, (C,), jnp.float32)

    out = residual_block_forward(x, w1, b1, w2, b2)
    out = jax.block_until_ready(out)

    ref = _numpy_reference(x, w1, b1, w2, b2)
    assert out.shape == (N, C, H, W), out.shape
    # bf16 MXU operands (f32 accumulate) -> slightly looser tolerance vs f64 ref
    np.testing.assert_allclose(np.asarray(out), ref, rtol=5e-2, atol=5e-2)

    print("KERNEL_OK")
</pallas_src>

<mosaic_0001>
module attributes {stable_mosaic.version = 11 : i64} {
  func.func @_resblock_kernel(%arg0: i32, %arg1: memref<1x18x18x4xf32, #tpu.memory_space<vmem>>, %arg2: memref<3x3x4x4xbf16, #tpu.memory_space<vmem>>, %arg3: memref<1x4xf32, #tpu.memory_space<vmem>>, %arg4: memref<3x3x4x4xbf16, #tpu.memory_space<vmem>>, %arg5: memref<1x4xf32, #tpu.memory_space<vmem>>, %arg6: memref<1x256x4xf32, #tpu.memory_space<vmem>>, %arg7: memref<18x18x4xbf16, #tpu.memory_space<vmem>>) attributes {dimension_semantics = [#tpu.dimension_semantics<parallel>], iteration_bounds = array<i64: 2>, scalar_prefetch = 0 : i64, scratch_operands = 1 : i64, tpu.core_type = #tpu.core_type<tc>, window_params = [{transform_indices = @transform_0, window_bounds = array<i64: 1, 18, 18, 4>}, {pipeline_mode = #tpu.pipeline_mode<synchronous>, transform_indices = @transform_1, window_bounds = array<i64: 3, 3, 4, 4>}, {pipeline_mode = #tpu.pipeline_mode<synchronous>, transform_indices = @transform_2, window_bounds = array<i64: 1, 4>}, {pipeline_mode = #tpu.pipeline_mode<synchronous>, transform_indices = @transform_3, window_bounds = array<i64: 3, 3, 4, 4>}, {pipeline_mode = #tpu.pipeline_mode<synchronous>, transform_indices = @transform_4, window_bounds = array<i64: 1, 4>}, {transform_indices = @transform_5, window_bounds = array<i64: 1, 256, 4>}]} {
    %c0 = arith.constant 0 : index
    %c0_0 = arith.constant 0 : index
    %c0_1 = arith.constant 0 : index
    %c0_2 = arith.constant 0 : index
    %0 = vector.load %arg1[%c0, %c0_0, %c0_1, %c0_2] : memref<1x18x18x4xf32, #tpu.memory_space<vmem>>, vector<1x18x18x4xf32>
    %1 = vector.shape_cast %0 : vector<1x18x18x4xf32> to vector<18x18x4xf32>
    %2 = arith.truncf %1 : vector<18x18x4xf32> to vector<18x18x4xbf16>
    %c0_3 = arith.constant 0 : index
    %c0_4 = arith.constant 0 : index
    %c0_5 = arith.constant 0 : index
    %3 = vector.load %arg7[%c0_3, %c0_4, %c0_5] : memref<18x18x4xbf16, #tpu.memory_space<vmem>>, vector<18x18x4xbf16>
    tpu.vector_store %arg7[%c0_3, %c0_4, %c0_5], %2 {strides = array<i32>} : memref<18x18x4xbf16, #tpu.memory_space<vmem>>, vector<18x18x4xbf16>,
    %c0_6 = arith.constant 0 : index
    %c0_7 = arith.constant 0 : index
    %4 = vector.load %arg3[%c0_6, %c0_7] : memref<1x4xf32, #tpu.memory_space<vmem>>, vector<1x4xf32>
    %5 = vector.shape_cast %4 : vector<1x4xf32> to vector<1x4xf32>
    %6 = vector.broadcast %5 : vector<1x4xf32> to vector<256x4xf32>
    %c0_8 = arith.constant 0 : index
    %c0_9 = arith.constant 0 : index
    %c0_10 = arith.constant 0 : index
    %7 = vector.load %arg7[%c0_8, %c0_9, %c0_10] : memref<18x18x4xbf16, #tpu.memory_space<vmem>>, vector<16x16x4xbf16>
    %8 = vector.shape_cast %7 : vector<16x16x4xbf16> to vector<256x4xbf16>
    %c0_11 = arith.constant 0 : index
    %c0_12 = arith.constant 0 : index
    %c0_13 = arith.constant 0 : index
    %c0_14 = arith.constant 0 : index
    %9 = vector.load %arg2[%c0_11, %c0_12, %c0_13, %c0_14] : memref<3x3x4x4xbf16, #tpu.memory_space<vmem>>, vector<1x1x4x4xbf16>
    %10 = vector.shape_cast %9 : vector<1x1x4x4xbf16> to vector<4x4xbf16>
    %cst = arith.constant dense<0.000000e+00> : vector<256x4xf32>
    %11 = tpu.matmul %8, %10, %cst {dimension_numbers = #tpu.dot_dimension_numbers<[1], [0], [0], [1], [0, 0, 1, 1], [], []>} : vector<256x4xbf16>, vector<4x4xbf16>, vector<256x4xf32> -> vector<256x4xf32>
    %12 = arith.addf %6, %11 : vector<256x4xf32>
    %c0_15 = arith.constant 0 : index
    %c1 = arith.constant 1 : index
    %c0_16 = arith.constant 0 : index
    %13 = vector.load %arg7[%c0_15, %c1, %c0_16] : memref<18x18x4xbf16, #tpu.memory_space<vmem>>, vector<16x16x4xbf16>
    %14 = vector.shape_cast %13 : vector<16x16x4xbf16> to vector<256x4xbf16>
    %c0_17 = arith.constant 0 : index
    %c1_18 = arith.constant 1 : index
    %c0_19 = arith.constant 0 : index
    %c0_20 = arith.constant 0 : index
    %15 = vector.load %arg2[%c0_17, %c1_18, %c0_19, %c0_20] : memref<3x3x4x4xbf16, #tpu.memory_space<vmem>>, vector<1x1x4x4xbf16>
    %16 = vector.shape_cast %15 : vector<1x1x4x4xbf16> to vector<4x4xbf16>
    %cst_21 = arith.constant dense<0.000000e+00> : vector<256x4xf32>
    %17 = tpu.matmul %14, %16, %cst_21 {dimension_numbers = #tpu.dot_dimension_numbers<[1], [0], [0], [1], [0, 0, 1, 1], [], []>} : vector<256x4xbf16>, vector<4x4xbf16>, vector<256x4xf32> -> vector<256x4xf32>
    %18 = arith.addf %12, %17 : vector<256x4xf32>
    %c0_22 = arith.constant 0 : index
    %c2 = arith.constant 2 : index
    %c0_23 = arith.constant 0 : index
    %19 = vector.load %arg7[%c0_22, %c2, %c0_23] : memref<18x18x4xbf16, #tpu.memory_space<vmem>>, vector<16x16x4xbf16>
    %20 = vector.shape_cast %19 : vector<16x16x4xbf16> to vector<256x4xbf16>
    %c0_24 = arith.constant 0 : index
    %c2_25 = arith.constant 2 : index
    %c0_26 = arith.constant 0 : index
    %c0_27 = arith.constant 0 : index
    %21 = vector.load %arg2[%c0_24, %c2_25, %c0_26, %c0_27] : memref<3x3x4x4xbf16, #tpu.memory_space<vmem>>, vector<1x1x4x4xbf16>
    %22 = vector.shape_cast %21 : vector<1x1x4x4xbf16> to vector<4x4xbf16>
    %cst_28 = arith.constant dense<0.000000e+00> : vector<256x4xf32>
    %23 = tpu.matmul %20, %22, %cst_28 {dimension_numbers = #tpu.dot_dimension_numbers<[1], [0], [0], [1], [0, 0, 1, 1], [], []>} : vector<256x4xbf16>, vector<4x4xbf16>, vector<256x4xf32> -> vector<256x4xf32>
    %24 = arith.addf %18, %23 : vector<256x4xf32>
    %c1_29 = arith.constant 1 : index
    %c0_30 = arith.constant 0 : index
    %c0_31 = arith.constant 0 : index
    %25 = vector.load %arg7[%c1_29, %c0_30, %c0_31] : memref<18x18x4xbf16, #tpu.memory_space<vmem>>, vector<16x16x4xbf16>
    %26 = vector.shape_cast %25 : vector<16x16x4xbf16> to vector<256x4xbf16>
    %c1_32 = arith.constant 1 : index
    %c0_33 = arith.constant 0 : index
    %c0_34 = arith.constant 0 : index
    %c0_35 = arith.constant 0 : index
    %27 = vector.load %arg2[%c1_32, %c0_33, %c0_34, %c0_35] : memref<3x3x4x4xbf16, #tpu.memory_space<vmem>>, vector<1x1x4x4xbf16>
    %28 = vector.shape_cast %27 : vector<1x1x4x4xbf16> to vector<4x4xbf16>
    %cst_36 = arith.constant dense<0.000000e+00> : vector<256x4xf32>
    %29 = tpu.matmul %26, %28, %cst_36 {dimension_numbers = #tpu.dot_dimension_numbers<[1], [0], [0], [1], [0, 0, 1, 1], [], []>} : vector<256x4xbf16>, vector<4x4xbf16>, vector<256x4xf32> -> vector<256x4xf32>
    %30 = arith.addf %24, %29 : vector<256x4xf32>
    %c1_37 = arith.constant 1 : index
    %c1_38 = arith.constant 1 : index
    %c0_39 = arith.constant 0 : index
    %31 = vector.load %arg7[%c1_37, %c1_38, %c0_39] : memref<18x18x4xbf16, #tpu.memory_space<vmem>>, vector<16x16x4xbf16>
    %32 = vector.shape_cast %31 : vector<16x16x4xbf16> to vector<256x4xbf16>
    %c1_40 = arith.constant 1 : index
    %c1_41 = arith.constant 1 : index
    %c0_42 = arith.constant 0 : index
    %c0_43 = arith.constant 0 : index
    %33 = vector.load %arg2[%c1_40, %c1_41, %c0_42, %c0_43] : memref<3x3x4x4xbf16, #tpu.memory_space<vmem>>, vector<1x1x4x4xbf16>
    %34 = vector.shape_cast %33 : vector<1x1x4x4xbf16> to vector<4x4xbf16>
    %cst_44 = arith.constant dense<0.000000e+00> : vector<256x4xf32>
    %35 = tpu.matmul %32, %34, %cst_44 {dimension_numbers = #tpu.dot_dimension_numbers<[1], [0], [0], [1], [0, 0, 1, 1], [], []>} : vector<256x4xbf16>, vector<4x4xbf16>, vector<256x4xf32> -> vector<256x4xf32>
    %36 = arith.addf %30, %35 : vector<256x4xf32>
    %c1_45 = arith.constant 1 : index
    %c2_46 = arith.constant 2 : index
    %c0_47 = arith.constant 0 : index
    %37 = vector.load %arg7[%c1_45, %c2_46, %c0_47] : memref<18x18x4xbf16, #tpu.memory_space<vmem>>, vector<16x16x4xbf16>
    %38 = vector.shape_cast %37 : vector<16x16x4xbf16> to vector<256x4xbf16>
    %c1_48 = arith.constant 1 : index
    %c2_49 = arith.constant 2 : index
    %c0_50 = arith.constant 0 : index
    %c0_51 = arith.constant 0 : index
    %39 = vector.load %arg2[%c1_48, %c2_49, %c0_50, %c0_51] : memref<3x3x4x4xbf16, #tpu.memory_space<vmem>>, vector<1x1x4x4xbf16>
    %40 = vector.shape_cast %39 : vector<1x1x4x4xbf16> to vector<4x4xbf16>
    %cst_52 = arith.constant dense<0.000000e+00> : vector<256x4xf32>
    %41 = tpu.matmul %38, %40, %cst_52 {dimension_numbers = #tpu.dot_dimension_numbers<[1], [0], [0], [1], [0, 0, 1, 1], [], []>} : vector<256x4xbf16>, vector<4x4xbf16>, vector<256x4xf32> -> vector<256x4xf32>
    %42 = arith.addf %36, %41 : vector<256x4xf32>
    %c2_53 = arith.constant 2 : index
    %c0_54 = arith.constant 0 : index
    %c0_55 = arith.constant 0 : index
    %43 = vector.load %arg7[%c2_53, %c0_54, %c0_55] : memref<18x18x4xbf16, #tpu.memory_space<vmem>>, vector<16x16x4xbf16>
    %44 = vector.shape_cast %43 : vector<16x16x4xbf16> to vector<256x4xbf16>
    %c2_56 = arith.constant 2 : index
    %c0_57 = arith.constant 0 : index
    %c0_58 = arith.constant 0 : index
    %c0_59 = arith.constant 0 : index
    %45 = vector.load %arg2[%c2_56, %c0_57, %c0_58, %c0_59] : memref<3x3x4x4xbf16, #tpu.memory_space<vmem>>, vector<1x1x4x4xbf16>
    %46 = vector.shape_cast %45 : vector<1x1x4x4xbf16> to vector<4x4xbf16>
    %cst_60 = arith.constant dense<0.000000e+00> : vector<256x4xf32>
    %47 = tpu.matmul %44, %46, %cst_60 {dimension_numbers = #tpu.dot_dimension_numbers<[1], [0], [0], [1], [0, 0, 1, 1], [], []>} : vector<256x4xbf16>, vector<4x4xbf16>, vector<256x4xf32> -> vector<256x4xf32>
    %48 = arith.addf %42, %47 : vector<256x4xf32>
    %c2_61 = arith.constant 2 : index
    %c1_62 = arith.constant 1 : index
    %c0_63 = arith.constant 0 : index
    %49 = vector.load %arg7[%c2_61, %c1_62, %c0_63] : memref<18x18x4xbf16, #tpu.memory_space<vmem>>, vector<16x16x4xbf16>
    %50 = vector.shape_cast %49 : vector<16x16x4xbf16> to vector<256x4xbf16>
    %c2_64 = arith.constant 2 : index
    %c1_65 = arith.constant 1 : index
    %c0_66 = arith.constant 0 : index
    %c0_67 = arith.constant 0 : index
    %51 = vector.load %arg2[%c2_64, %c1_65, %c0_66, %c0_67] : memref<3x3x4x4xbf16, #tpu.memory_space<vmem>>, vector<1x1x4x4xbf16>
    %52 = vector.shape_cast %51 : vector<1x1x4x4xbf16> to vector<4x4xbf16>
    %cst_68 = arith.constant dense<0.000000e+00> : vector<256x4xf32>
    %53 = tpu.matmul %50, %52, %cst_68 {dimension_numbers = #tpu.dot_dimension_numbers<[1], [0], [0], [1], [0, 0, 1, 1], [], []>} : vector<256x4xbf16>, vector<4x4xbf16>, vector<256x4xf32> -> vector<256x4xf32>
    %54 = arith.addf %48, %53 : vector<256x4xf32>
    %c2_69 = arith.constant 2 : index
    %c2_70 = arith.constant 2 : index
    %c0_71 = arith.constant 0 : index
    %55 = vector.load %arg7[%c2_69, %c2_70, %c0_71] : memref<18x18x4xbf16, #tpu.memory_space<vmem>>, vector<16x16x4xbf16>
    %56 = vector.shape_cast %55 : vector<16x16x4xbf16> to vector<256x4xbf16>
    %c2_72 = arith.constant 2 : index
    %c2_73 = arith.constant 2 : index
    %c0_74 = arith.constant 0 : index
    %c0_75 = arith.constant 0 : index
    %57 = vector.load %arg2[%c2_72, %c2_73, %c0_74, %c0_75] : memref<3x3x4x4xbf16, #tpu.memory_space<vmem>>, vector<1x1x4x4xbf16>
    %58 = vector.shape_cast %57 : vector<1x1x4x4xbf16> to vector<4x4xbf16>
    %cst_76 = arith.constant dense<0.000000e+00> : vector<256x4xf32>
    %59 = tpu.matmul %56, %58, %cst_76 {dimension_numbers = #tpu.dot_dimension_numbers<[1], [0], [0], [1], [0, 0, 1, 1], [], []>} : vector<256x4xbf16>, vector<4x4xbf16>, vector<256x4xf32> -> vector<256x4xf32>
    %60 = arith.addf %54, %59 : vector<256x4xf32>
    %cst_77 = arith.constant dense<0.000000e+00> : vector<4xf32>
    %61 = vector.multi_reduction <add>, %60, %cst_77 [0] : vector<256x4xf32> to vector<4xf32>
    %62 = vector.shape_cast %61 : vector<4xf32> to vector<1x4xf32>
    %63 = arith.mulf %60, %60 : vector<256x4xf32>
    %cst_78 = arith.constant dense<0.000000e+00> : vector<4xf32>
    %64 = vector.multi_reduction <add>, %63, %cst_78 [0] : vector<256x4xf32> to vector<4xf32>
    %65 = vector.shape_cast %64 : vector<4xf32> to vector<1x4xf32>
    %cst_79 = arith.constant 3.906250e-03 : f32
    %66 = vector.broadcast %cst_79 : f32 to vector<1x4xf32>
    %67 = arith.mulf %62, %66 : vector<1x4xf32>
    %cst_80 = arith.constant 3.906250e-03 : f32
    %68 = vector.broadcast %cst_80 : f32 to vector<1x4xf32>
    %69 = arith.mulf %65, %68 : vector<1x4xf32>
    %70 = arith.mulf %67, %67 : vector<1x4xf32>
    %71 = arith.subf %69, %70 : vector<1x4xf32>
    %72 = vector.broadcast %67 : vector<1x4xf32> to vector<256x4xf32>
    %73 = arith.subf %60, %72 : vector<256x4xf32>
    %cst_81 = arith.constant 9.99999974E-6 : f32
    %74 = vector.broadcast %cst_81 : f32 to vector<1x4xf32>
    %75 = arith.addf %71, %74 : vector<1x4xf32>
    %76 = math.rsqrt %75 : vector<1x4xf32>
    %77 = vector.broadcast %76 : vector<1x4xf32> to vector<256x4xf32>
    %78 = arith.mulf %73, %77 : vector<256x4xf32>
    %cst_82 = arith.constant 0.000000e+00 : f32
    %79 = vector.broadcast %cst_82 : f32 to vector<256x4xf32>
    %80 = arith.maximumf %78, %79 : vector<256x4xf32>
    %81 = vector.shape_cast %80 : vector<256x4xf32> to vector<16x16x4xf32>
    %82 = arith.truncf %81 : vector<16x16x4xf32> to vector<16x16x4xbf16>
    %83 = vector.extract_strided_slice %82 {offsets = [1, 0, 0], sizes = [1, 16, 4], strides = [1, 1, 1]} : vector<16x16x4xbf16> to vector<1x16x4xbf16>
    %84 = vector.extract_strided_slice %82 {offsets = [14, 0, 0], sizes = [1, 16, 4], strides = [1, 1, 1]} : vector<16x16x4xbf16> to vector<1x16x4xbf16>
    %85 = tpu.concatenate %83, %82, %84 in 0 : vector<1x16x4xbf16>, vector<16x16x4xbf16>, vector<1x16x4xbf16> -> vector<18x16x4xbf16>
    %86 = vector.extract_strided_slice %85 {offsets = [0, 1, 0], sizes = [18, 1, 4], strides = [1, 1, 1]} : vector<18x16x4xbf16> to vector<18x1x4xbf16>
    %87 = vector.extract_strided_slice %85 {offsets = [0, 14, 0], sizes = [18, 1, 4], strides = [1, 1, 1]} : vector<18x16x4xbf16> to vector<18x1x4xbf16>
    %88 = tpu.concatenate %86, %85, %87 in 1 : vector<18x1x4xbf16>, vector<18x16x4xbf16>, vector<18x1x4xbf16> -> vector<18x18x4xbf16>
    %c0_83 = arith.constant 0 : index
    %c0_84 = arith.constant 0 : index
    %c0_85 = arith.constant 0 : index
    %89 = vector.load %arg7[%c0_83, %c0_84, %c0_85] : memref<18x18x4xbf16, #tpu.memory_space<vmem>>, vector<18x18x4xbf16>
    tpu.vector_store %arg7[%c0_83, %c0_84, %c0_85], %88 {strides = array<i32>} : memref<18x18x4xbf16, #tpu.memory_space<vmem>>, vector<18x18x4xbf16>,
    %c0_86 = arith.constant 0 : index
    %c0_87 = arith.constant 0 : index
    %90 = vector.load %arg5[%c0_86, %c0_87] : memref<1x4xf32, #tpu.memory_space<vmem>>, vector<1x4xf32>
    %91 = vector.shape_cast %90 : vector<1x4xf32> to vector<1x4xf32>
    %92 = vector.broadcast %91 : vector<1x4xf32> to vector<256x4xf32>
    %c0_88 = arith.constant 0 : index
    %c0_89 = arith.constant 0 : index
    %c0_90 = arith.constant 0 : index
    %93 = vector.load %arg7[%c0_88, %c0_89, %c0_90] : memref<18x18x4xbf16, #tpu.memory_space<vmem>>, vector<16x16x4xbf16>
    %94 = vector.shape_cast %93 : vector<16x16x4xbf16> to vector<256x4xbf16>
    %c0_91 = arith.constant 0 : index
    %c0_92 = arith.constant 0 : index
    %c0_93 = arith.constant 0 : index
    %c0_94 = arith.constant 0 : index
    %95 = vector.load %arg4[%c0_91, %c0_92, %c0_93, %c0_94] : memref<3x3x4x4xbf16, #tpu.memory_space<vmem>>, vector<1x1x4x4xbf16>
    %96 = vector.shape_cast %95 : vector<1x1x4x4xbf16> to vector<4x4xbf16>
    %cst_95 = arith.constant dense<0.000000e+00> : vector<256x4xf32>
    %97 = tpu.matmul %94, %96, %cst_95 {dimension_numbers = #tpu.dot_dimension_numbers<[1], [0], [0], [1], [0, 0, 1, 1], [], []>} : vector<256x4xbf16>, vector<4x4xbf16>, vector<256x4xf32> -> vector<256x4xf32>
    %98 = arith.addf %92, %97 : vector<256x4xf32>
    %c0_96 = arith.constant 0 : index
    %c1_97 = arith.constant 1 : index
    %c0_98 = arith.constant 0 : index
    %99 = vector.load %arg7[%c0_96, %c1_97, %c0_98] : memref<18x18x4xbf16, #tpu.memory_space<vmem>>, vector<16x16x4xbf16>
    %100 = vector.shape_cast %99 : vector<16x16x4xbf16> to vector<256x4xbf16>
    %c0_99 = arith.constant 0 : index
    %c1_100 = arith.constant 1 : index
    %c0_101 = arith.constant 0 : index
    %c0_102 = arith.constant 0 : index
    %101 = vector.load %arg4[%c0_99, %c1_100, %c0_101, %c0_102] : memref<3x3x4x4xbf16, #tpu.memory_space<vmem>>, vector<1x1x4x4xbf16>
    %102 = vector.shape_cast %101 : vector<1x1x4x4xbf16> to vector<4x4xbf16>
    %cst_103 = arith.constant dense<0.000000e+00> : vector<256x4xf32>
    %103 = tpu.matmul %100, %102, %cst_103 {dimension_numbers = #tpu.dot_dimension_numbers<[1], [0], [0], [1], [0, 0, 1, 1], [], []>} : vector<256x4xbf16>, vector<4x4xbf16>, vector<256x4xf32> -> vector<256x4xf32>
    %104 = arith.addf %98, %103 : vector<256x4xf32>
    %c0_104 = arith.constant 0 : index
    %c2_105 = arith.constant 2 : index
    %c0_106 = arith.constant 0 : index
    %105 = vector.load %arg7[%c0_104, %c2_105, %c0_106] : memref<18x18x4xbf16, #tpu.memory_space<vmem>>, vector<16x16x4xbf16>
    %106 = vector.shape_cast %105 : vector<16x16x4xbf16> to vector<256x4xbf16>
    %c0_107 = arith.constant 0 : index
    %c2_108 = arith.constant 2 : index
    %c0_109 = arith.constant 0 : index
    %c0_110 = arith.constant 0 : index
    %107 = vector.load %arg4[%c0_107, %c2_108, %c0_109, %c0_110] : memref<3x3x4x4xbf16, #tpu.memory_space<vmem>>, vector<1x1x4x4xbf16>
    %108 = vector.shape_cast %107 : vector<1x1x4x4xbf16> to vector<4x4xbf16>
    %cst_111 = arith.constant dense<0.000000e+00> : vector<256x4xf32>
    %109 = tpu.matmul %106, %108, %cst_111 {dimension_numbers = #tpu.dot_dimension_numbers<[1], [0], [0], [1], [0, 0, 1, 1], [], []>} : vector<256x4xbf16>, vector<4x4xbf16>, vector<256x4xf32> -> vector<256x4xf32>
    %110 = arith.addf %104, %109 : vector<256x4xf32>
    %c1_112 = arith.constant 1 : index
    %c0_113 = arith.constant 0 : index
    %c0_114 = arith.constant 0 : index
    %111 = vector.load %arg7[%c1_112, %c0_113, %c0_114] : memref<18x18x4xbf16, #tpu.memory_space<vmem>>, vector<16x16x4xbf16>
    %112 = vector.shape_cast %111 : vector<16x16x4xbf16> to vector<256x4xbf16>
    %c1_115 = arith.constant 1 : index
    %c0_116 = arith.constant 0 : index
    %c0_117 = arith.constant 0 : index
    %c0_118 = arith.constant 0 : index
    %113 = vector.load %arg4[%c1_115, %c0_116, %c0_117, %c0_118] : memref<3x3x4x4xbf16, #tpu.memory_space<vmem>>, vector<1x1x4x4xbf16>
    %114 = vector.shape_cast %113 : vector<1x1x4x4xbf16> to vector<4x4xbf16>
    %cst_119 = arith.constant dense<0.000000e+00> : vector<256x4xf32>
    %115 = tpu.matmul %112, %114, %cst_119 {dimension_numbers = #tpu.dot_dimension_numbers<[1], [0], [0], [1], [0, 0, 1, 1], [], []>} : vector<256x4xbf16>, vector<4x4xbf16>, vector<256x4xf32> -> vector<256x4xf32>
    %116 = arith.addf %110, %115 : vector<256x4xf32>
    %c1_120 = arith.constant 1 : index
    %c1_121 = arith.constant 1 : index
    %c0_122 = arith.constant 0 : index
    %117 = vector.load %arg7[%c1_120, %c1_121, %c0_122] : memref<18x18x4xbf16, #tpu.memory_space<vmem>>, vector<16x16x4xbf16>
    %118 = vector.shape_cast %117 : vector<16x16x4xbf16> to vector<256x4xbf16>
    %c1_123 = arith.constant 1 : index
    %c1_124 = arith.constant 1 : index
    %c0_125 = arith.constant 0 : index
    %c0_126 = arith.constant 0 : index
    %119 = vector.load %arg4[%c1_123, %c1_124, %c0_125, %c0_126] : memref<3x3x4x4xbf16, #tpu.memory_space<vmem>>, vector<1x1x4x4xbf16>
    %120 = vector.shape_cast %119 : vector<1x1x4x4xbf16> to vector<4x4xbf16>
    %cst_127 = arith.constant dense<0.000000e+00> : vector<256x4xf32>
    %121 = tpu.matmul %118, %120, %cst_127 {dimension_numbers = #tpu.dot_dimension_numbers<[1], [0], [0], [1], [0, 0, 1, 1], [], []>} : vector<256x4xbf16>, vector<4x4xbf16>, vector<256x4xf32> -> vector<256x4xf32>
    %122 = arith.addf %116, %121 : vector<256x4xf32>
    %c1_128 = arith.constant 1 : index
    %c2_129 = arith.constant 2 : index
    %c0_130 = arith.constant 0 : index
    %123 = vector.load %arg7[%c1_128, %c2_129, %c0_130] : memref<18x18x4xbf16, #tpu.memory_space<vmem>>, vector<16x16x4xbf16>
    %124 = vector.shape_cast %123 : vector<16x16x4xbf16> to vector<256x4xbf16>
    %c1_131 = arith.constant 1 : index
    %c2_132 = arith.constant 2 : index
    %c0_133 = arith.constant 0 : index
    %c0_134 = arith.constant 0 : index
    %125 = vector.load %arg4[%c1_131, %c2_132, %c0_133, %c0_134] : memref<3x3x4x4xbf16, #tpu.memory_space<vmem>>, vector<1x1x4x4xbf16>
    %126 = vector.shape_cast %125 : vector<1x1x4x4xbf16> to vector<4x4xbf16>
    %cst_135 = arith.constant dense<0.000000e+00> : vector<256x4xf32>
    %127 = tpu.matmul %124, %126, %cst_135 {dimension_numbers = #tpu.dot_dimension_numbers<[1], [0], [0], [1], [0, 0, 1, 1], [], []>} : vector<256x4xbf16>, vector<4x4xbf16>, vector<256x4xf32> -> vector<256x4xf32>
    %128 = arith.addf %122, %127 : vector<256x4xf32>
    %c2_136 = arith.constant 2 : index
    %c0_137 = arith.constant 0 : index
    %c0_138 = arith.constant 0 : index
    %129 = vector.load %arg7[%c2_136, %c0_137, %c0_138] : memref<18x18x4xbf16, #tpu.memory_space<vmem>>, vector<16x16x4xbf16>
    %130 = vector.shape_cast %129 : vector<16x16x4xbf16> to vector<256x4xbf16>
    %c2_139 = arith.constant 2 : index
    %c0_140 = arith.constant 0 : index
    %c0_141 = arith.constant 0 : index
    %c0_142 = arith.constant 0 : index
    %131 = vector.load %arg4[%c2_139, %c0_140, %c0_141, %c0_142] : memref<3x3x4x4xbf16, #tpu.memory_space<vmem>>, vector<1x1x4x4xbf16>
    %132 = vector.shape_cast %131 : vector<1x1x4x4xbf16> to vector<4x4xbf16>
    %cst_143 = arith.constant dense<0.000000e+00> : vector<256x4xf32>
    %133 = tpu.matmul %130, %132, %cst_143 {dimension_numbers = #tpu.dot_dimension_numbers<[1], [0], [0], [1], [0, 0, 1, 1], [], []>} : vector<256x4xbf16>, vector<4x4xbf16>, vector<256x4xf32> -> vector<256x4xf32>
    %134 = arith.addf %128, %133 : vector<256x4xf32>
    %c2_144 = arith.constant 2 : index
    %c1_145 = arith.constant 1 : index
    %c0_146 = arith.constant 0 : index
    %135 = vector.load %arg7[%c2_144, %c1_145, %c0_146] : memref<18x18x4xbf16, #tpu.memory_space<vmem>>, vector<16x16x4xbf16>
    %136 = vector.shape_cast %135 : vector<16x16x4xbf16> to vector<256x4xbf16>
    %c2_147 = arith.constant 2 : index
    %c1_148 = arith.constant 1 : index
    %c0_149 = arith.constant 0 : index
    %c0_150 = arith.constant 0 : index
    %137 = vector.load %arg4[%c2_147, %c1_148, %c0_149, %c0_150] : memref<3x3x4x4xbf16, #tpu.memory_space<vmem>>, vector<1x1x4x4xbf16>
    %138 = vector.shape_cast %137 : vector<1x1x4x4xbf16> to vector<4x4xbf16>
    %cst_151 = arith.constant dense<0.000000e+00> : vector<256x4xf32>
    %139 = tpu.matmul %136, %138, %cst_151 {dimension_numbers = #tpu.dot_dimension_numbers<[1], [0], [0], [1], [0, 0, 1, 1], [], []>} : vector<256x4xbf16>, vector<4x4xbf16>, vector<256x4xf32> -> vector<256x4xf32>
    %140 = arith.addf %134, %139 : vector<256x4xf32>
    %c2_152 = arith.constant 2 : index
    %c2_153 = arith.constant 2 : index
    %c0_154 = arith.constant 0 : index
    %141 = vector.load %arg7[%c2_152, %c2_153, %c0_154] : memref<18x18x4xbf16, #tpu.memory_space<vmem>>, vector<16x16x4xbf16>
    %142 = vector.shape_cast %141 : vector<16x16x4xbf16> to vector<256x4xbf16>
    %c2_155 = arith.constant 2 : index
    %c2_156 = arith.constant 2 : index
    %c0_157 = arith.constant 0 : index
    %c0_158 = arith.constant 0 : index
    %143 = vector.load %arg4[%c2_155, %c2_156, %c0_157, %c0_158] : memref<3x3x4x4xbf16, #tpu.memory_space<vmem>>, vector<1x1x4x4xbf16>
    %144 = vector.shape_cast %143 : vector<1x1x4x4xbf16> to vector<4x4xbf16>
    %cst_159 = arith.constant dense<0.000000e+00> : vector<256x4xf32>
    %145 = tpu.matmul %142, %144, %cst_159 {dimension_numbers = #tpu.dot_dimension_numbers<[1], [0], [0], [1], [0, 0, 1, 1], [], []>} : vector<256x4xbf16>, vector<4x4xbf16>, vector<256x4xf32> -> vector<256x4xf32>
    %146 = arith.addf %140, %145 : vector<256x4xf32>
    %cst_160 = arith.constant dense<0.000000e+00> : vector<4xf32>
    %147 = vector.multi_reduction <add>, %146, %cst_160 [0] : vector<256x4xf32> to vector<4xf32>
    %148 = vector.shape_cast %147 : vector<4xf32> to vector<1x4xf32>
    %149 = arith.mulf %146, %146 : vector<256x4xf32>
    %cst_161 = arith.constant dense<0.000000e+00> : vector<4xf32>
    %150 = vector.multi_reduction <add>, %149, %cst_161 [0] : vector<256x4xf32> to vector<4xf32>
    %151 = vector.shape_cast %150 : vector<4xf32> to vector<1x4xf32>
    %cst_162 = arith.constant 3.906250e-03 : f32
    %152 = vector.broadcast %cst_162 : f32 to vector<1x4xf32>
    %153 = arith.mulf %148, %152 : vector<1x4xf32>
    %cst_163 = arith.constant 3.906250e-03 : f32
    %154 = vector.broadcast %cst_163 : f32 to vector<1x4xf32>
    %155 = arith.mulf %151, %154 : vector<1x4xf32>
    %156 = arith.mulf %153, %153 : vector<1x4xf32>
    %157 = arith.subf %155, %156 : vector<1x4xf32>
    %158 = vector.broadcast %153 : vector<1x4xf32> to vector<256x4xf32>
    %159 = arith.subf %146, %158 : vector<256x4xf32>
    %cst_164 = arith.constant 9.99999974E-6 : f32
    %160 = vector.broadcast %cst_164 : f32 to vector<1x4xf32>
    %161 = arith.addf %157, %160 : vector<1x4xf32>
    %162 = math.rsqrt %161 : vector<1x4xf32>
    %163 = vector.broadcast %162 : vector<1x4xf32> to vector<256x4xf32>
    %164 = arith.mulf %159, %163 : vector<256x4xf32>
    %c0_165 = arith.constant 0 : index
    %c1_166 = arith.constant 1 : index
    %c1_167 = arith.constant 1 : index
    %c0_168 = arith.constant 0 : index
    %165 = vector.load %arg1[%c0_165, %c1_166, %c1_167, %c0_168] : memref<1x18x18x4xf32, #tpu.memory_space<vmem>>, vector<1x16x16x4xf32>
    %166 = vector.shape_cast %165 : vector<1x16x16x4xf32> to vector<16x16x4xf32>
    %167 = vector.shape_cast %166 : vector<16x16x4xf32> to vector<256x4xf32>
    %168 = arith.addf %167, %164 : vector<256x4xf32>
    %c0_169 = arith.constant 0 : index
    %c0_170 = arith.constant 0 : index
    %c0_171 = arith.constant 0 : index
    %169 = vector.load %arg6[%c0_169, %c0_170, %c0_171] : memref<1x256x4xf32, #tpu.memory_space<vmem>>, vector<1x256x4xf32>
    %170 = vector.shape_cast %169 : vector<1x256x4xf32> to vector<256x4xf32>
    %171 = vector.shape_cast %168 : vector<256x4xf32> to vector<1x256x4xf32>
    tpu.vector_store %arg6[%c0_169, %c0_170, %c0_171], %171 {strides = array<i32>} : memref<1x256x4xf32, #tpu.memory_space<vmem>>, vector<1x256x4xf32>,
    return
  }
  func.func @transform_0(%arg0: i32) -> (i32, i32, i32, i32) {
    %c0_i32 = arith.constant 0 : i32
    %c0_i32_0 = arith.constant 0 : i32
    %c0_i32_1 = arith.constant 0 : i32
    %c0_i32_2 = arith.constant 0 : i32
    return %arg0, %c0_i32, %c0_i32_0, %c0_i32_1 : i32, i32, i32, i32
  }
  func.func @transform_1(%arg0: i32) -> (i32, i32, i32, i32) {
    %c0_i32 = arith.constant 0 : i32
    %c0_i32_0 = arith.constant 0 : i32
    %c0_i32_1 = arith.constant 0 : i32
    %c0_i32_2 = arith.constant 0 : i32
    %c0_i32_3 = arith.constant 0 : i32
    return %c0_i32, %c0_i32_0, %c0_i32_1, %c0_i32_2 : i32, i32, i32, i32
  }
  func.func @transform_2(%arg0: i32) -> (i32, i32) {
    %c0_i32 = arith.constant 0 : i32
    %c0_i32_0 = arith.constant 0 : i32
    %c0_i32_1 = arith.constant 0 : i32
    return %c0_i32, %c0_i32_0 : i32, i32
  }
  func.func @transform_3(%arg0: i32) -> (i32, i32, i32, i32) {
    %c0_i32 = arith.constant 0 : i32
    %c0_i32_0 = arith.constant 0 : i32
    %c0_i32_1 = arith.constant 0 : i32
    %c0_i32_2 = arith.constant 0 : i32
    %c0_i32_3 = arith.constant 0 : i32
    return %c0_i32, %c0_i32_0, %c0_i32_1, %c0_i32_2 : i32, i32, i32, i32
  }
  func.func @transform_4(%arg0: i32) -> (i32, i32) {
    %c0_i32 = arith.constant 0 : i32
    %c0_i32_0 = arith.constant 0 : i32
    %c0_i32_1 = arith.constant 0 : i32
    return %c0_i32, %c0_i32_0 : i32, i32
  }
  func.func @transform_5(%arg0: i32) -> (i32, i32, i32) {
    %c0_i32 = arith.constant 0 : i32
    %c0_i32_0 = arith.constant 0 : i32
    %c0_i32_1 = arith.constant 0 : i32
    return %arg0, %c0_i32, %c0_i32_0 : i32, i32, i32
  }
}

</mosaic_0001>

<bundles_post_ra>
// kernel: tpu_custom_call.1
= control target key start
LH: loop header
LB: loop body
LE: loop exit
PB: predicated region body
PF: predicated region fallthrough
CT: control target
= control target key end

     0   :  { %s13027_s18 = smov 0   ;;  %s18228_s0 = inlined_call_operand.vmem [shape: f32[2,18,18,4], index: 0, kind: input, shape index: {}]   ;;  %s18229_s1 = inlined_call_operand.vmem [shape: bf16[3,3,4,4], index: 1, kind: input, shape index: {}]   ;;  %s18230_s2 = inlined_call_operand.vmem [shape: f32[1,4], index: 2, kind: input, shape index: {}]   ;;  %s18231_s3 = inlined_call_operand.vmem [shape: bf16[3,3,4,4], index: 3, kind: input, shape index: {}]   ;;  %s18232_s4 = inlined_call_operand.vmem [shape: f32[1,4], index: 4, kind: input, shape index: {}]   ;;  %s18233_s5 = inlined_call_operand.vmem [shape: f32[2,256,4], index: 5, kind: output, shape index: {}]  }
   0x1 LB: > { %s11053_s19 = sadd.s32 4294967295, %s12995_s18   ;;  %p11057_p0 = scmp.ge.s32.totalorder %s12995_s18, 1  ;;  %s12995_s18 = sphi %s13027_s18, %s15_s18  }
   0x2   : > { %p187_p1 = scmp.lt.s32.totalorder %s12995_s18, 3 }
   0x4   : > { %p188_p2 = pnand %p11057_p0, %p187_p1 }
   0x6   : > { %191 = sbr.rel (%p188_p2) target bundleno = 1305 (0x519), region = 40 }
   0xb   : > { %v609_v0 = vld [vmem:[%s18229_s1] sm:$0x3]  ;;  %vm739_vm0 = vcmask 1041408   ;;  %p215_p3 = scmp.lt.s32.totalorder %s11053_s19, 1  ;;  %v13043_v2 = vld [vmem:[%s18229_s1 + $0x4] sm:$0x3] }
   0xc   : > { %12860 = vmatprep.subr.msk.bf16.mxu0 %vm739_vm0, %v609_v0  ;;  %v741_v1 = vsel %vm739_vm0, %v609_v0, 0  ;;  %v11148_v3 = vld [vmem:[%s18229_s1 + $0x2] sm:$0x3]  ;;  %v13057_v5 = vld [vmem:[%s18229_s1 + $0x6] sm:$0x3]  ;;  %vm514_vm1 = vcmask 27648  }
   0xd   : > { %12249 = vmatpush3.bf16.msra.mxu0 %v741_v1  ;;  %s18625_s19 = smov (!%p215_p3, %s11053_s19), 1  ;;  %12861 = vmatprep.subr.msk.bf16.mxu1 %vm739_vm0, %v11148_v3  ;;  %v1470_v4 = vsel %vm739_vm0, %v11148_v3, 0  ;;  %vm517_vm2 = vcmask 24576   ;;  %vm690_vm3 = vcmask 31744   ;;  %v11263_v57 = vld [vmem:[%s18229_s1 + $0x8] sm:$0x3] }
   0xe   : > { %12862 = vmatprep.subr.msk.bf16.mxu0 %vm739_vm0, %v13043_v2  ;;  %12283 = vmatpush3.bf16.msra.mxu1 %v1470_v4  ;;  %s12878_s28 = smul.u32 432, %s18625_s19  ;;  %vm984_vm4 = vsmask.f32 3328  ;;  %vm985_vm5 = vsmask.f32 7440  ;;  %vm1729_vm7 = vcmask 1042432  }
   0xf   : > { %12863 = vmatprep.subr.msk.bf16.mxu1 %vm739_vm0, %v13057_v5  ;;  %vm13160_vm6 = vmor %vm984_vm4, %vm985_vm5  ;;  %vm1730_vm8 = vcmask 1046532   ;;  %vm5728_vm10 = vcmask 1040384   ;;  %vm5729_vm11 = vsmask.f32 256  ;;  %s11887_s23 = sshll.u32 %s18625_s19, 8 }
  0x10   : > { %s13065_s6 = scalar_lea.vmem %s18228_s0, %s12878_s28  ;;  %vm13369_vm9 = vmor %vm1729_vm7, %vm1730_vm8  ;;  %s18113_s25 = scalar_lea.vmem %s18233_s5, %s11887_s23 }
  0x11   : > { %v226_v6 = vld [vmem:[%s13065_s6] sm:$0xff]  ;;  %v227_v7 = vld [vmem:[%s13065_s6 + $0x8] sm:$0xff]  ;;  %v229_v8 = vld [vmem:[%s13065_s6 + $0x18] sm:$0xff] }
  0x12   : > { %v11888_v9 = vpack.c.bf16 %v226_v6, %v226_v6  ;;  %v11889_v10 = vpack.c.bf16 %v227_v7, %v227_v7  ;;  %v230_v11 = vld [vmem:[%s13065_s6 + $0x20] sm:$0xff]  ;;  %v11891_v12 = vpack.c.bf16 %v229_v8, %v229_v8  ;;  %v232_v13 = vld [vmem:[%s13065_s6 + $0x30] sm:$0xff]  ;;  %v233_v14 = vld [vmem:[%s13065_s6 + $0x38] sm:$0xff]  ;;  %v1943_v7 = vsel %vm739_vm0, %v13043_v2, 0 }
  0x13   : > { %v11892_v15 = vpack.c.bf16 %v230_v11, %v230_v11  ;;  %v11894_v16 = vpack.c.bf16 %v232_v13, %v232_v13  ;;  %v11895_v17 = vpack.c.bf16 %v233_v14, %v233_v14  ;;  %v235_v18 = vld [vmem:[%s13065_s6 + $0x48] sm:$0xff]  ;;  %v236_v19 = vld [vmem:[%s13065_s6 + $0x50] sm:$0xff]  ;;  %v238_v25 = vld [vmem:[%s13065_s6 + $0x60] sm:$0xff]  ;;  %v13136_v2 = vsel %vm739_vm0, %v13057_v5, 0 }
  0x14   : > { %v228_v20 = vld [vmem:[%s13065_s6 + $0x10] sm:$0x3]  ;;  %515 = vst.msk [vmem:[#allocation2] sm:$0xf] %vm514_vm1, %v11888_v9  ;;  %516 = vst.msk [vmem:[#allocation2 + $0x4] sm:$0xf] %vm514_vm1, %v11889_v10  ;;  %v11897_v21 = vpack.c.bf16 %v235_v18, %v235_v18  ;;  %v11898_v22 = vpack.c.bf16 %v236_v19, %v236_v19  ;;  %v11900_v28 = vpack.c.bf16 %v238_v25, %v238_v25 }
  0x15   : > { %519 = vst.msk [vmem:[#allocation2 + $0xc] sm:$0xf] %vm514_vm1, %v11891_v12  ;;  %v11890_v23 = vpack.c.bf16 %v228_v20, %v228_v20  ;;  %v231_v24 = vld [vmem:[%s13065_s6 + $0x28] sm:$0x3]  ;;  %520 = vst.msk [vmem:[#allocation2 + $0x10] sm:$0xf] %vm514_vm1, %v11892_v15 }
  0x16   : > { %v239_v26 = vld [vmem:[%s13065_s6 + $0x68] sm:$0xff]  ;;  %522 = vst.msk [vmem:[#allocation2 + $0x18] sm:$0xf] %vm514_vm1, %v11894_v16  ;;  %523 = vst.msk [vmem:[#allocation2 + $0x1c] sm:$0xf] %vm514_vm1, %v11895_v17  ;;  %v11893_v27 = vpack.c.bf16 %v231_v24, %v231_v24  ;;  %v241_v30 = vld [vmem:[%s13065_s6 + $0x78] sm:$0xff] }
  0x17   : > { %v11901_v29 = vpack.c.bf16 %v239_v26, %v239_v26  ;;  %v242_v31 = vld [vmem:[%s13065_s6 + $0x80] sm:$0xff]  ;;  %525 = vst.msk [vmem:[#allocation2 + $0x24] sm:$0xf] %vm514_vm1, %v11897_v21  ;;  %526 = vst.msk [vmem:[#allocation2 + $0x28] sm:$0xf] %vm514_vm1, %v11898_v22  ;;  %v11903_v33 = vpack.c.bf16 %v241_v30, %v241_v30  ;;  %v244_v37 = vld [vmem:[%s13065_s6 + $0x90] sm:$0xff] }
  0x18   : > { %v234_v32 = vld [vmem:[%s13065_s6 + $0x40] sm:$0x3]  ;;  %518 = vst.msk [vmem:[#allocation2 + $0x8] sm:$0x1] %vm517_vm2, %v11890_v23  ;;  %v11904_v34 = vpack.c.bf16 %v242_v31, %v242_v31  ;;  %v237_v36 = vld [vmem:[%s13065_s6 + $0x58] sm:$0x3]  ;;  %v11906_v40 = vpack.c.bf16 %v244_v37, %v244_v37  ;;  %vm15484_vm12 = vmand %vm5728_vm10, %vm5729_vm11 }
  0x19   : > { %v11896_v35 = vpack.c.bf16 %v234_v32, %v234_v32  ;;  %v245_v38 = vld [vmem:[%s13065_s6 + $0x98] sm:$0xff]  ;;  %521 = vst.msk [vmem:[#allocation2 + $0x14] sm:$0x1] %vm517_vm2, %v11893_v27  ;;  %v11899_v39 = vpack.c.bf16 %v237_v36, %v237_v36  ;;  %v247_v42 = vld [vmem:[%s13065_s6 + $0xa8] sm:$0xff]  ;;  %v248_v43 = vld [vmem:[%s13065_s6 + $0xb0] sm:$0xff]  ;;  %v13139_v9 = vsel %vm739_vm0, %v11263_v57, 0 }
  0x1a   : > { %528 = vst.msk [vmem:[#allocation2 + $0x30] sm:$0xf] %vm514_vm1, %v11900_v28  ;;  %529 = vst.msk [vmem:[#allocation2 + $0x34] sm:$0xf] %vm514_vm1, %v11901_v29  ;;  %v11907_v41 = vpack.c.bf16 %v245_v38, %v245_v38  ;;  %v240_v44 = vld [vmem:[%s13065_s6 + $0x70] sm:$0x3]  ;;  %v11909_v45 = vpack.c.bf16 %v247_v42, %v247_v42  ;;  %v11910_v46 = vpack.c.bf16 %v248_v43, %v248_v43 }
  0x1b   : > { %531 = vst.msk [vmem:[#allocation2 + $0x3c] sm:$0xf] %vm514_vm1, %v11903_v33  ;;  %532 = vst.msk [vmem:[#allocation2 + $0x40] sm:$0xf] %vm514_vm1, %v11904_v34  ;;  %v11902_v47 = vpack.c.bf16 %v240_v44, %v240_v44  ;;  %v243_v48 = vld [vmem:[%s13065_s6 + $0x88] sm:$0x3] }
  0x1c   : > { %524 = vst.msk [vmem:[#allocation2 + $0x20] sm:$0x1] %vm517_vm2, %v11896_v35  ;;  %v250_v49 = vld [vmem:[%s13065_s6 + $0xc0] sm:$0xff]  ;;  %v251_v50 = vld [vmem:[%s13065_s6 + $0xc8] sm:$0xff]  ;;  %527 = vst.msk [vmem:[#allocation2 + $0x2c] sm:$0x1] %vm517_vm2, %v11899_v39  ;;  %v11905_v51 = vpack.c.bf16 %v243_v48, %v243_v48 }
  0x1d   : > { %534 = vst.msk [vmem:[#allocation2 + $0x48] sm:$0xf] %vm514_vm1, %v11906_v40  ;;  %535 = vst.msk [vmem:[#allocation2 + $0x4c] sm:$0xf] %vm514_vm1, %v11907_v41  ;;  %v11912_v52 = vpack.c.bf16 %v250_v49, %v250_v49  ;;  %v11913_v53 = vpack.c.bf16 %v251_v50, %v251_v50  ;;  %v253_v54 = vld [vmem:[%s13065_s6 + $0xd8] sm:$0xff]  ;;  %v254_v55 = vld [vmem:[%s13065_s6 + $0xe0] sm:$0xff] }
  0x1e   : > { %v246_v56 = vld [vmem:[%s13065_s6 + $0xa0] sm:$0x3]  ;;  %537 = vst.msk [vmem:[#allocation2 + $0x54] sm:$0xf] %vm514_vm1, %v11909_v45  ;;  %538 = vst.msk [vmem:[#allocation2 + $0x58] sm:$0xf] %vm514_vm1, %v11910_v46  ;;  %v11915_v58 = vpack.c.bf16 %v253_v54, %v253_v54  ;;  %v11916_v59 = vpack.c.bf16 %v254_v55, %v254_v55 }
  0x1f   : > { %530 = vst.msk [vmem:[#allocation2 + $0x38] sm:$0x1] %vm517_vm2, %v11902_v47  ;;  %v11908_v60 = vpack.c.bf16 %v246_v56, %v246_v56  ;;  %v249_v61 = vld [vmem:[%s13065_s6 + $0xb8] sm:$0x3]  ;;  %v256_v62 = vld [vmem:[%s13065_s6 + $0xf0] sm:$0xff]  ;;  %v12887_v0 = vld [vmem:[#allocation2] sm:$0xff]  }
  0x20   : > { %v257_v63 = vld [vmem:[%s13065_s6 + $0xf8] sm:$0xff]  ;;  %533 = vst.msk [vmem:[#allocation2 + $0x44] sm:$0x1] %vm517_vm2, %v11905_v51  ;;  %v11911_v1 = vpack.c.bf16 %v249_v61, %v249_v61  ;;  %v11918_v3 = vpack.c.bf16 %v256_v62, %v256_v62  ;;  %v12888_v6 = vld [vmem:[#allocation2 + $0xc] sm:$0xff]   ;;  %12250 = vmatprep.mubr.msk.bf16.mxu0 %vm690_vm3, %v12887_v0  ;;  %v936_v10 = vld [vmem:[#allocation2] sm:$0xf] }
  0x21   : > { %540 = vst.msk [vmem:[#allocation2 + $0x60] sm:$0xf] %vm514_vm1, %v11912_v52  ;;  %541 = vst.msk [vmem:[#allocation2 + $0x64] sm:$0xf] %vm514_vm1, %v11913_v53  ;;  %v11919_v4 = vpack.c.bf16 %v257_v63, %v257_v63  ;;  %v12889_v8 = vld [vmem:[#allocation2 + $0x18] sm:$0xff]   ;;  %12251 = vmatmul.mubr.msk.bf16.vlgmr.msra.gmra.mxu0 %vm690_vm3, %v12888_v6  ;;  %v12890_v13 = vld [vmem:[#allocation2 + $0x24] sm:$0xff]  }
  0x22   : > { %543 = vst.msk [vmem:[#allocation2 + $0x6c] sm:$0xf] %vm514_vm1, %v11915_v58  ;;  %544 = vst.msk [vmem:[#allocation2 + $0x70] sm:$0xf] %vm514_vm1, %v11916_v59  ;;  %12317 = vmatpush3.bf16.msra.mxu0 %v1943_v7  ;;  %12254 = vmatprep.mubr.msk.bf16.mxu0 %vm690_vm3, %v12889_v8  ;;  %v13142_v11 = vld [vmem:[#allocation2 + $0x4] sm:$0xf] }
  0x23   : > { %536 = vst.msk [vmem:[#allocation2 + $0x50] sm:$0x1] %vm517_vm2, %v11908_v60  ;;  %539 = vst.msk [vmem:[#allocation2 + $0x5c] sm:$0x1] %vm517_vm2, %v11911_v1  ;;  %v13144_v12 = vld [vmem:[#allocation2 + $0x8] sm:$0x1]  ;;  %12864 = vmatprep.subr.msk.bf16.mxu0 %vm739_vm0, %v11263_v57 }
  0x24   : > { %546 = vst.msk [vmem:[#allocation2 + $0x78] sm:$0xf] %vm514_vm1, %v11918_v3  ;;  %547 = vst.msk [vmem:[#allocation2 + $0x7c] sm:$0xf] %vm514_vm1, %v11919_v4  ;;  %v988_v14 = vshrl.u32 %v936_v10, 16  ;;  %v991_v15 = vshll.u32 %v936_v10, 16 }
  0x25   : > { %v997_v16 = vshll.u32 %v13142_v11, 16  ;;  %v1001_v17 = vshrl.u32 %v13142_v11, 16  ;;  %v939_v5 = vld [vmem:[#allocation2 + $0xc] sm:$0xf]  ;;  %v1007_v18 = vshll.u32 %v13144_v12, 16  ;;  %v1737_v19 = vrot.slane %v13144_v12, 5 }
  0x26   : > { %v13151_v20 = vld [vmem:[#allocation2 + $0x10] sm:$0xf]  ;;  %v13153_v21 = vld [vmem:[#allocation2 + $0x14] sm:$0x1]  ;;  %v990_v22 = vrot.slane %v988_v14, 4  ;;  %v993_v23 = vrot.slane %v991_v15, 5 }
  0x27   : > { %v999_v24 = vrot.slane %v997_v16, 5  ;;  %v1003_v25 = vrot.slane %v1001_v17, 4  ;;  %v1009_v26 = vrot.slane %v1007_v18, 5  ;;  %v1012_v27 = vshrl.u32 %v939_v5, 16  ;;  %v12891_v34 = vld [vmem:[#allocation2 + $0x30] sm:$0xff]   ;;  %v12892_v58 = vld [vmem:[#allocation2 + $0x3c] sm:$0xff]  }
  0x28   : > { %v1015_v28 = vshll.u32 %v939_v5, 16  ;;  %v1021_v29 = vshll.u32 %v13151_v20, 16  ;;  %v994_v30 = vor.u32 %v993_v23, %v990_v22  ;;  %v1025_v32 = vshrl.u32 %v13151_v20, 16  ;;  %v942_v44 = vld [vmem:[#allocation2 + $0x18] sm:$0xf]  ;;  %v12893_v8 = vld [vmem:[#allocation2 + $0x48] sm:$0xff]  }
  0x29   : > { %v1004_v31 = vor.u32 %v1003_v25, %v999_v24  ;;  %v1031_v33 = vshll.u32 %v13153_v21, 16  ;;  %v18296_v35 = vmov 0  ;;  %v1014_v36 = vrot.slane %v1012_v27, 4  ;;  %12255 = vmatmul.mubr.msk.bf16.gmra.mxu0 %vm690_vm3, %v12890_v13  ;;  %v13168_v47 = vld [vmem:[#allocation2 + $0x1c] sm:$0xf] }
  0x2a   : > { %v18297_v35 = vsel %vm13160_vm6, 4294967295, %v18296_v35  ;;  %v1017_v37 = vrot.slane %v1015_v28, 5  ;;  %v1023_v38 = vrot.slane %v1021_v29, 5  ;;  %v1741_v39 = vrot.slane %v13151_v20, 5  ;;  %12258 = vmatprep.mubr.msk.bf16.mxu0 %vm690_vm3, %v12891_v34  ;;  %v13170_v48 = vld [vmem:[#allocation2 + $0x20] sm:$0x1] }
  0x2b   : > { %18298 = vst [vmem:[#allocation3_spill] sm:$0xff] %v18297_v35  ;;  %v995_v40 = vrot.slane %v994_v30, 4  ;;  %v1005_v41 = vrot.slane %v1004_v31, 4  ;;  %v1027_v42 = vrot.slane %v1025_v32, 4  ;;  %v1033_v43 = vrot.slane %v1031_v33, 5 }
  0x2c   : > { %v1018_v45 = vor.u32 %v1017_v37, %v1014_v36  ;;  %v1744_v46 = vrot.slane %v13153_v21, 5  ;;  %v1036_v49 = vshrl.u32 %v942_v44, 16  ;;  %v1039_v53 = vshll.u32 %v942_v44, 16  ;;  %v945_v54 = vld [vmem:[#allocation2 + $0x24] sm:$0xf] }
  0x2d   : > { %v1000_v50 = vsel %vm13160_vm6, %v995_v40, %v999_v24  ;;  %v1010_v51 = vsel %vm13160_vm6, %v1005_v41, %v1009_v26  ;;  %v1028_v52 = vor.u32 %v1027_v42, %v1023_v38  ;;  %v13176_v55 = vld [vmem:[#allocation2 + $0x28] sm:$0xf]  ;;  %v1045_v60 = vshll.u32 %v13168_v47, 16  ;;  %v13179_v61 = vld [vmem:[#allocation2 + $0x2c] sm:$0x1] }
  0x2e   : > { %v11149_v56 = vcombine.low %v1000_v50, %v1010_v51  ;;  %v1019_v57 = vrot.slane %v1018_v45, 4  ;;  %v1038_v59 = vrot.slane %v1036_v49, 4  ;;  %v1041_v63 = vrot.slane %v1039_v53, 5  ;;  %v948_v22 = vld [vmem:[#allocation2 + $0x30] sm:$0xf] }
  0x2f   : > { %v1029_v62 = vrot.slane %v1028_v52, 4  ;;  %v1049_v0 = vshrl.u32 %v13168_v47, 16  ;;  %v1055_v1 = vshll.u32 %v13170_v48, 16  ;;  %v1047_v4 = vrot.slane %v1045_v60, 5  ;;  %v13192_v27 = vld [vmem:[#allocation2 + $0x34] sm:$0xf] }
  0x30   : > { %12284 = vmatprep.mubr.msk.bf16.mxu1 %vm690_vm3, %v11149_v56  ;;  %v1024_v3 = vsel %vm13160_vm6, %v1019_v57, %v1023_v38  ;;  %v1060_v6 = vshrl.u32 %v945_v54, 16  ;;  %v1063_v7 = vshll.u32 %v945_v54, 16  ;;  %v1042_v13 = vor.u32 %v1041_v63, %v1038_v59  ;;  %v13196_v30 = vld [vmem:[#allocation2 + $0x38] sm:$0x1]  ;;  %v951_v40 = vld [vmem:[#allocation2 + $0x3c] sm:$0xf] }
  0x31   : > { %v1034_v10 = vsel %vm13160_vm6, %v1029_v62, %v1033_v43  ;;  %v1051_v14 = vrot.slane %v1049_v0, 4  ;;  %v1057_v15 = vrot.slane %v1055_v1, 5  ;;  %v1069_v18 = vshll.u32 %v13176_v55, 16  ;;  %12259 = vmatmul.mubr.msk.bf16.gmra.mxu0 %vm690_vm3, %v12892_v58  ;;  %v12894_v38 = vld [vmem:[#allocation2 + $0x54] sm:$0xff]   ;;  %v13202_v45 = vld [vmem:[#allocation2 + $0x40] sm:$0xf] }
  0x32   : > { %v11150_v16 = vcombine.low %v1024_v3, %v1034_v10  ;;  %v1062_v17 = vrot.slane %v1060_v6, 4  ;;  %v1065_v5 = vrot.slane %v1063_v7, 5  ;;  %v1043_v23 = vrot.slane %v1042_v13, 4  ;;  %12262 = vmatprep.mubr.msk.bf16.mxu0 %vm690_vm3, %v12893_v8  ;;  %v13208_v53 = vld [vmem:[#allocation2 + $0x44] sm:$0x1] }
  0x33   : > { %v1052_v24 = vor.u32 %v1051_v14, %v1047_v4  ;;  %v1073_v25 = vshrl.u32 %v13176_v55, 16  ;;  %v1079_v26 = vshll.u32 %v13179_v61, 16  ;;  %v1071_v29 = vrot.slane %v1069_v18, 5  ;;  %v12895_v58 = vld [vmem:[#allocation2 + $0x60] sm:$0xff]   ;;  %v954_v6 = vld [vmem:[#allocation2 + $0x48] sm:$0xf] }
  0x34   : > { %12285 = vmatmul.mubr.msk.bf16.vlgmr.msra.gmra.mxu1 %vm690_vm3, %v11150_v16  ;;  %v1066_v28 = vor.u32 %v1065_v5, %v1062_v17  ;;  %v1084_v31 = vshrl.u32 %v948_v22, 16  ;;  %v1087_v32 = vshll.u32 %v948_v22, 16  ;;  %v1048_v33 = vsel %vm13160_vm6, %v1043_v23, %v1047_v4  ;;  %v13219_v14 = vld [vmem:[#allocation2 + $0x4c] sm:$0xf]  ;;  %v13224_v18 = vld [vmem:[#allocation2 + $0x50] sm:$0x1] }
  0x35   : > { %v1053_v34 = vrot.slane %v1052_v24, 4  ;;  %v1075_v36 = vrot.slane %v1073_v25, 4  ;;  %v1081_v37 = vrot.slane %v1079_v26, 5  ;;  %12351 = vmatpush3.bf16.msra.mxu1 %v13136_v2  ;;  %v1093_v44 = vshll.u32 %v13192_v27, 16  ;;  %v957_v26 = vld [vmem:[#allocation2 + $0x54] sm:$0xf] }
  0x36   : > { %v1067_v41 = vrot.slane %v1066_v28, 4  ;;  %v1086_v42 = vrot.slane %v1084_v31, 4  ;;  %v1089_v43 = vrot.slane %v1087_v32, 5  ;;  %v1097_v51 = vshrl.u32 %v13192_v27, 16 }
  0x37   : > { %v1058_v49 = vsel %vm13160_vm6, %v1053_v34, %v1057_v15  ;;  %v1076_v50 = vor.u32 %v1075_v36, %v1071_v29  ;;  %v1103_v52 = vshll.u32 %v13196_v30, 16  ;;  %v1095_v57 = vrot.slane %v1093_v44, 5 }
  0x38   : > { %v11151_v54 = vcombine.low %v1048_v33, %v1058_v49  ;;  %v1072_v2 = vsel %vm13160_vm6, %v1067_v41, %v1071_v29  ;;  %v1090_v56 = vor.u32 %v1089_v43, %v1086_v42  ;;  %v1099_v60 = vrot.slane %v1097_v51, 4  ;;  %v12896_v29 = vld [vmem:[#allocation2 + $0x6c] sm:$0xff]   ;;  %v12897_v49 = vld [vmem:[#allocation2 + $0x78] sm:$0xff]  }
  0x39   : > { %v1077_v59 = vrot.slane %v1076_v50, 4  ;;  %v1105_v62 = vrot.slane %v1103_v52, 5  ;;  %v1108_v63 = vshrl.u32 %v951_v40, 16  ;;  %v1111_v1 = vshll.u32 %v951_v40, 16  ;;  %12263 = vmatmul.mubr.msk.bf16.gmra.mxu0 %vm690_vm3, %v12894_v38  ;;  %v13232_v40 = vld [vmem:[#allocation2 + $0x58] sm:$0xf] }
  0x3a   : > { %12288 = vmatprep.mubr.msk.bf16.mxu1 %vm690_vm3, %v11151_v54  ;;  %v1091_v0 = vrot.slane %v1090_v56, 4  ;;  %v1117_v3 = vshll.u32 %v13202_v45, 16  ;;  %v1121_v4 = vshrl.u32 %v13202_v45, 16  ;;  %v1100_v8 = vor.u32 %v1099_v60, %v1095_v57  ;;  %12266 = vmatprep.mubr.msk.bf16.mxu0 %vm690_vm3, %v12895_v58  ;;  %v259_v60 = vld [vmem:[%s13065_s6 + $0x108] sm:$0xff] }
  0x3b   : > { %v1082_v7 = vsel %vm13160_vm6, %v1077_v59, %v1081_v37  ;;  %v1110_v10 = vrot.slane %v1108_v63, 4  ;;  %v1127_v13 = vshll.u32 %v13208_v53, 16  ;;  %v1113_v17 = vrot.slane %v1111_v1, 5 }
  0x3c   : > { %v11152_v15 = vcombine.low %v1072_v2, %v1082_v7  ;;  %v1096_v16 = vsel %vm13160_vm6, %v1091_v0, %v1095_v57  ;;  %v1119_v5 = vrot.slane %v1117_v3, 5  ;;  %v1101_v22 = vrot.slane %v1100_v8, 4  ;;  %v13237_v57 = vld [vmem:[#allocation2 + $0x5c] sm:$0x1]  ;;  %v260_v3 = vld [vmem:[%s13065_s6 + $0x110] sm:$0xff] }
  0x3d   : > { %v1123_v23 = vrot.slane %v1121_v4, 4  ;;  %v1129_v24 = vrot.slane %v1127_v13, 5  ;;  %v1132_v25 = vshrl.u32 %v954_v6, 16  ;;  %v1114_v28 = vor.u32 %v1113_v17, %v1110_v10  ;;  %v252_v4 = vld [vmem:[%s13065_s6 + $0xd0] sm:$0x3] }
  0x3e   : > { %12289 = vmatmul.mubr.msk.bf16.gmra.mxu1 %vm690_vm3, %v11152_v15  ;;  %v1135_v31 = vshll.u32 %v954_v6, 16  ;;  %v1141_v32 = vshll.u32 %v13219_v14, 16  ;;  %v1145_v33 = vshrl.u32 %v13219_v14, 16  ;;  %v1106_v34 = vsel %vm13160_vm6, %v1101_v22, %v1105_v62  ;;  %v960_v13 = vld [vmem:[#allocation2 + $0x60] sm:$0xf] }
  0x3f   : > { %v1124_v36 = vor.u32 %v1123_v23, %v1119_v5  ;;  %v1134_v37 = vrot.slane %v1132_v25, 4  ;;  %v1151_v38 = vshll.u32 %v13224_v18, 16  ;;  %v11153_v41 = vcombine.low %v1096_v16, %v1106_v34  ;;  %v13249_v22 = vld [vmem:[#allocation2 + $0x64] sm:$0xf]  ;;  %v963_v34 = vld [vmem:[#allocation2 + $0x6c] sm:$0xf] }
  0x40   : > { %v1115_v42 = vrot.slane %v1114_v28, 4  ;;  %v1137_v43 = vrot.slane %v1135_v31, 5  ;;  %v1143_v44 = vrot.slane %v1141_v32, 5  ;;  %v1147_v51 = vrot.slane %v1145_v33, 4  ;;  %v255_v28 = vld [vmem:[%s13065_s6 + $0xe8] sm:$0x3] }
  0x41   : > { %v1125_v50 = vrot.slane %v1124_v36, 4  ;;  %v1153_v52 = vrot.slane %v1151_v38, 5  ;;  %v1156_v54 = vshrl.u32 %v957_v26, 16  ;;  %12292 = vmatprep.mubr.msk.bf16.mxu1 %vm690_vm3, %v11153_v41  ;;  %v1159_v58 = vshll.u32 %v957_v26, 16  ;;  %12267 = vmatmul.mubr.msk.bf16.gmra.mxu0 %vm690_vm3, %v12896_v29 }
  0x42   : > { %v1120_v2 = vsel %vm13160_vm6, %v1115_v42, %v1119_v5  ;;  %v1138_v56 = vor.u32 %v1137_v43, %v1134_v37  ;;  %v1165_v59 = vshll.u32 %v13232_v40, 16  ;;  %v1148_v63 = vor.u32 %v1147_v51, %v1143_v44  ;;  %12270 = vmatprep.mubr.msk.bf16.mxu0 %vm690_vm3, %v12897_v49  ;;  %v13261_v42 = vld [vmem:[#allocation2 + $0x70] sm:$0xf] }
  0x43   : > { %v1130_v62 = vsel %vm13160_vm6, %v1125_v50, %v1129_v24  ;;  %v1158_v0 = vrot.slane %v1156_v54, 4  ;;  %v1169_v1 = vshrl.u32 %v13232_v40, 16  ;;  %v1161_v8 = vrot.slane %v1159_v58, 5  ;;  %v263_v58 = vld [vmem:[%s13065_s6 + $0x128] sm:$0xff] }
  0x44   : > { %v11154_v6 = vcombine.low %v1120_v2, %v1130_v62  ;;  %v1139_v7 = vrot.slane %v1138_v56, 4  ;;  %v1167_v10 = vrot.slane %v1165_v59, 5  ;;  %v1149_v15 = vrot.slane %v1148_v63, 4  ;;  %v262_v56 = vld [vmem:[%s13065_s6 + $0x120] sm:$0xff]  ;;  %v265_v59 = vld [vmem:[%s13065_s6 + $0x138] sm:$0xff] }
  0x45   : > { %v1171_v16 = vrot.slane %v1169_v1, 4  ;;  %v1175_v17 = vshll.u32 %v13237_v57, 16  ;;  %v11921_v5 = vpack.c.bf16 %v259_v60, %v259_v60  ;;  %v1162_v24 = vor.u32 %v1161_v8, %v1158_v0  ;;  %v266_v1 = vld [vmem:[%s13065_s6 + $0x140] sm:$0xff] }
  0x46   : > { %12293 = vmatmul.mubr.msk.bf16.gmra.mxu1 %vm690_vm3, %v11154_v6  ;;  %v1144_v23 = vsel %vm13160_vm6, %v1139_v7, %v1143_v44  ;;  %v11922_v25 = vpack.c.bf16 %v260_v3, %v260_v3  ;;  %v11914_v26 = vpack.c.bf16 %v252_v4, %v252_v4  ;;  %v1154_v29 = vsel %vm13160_vm6, %v1149_v15, %v1153_v52  ;;  %v258_v3 = vld [vmem:[%s13065_s6 + $0x100] sm:$0x3] }
  0x47   : > { %v1172_v31 = vor.u32 %v1171_v16, %v1167_v10  ;;  %v1177_v32 = vrot.slane %v1175_v17, 5  ;;  %549 = vst.msk [vmem:[#allocation2 + $0x84] sm:$0xf] %vm514_vm1, %v11921_v5  ;;  %v1180_v33 = vshrl.u32 %v960_v13, 16  ;;  %v11155_v36 = vcombine.low %v1144_v23, %v1154_v29 }
  0x48   : > { %v1163_v37 = vrot.slane %v1162_v24, 4  ;;  %550 = vst.msk [vmem:[#allocation2 + $0x88] sm:$0xf] %vm514_vm1, %v11922_v25  ;;  %v1183_v38 = vshll.u32 %v960_v13, 16  ;;  %v1189_v41 = vshll.u32 %v13249_v22, 16  ;;  %v1193_v49 = vshrl.u32 %v13249_v22, 16 }
  0x49   : > { %542 = vst.msk [vmem:[#allocation2 + $0x68] sm:$0x1] %vm517_vm2, %v11914_v26  ;;  %v1173_v43 = vrot.slane %v1172_v31, 4  ;;  %v1182_v44 = vrot.slane %v1180_v33, 4  ;;  %v11917_v50 = vpack.c.bf16 %v255_v28, %v255_v28  ;;  %12296 = vmatprep.mubr.msk.bf16.mxu1 %vm690_vm3, %v11155_v36  ;;  %v1204_v2 = vshrl.u32 %v963_v34, 16 }
  0x4a   : > { %v1168_v51 = vsel %vm13160_vm6, %v1163_v37, %v1167_v10  ;;  %v1185_v52 = vrot.slane %v1183_v38, 5  ;;  %v13267_v54 = vrot.slane %v1189_v41, 5  ;;  %v1195_v62 = vrot.slane %v1193_v49, 4  ;;  %v966_v10 = vld [vmem:[#allocation2 + $0x78] sm:$0xf] }
  0x4b   : > { %v1178_v60 = vsel %vm13160_vm6, %v1173_v43, %v1177_v32  ;;  %545 = vst.msk [vmem:[#allocation2 + $0x74] sm:$0x1] %vm517_vm2, %v11917_v50  ;;  %v1207_v63 = vshll.u32 %v963_v34, 16  ;;  %v1213_v0 = vshll.u32 %v13261_v42, 16  ;;  %v1206_v7 = vrot.slane %v1204_v2, 4 }
  0x4c   : > { %v11156_v4 = vcombine.low %v1168_v51, %v1178_v60  ;;  %v1186_v6 = vor.u32 %v1185_v52, %v1182_v44  ;;  %v1217_v8 = vshrl.u32 %v13261_v42, 16  ;;  %v13279_v13 = vld [vmem:[#allocation2 + $0x7c] sm:$0xf]  ;;  %v1196_v15 = vor.u32 %v1195_v62, %v13267_v54  ;;  %v261_v28 = vld [vmem:[%s13065_s6 + $0x118] sm:$0x3] }
  0x4d   : > { %v1209_v16 = vrot.slane %v1207_v63, 5  ;;  %v13282_v17 = vrot.slane %v1213_v0, 5  ;;  %v11924_v5 = vpack.c.bf16 %v262_v56, %v262_v56  ;;  %v11925_v25 = vpack.c.bf16 %v263_v58, %v263_v58 }
  0x4e   : > { %12297 = vmatmul.mubr.msk.bf16.gmra.mxu1 %vm690_vm3, %v11156_v4  ;;  %v1187_v23 = vrot.slane %v1186_v6, 4  ;;  %v1219_v24 = vrot.slane %v1217_v8, 4  ;;  %v11927_v26 = vpack.c.bf16 %v265_v59, %v265_v59  ;;  %v1197_v32 = vrot.slane %v1196_v15, 4  ;;  %v969_v37 = vld [vmem:[#allocation2 + $0x84] sm:$0xf]  ;;  %v268_v8 = vld [vmem:[%s13065_s6 + $0x150] sm:$0xff] }
  0x4f   : > { %v12898_v29 = vld [vmem:[#allocation2 + $0x84] sm:$0xff]   ;;  %v1210_v33 = vor.u32 %v1209_v16, %v1206_v7  ;;  %552 = vst.msk [vmem:[#allocation2 + $0x90] sm:$0xf] %vm514_vm1, %v11924_v5  ;;  %v11928_v34 = vpack.c.bf16 %v266_v1, %v266_v1  ;;  %v11920_v36 = vpack.c.bf16 %v258_v3, %v258_v3  ;;  %553 = vst.msk [vmem:[#allocation2 + $0x94] sm:$0xf] %vm514_vm1, %v11925_v25  ;;  %v1228_v44 = vshrl.u32 %v966_v10, 16 }
  0x50   : > { %v13286_v31 = vld [vmem:[#allocation2 + $0x68] sm:$0x1]  ;;  %v1192_v38 = vsel %vm13160_vm6, %v1187_v23, %v13267_v54  ;;  %v1220_v43 = vor.u32 %v1219_v24, %v13282_v17  ;;  %555 = vst.msk [vmem:[#allocation2 + $0x9c] sm:$0xf] %vm514_vm1, %v11927_v26  ;;  %12271 = vmatmul.mubr.msk.bf16.gmra.mxu0 %vm690_vm3, %v12898_v29  ;;  %v1231_v51 = vshll.u32 %v966_v10, 16  ;;  %v1237_v52 = vshll.u32 %v13279_v13, 16 }
  0x51   : > { %v1199_v41 = vshll.u32 %v13286_v31, 16  ;;  %v13296_v49 = vld [vmem:[#allocation2 + $0x88] sm:$0xf]  ;;  %v1211_v50 = vrot.slane %v1210_v33, 4  ;;  %556 = vst.msk [vmem:[#allocation2 + $0xa0] sm:$0xf] %vm514_vm1, %v11928_v34  ;;  %v11923_v60 = vpack.c.bf16 %v261_v28, %v261_v28 }
  0x52   : > { %548 = vst.msk [vmem:[#allocation2 + $0x80] sm:$0x1] %vm517_vm2, %v11920_v36  ;;  %v1241_v54 = vshrl.u32 %v13279_v13, 16  ;;  %v13303_v56 = vld [vmem:[#allocation2 + $0x74] sm:$0x1]  ;;  %v1221_v58 = vrot.slane %v1220_v43, 4 }
  0x53   : > { %v1201_v2 = vrot.slane %v1199_v41, 5  ;;  %v1230_v59 = vrot.slane %v1228_v44, 4  ;;  %v1216_v62 = vsel %vm13160_vm6, %v1211_v50, %v13282_v17  ;;  %v1223_v63 = vshll.u32 %v13303_v56, 16  ;;  %551 = vst.msk [vmem:[#allocation2 + $0x8c] sm:$0x1] %vm517_vm2, %v11923_v60  ;;  %v269_v10 = vld [vmem:[%s13065_s6 + $0x158] sm:$0xff] }
  0x54   : > { %v1233_v0 = vrot.slane %v1231_v51, 5  ;;  %v13309_v1 = vrot.slane %v1237_v52, 5  ;;  %v1243_v4 = vrot.slane %v1241_v54, 4  ;;  %v1252_v6 = vshrl.u32 %v969_v37, 16  ;;  %v271_v15 = vld [vmem:[%s13065_s6 + $0x168] sm:$0xff] }
  0x55   : > { %v1202_v3 = vsel %vm13160_vm6, %v1197_v32, %v1201_v2  ;;  %v1255_v7 = vshll.u32 %v969_v37, 16  ;;  %v1225_v17 = vrot.slane %v1223_v63, 5  ;;  %v1261_v23 = vshll.u32 %v13296_v49, 16  ;;  %v264_v24 = vld [vmem:[%s13065_s6 + $0x130] sm:$0x3] }
  0x56   : > { %v11157_v16 = vcombine.low %v1192_v38, %v1202_v3  ;;  %v1234_v5 = vor.u32 %v1233_v0, %v1230_v59  ;;  %v1244_v25 = vor.u32 %v1243_v4, %v13309_v1  ;;  %v1254_v26 = vrot.slane %v1252_v6, 4  ;;  %v272_v32 = vld [vmem:[%s13065_s6 + $0x170] sm:$0xff] }
  0x57   : > { %v1257_v28 = vrot.slane %v1255_v7, 5  ;;  %v1265_v29 = vshrl.u32 %v13296_v49, 16  ;;  %v1226_v33 = vsel %vm13160_vm6, %v1221_v58, %v1225_v17  ;;  %v12899_v34 = vld [vmem:[#allocation2 + $0x90] sm:$0xff]   ;;  %v11930_v37 = vpack.c.bf16 %v268_v8, %v268_v8  ;;  %v975_v6 = vld [vmem:[#allocation2 + $0x9c] sm:$0xf] }
  0x58   : > { %12300 = vmatprep.mubr.msk.bf16.mxu1 %vm690_vm3, %v11157_v16  ;;  %v1235_v36 = vrot.slane %v1234_v5, 4  ;;  %v11931_v38 = vpack.c.bf16 %v269_v10, %v269_v10  ;;  %v11158_v41 = vcombine.low %v1216_v62, %v1226_v33  ;;  %v12900_v43 = vld [vmem:[#allocation2 + $0x9c] sm:$0xff]   ;;  %v1245_v50 = vrot.slane %v1244_v25, 4  ;;  %12274 = vmatprep.mubr.msk.bf16.mxu0 %vm690_vm3, %v12899_v34  ;;  %v972_v60 = vld [vmem:[#allocation2 + $0x90] sm:$0xf] }
  0x59   : > { %v13325_v44 = vld [vmem:[#allocation2 + $0x80] sm:$0x1]  ;;  %v1258_v51 = vor.u32 %v1257_v28, %v1254_v26  ;;  %v11933_v52 = vpack.c.bf16 %v271_v15, %v271_v15  ;;  %v1263_v58 = vrot.slane %v1261_v23, 5  ;;  %v1267_v59 = vrot.slane %v1265_v29, 4  ;;  %558 = vst.msk [vmem:[#allocation2 + $0xa8] sm:$0xf] %vm514_vm1, %v11930_v37  ;;  %12275 = vmatmul.mubr.msk.bf16.gmra.mxu0 %vm690_vm3, %v12900_v43 }
  0x5a   : > { %v1240_v54 = vsel %vm13160_vm6, %v1235_v36, %v13309_v1  ;;  %v1247_v2 = vshll.u32 %v13325_v44, 16  ;;  %559 = vst.msk [vmem:[#allocation2 + $0xac] sm:$0xf] %vm514_vm1, %v11931_v38  ;;  %v267_v62 = vld [vmem:[%s13065_s6 + $0x148] sm:$0x3]  ;;  %12301 = vmatmul.mubr.msk.bf16.gmra.mxu1 %vm690_vm3, %v11158_v41  ;;  %v11934_v0 = vpack.c.bf16 %v272_v32, %v272_v32  ;;  %v11926_v1 = vpack.c.bf16 %v264_v24, %v264_v24 }
  0x5b   : > { %v1259_v63 = vrot.slane %v1258_v51, 4  ;;  %561 = vst.msk [vmem:[#allocation2 + $0xb4] sm:$0xf] %vm514_vm1, %v11933_v52  ;;  %v13338_v3 = vld [vmem:[#allocation2 + $0x94] sm:$0xf]  ;;  %v1276_v4 = vshrl.u32 %v972_v60, 16  ;;  %v1268_v10 = vor.u32 %v1267_v59, %v1263_v58  ;;  %v11929_v38 = vpack.c.bf16 %v267_v62, %v267_v62 }
  0x5c   : > { %v1249_v7 = vrot.slane %v1247_v2, 5  ;;  %v13340_v8 = vld [vmem:[#allocation2 + $0x8c] sm:$0x1]  ;;  %v1279_v15 = vshll.u32 %v972_v60, 16  ;;  %v1285_v16 = vshll.u32 %v13338_v3, 16  ;;  %v1289_v25 = vshrl.u32 %v13338_v3, 16 }
  0x5d   : > { %v270_v17 = vld [vmem:[%s13065_s6 + $0x160] sm:$0x3]  ;;  %v1264_v5 = vsel %vm13160_vm6, %v1259_v63, %v1263_v58  ;;  %v1271_v23 = vshll.u32 %v13340_v8, 16  ;;  %562 = vst.msk [vmem:[#allocation2 + $0xb8] sm:$0xf] %vm514_vm1, %v11934_v0  ;;  %v1278_v24 = vrot.slane %v1276_v4, 4 }
  0x5e   : > { %554 = vst.msk [vmem:[#allocation2 + $0x98] sm:$0x1] %vm517_vm2, %v11926_v1  ;;  %v13350_v26 = vld [vmem:[#allocation2 + $0xa0] sm:$0xf]  ;;  %v1250_v28 = vsel %vm13160_vm6, %v1245_v50, %v1249_v7  ;;  %v1269_v29 = vrot.slane %v1268_v10, 4  ;;  %v1281_v32 = vrot.slane %v1279_v15, 5  ;;  %v11932_v62 = vpack.c.bf16 %v270_v17, %v270_v17 }
  0x5f   : > { %v13354_v33 = vrot.slane %v1285_v16, 5  ;;  %v11159_v34 = vcombine.low %v1240_v54, %v1250_v28  ;;  %v1273_v36 = vrot.slane %v1271_v23, 5  ;;  %v1291_v37 = vrot.slane %v1289_v25, 4  ;;  %v1665_v41 = vld [vmem:[#allocation2] sm:$0xe] }
  0x60   : > { %v1282_v43 = vor.u32 %v1281_v32, %v1278_v24  ;;  %v1300_v51 = vshrl.u32 %v975_v6, 16  ;;  %v1303_v52 = vshll.u32 %v975_v6, 16  ;;  %v1309_v2 = vshll.u32 %v13350_v26, 16  ;;  %v273_v58 = vld [vmem:[%s13065_s6 + $0x178] sm:$0x3] }
  0x61   : > { %12304 = vmatprep.mubr.msk.bf16.mxu1 %vm690_vm3, %v11159_v34  ;;  %v1274_v50 = vsel %vm13160_vm6, %v1269_v29, %v1273_v36  ;;  %v12901_v59 = vld [vmem:[#allocation2 + $0xa8] sm:$0xff]   ;;  %v1292_v60 = vor.u32 %v1291_v37, %v13354_v33  ;;  %557 = vst.msk [vmem:[#allocation2 + $0xa4] sm:$0x1] %vm517_vm2, %v11929_v38  ;;  %v1313_v54 = vshrl.u32 %v13350_v26, 16  ;;  %v18299_v15 = vmov 0 }
  0x62   : > { %v11160_v63 = vcombine.low %v1264_v5, %v1274_v50  ;;  %v1283_v0 = vrot.slane %v1282_v43, 4  ;;  %v1302_v1 = vrot.slane %v1300_v51, 4  ;;  %v1305_v4 = vrot.slane %v1303_v52, 5  ;;  %12278 = vmatprep.mubr.msk.bf16.mxu0 %vm690_vm3, %v12901_v59  ;;  %560 = vst.msk [vmem:[#allocation2 + $0xb0] sm:$0x1] %vm517_vm2, %v11932_v62 }
  0x63   : > { %v1293_v6 = vrot.slane %v1292_v60, 4  ;;  %v13365_v7 = vrot.slane %v1309_v2, 5  ;;  %v1315_v10 = vrot.slane %v1313_v54, 4  ;;  %v18300_v15 = vsel %vm13369_vm9, 4294967295, %v18299_v15  ;;  %v978_v17 = vld [vmem:[#allocation2 + $0xa8] sm:$0xf] }
  0x64   : > { %18301 = vst [vmem:[#allocation4_spill] sm:$0xff] %v18300_v15  ;;  %v11181_v16 = vrot.slane %v1665_v41, 9  ;;  %12305 = vmatmul.mubr.msk.bf16.gmra.mxu1 %vm690_vm3, %v11160_v63  ;;  %v12902_v5 = vld [vmem:[#allocation2 + $0xb4] sm:$0xff]   ;;  %v1288_v24 = vsel %vm13160_vm6, %v1283_v0, %v13354_v33  ;;  %v1306_v25 = vor.u32 %v1305_v4, %v1302_v1  ;;  %v1734_v28 = vrot.slane %v13142_v11, 5  ;;  %v13383_v36 = vld [vmem:[#allocation2 + $0xac] sm:$0xf] }
  0x65   : > { %v13375_v23 = vld [vmem:[#allocation2 + $0x98] sm:$0x1]  ;;  %v11935_v29 = vpack.c.bf16 %v273_v58, %v273_v58  ;;  %v1316_v34 = vor.u32 %v1315_v10, %v13365_v7  ;;  %v1324_v37 = vshrl.u32 %v978_v17, 16  ;;  %v1327_v38 = vshll.u32 %v978_v17, 16  ;;  %12279 = vmatmul.mubr.msk.bf16.gmra.mxu0 %vm690_vm3, %v12902_v5  ;;  %v1666_v52 = vld [vmem:[#allocation2 + $0xc] sm:$0xe] }
  0x66   : > { %v1295_v32 = vshll.u32 %v13375_v23, 16  ;;  %v1307_v41 = vrot.slane %v1306_v25, 4  ;;  %v1735_v43 = vsel %vm13369_vm9, %v11181_v16, %v1734_v28  ;;  %v1736_v51 = vrot.slane %v1734_v28, 4  ;;  %v981_v59 = vld [vmem:[#allocation2 + $0xb4] sm:$0xf] }
  0x67   : > { %v1333_v33 = vshll.u32 %v13383_v36, 16  ;;  %563 = vst.msk [vmem:[#allocation2 + $0xbc] sm:$0x1] %vm517_vm2, %v11935_v29  ;;  %v1317_v2 = vrot.slane %v1316_v34, 4  ;;  %v1326_v58 = vrot.slane %v1324_v37, 4  ;;  %v1329_v50 = vrot.slane %v1327_v38, 5 }
  0x68   : > { %v1297_v11 = vrot.slane %v1295_v32, 5  ;;  %v13390_v60 = vld [vmem:[#allocation2 + $0xa4] sm:$0x1]  ;;  %v1312_v54 = vsel %vm13160_vm6, %v1307_v41, %v13365_v7  ;;  %v1738_v62 = vsel %vm13369_vm9, %v1736_v51, %v1737_v19  ;;  %v1337_v0 = vshrl.u32 %v13383_v36, 16  ;;  %v13418_v37 = vld [vmem:[#allocation2 + $0xb8] sm:$0xf] }
  0x69   : > { %v1335_v63 = vrot.slane %v1333_v33, 5  ;;  %v1319_v4 = vshll.u32 %v13390_v60, 16  ;;  %v11198_v10 = vcombine.low %v1735_v43, %v1738_v62  ;;  %v1330_v16 = vor.u32 %v1329_v50, %v1326_v58  ;;  %v13403_v5 = vld [vmem:[#allocation2 + $0xb0] sm:$0x1]  ;;  %v1667_v41 = vld [vmem:[#allocation2 + $0x18] sm:$0xe] }
  0x6a   : > { %v1298_v1 = vsel %vm13160_vm6, %v1293_v6, %v1297_v11  ;;  %v1339_v25 = vrot.slane %v1337_v0, 4  ;;  %v11182_v7 = vrot.slane %v1666_v52, 9  ;;  %v1743_v12 = vrot.slane %v1741_v39, 4 }
  0x6b   : > { %v11161_v17 = vcombine.low %v1288_v24, %v1298_v1  ;;  %v1321_v28 = vrot.slane %v1319_v4, 5  ;;  %12318 = vmatprep.mubr.msk.bf16.mxu0 %vm690_vm3, %v11198_v10  ;;  %v1331_v19 = vrot.slane %v1330_v16, 4  ;;  %v1343_v29 = vshll.u32 %v13403_v5, 16  ;;  %v1669_v4 = vld [vmem:[#allocation2 + $0x30] sm:$0xe] }
  0x6c   : > { %v1348_v32 = vshrl.u32 %v981_v59, 16  ;;  %v1340_v6 = vor.u32 %v1339_v25, %v1335_v63  ;;  %v1742_v24 = vsel %vm13369_vm9, %v11182_v7, %v1741_v39  ;;  %v1745_v34 = vsel %vm13369_vm9, %v1743_v12, %v1744_v46  ;;  %v1668_v39 = vld [vmem:[#allocation2 + $0x24] sm:$0xe]  ;;  %v1670_v7 = vld [vmem:[#allocation2 + $0x3c] sm:$0xe] }
  0x6d   : > { %12308 = vmatprep.mubr.msk.bf16.mxu1 %vm690_vm3, %v11161_v17  ;;  %v1351_v38 = vshll.u32 %v981_v59, 16  ;;  %v1322_v43 = vsel %vm13160_vm6, %v1317_v2, %v1321_v28  ;;  %v1336_v51 = vsel %vm13160_vm6, %v1331_v19, %v1335_v63  ;;  %v1345_v33 = vrot.slane %v1343_v29, 5 }
  0x6e   : > { %v11199_v20 = vcombine.low %v1742_v24, %v1745_v34  ;;  %v13424_v52 = vld [vmem:[#allocation2 + $0xbc] sm:$0x1]  ;;  %v11162_v11 = vcombine.low %v1312_v54, %v1322_v43  ;;  %v1341_v21 = vrot.slane %v1340_v6, 4  ;;  %v1350_v58 = vrot.slane %v1348_v32, 4  ;;  %v1671_v32 = vld [vmem:[#allocation2 + $0x48] sm:$0xe] }
  0x6f   : > { %v1353_v50 = vrot.slane %v1351_v38, 5  ;;  %v1357_v46 = vshll.u32 %v13418_v37, 16  ;;  %v1361_v59 = vshrl.u32 %v13418_v37, 16  ;;  %v1367_v2 = vshll.u32 %v13424_v52, 16 }
  0x70   : > { %12319 = vmatmul.mubr.msk.bf16.vlgmr.msra.gmra.mxu0 %vm690_vm3, %v11199_v20  ;;  %v11183_v62 = vrot.slane %v1667_v41, 9  ;;  %12309 = vmatmul.mubr.msk.bf16.gmra.mxu1 %vm690_vm3, %v11162_v11  ;;  %v1346_v63 = vsel %vm13160_vm6, %v1341_v21, %v1345_v33  ;;  %v1748_v0 = vrot.slane %v13168_v47, 5  ;;  %v1751_v1 = vrot.slane %v13170_v48, 5 }
  0x71   : > { %12385 = vmatpush3.bf16.msra.mxu0 %v13139_v9  ;;  %v1354_v54 = vor.u32 %v1353_v50, %v1350_v58  ;;  %v11163_v10 = vcombine.low %v1336_v51, %v1346_v63  ;;  %v1359_v16 = vrot.slane %v1357_v46, 5  ;;  %v1363_v17 = vrot.slane %v1361_v59, 4 }
  0x72   : > { %v1369_v25 = vrot.slane %v1367_v2, 5  ;;  %v1749_v28 = vsel %vm13369_vm9, %v11183_v62, %v1748_v0  ;;  %v1750_v19 = vrot.slane %v1748_v0, 4  ;;  %v11184_v29 = vrot.slane %v1668_v39, 9  ;;  %v1673_v39 = vld [vmem:[#allocation2 + $0x60] sm:$0xe] }
  0x73   : > { %v1355_v12 = vrot.slane %v1354_v54, 4  ;;  %12312 = vmatprep.mubr.msk.bf16.mxu1 %vm690_vm3, %v11163_v10  ;;  %v1364_v9 = vor.u32 %v1363_v17, %v1359_v16  ;;  %v1755_v47 = vrot.slane %v13176_v55, 5  ;;  %v1758_v48 = vrot.slane %v13179_v61, 5  ;;  %v1672_v55 = vld [vmem:[#allocation2 + $0x54] sm:$0xe]  ;;  %v12903_v61 = vld [vmem:[#allocation2 + $0xc] sm:$0xff]  }
  0x74   : > { %v11185_v6 = vrot.slane %v1669_v4, 9  ;;  %v1752_v34 = vsel %vm13369_vm9, %v1750_v19, %v1751_v1  ;;  %v1762_v38 = vrot.slane %v13192_v27, 5  ;;  %v1765_v41 = vrot.slane %v13196_v30, 5 }
  0x75   : > { %v1360_v24 = vsel %vm13160_vm6, %v1355_v12, %v1359_v16  ;;  %v1365_v43 = vrot.slane %v1364_v9, 4  ;;  %v11200_v51 = vcombine.low %v1749_v28, %v1752_v34  ;;  %v1756_v33 = vsel %vm13369_vm9, %v11184_v29, %v1755_v47  ;;  %v1675_v29 = vld [vmem:[#allocation2 + $0x78] sm:$0xe]  ;;  %v12905_v9 = vld [vmem:[#allocation2 + $0x24] sm:$0xff]  }
  0x76   : > { %v1757_v20 = vrot.slane %v1755_v47, 4  ;;  %v1763_v11 = vsel %vm13369_vm9, %v11185_v6, %v1762_v38  ;;  %v1764_v21 = vrot.slane %v1762_v38, 4  ;;  %v11186_v58 = vrot.slane %v1670_v7, 9 }
  0x77   : > { %v1769_v50 = vrot.slane %v13202_v45, 5  ;;  %v1370_v27 = vsel %vm13160_vm6, %v1365_v43, %v1369_v25  ;;  %12322 = vmatprep.mubr.msk.bf16.mxu0 %vm690_vm3, %v11200_v51  ;;  %v1772_v46 = vrot.slane %v13208_v53, 5  ;;  %v11187_v59 = vrot.slane %v1671_v32, 9  ;;  %v1674_v45 = vld [vmem:[#allocation2 + $0x6c] sm:$0xe]  ;;  %v12904_v32 = vld [vmem:[#allocation2 + $0x18] sm:$0xff]  }
  0x78   : > { %v1759_v30 = vsel %vm13369_vm9, %v1757_v20, %v1758_v48  ;;  %v11164_v2 = vcombine.low %v1360_v24, %v1370_v27  ;;  %v1766_v63 = vsel %vm13369_vm9, %v1764_v21, %v1765_v41  ;;  %v1776_v4 = vrot.slane %v13219_v14, 5  ;;  %v1676_v24 = vld [vmem:[#allocation2 + $0x84] sm:$0xe]  ;;  %v13502_v43 = vld [vmem:[%s18229_s1 + $0xc] sm:$0x3] }
  0x79   : > { %v11201_v62 = vcombine.low %v1756_v33, %v1759_v30  ;;  %v1770_v54 = vsel %vm13369_vm9, %v11186_v58, %v1769_v50  ;;  %v11202_v0 = vcombine.low %v1763_v11, %v1766_v63  ;;  %v1771_v1 = vrot.slane %v1769_v50, 4  ;;  %12866 = vmatprep.subr.msk.bf16.mxu0 %vm739_vm0, %v13502_v43  ;;  %v1679_v63 = vld [vmem:[#allocation2 + $0xa8] sm:$0xe] }
  0x7a   : > { %v1779_v10 = vrot.slane %v13224_v18, 5  ;;  %12313 = vmatmul.mubr.msk.bf16.gmra.mxu1 %vm690_vm3, %v11164_v2  ;;  %v11188_v53 = vrot.slane %v1672_v55, 9  ;;  %v1783_v16 = vrot.slane %v13232_v40, 5  ;;  %v1786_v17 = vrot.slane %v13237_v57, 5  ;;  %v13479_v57 = vld [vmem:[%s18229_s1 + $0xa] sm:$0x3] }
  0x7b   : > { %12323 = vmatmul.mubr.msk.bf16.gmra.mxu0 %vm690_vm3, %v11201_v62  ;;  %v11189_v25 = vrot.slane %v1673_v39, 9  ;;  %12352 = vmatprep.mubr.msk.bf16.mxu1 %vm690_vm3, %v12903_v61  ;;  %v1773_v7 = vsel %vm13369_vm9, %v1771_v1, %v1772_v46  ;;  %v1778_v14 = vrot.slane %v1776_v4, 4  ;;  %v1790_v18 = vrot.slane %v13249_v22, 5  ;;  %v1677_v39 = vld [vmem:[#allocation2 + $0x90] sm:$0xe] }
  0x7c   : > { %12326 = vmatprep.mubr.msk.bf16.mxu0 %vm690_vm3, %v11202_v0  ;;  %v11203_v12 = vcombine.low %v1770_v54, %v1773_v7  ;;  %v1777_v28 = vsel %vm13369_vm9, %v11187_v59, %v1776_v4  ;;  %v1785_v19 = vrot.slane %v1783_v16, 4  ;;  %v1793_v40 = vrot.slane %v13286_v31, 5  ;;  %12865 = vmatprep.subr.msk.bf16.mxu1 %vm739_vm0, %v13479_v57  ;;  %v1678_v59 = vld [vmem:[#allocation2 + $0x9c] sm:$0xe] }
  0x7d   : > { %v1780_v47 = vsel %vm13369_vm9, %v1778_v14, %v1779_v10  ;;  %v13485_v22 = vsel %vm13369_vm9, %v11188_v53, %v1783_v16  ;;  %v1792_v48 = vrot.slane %v1790_v18, 4  ;;  %v11190_v6 = vrot.slane %v1674_v45, 9  ;;  %v1680_v16 = vld [vmem:[#allocation2 + $0xb4] sm:$0xe] }
  0x7e   : > { %v13491_v31 = vsel %vm13369_vm9, %v1785_v19, %v1786_v17  ;;  %v13495_v34 = vsel %vm13369_vm9, %v11189_v25, %v1790_v18  ;;  %v1797_v38 = vrot.slane %v13261_v42, 5  ;;  %v1800_v41 = vrot.slane %v13303_v56, 5  ;;  %v12906_v17 = vld [vmem:[#allocation2 + $0x30] sm:$0xff]   ;;  %v2497_v18 = vld [vmem:[#allocation2 + $0xc] sm:$0xf] }
  0x7f   : > { %v11204_v51 = vcombine.low %v1777_v28, %v1780_v47  ;;  %v13506_v33 = vsel %vm13369_vm9, %v1792_v48, %v1793_v40  ;;  %v11191_v20 = vrot.slane %v1675_v29, 9  ;;  %v1804_v55 = vrot.slane %v13279_v13, 5  ;;  %v13570_v40 = vld [vmem:[#allocation2 + $0x10] sm:$0xf]  ;;  %v13575_v47 = vld [vmem:[#allocation2 + $0x14] sm:$0x1] }
  0x80   : > { %v11205_v42 = vcombine.low %v13485_v22, %v13491_v31  ;;  %v13515_v56 = vsel %vm13369_vm9, %v11190_v6, %v1797_v38  ;;  %v1799_v61 = vrot.slane %v1797_v38, 4  ;;  %v1807_v11 = vrot.slane %v13325_v44, 5 }
  0x81   : > { %v11206_v21 = vcombine.low %v13495_v34, %v13506_v33  ;;  %v1806_v58 = vrot.slane %v1804_v55, 4  ;;  %v11192_v50 = vrot.slane %v1676_v24, 9  ;;  %v1811_v13 = vrot.slane %v13296_v49, 5  ;;  %v2500_v24 = vld [vmem:[#allocation2 + $0x18] sm:$0xf] }
  0x82   : > { %12353 = vmatmul.mubr.msk.bf16.vlgmr.msra.gmra.mxu1 %vm690_vm3, %v12904_v32  ;;  %v13525_v27 = vsel %vm13369_vm9, %v1799_v61, %v1800_v41  ;;  %v1814_v30 = vrot.slane %v13340_v8, 5  ;;  %v11193_v46 = vrot.slane %v1677_v39, 9  ;;  %v1818_v44 = vrot.slane %v13338_v3, 5  ;;  %v13603_v33 = vld [vmem:[#allocation2 + $0x1c] sm:$0xf] }
  0x83   : > { %12327 = vmatmul.mubr.msk.bf16.gmra.mxu0 %vm690_vm3, %v11203_v12  ;;  %12356 = vmatprep.mubr.msk.bf16.mxu1 %vm690_vm3, %v12905_v9  ;;  %v11207_v49 = vcombine.low %v13515_v56, %v13525_v27  ;;  %v13535_v2 = vsel %vm13369_vm9, %v11191_v20, %v1804_v55  ;;  %v13539_v62 = vsel %vm13369_vm9, %v1806_v58, %v1807_v11  ;;  %v1813_v8 = vrot.slane %v1811_v13, 4  ;;  %v12907_v12 = vld [vmem:[#allocation2 + $0x3c] sm:$0xff]   ;;  %v13642_v27 = vld [vmem:[#allocation2 + $0x2c] sm:$0x1] }
  0x84   : > { %12330 = vmatprep.mubr.msk.bf16.mxu0 %vm690_vm3, %v11204_v51  ;;  %v13543_v3 = vsel %vm13369_vm9, %v11192_v50, %v1811_v13  ;;  %v13547_v54 = vsel %vm13369_vm9, %v11193_v46, %v1818_v44  ;;  %v1820_v45 = vrot.slane %v1818_v44, 4  ;;  %v1821_v0 = vrot.slane %v13375_v23, 5  ;;  %v274_v13 = vld [vmem:[%s13065_s6 + $0x180] sm:$0xff]  ;;  %v12909_v46 = vld [vmem:[#allocation2 + $0x54] sm:$0xff]  }
  0x85   : > { %v13552_v1 = vsel %vm13369_vm9, %v1813_v8, %v1814_v30  ;;  %v11194_v4 = vrot.slane %v1678_v59, 9  ;;  %v1825_v10 = vrot.slane %v13350_v26, 5  ;;  %v1828_v53 = vrot.slane %v13390_v60, 5  ;;  %v12908_v30 = vld [vmem:[#allocation2 + $0x48] sm:$0xff]  }
  0x86   : > { %v11208_v25 = vcombine.low %v13535_v2, %v13539_v62  ;;  %v13560_v7 = vsel %vm13369_vm9, %v1820_v45, %v1821_v0  ;;  %v11195_v14 = vrot.slane %v1679_v63, 9  ;;  %v1832_v23 = vrot.slane %v13383_v36, 5 }
  0x87   : > { %v11209_v28 = vcombine.low %v13543_v3, %v13552_v1  ;;  %v13567_v26 = vsel %vm13369_vm9, %v11194_v4, %v1825_v10  ;;  %v1827_v60 = vrot.slane %v1825_v10, 4  ;;  %v1835_v19 = vrot.slane %v13403_v5, 5 }
  0x88   : > { %v11210_v29 = vcombine.low %v13547_v54, %v13560_v7  ;;  %v1834_v32 = vrot.slane %v1832_v23, 4  ;;  %v11196_v9 = vrot.slane %v1680_v16, 9  ;;  %v1839_v36 = vrot.slane %v13418_v37, 5  ;;  %v2503_v16 = vld [vmem:[#allocation2 + $0x24] sm:$0xf] }
  0x89   : > { %v13579_v22 = vsel %vm13369_vm9, %v1827_v60, %v1828_v53  ;;  %v1842_v48 = vrot.slane %v13424_v52, 5  ;;  %v3498_v5 = vsel %vm739_vm0, %v13479_v57, 0  ;;  %v2546_v6 = vshrl.u32 %v2497_v18, 16  ;;  %v275_v53 = vld [vmem:[%s13065_s6 + $0x188] sm:$0xff] }
  0x8a   : > { %12357 = vmatmul.mubr.msk.bf16.gmra.mxu1 %vm690_vm3, %v12906_v17  ;;  %v11211_v37 = vcombine.low %v13567_v26, %v13579_v22  ;;  %v13590_v31 = vsel %vm13369_vm9, %v11195_v14, %v1832_v23  ;;  %v13594_v34 = vsel %vm13369_vm9, %v1834_v32, %v1835_v19  ;;  %v1841_v52 = vrot.slane %v1839_v36, 4  ;;  %v3225_v22 = vld [vmem:[#allocation2 + $0x24] sm:$0xe] }
  0x8b   : > { %12331 = vmatmul.mubr.msk.bf16.gmra.mxu0 %vm690_vm3, %v11205_v42  ;;  %12360 = vmatprep.mubr.msk.bf16.mxu1 %vm690_vm3, %v12907_v12  ;;  %v13600_v57 = vsel %vm13369_vm9, %v11196_v9, %v1839_v36  ;;  %v2548_v38 = vrot.slane %v2546_v6, 4  ;;  %v2549_v41 = vshll.u32 %v2497_v18, 16  ;;  %v2555_v51 = vshll.u32 %v13570_v40, 16  ;;  %v13611_v42 = vld [vmem:[#allocation2 + $0x20] sm:$0x1] }
  0x8c   : > { %12334 = vmatprep.mubr.msk.bf16.mxu0 %vm690_vm3, %v11206_v21  ;;  %v13607_v20 = vsel %vm13369_vm9, %v1841_v52, %v1842_v48  ;;  %12419 = vmatpush3.bf16.msra.mxu1 %v3498_v5  ;;  %v2559_v55 = vshrl.u32 %v13570_v40, 16  ;;  %v2565_v39 = vshll.u32 %v13575_v47, 16  ;;  %v2570_v61 = vshrl.u32 %v2500_v24, 16  ;;  %v13624_v12 = vld [vmem:[#allocation2 + $0x28] sm:$0xf] }
  0x8d   : > { %v11212_v11 = vcombine.low %v13590_v31, %v13594_v34  ;;  %v2551_v21 = vrot.slane %v2549_v41, 5  ;;  %v2557_v58 = vrot.slane %v2555_v51, 5  ;;  %v2573_v50 = vshll.u32 %v2500_v24, 16  ;;  %v12914_v31 = vld [vmem:[#allocation2 + $0x90] sm:$0xff]  }
  0x8e   : > { %v11213_v44 = vcombine.low %v13600_v57, %v13607_v20  ;;  %v2561_v59 = vrot.slane %v2559_v55, 4  ;;  %v2572_v8 = vrot.slane %v2570_v61, 4  ;;  %v2579_v63 = vshll.u32 %v13603_v33, 16 }
  0x8f   : > { %v2552_v45 = vor.u32 %v2551_v21, %v2548_v38  ;;  %v2575_v0 = vrot.slane %v2573_v50, 5  ;;  %v2583_v4 = vshrl.u32 %v13603_v33, 16  ;;  %v2589_v10 = vshll.u32 %v13611_v42, 16  ;;  %v2506_v38 = vld [vmem:[#allocation2 + $0x30] sm:$0xf] }
  0x90   : > { %v2562_v17 = vor.u32 %v2561_v59, %v2557_v58  ;;  %v2567_v14 = vrot.slane %v2565_v39, 5  ;;  %v13622_v23 = vrot.slane %v2579_v63, 5  ;;  %v11936_v18 = vpack.c.bf16 %v274_v13, %v274_v13 }
  0x91   : > { %v2553_v60 = vrot.slane %v2552_v45, 4  ;;  %v2576_v19 = vor.u32 %v2575_v0, %v2572_v8  ;;  %v2585_v32 = vrot.slane %v2583_v4, 4  ;;  %v13626_v9 = vrot.slane %v2589_v10, 5  ;;  %v12911_v8 = vld [vmem:[#allocation2 + $0x6c] sm:$0xff]  }
  0x92   : > { %12361 = vmatmul.mubr.msk.bf16.gmra.mxu1 %vm690_vm3, %v12908_v30  ;;  %v2563_v36 = vrot.slane %v2562_v17, 4  ;;  %v11937_v48 = vpack.c.bf16 %v275_v53, %v275_v53  ;;  %564 = vst.msk [vmem:[#allocation2 + $0xc0] sm:$0xf] %vm514_vm1, %v11936_v18  ;;  %v2594_v5 = vshrl.u32 %v2503_v16, 16  ;;  %v2597_v6 = vshll.u32 %v2503_v16, 16 }
  0x93   : > { %12335 = vmatmul.mubr.msk.bf16.gmra.mxu0 %vm690_vm3, %v11207_v49  ;;  %12364 = vmatprep.mubr.msk.bf16.mxu1 %vm690_vm3, %v12909_v46  ;;  %v2558_v24 = vsel %vm13160_vm6, %v2553_v60, %v2557_v58  ;;  %v2577_v52 = vrot.slane %v2576_v19, 4  ;;  %v2586_v56 = vor.u32 %v2585_v32, %v13622_v23  ;;  %v2603_v49 = vshll.u32 %v13624_v12, 16  ;;  %v12910_v58 = vld [vmem:[#allocation2 + $0x60] sm:$0xff]   ;;  %v13658_v46 = vld [vmem:[#allocation2 + $0x38] sm:$0x1] }
  0x94   : > { %12338 = vmatprep.mubr.msk.bf16.mxu0 %vm690_vm3, %v11208_v25  ;;  %v2568_v41 = vsel %vm13160_vm6, %v2563_v36, %v2567_v14  ;;  %565 = vst.msk [vmem:[#allocation2 + $0xc4] sm:$0xf] %vm514_vm1, %v11937_v48  ;;  %v2596_v51 = vrot.slane %v2594_v5, 4  ;;  %v2599_v2 = vrot.slane %v2597_v6, 5  ;;  %v2607_v62 = vshrl.u32 %v13624_v12, 16 }
  0x95   : > { %v13649_v25 = vld [vmem:[#allocation2 + $0x34] sm:$0xf]  ;;  %v13651_v55 = vcombine.low %v2558_v24, %v2568_v41  ;;  %v2587_v39 = vrot.slane %v2586_v56, 4  ;;  %v13655_v61 = vsel %vm739_vm0, %v13502_v43, 0  ;;  %v2605_v21 = vrot.slane %v2603_v49, 5 }
  0x96   : > { %v2600_v50 = vor.u32 %v2599_v2, %v2596_v51  ;;  %v2609_v13 = vrot.slane %v2607_v62, 4  ;;  %v2613_v30 = vshll.u32 %v13642_v27, 16  ;;  %v2618_v59 = vshrl.u32 %v2506_v38, 16  ;;  %v3223_v4 = vld [vmem:[#allocation2 + $0xc] sm:$0xe]  ;;  %v12912_v51 = vld [vmem:[#allocation2 + $0x78] sm:$0xff]  }
  0x97   : > { %v2582_v63 = vsel %vm13160_vm6, %v2577_v52, %v13622_v23  ;;  %v2621_v45 = vshll.u32 %v2506_v38, 16  ;;  %v2627_v0 = vshll.u32 %v13649_v25, 16  ;;  %v2631_v43 = vshrl.u32 %v13649_v25, 16  ;;  %v3224_v14 = vld [vmem:[#allocation2 + $0x18] sm:$0xe] }
  0x98   : > { %v2592_v10 = vsel %vm13160_vm6, %v2587_v39, %v13626_v9  ;;  %v2601_v53 = vrot.slane %v2600_v50, 4  ;;  %v2610_v16 = vor.u32 %v2609_v13, %v2605_v21  ;;  %v2615_v17 = vrot.slane %v2613_v30, 5  ;;  %v2509_v49 = vld [vmem:[#allocation2 + $0x3c] sm:$0xf]  ;;  %v2512_v30 = vld [vmem:[#allocation2 + $0x48] sm:$0xf] }
  0x99   : > { %v2620_v18 = vrot.slane %v2618_v59, 4  ;;  %v2623_v60 = vrot.slane %v2621_v45, 5  ;;  %v2629_v19 = vrot.slane %v2627_v0, 5  ;;  %v2633_v32 = vrot.slane %v2631_v43, 4  ;;  %v13714_v45 = vld [vmem:[#allocation2 + $0x4c] sm:$0xf] }
  0x9a   : > { %12365 = vmatmul.mubr.msk.bf16.gmra.mxu1 %vm690_vm3, %v12910_v58  ;;  %v2606_v23 = vsel %vm13160_vm6, %v2601_v53, %v2605_v21  ;;  %v2611_v36 = vrot.slane %v2610_v16, 4  ;;  %v2637_v9 = vshll.u32 %v13658_v46, 16  ;;  %v11296_v48 = vrot.slane %v3223_v4, 9  ;;  %v13701_v58 = vld [vmem:[#allocation2 + $0x44] sm:$0x1] }
  0x9b   : > { %12339 = vmatmul.mubr.msk.bf16.gmra.mxu0 %vm690_vm3, %v11209_v28  ;;  %12368 = vmatprep.mubr.msk.bf16.mxu1 %vm690_vm3, %v12911_v8  ;;  %v2624_v5 = vor.u32 %v2623_v60, %v2620_v18  ;;  %v2634_v6 = vor.u32 %v2633_v32, %v2629_v19  ;;  %v3289_v3 = vrot.slane %v13570_v40, 5  ;;  %v3292_v1 = vrot.slane %v13575_v47, 5  ;;  %v12913_v40 = vld [vmem:[#allocation2 + $0x84] sm:$0xff]   ;;  %v13722_v53 = vld [vmem:[#allocation2 + $0x50] sm:$0x1] }
  0x9c   : > { %12342 = vmatprep.mubr.msk.bf16.mxu0 %vm690_vm3, %v11210_v29  ;;  %v2616_v28 = vsel %vm13160_vm6, %v2611_v36, %v2615_v17  ;;  %v2639_v24 = vrot.slane %v2637_v9, 5  ;;  %v11297_v52 = vrot.slane %v3224_v14, 9  ;;  %v3296_v56 = vrot.slane %v13603_v33, 5  ;;  %v13690_v29 = vld [vmem:[#allocation2 + $0x40] sm:$0xf] }
  0x9d   : > { %v13686_v38 = vcombine.low %v2582_v63, %v2592_v10  ;;  %v13688_v41 = vcombine.low %v2606_v23, %v2616_v28  ;;  %v2625_v54 = vrot.slane %v2624_v5, 4  ;;  %v2635_v7 = vrot.slane %v2634_v6, 4 }
  0x9e   : > { %v13694_v47 = vsel %vm13369_vm9, %v11296_v48, %v3289_v3  ;;  %v3291_v2 = vrot.slane %v3289_v3, 4  ;;  %v3298_v62 = vrot.slane %v3296_v56, 4  ;;  %v3299_v39 = vrot.slane %v13611_v42, 5 }
  0x9f   : > { %v2630_v33 = vsel %vm13160_vm6, %v2625_v54, %v2629_v19  ;;  %v2640_v21 = vsel %vm13160_vm6, %v2635_v7, %v2639_v24  ;;  %v2642_v50 = vshrl.u32 %v2509_v49, 16  ;;  %v2645_v13 = vshll.u32 %v2509_v49, 16 }
  0xa0   : > { %v13703_v59 = vcombine.low %v2630_v33, %v2640_v21  ;;  %v13707_v8 = vsel %vm13369_vm9, %v3291_v2, %v3292_v1  ;;  %v13711_v42 = vsel %vm13369_vm9, %v11297_v52, %v3296_v56  ;;  %v2651_v63 = vshll.u32 %v13690_v29, 16  ;;  %v3226_v1 = vld [vmem:[#allocation2 + $0x30] sm:$0xe]  ;;  %v12915_v52 = vld [vmem:[#allocation2 + $0x9c] sm:$0xff]  }
  0xa1   : > { %v11313_v0 = vcombine.low %v13694_v47, %v13707_v8  ;;  %v13720_v43 = vsel %vm13369_vm9, %v3298_v62, %v3299_v39  ;;  %v2644_v4 = vrot.slane %v2642_v50, 4  ;;  %v2647_v10 = vrot.slane %v2645_v13, 5  ;;  %v13749_v13 = vld [vmem:[#allocation2 + $0x58] sm:$0xf] }
  0xa2   : > { %12369 = vmatmul.mubr.msk.bf16.gmra.mxu1 %vm690_vm3, %v12912_v51  ;;  %v2653_v16 = vrot.slane %v2651_v63, 5  ;;  %v2655_v17 = vshrl.u32 %v13690_v29, 16  ;;  %v2661_v14 = vshll.u32 %v13701_v58, 16  ;;  %v2666_v18 = vshrl.u32 %v2512_v30, 16  ;;  %v2515_v51 = vld [vmem:[#allocation2 + $0x54] sm:$0xf] }
  0xa3   : > { %12343 = vmatmul.mubr.msk.bf16.gmra.mxu0 %vm690_vm3, %v11211_v37  ;;  %12372 = vmatprep.mubr.msk.bf16.mxu1 %vm690_vm3, %v12913_v40  ;;  %v2648_v60 = vor.u32 %v2647_v10, %v2644_v4  ;;  %v2669_v19 = vshll.u32 %v2512_v30, 16  ;;  %v2675_v32 = vshll.u32 %v13714_v45, 16  ;;  %v2679_v26 = vshrl.u32 %v13714_v45, 16  ;;  %v13762_v63 = vld [vmem:[#allocation2 + $0x5c] sm:$0x1] }
  0xa4   : > { %12346 = vmatprep.mubr.msk.bf16.mxu0 %vm690_vm3, %v11212_v11  ;;  %v2657_v37 = vrot.slane %v2655_v17, 4  ;;  %v2663_v23 = vrot.slane %v2661_v14, 5  ;;  %v2668_v36 = vrot.slane %v2666_v18, 4  ;;  %v2685_v9 = vshll.u32 %v13722_v53, 16  ;;  %v2518_v4 = vld [vmem:[#allocation2 + $0x60] sm:$0xf] }
  0xa5   : > { %v2649_v48 = vrot.slane %v2648_v60, 4  ;;  %v2671_v5 = vrot.slane %v2669_v19, 5  ;;  %v2677_v6 = vrot.slane %v2675_v32, 5  ;;  %v2681_v3 = vrot.slane %v2679_v26, 4  ;;  %v13778_v17 = vld [vmem:[%s18229_s1 + $0xe] sm:$0x3] }
  0xa6   : > { %v2658_v34 = vor.u32 %v2657_v37, %v2653_v16  ;;  %v2687_v11 = vrot.slane %v2685_v9, 5  ;;  %v11298_v28 = vrot.slane %v3225_v22, 9  ;;  %v3303_v24 = vrot.slane %v13624_v12, 5  ;;  %12867 = vmatprep.subr.msk.bf16.mxu1 %vm739_vm0, %v13778_v17  ;;  %v13794_v37 = vld [vmem:[#allocation2 + $0x68] sm:$0x1] }
  0xa7   : > { %v2654_v56 = vsel %vm13160_vm6, %v2649_v48, %v2653_v16  ;;  %v2672_v49 = vor.u32 %v2671_v5, %v2668_v36  ;;  %v2682_v54 = vor.u32 %v2681_v3, %v2677_v6  ;;  %v3306_v7 = vrot.slane %v13642_v27, 5  ;;  %v13773_v16 = vld [vmem:[#allocation2 + $0x64] sm:$0xf]  ;;  %v12917_v3 = vld [vmem:[#allocation2 + $0xb4] sm:$0xff]  }
  0xa8   : > { %v2659_v40 = vrot.slane %v2658_v34, 4  ;;  %v13745_v2 = vsel %vm13369_vm9, %v11298_v28, %v3303_v24  ;;  %v3305_v62 = vrot.slane %v3303_v24, 4  ;;  %v11299_v39 = vrot.slane %v3226_v1, 9  ;;  %v13805_v28 = vld [vmem:[%s18229_s1 + $0x10] sm:$0x3] }
  0xa9   : > { %v2673_v33 = vrot.slane %v2672_v49, 4  ;;  %v2683_v21 = vrot.slane %v2682_v54, 4  ;;  %v3310_v12 = vrot.slane %v13649_v25, 5  ;;  %v3313_v50 = vrot.slane %v13658_v46, 5  ;;  %v3228_v54 = vld [vmem:[#allocation2 + $0x48] sm:$0xe] }
  0xaa   : > { %12373 = vmatmul.mubr.msk.bf16.gmra.mxu1 %vm690_vm3, %v12914_v31  ;;  %v2664_v27 = vsel %vm13160_vm6, %v2659_v40, %v2663_v23  ;;  %v13760_v30 = vsel %vm13369_vm9, %v3305_v62, %v3306_v7  ;;  %v2690_v25 = vshrl.u32 %v2515_v51, 16  ;;  %v2693_v46 = vshll.u32 %v2515_v51, 16  ;;  %v12916_v23 = vld [vmem:[#allocation2 + $0xa8] sm:$0xff]  }
  0xab   : > { %12347 = vmatmul.mubr.msk.bf16.gmra.mxu0 %vm690_vm3, %v11213_v44  ;;  %12376 = vmatprep.mubr.msk.bf16.mxu1 %vm690_vm3, %v12915_v52  ;;  %v11314_v57 = vcombine.low %v13711_v42, %v13720_v43  ;;  %v2678_v20 = vsel %vm13160_vm6, %v2673_v33, %v2677_v6  ;;  %v2688_v44 = vsel %vm13160_vm6, %v2683_v21, %v2687_v11  ;;  %v3312_v10 = vrot.slane %v3310_v12, 4  ;;  %v3227_v6 = vld [vmem:[#allocation2 + $0x3c] sm:$0xe] }
  0xac   : > { %12386 = vmatprep.mubr.msk.bf16.mxu0 %vm690_vm3, %v13651_v55  ;;  %v13780_v14 = vcombine.low %v2654_v56, %v2664_v27  ;;  %v13782_v55 = vcombine.low %v2678_v20, %v2688_v44  ;;  %v11315_v18 = vcombine.low %v13745_v2, %v13760_v30  ;;  %v2692_v60 = vrot.slane %v2690_v25, 4 }
  0xad   : > { %v13790_v19 = vsel %vm13369_vm9, %v11299_v39, %v3310_v12  ;;  %v2695_v32 = vrot.slane %v2693_v46, 5  ;;  %v2699_v26 = vshll.u32 %v13749_v13, 16  ;;  %v2703_v22 = vshrl.u32 %v13749_v13, 16 }
  0xae   : > { %v13798_v36 = vsel %vm13369_vm9, %v3312_v10, %v3313_v50  ;;  %v2709_v9 = vshll.u32 %v13762_v63, 16  ;;  %v2714_v48 = vshrl.u32 %v2518_v4, 16  ;;  %v2717_v5 = vshll.u32 %v2518_v4, 16  ;;  %v2521_v50 = vld [vmem:[#allocation2 + $0x6c] sm:$0xf] }
  0xaf   : > { %v2696_v1 = vor.u32 %v2695_v32, %v2692_v60  ;;  %v2701_v31 = vrot.slane %v2699_v26, 5  ;;  %v2705_v34 = vrot.slane %v2703_v22, 4  ;;  %v2723_v11 = vshll.u32 %v13773_v16, 16  ;;  %v12918_v32 = vld [vmem:[#allocation2 + $0xc0] sm:$0xff]  }
  0xb0   : > { %v2711_v24 = vrot.slane %v2709_v9, 5  ;;  %v2716_v52 = vrot.slane %v2714_v48, 4  ;;  %v2719_v56 = vrot.slane %v2717_v5, 5  ;;  %v2727_v49 = vshrl.u32 %v13773_v16, 16  ;;  %v13840_v48 = vld [vmem:[#allocation2 + $0x74] sm:$0x1] }
  0xb1   : > { %v2697_v7 = vrot.slane %v2696_v1, 4  ;;  %v2706_v51 = vor.u32 %v2705_v34, %v2701_v31  ;;  %v2725_v40 = vrot.slane %v2723_v11, 5  ;;  %v2733_v62 = vshll.u32 %v13794_v37, 16  ;;  %v2524_v1 = vld [vmem:[#allocation2 + $0x78] sm:$0xf] }
  0xb2   : > { %12377 = vmatmul.mubr.msk.bf16.gmra.mxu1 %vm690_vm3, %v12916_v23  ;;  %v2720_v39 = vor.u32 %v2719_v56, %v2716_v52  ;;  %v2729_v33 = vrot.slane %v2727_v49, 4  ;;  %v11300_v21 = vrot.slane %v3227_v6, 9  ;;  %v3317_v12 = vrot.slane %v13690_v29, 5  ;;  %v13852_v52 = vld [vmem:[#allocation2 + $0x80] sm:$0x1] }
  0xb3   : > { %12387 = vmatmul.mubr.msk.bf16.vlgmr.msra.gmra.mxu0 %vm690_vm3, %v13686_v38  ;;  %12380 = vmatprep.mubr.msk.bf16.mxu1 %vm690_vm3, %v12917_v3  ;;  %v2702_v27 = vsel %vm13160_vm6, %v2697_v7, %v2701_v31  ;;  %v2707_v25 = vrot.slane %v2706_v51, 4  ;;  %v2735_v46 = vrot.slane %v2733_v62, 5  ;;  %v3320_v4 = vrot.slane %v13701_v58, 5  ;;  %v13846_v31 = vld [vmem:[#allocation2 + $0x7c] sm:$0xf] }
  0xb4   : > { %12453 = vmatpush3.bf16.msra.mxu0 %v13655_v61  ;;  %12390 = vmatprep.mubr.msk.bf16.mxu0 %vm690_vm3, %v13688_v41  ;;  %v2721_v38 = vrot.slane %v2720_v39, 4  ;;  %v2730_v20 = vor.u32 %v2729_v33, %v2725_v40  ;;  %v13822_v29 = vsel %vm13369_vm9, %v11300_v21, %v3317_v12  ;;  %v3319_v44 = vrot.slane %v3317_v12, 4  ;;  %v13831_v41 = vld [vmem:[#allocation2 + $0x70] sm:$0xf]  ;;  %v3229_v51 = vld [vmem:[#allocation2 + $0x54] sm:$0xe] }
  0xb5   : > { %12868 = vmatprep.subr.msk.bf16.mxu0 %vm739_vm0, %v13805_v28  ;;  %v11316_v61 = vcombine.low %v13790_v19, %v13798_v36  ;;  %v2712_v10 = vsel %vm13160_vm6, %v2707_v25, %v2711_v24  ;;  %v11301_v58 = vrot.slane %v3228_v54, 9  ;;  %v3324_v60 = vrot.slane %v13714_v45, 5 }
  0xb6   : > { %v2726_v26 = vsel %vm13160_vm6, %v2721_v38, %v2725_v40  ;;  %v2731_v22 = vrot.slane %v2730_v20, 4  ;;  %v13837_v23 = vsel %vm13369_vm9, %v3319_v44, %v3320_v4  ;;  %v3327_v9 = vrot.slane %v13722_v53, 5  ;;  %v3230_v38 = vld [vmem:[#allocation2 + $0x60] sm:$0xe] }
  0xb7   : > { %v13842_v5 = vcombine.low %v2702_v27, %v2712_v10  ;;  %v11317_v45 = vcombine.low %v13822_v29, %v13837_v23  ;;  %v3326_v6 = vrot.slane %v3324_v60, 4  ;;  %v2738_v3 = vshrl.u32 %v2521_v50, 16  ;;  %v13956_v29 = vld [vmem:[#allocation2 + $0xa0] sm:$0xf] }
  0xb8   : > { %v2736_v34 = vsel %vm13160_vm6, %v2731_v22, %v2735_v46  ;;  %v2741_v11 = vshll.u32 %v2521_v50, 16  ;;  %v2747_v24 = vshll.u32 %v13831_v41, 16  ;;  %v2751_v53 = vshrl.u32 %v13831_v41, 16 }
  0xb9   : > { %v13854_v56 = vcombine.low %v2726_v26, %v2736_v34  ;;  %v13858_v49 = vsel %vm13369_vm9, %v11301_v58, %v3324_v60  ;;  %v2740_v54 = vrot.slane %v2738_v3, 4  ;;  %v2757_v7 = vshll.u32 %v13840_v48, 16  ;;  %v2527_v34 = vld [vmem:[#allocation2 + $0x84] sm:$0xf] }
  0xba   : > { %12381 = vmatmul.mubr.msk.bf16.gmra.mxu1 %vm690_vm3, %v12918_v32  ;;  %v13866_v40 = vsel %vm13369_vm9, %v3326_v6, %v3327_v9  ;;  %v2743_v62 = vrot.slane %v2741_v11, 5  ;;  %v2749_v39 = vrot.slane %v2747_v24, 5  ;;  %v2753_v33 = vrot.slane %v2751_v53, 4  ;;  %v13884_v11 = vld [vmem:[#allocation2 + $0x88] sm:$0xf] }
  0xbb   : > { %12391 = vmatmul.mubr.msk.bf16.gmra.mxu0 %vm690_vm3, %v13703_v59  ;;  %12420 = vmatprep.mubr.msk.bf16.mxu1 %vm690_vm3, %v11313_v0  ;;  %v2759_v21 = vrot.slane %v2757_v7, 5  ;;  %v2762_v12 = vshrl.u32 %v2524_v1, 16  ;;  %v2765_v50 = vshll.u32 %v2524_v1, 16  ;;  %v2771_v59 = vshll.u32 %v13846_v31, 16 }
  0xbc   : > { %12394 = vmatprep.mubr.msk.bf16.mxu0 %vm690_vm3, %v13780_v14  ;;  %v2744_v27 = vor.u32 %v2743_v62, %v2740_v54  ;;  %v2754_v25 = vor.u32 %v2753_v33, %v2749_v39  ;;  %v2775_v46 = vshrl.u32 %v13846_v31, 16  ;;  %v2781_v4 = vshll.u32 %v13852_v52, 16  ;;  %v13892_v54 = vld [vmem:[#allocation2 + $0x8c] sm:$0x1] }
  0xbd   : > { %v2764_v20 = vrot.slane %v2762_v12, 4  ;;  %v2767_v44 = vrot.slane %v2765_v50, 5  ;;  %v2773_v47 = vrot.slane %v2771_v59, 5  ;;  %v11302_v8 = vrot.slane %v3229_v51, 9  ;;  %v13930_v59 = vld [vmem:[#allocation2 + $0x98] sm:$0x1] }
  0xbe   : > { %v2745_v0 = vrot.slane %v2744_v27, 4  ;;  %v2755_v10 = vrot.slane %v2754_v25, 4  ;;  %v2777_v58 = vrot.slane %v2775_v46, 4  ;;  %v2783_v14 = vrot.slane %v2781_v4, 5 }
  0xbf   : > { %v2768_v60 = vor.u32 %v2767_v44, %v2764_v20  ;;  %v3331_v32 = vrot.slane %v13749_v13, 5  ;;  %v3334_v26 = vrot.slane %v13762_v63, 5  ;;  %v11303_v22 = vrot.slane %v3230_v38, 9  ;;  %v3231_v38 = vld [vmem:[#allocation2 + $0x6c] sm:$0xe] }
  0xc0   : > { %v2750_v9 = vsel %vm13160_vm6, %v2745_v0, %v2749_v39  ;;  %v2760_v6 = vsel %vm13160_vm6, %v2755_v10, %v2759_v21  ;;  %v2778_v3 = vor.u32 %v2777_v58, %v2773_v47  ;;  %v3338_v1 = vrot.slane %v13773_v16, 5  ;;  %v2530_v39 = vld [vmem:[#allocation2 + $0x90] sm:$0xf]  ;;  %v3232_v0 = vld [vmem:[#allocation2 + $0x78] sm:$0xe] }
  0xc1   : > { %v11318_v24 = vcombine.low %v13858_v49, %v13866_v40  ;;  %v2769_v53 = vrot.slane %v2768_v60, 4  ;;  %v13890_v13 = vsel %vm13369_vm9, %v11302_v8, %v3331_v32  ;;  %v3333_v63 = vrot.slane %v3331_v32, 4 }
  0xc2   : > { %12421 = vmatmul.mubr.msk.bf16.vlgmr.msra.gmra.mxu1 %vm690_vm3, %v11314_v57  ;;  %v11272_v16 = vcombine.low %v2750_v9, %v2760_v6  ;;  %v2779_v7 = vrot.slane %v2778_v3, 4  ;;  %v3340_v51 = vrot.slane %v3338_v1, 4  ;;  %v3341_v62 = vrot.slane %v13794_v37, 5 }
  0xc3   : > { %12395 = vmatmul.mubr.msk.bf16.gmra.mxu0 %vm690_vm3, %v13782_v55  ;;  %12424 = vmatprep.mubr.msk.bf16.mxu1 %vm690_vm3, %v11315_v18  ;;  %v2774_v42 = vsel %vm13160_vm6, %v2769_v53, %v2773_v47  ;;  %v13911_v43 = vsel %vm13369_vm9, %v3333_v63, %v3334_v26  ;;  %v2786_v57 = vshrl.u32 %v2527_v34, 16  ;;  %v2789_v55 = vshll.u32 %v2527_v34, 16 }
  0xc4   : > { %12398 = vmatprep.mubr.msk.bf16.mxu0 %vm690_vm3, %v13842_v5  ;;  %v2784_v37 = vsel %vm13160_vm6, %v2779_v7, %v2783_v14  ;;  %v11319_v2 = vcombine.low %v13890_v13, %v13911_v43  ;;  %v13919_v30 = vsel %vm13369_vm9, %v11303_v22, %v3338_v1  ;;  %v2795_v18 = vshll.u32 %v13884_v11, 16  ;;  %v13922_v5 = vld [vmem:[#allocation2 + $0x94] sm:$0xf] }
  0xc5   : > { %v13924_v33 = vcombine.low %v2774_v42, %v2784_v37  ;;  %v13928_v21 = vsel %vm13369_vm9, %v3340_v51, %v3341_v62  ;;  %v2788_v12 = vrot.slane %v2786_v57, 4  ;;  %v2791_v50 = vrot.slane %v2789_v55, 5  ;;  %v13960_v42 = vld [vmem:[#allocation2 + $0xa4] sm:$0x1]  ;;  %v2536_v37 = vld [vmem:[#allocation2 + $0xa8] sm:$0xf] }
  0xc6   : > { %v2797_v27 = vrot.slane %v2795_v18, 5  ;;  %v2799_v25 = vshrl.u32 %v13884_v11, 16  ;;  %v2805_v46 = vshll.u32 %v13892_v54, 16  ;;  %v2810_v4 = vshrl.u32 %v2530_v39, 16  ;;  %v13968_v18 = vld [vmem:[#allocation2 + $0xac] sm:$0xf] }
  0xc7   : > { %v2792_v20 = vor.u32 %v2791_v50, %v2788_v12  ;;  %v2813_v44 = vshll.u32 %v2530_v39, 16  ;;  %v2819_v47 = vshll.u32 %v13922_v5, 16  ;;  %v2823_v8 = vshrl.u32 %v13922_v5, 16 }
  0xc8   : > { %v2801_v10 = vrot.slane %v2799_v25, 4  ;;  %v2807_v58 = vrot.slane %v2805_v46, 5  ;;  %v2812_v14 = vrot.slane %v2810_v4, 4  ;;  %v2829_v60 = vshll.u32 %v13930_v59, 16 }
  0xc9   : > { %v2793_v32 = vrot.slane %v2792_v20, 4  ;;  %v2815_v26 = vrot.slane %v2813_v44, 5  ;;  %v2821_v22 = vrot.slane %v2819_v47, 5  ;;  %v2825_v9 = vrot.slane %v2823_v8, 4  ;;  %v13991_v47 = vld [vmem:[#allocation2 + $0xb0] sm:$0x1] }
  0xca   : > { %12425 = vmatmul.mubr.msk.bf16.gmra.mxu1 %vm690_vm3, %v11316_v61  ;;  %v2802_v6 = vor.u32 %v2801_v10, %v2797_v27  ;;  %v2831_v3 = vrot.slane %v2829_v60, 5  ;;  %v11304_v1 = vrot.slane %v3231_v38, 9  ;;  %v3345_v34 = vrot.slane %v13831_v41, 5 }
  0xcb   : > { %12399 = vmatmul.mubr.msk.bf16.gmra.mxu0 %vm690_vm3, %v13854_v56  ;;  %12428 = vmatprep.mubr.msk.bf16.mxu1 %vm690_vm3, %v11317_v45  ;;  %v2798_v19 = vsel %vm13160_vm6, %v2793_v32, %v2797_v27  ;;  %v2816_v36 = vor.u32 %v2815_v26, %v2812_v14  ;;  %v2826_v61 = vor.u32 %v2825_v9, %v2821_v22  ;;  %v3348_v53 = vrot.slane %v13840_v48, 5  ;;  %v2533_v56 = vld [vmem:[#allocation2 + $0x9c] sm:$0xf] }
  0xcc   : > { %12402 = vmatprep.mubr.msk.bf16.mxu0 %vm690_vm3, %v11272_v16  ;;  %v2803_v63 = vrot.slane %v2802_v6, 4  ;;  %v13954_v7 = vsel %vm13369_vm9, %v11304_v1, %v3345_v34  ;;  %v3347_v41 = vrot.slane %v3345_v34, 4  ;;  %v11305_v51 = vrot.slane %v3232_v0, 9 }
  0xcd   : > { %v2817_v23 = vrot.slane %v2816_v36, 4  ;;  %v2827_v45 = vrot.slane %v2826_v61, 4  ;;  %v3352_v16 = vrot.slane %v13846_v31, 5  ;;  %v3355_v62 = vrot.slane %v13852_v52, 5 }
  0xce   : > { %v2808_v48 = vsel %vm13160_vm6, %v2803_v63, %v2807_v58  ;;  %v13966_v57 = vsel %vm13369_vm9, %v3347_v41, %v3348_v53  ;;  %v2834_v55 = vshrl.u32 %v2533_v56, 16  ;;  %v2837_v39 = vshll.u32 %v2533_v56, 16  ;;  %v3233_v58 = vld [vmem:[#allocation2 + $0x84] sm:$0xe]  ;;  %v2539_v56 = vld [vmem:[#allocation2 + $0xb4] sm:$0xf] }
  0xcf   : > { %v11320_v12 = vcombine.low %v13919_v30, %v13928_v21  ;;  %v11274_v31 = vcombine.low %v2798_v19, %v2808_v48  ;;  %v2822_v52 = vsel %vm13160_vm6, %v2817_v23, %v2821_v22  ;;  %v2832_v50 = vsel %vm13160_vm6, %v2827_v45, %v2831_v3  ;;  %v3234_v22 = vld [vmem:[#allocation2 + $0x90] sm:$0xe] }
  0xd0   : > { %v11275_v27 = vcombine.low %v2822_v52, %v2832_v50  ;;  %v11321_v25 = vcombine.low %v13954_v7, %v13966_v57  ;;  %v3354_v46 = vrot.slane %v3352_v16, 4  ;;  %v2836_v4 = vrot.slane %v2834_v55, 4  ;;  %v14023_v55 = vld [vmem:[#allocation2 + $0xbc] sm:$0x1]  ;;  %v2542_v50 = vld [vmem:[#allocation2 + $0xc0] sm:$0xf] }
  0xd1   : > { %v2839_v38 = vrot.slane %v2837_v39, 5  ;;  %v2843_v20 = vshll.u32 %v13956_v29, 16  ;;  %v2847_v44 = vshrl.u32 %v13956_v29, 16  ;;  %v2853_v30 = vshll.u32 %v13960_v42, 16 }
  0xd2   : > { %12429 = vmatmul.mubr.msk.bf16.gmra.mxu1 %vm690_vm3, %v11318_v24  ;;  %v13989_v21 = vsel %vm13369_vm9, %v11305_v51, %v3352_v16  ;;  %v2858_v8 = vshrl.u32 %v2536_v37, 16  ;;  %v2861_v0 = vshll.u32 %v2536_v37, 16  ;;  %v2867_v10 = vshll.u32 %v13968_v18, 16  ;;  %v14016_v16 = vld [vmem:[#allocation2 + $0xb8] sm:$0xf] }
  0xd3   : > { %12403 = vmatmul.mubr.msk.bf16.gmra.mxu0 %vm690_vm3, %v13924_v33  ;;  %12432 = vmatprep.mubr.msk.bf16.mxu1 %vm690_vm3, %v11319_v2  ;;  %v14001_v49 = vsel %vm13369_vm9, %v3354_v46, %v3355_v62  ;;  %v2840_v40 = vor.u32 %v2839_v38, %v2836_v4  ;;  %v2845_v24 = vrot.slane %v2843_v20, 5  ;;  %v2849_v33 = vrot.slane %v2847_v44, 4  ;;  %v276_v37 = vld [vmem:[%s13065_s6 + $0x190] sm:$0x3] }
  0xd4   : > { %12406 = vmatprep.mubr.msk.bf16.mxu0 %vm690_vm3, %v11274_v31  ;;  %v2855_v14 = vrot.slane %v2853_v30, 5  ;;  %v2860_v60 = vrot.slane %v2858_v8, 4  ;;  %v2863_v32 = vrot.slane %v2861_v0, 5  ;;  %v2869_v26 = vrot.slane %v2867_v10, 5 }
  0xd5   : > { %v2841_v9 = vrot.slane %v2840_v40, 4  ;;  %v2850_v6 = vor.u32 %v2849_v33, %v2845_v24  ;;  %v2871_v13 = vshrl.u32 %v13968_v18, 16  ;;  %v2877_v43 = vshll.u32 %v13991_v47, 16 }
  0xd6   : > { %v2864_v2 = vor.u32 %v2863_v32, %v2860_v60  ;;  %v11306_v3 = vrot.slane %v3233_v58, 9  ;;  %v3359_v1 = vrot.slane %v13884_v11, 5  ;;  %v3362_v34 = vrot.slane %v13892_v54, 5 }
  0xd7   : > { %v11322_v19 = vcombine.low %v13989_v21, %v14001_v49  ;;  %v2846_v36 = vsel %vm13160_vm6, %v2841_v9, %v2845_v24  ;;  %v2851_v61 = vrot.slane %v2850_v6, 4  ;;  %v2873_v53 = vrot.slane %v2871_v13, 4  ;;  %v3235_v21 = vld [vmem:[#allocation2 + $0x9c] sm:$0xe] }
  0xd8   : > { %v2865_v63 = vrot.slane %v2864_v2, 4  ;;  %v2879_v7 = vrot.slane %v2877_v43, 5  ;;  %v3360_v41 = vsel %vm13369_vm9, %v11306_v3, %v3359_v1  ;;  %v3361_v51 = vrot.slane %v3359_v1, 4 }
  0xd9   : > { %v2856_v11 = vsel %vm13160_vm6, %v2851_v61, %v2855_v14  ;;  %v2874_v54 = vor.u32 %v2873_v53, %v2869_v26  ;;  %v11307_v23 = vrot.slane %v3234_v22, 9  ;;  %v3366_v45 = vrot.slane %v13922_v5, 5  ;;  %v3236_v53 = vld [vmem:[#allocation2 + $0xa8] sm:$0xe] }
  0xda   : > { %12433 = vmatmul.mubr.msk.bf16.gmra.mxu1 %vm690_vm3, %v11320_v12  ;;  %v11276_v62 = vcombine.low %v2846_v36, %v2856_v11  ;;  %v3363_v48 = vsel %vm13369_vm9, %v3361_v51, %v3362_v34  ;;  %v3369_v57 = vrot.slane %v13930_v59, 5  ;;  %v2882_v39 = vshrl.u32 %v2539_v56, 16 }
  0xdb   : > { %12407 = vmatmul.mubr.msk.bf16.gmra.mxu0 %vm690_vm3, %v11275_v27  ;;  %12436 = vmatprep.mubr.msk.bf16.mxu1 %vm690_vm3, %v11321_v25  ;;  %v2870_v5 = vsel %vm13160_vm6, %v2865_v63, %v2869_v26  ;;  %v2875_v31 = vrot.slane %v2874_v54, 4  ;;  %v11323_v52 = vcombine.low %v3360_v41, %v3363_v48  ;;  %v3368_v12 = vrot.slane %v3366_v45, 4  ;;  %v14029_v27 = vld [vmem:[#allocation2 + $0xc4] sm:$0xf]  ;;  %v3237_v54 = vld [vmem:[#allocation2 + $0xb4] sm:$0xe] }
  0xdc   : > { %12410 = vmatprep.mubr.msk.bf16.mxu0 %vm690_vm3, %v11276_v62  ;;  %v2884_v46 = vrot.slane %v2882_v39, 4  ;;  %v2885_v4 = vshll.u32 %v2539_v56, 16  ;;  %v2891_v59 = vshll.u32 %v14016_v16, 16  ;;  %v2895_v38 = vshrl.u32 %v14016_v16, 16 }
  0xdd   : > { %v2880_v25 = vsel %vm13160_vm6, %v2875_v31, %v2879_v7  ;;  %v14038_v20 = vsel %vm13369_vm9, %v11307_v23, %v3366_v45  ;;  %v2901_v44 = vshll.u32 %v14023_v55, 16  ;;  %v11938_v30 = vpack.c.bf16 %v276_v37, %v276_v37  ;;  %v3238_v23 = vld [vmem:[#allocation2 + $0xc0] sm:$0xe] }
  0xde   : > { %v11277_v8 = vcombine.low %v2870_v5, %v2880_v25  ;;  %v3370_v0 = vsel %vm13369_vm9, %v3368_v12, %v3369_v57  ;;  %v2887_v10 = vrot.slane %v2885_v4, 5  ;;  %v2893_v49 = vrot.slane %v2891_v59, 5  ;;  %v14068_v12 = vld [vmem:[%s18230_s2] ss:$0 sm:$0xff] }
  0xdf   : > { %v2897_v40 = vrot.slane %v2895_v38, 4  ;;  %v2903_v24 = vrot.slane %v2901_v44, 5  ;;  %566 = vst.msk [vmem:[#allocation2 + $0xc8] sm:$0x1] %vm517_vm2, %v11938_v30  ;;  %v2906_v33 = vshrl.u32 %v2542_v50, 16  ;;  %v2909_v58 = vshll.u32 %v2542_v50, 16 }
  0xe0   : > { %v2888_v14 = vor.u32 %v2887_v10, %v2884_v46  ;;  %v2915_v60 = vshll.u32 %v14029_v27, 16  ;;  %v2919_v32 = vshrl.u32 %v14029_v27, 16  ;;  %v11308_v26 = vrot.slane %v3235_v21, 9  ;;  %v4052_v21 = vld [vmem:[#allocation2 + $0x18] sm:$0xf] }
  0xe1   : > { %v2898_v22 = vor.u32 %v2897_v40, %v2893_v49  ;;  %v2908_v9 = vrot.slane %v2906_v33, 4  ;;  %v2911_v6 = vrot.slane %v2909_v58, 5  ;;  %v3373_v13 = vrot.slane %v13956_v29, 5  ;;  %v12252_v7 = vpop.f32.mrf.mxu0  ;;  %v14088_v40 = vld [vmem:[#allocation2 + $0x1c] sm:$0xf] }
  0xe2   : > { %12437 = vmatmul.mubr.msk.bf16.gmra.mxu1 %vm690_vm3, %v11322_v19  ;;  %v2889_v43 = vrot.slane %v2888_v14, 4  ;;  %v2917_v2 = vrot.slane %v2915_v60, 5  ;;  %v2921_v3 = vrot.slane %v2919_v32, 4  ;;  %v3376_v1 = vrot.slane %v13960_v42, 5  ;;  %v14094_v60 = vld [vmem:[#allocation2 + $0x20] sm:$0x1] }
  0xe3   : > { %12411 = vmatmul.mubr.msk.bf16.gmra.mxu0 %vm690_vm3, %v11277_v8  ;;  %12440 = vmatprep.mubr.msk.bf16.mxu1 %vm690_vm3, %v11323_v52  ;;  %v2899_v34 = vrot.slane %v2898_v22, 4  ;;  %v2912_v36 = vor.u32 %v2911_v6, %v2908_v9  ;;  %v3375_v61 = vrot.slane %v3373_v13, 4  ;;  %v3374_v29 = vsel %vm13369_vm9, %v11308_v26, %v3373_v13  ;;  %v777_v37 = vpop.f32.mrf.mxu0  ;;  %v12919_v8 = vld [vmem:[#allocation2 + $0x18] sm:$0xff]   ;;  %v4055_v32 = vld [vmem:[#allocation2 + $0x24] sm:$0xf] }
  0xe4   : > { %v2894_v56 = vsel %vm13160_vm6, %v2889_v43, %v2893_v49  ;;  %v2922_v63 = vor.u32 %v2921_v3, %v2917_v2  ;;  %v3380_v19 = vrot.slane %v13968_v18, 5  ;;  %v11324_v41 = vcombine.low %v14038_v20, %v3370_v0  ;;  %v14106_v3 = vld [vmem:[#allocation2 + $0x28] sm:$0xf] }
  0xe5   : > { %v2904_v42 = vsel %vm13160_vm6, %v2899_v34, %v2903_v24  ;;  %v2913_v51 = vrot.slane %v2912_v36, 4  ;;  %v3377_v11 = vsel %vm13369_vm9, %v3375_v61, %v3376_v1  ;;  %v11309_v57 = vrot.slane %v3236_v53, 9  ;;  %v12253_v4 = vpop.f32.mrf.mxu0  ;;  %v14114_v53 = vld [vmem:[#allocation2 + $0x2c] sm:$0x1] }
  0xe6   : > { %v11278_v45 = vcombine.low %v2894_v56, %v2904_v42  ;;  %v2544_v62 = vld [vmem:[#allocation2 + $0xc8] sm:$0x1]  ;;  %v2923_v48 = vrot.slane %v2922_v63, 4  ;;  %v3383_v39 = vrot.slane %v13991_v47, 5  ;;  %v11325_v5 = vcombine.low %v3374_v29, %v3377_v11 }
  0xe7   : > { %v2925_v18 = vshll.u32 %v2544_v62, 16  ;;  %v3382_v31 = vrot.slane %v3380_v19, 4  ;;  %v4583_v52 = vsel %vm739_vm0, %v13778_v17, 0  ;;  %v11310_v50 = vrot.slane %v3237_v54, 9 }
  0xe8   : > { %12414 = vmatprep.mubr.msk.bf16.mxu0 %vm690_vm3, %v11278_v45  ;;  %12487 = vmatpush3.bf16.msra.mxu1 %v4583_v52  ;;  %v3387_v46 = vrot.slane %v14016_v16, 5  ;;  %v3390_v47 = vrot.slane %v14023_v55, 5  ;;  %v2918_v59 = vsel %vm13160_vm6, %v2913_v51, %v2917_v2  ;;  %v11311_v25 = vrot.slane %v3238_v23, 9  ;;  %v780_v16 = vpop.f32.mrf.mxu0  ;;  %v12920_v23 = vld [vmem:[#allocation2 + $0x24] sm:$0xff]  }
  0xe9   : > { %v2927_v38 = vrot.slane %v2925_v18, 5  ;;  %v3381_v17 = vsel %vm13369_vm9, %v11309_v57, %v3380_v19  ;;  %v3384_v20 = vsel %vm13369_vm9, %v3382_v31, %v3383_v39  ;;  %v3394_v30 = vrot.slane %v14029_v27, 5 }
  0xea   : > { %12441 = vmatmul.mubr.msk.bf16.gmra.mxu1 %vm690_vm3, %v11324_v41  ;;  %v3389_v44 = vrot.slane %v3387_v46, 4  ;;  %v14084_v0 = vadd.f32 %v12252_v7, %v14068_v12  ;;  %v3388_v10 = vsel %vm13369_vm9, %v11310_v50, %v3387_v46  ;;  %v3397_v49 = vrot.slane %v2544_v62, 5  ;;  %v12256_v14 = vpop.f32.mrf.mxu0 }
  0xeb   : > { %v2928_v55 = vsel %vm13160_vm6, %v2923_v48, %v2927_v38  ;;  %12444 = vmatprep.mubr.msk.bf16.mxu1 %vm690_vm3, %v11325_v5  ;;  %v5053_v33 = vsel %vm739_vm0, %v13805_v28, 0  ;;  %v3396_v58 = vrot.slane %v3394_v30, 4  ;;  %v11326_v26 = vcombine.low %v3381_v17, %v3384_v20  ;;  %v12921_v5 = vld [vmem:[#allocation2 + $0x30] sm:$0xff]  }
  0xec   : > { %v11279_v24 = vcombine.low %v2918_v59, %v2928_v55  ;;  %v3391_v27 = vsel %vm13369_vm9, %v3389_v44, %v3390_v47  ;;  %v14098_v22 = vsel %vm13369_vm9, %v11311_v25, %v3394_v30  ;;  %v14101_v9 = vadd.f32 %v14068_v12, %v777_v37  ;;  %v793_v1 = vpop.f32.mrf.mxu0  ;;  %v4058_v25 = vld [vmem:[#allocation2 + $0x30] sm:$0xf] }
  0xed   : > { %v4101_v6 = vshrl.u32 %v4052_v21, 16  ;;  %v11327_v13 = vcombine.low %v3388_v10, %v3391_v27  ;;  %v4104_v43 = vshll.u32 %v4052_v21, 16  ;;  %v4110_v28 = vshll.u32 %v14088_v40, 16 }
  0xee   : > { %12415 = vmatmul.mubr.msk.bf16.gmra.mxu0 %vm690_vm3, %v11279_v24  ;;  %v4114_v2 = vshrl.u32 %v14088_v40, 16  ;;  %v14111_v34 = vsel %vm13369_vm9, %v3396_v58, %v3397_v49  ;;  %v4120_v61 = vshll.u32 %v14094_v60, 16  ;;  %v4125_v56 = vshrl.u32 %v4055_v32, 16  ;;  %v12257_v41 = vpop.f32.mrf.mxu0  ;;  %v14148_v49 = vld [vmem:[#allocation2 + $0x38] sm:$0x1] }
  0xef   : > { %12454 = vmatprep.mubr.msk.bf16.mxu0 %vm690_vm3, %v12919_v8  ;;  %v4103_v36 = vrot.slane %v4101_v6, 4  ;;  %v4106_v63 = vrot.slane %v4104_v43, 5  ;;  %v4112_v29 = vrot.slane %v4110_v28, 5  ;;  %v4128_v7 = vshll.u32 %v4055_v32, 16  ;;  %v4061_v43 = vld [vmem:[#allocation2 + $0x3c] sm:$0xf] }
  0xf0   : > { %v4116_v19 = vrot.slane %v4114_v2, 4  ;;  %v4122_v42 = vrot.slane %v4120_v61, 5  ;;  %v4127_v51 = vrot.slane %v4125_v56, 4  ;;  %v4134_v11 = vshll.u32 %v14106_v3, 16  ;;  %v14120_v39 = vpop.f32.mrf.mxu0  ;;  %v12922_v61 = vld [vmem:[#allocation2 + $0x3c] sm:$0xff]  }
  0xf1   : > { %v4138_v54 = vshrl.u32 %v14106_v3, 16  ;;  %v4107_v45 = vor.u32 %v4106_v63, %v4103_v36  ;;  %v4130_v48 = vrot.slane %v4128_v7, 5  ;;  %v4144_v57 = vshll.u32 %v14114_v53, 16  ;;  %v14167_v36 = vld [vmem:[#allocation2 + $0x40] sm:$0xf] }
  0xf2   : > { %12445 = vmatmul.mubr.msk.bf16.gmra.mxu1 %vm690_vm3, %v11326_v26  ;;  %v4117_v62 = vor.u32 %v4116_v19, %v4112_v29  ;;  %v907_v37 = vadd.f32 %v12253_v4, %v14068_v12  ;;  %v905_v18 = vadd.f32 %v14068_v12, %v780_v16  ;;  %v14125_v31 = vrot.slane %v4134_v11, 5  ;;  %v14130_v38 = vpop.f32.mrf.mxu0  ;;  %v14138_v16 = vld [vmem:[#allocation2 + $0x34] sm:$0xf]  ;;  %v14174_v7 = vld [vmem:[#allocation2 + $0x44] sm:$0x1] }
  0xf3   : > { %12448 = vmatprep.mubr.msk.bf16.mxu1 %vm690_vm3, %v11327_v13  ;;  %v4140_v52 = vrot.slane %v4138_v54, 4  ;;  %v14128_v50 = vadd.f32 %v12256_v14, %v14068_v12  ;;  %v4108_v46 = vrot.slane %v4107_v45, 4  ;;  %v4131_v59 = vor.u32 %v4130_v48, %v4127_v51  ;;  %v12923_v51 = vld [vmem:[#allocation2 + $0x48] sm:$0xff]  }
  0xf4   : > { %v4118_v47 = vrot.slane %v4117_v62, 4  ;;  %v11328_v17 = vcombine.low %v14098_v22, %v14111_v34  ;;  %v12286_v20 = vpop.f32.mrf.mxu1  ;;  %v4146_v44 = vrot.slane %v4144_v57, 5  ;;  %v14136_v30 = vadd.f32 %v14068_v12, %v793_v1  ;;  %v14150_v24 = vpop.f32.mrf.mxu0 }
  0xf5   : > { %v4141_v4 = vor.u32 %v4140_v52, %v14125_v31  ;;  %v4113_v21 = vsel %vm13160_vm6, %v4108_v46, %v4112_v29  ;;  %v14146_v8 = vadd.f32 %v12286_v20, %v14084_v0  ;;  %v4132_v10 = vrot.slane %v4131_v59, 4 }
  0xf6   : > { %12455 = vmatmul.mubr.msk.bf16.vlgmr.msra.gmra.mxu0 %vm690_vm3, %v12920_v23  ;;  %v4123_v55 = vsel %vm13160_vm6, %v4118_v47, %v4122_v42  ;;  %v1506_v14 = vpop.f32.mrf.mxu1  ;;  %v4149_v32 = vshrl.u32 %v4058_v25, 16  ;;  %v4152_v26 = vshll.u32 %v4058_v25, 16  ;;  %v14157_v6 = vadd.f32 %v12257_v41, %v14068_v12  ;;  %v14161_v28 = vpop.f32.mrf.mxu0 }
  0xf7   : > { %12521 = vmatpush3.bf16.msra.mxu0 %v5053_v33  ;;  %12458 = vmatprep.mubr.msk.bf16.mxu0 %vm690_vm3, %v12921_v5  ;;  %v11379_v27 = vcombine.low %v4113_v21, %v4123_v55  ;;  %v4142_v58 = vrot.slane %v4141_v4, 4  ;;  %v14154_v22 = vadd.f32 %v1506_v14, %v14101_v9  ;;  %v4158_v0 = vshll.u32 %v14138_v16, 16 }
  0xf8   : > { %v4162_v13 = vshrl.u32 %v14138_v16, 16  ;;  %v4137_v33 = vsel %vm13160_vm6, %v4132_v10, %v14125_v31  ;;  %v12287_v2 = vpop.f32.mrf.mxu1  ;;  %v4151_v1 = vrot.slane %v4149_v32, 4  ;;  %v4154_v34 = vrot.slane %v4152_v26, 5  ;;  %v14176_v41 = vpop.f32.mrf.mxu0 }
  0xf9   : > { %v4168_v9 = vshll.u32 %v14148_v49, 16  ;;  %v4147_v56 = vsel %vm13160_vm6, %v4142_v58, %v4146_v44  ;;  %v14172_v63 = vadd.f32 %v12287_v2, %v907_v37  ;;  %v4160_v29 = vrot.slane %v4158_v0, 5  ;;  %v14196_v58 = vld [vmem:[#allocation2 + $0x4c] sm:$0xf]  ;;  %v14203_v0 = vld [vmem:[#allocation2 + $0x50] sm:$0x1] }
  0xfa   : > { %12449 = vmatmul.mubr.msk.bf16.gmra.mxu1 %vm690_vm3, %v11328_v17  ;;  %v4164_v19 = vrot.slane %v4162_v13, 4  ;;  %v1509_v42 = vpop.f32.mrf.mxu1  ;;  %v4155_v11 = vor.u32 %v4154_v34, %v4151_v1  ;;  %v4173_v23 = vshrl.u32 %v4061_v43, 16  ;;  %v4176_v45 = vshll.u32 %v4061_v43, 16  ;;  %v14183_v5 = vpop.f32.mrf.mxu0  ;;  %v12924_v34 = vld [vmem:[#allocation2 + $0x54] sm:$0xff]  }
  0xfb   : > { %12488 = vmatprep.mubr.msk.bf16.mxu1 %vm690_vm3, %v11379_v27  ;;  %v4170_v54 = vrot.slane %v4168_v9, 5  ;;  %v14179_v62 = vadd.f32 %v1509_v42, %v905_v18  ;;  %v4182_v57 = vshll.u32 %v14167_v36, 16  ;;  %v4186_v37 = vshrl.u32 %v14167_v36, 16  ;;  %v4064_v18 = vld [vmem:[#allocation2 + $0x48] sm:$0xf] }
  0xfc   : > { %v4165_v48 = vor.u32 %v4164_v19, %v4160_v29  ;;  %v4156_v31 = vrot.slane %v4155_v11, 4  ;;  %v4175_v52 = vrot.slane %v4173_v23, 4  ;;  %v4178_v46 = vrot.slane %v4176_v45, 5  ;;  %v14187_v4 = vpop.f32.mrf.mxu0 }
  0xfd   : > { %v4192_v47 = vshll.u32 %v14174_v7, 16  ;;  %v11380_v59 = vcombine.low %v4137_v33, %v4147_v56  ;;  %v4184_v17 = vrot.slane %v4182_v57, 5  ;;  %v4188_v20 = vrot.slane %v4186_v37, 4 }
  0xfe   : > { %12459 = vmatmul.mubr.msk.bf16.gmra.mxu0 %vm690_vm3, %v12922_v61  ;;  %v4166_v25 = vrot.slane %v4165_v48, 4  ;;  %v909_v44 = vadd.f32 %v14068_v12, %v14120_v39  ;;  %v914_v21 = vadd.f32 %v14130_v38, %v14068_v12  ;;  %v4161_v55 = vsel %vm13160_vm6, %v4156_v31, %v4160_v29  ;;  %v12290_v10 = vpop.f32.mrf.mxu1  ;;  %v14205_v13 = vpop.f32.mrf.mxu0  ;;  %v4067_v29 = vld [vmem:[#allocation2 + $0x54] sm:$0xf]  ;;  %v14228_v31 = vld [vmem:[#allocation2 + $0x5c] sm:$0x1] }
  0xff   : > { %12462 = vmatprep.mubr.msk.bf16.mxu0 %vm690_vm3, %v12923_v51  ;;  %v4179_v27 = vor.u32 %v4178_v46, %v4175_v52  ;;  %v14201_v32 = vadd.f32 %v12290_v10, %v14128_v50  ;;  %v4189_v26 = vor.u32 %v4188_v20, %v4184_v17  ;;  %v4194_v39 = vrot.slane %v4192_v47, 5  ;;  %v12925_v51 = vld [vmem:[#allocation2 + $0x60] sm:$0xff]  }
 0x100   : > { %v4171_v14 = vsel %vm13160_vm6, %v4166_v25, %v4170_v54  ;;  %v912_v33 = vadd.f32 %v14068_v12, %v14150_v24  ;;  %v1522_v2 = vpop.f32.mrf.mxu1  ;;  %v4197_v1 = vshrl.u32 %v4064_v18, 16  ;;  %v4200_v61 = vshll.u32 %v4064_v18, 16  ;;  %v14214_v19 = vpop.f32.mrf.mxu0 }
 0x101   : > { %v11381_v38 = vcombine.low %v4161_v55, %v4171_v14  ;;  %v4180_v43 = vrot.slane %v4179_v27, 4  ;;  %v4190_v9 = vrot.slane %v4189_v26, 4  ;;  %v14211_v50 = vadd.f32 %v1522_v2, %v14136_v30  ;;  %v14221_v30 = vld [vmem:[#allocation2 + $0x58] sm:$0xf] }
 0x102   : > { %12489 = vmatmul.mubr.msk.bf16.vlgmr.msra.gmra.mxu1 %vm690_vm3, %v11380_v59  ;;  %v4206_v56 = vshll.u32 %v14196_v58, 16  ;;  %v12291_v42 = vpop.f32.mrf.mxu1  ;;  %v4199_v11 = vrot.slane %v4197_v1, 4  ;;  %v4210_v54 = vshrl.u32 %v14196_v58, 16  ;;  %v4216_v23 = vshll.u32 %v14203_v0, 16  ;;  %v14230_v52 = vpop.f32.mrf.mxu0 }
 0x103   : > { %12492 = vmatprep.mubr.msk.bf16.mxu1 %vm690_vm3, %v11381_v38  ;;  %v4185_v24 = vsel %vm13160_vm6, %v4180_v43, %v4184_v17  ;;  %v4195_v45 = vsel %vm13160_vm6, %v4190_v9, %v4194_v39  ;;  %v14226_v48 = vadd.f32 %v12291_v42, %v14157_v6  ;;  %v4202_v57 = vrot.slane %v4200_v61, 5 }
 0x104   : > { %v4208_v37 = vrot.slane %v4206_v56, 5  ;;  %v11382_v46 = vcombine.low %v4185_v24, %v4195_v45  ;;  %v1525_v47 = vpop.f32.mrf.mxu1  ;;  %v4212_v59 = vrot.slane %v4210_v54, 4  ;;  %v4218_v25 = vrot.slane %v4216_v23, 5  ;;  %v14236_v10 = vpop.f32.mrf.mxu0  ;;  %v4070_v24 = vld [vmem:[#allocation2 + $0x60] sm:$0xf] }
 0x105   : > { %v4221_v17 = vshrl.u32 %v4067_v29, 16  ;;  %v14233_v20 = vadd.f32 %v1525_v47, %v909_v44  ;;  %v4203_v18 = vor.u32 %v4202_v57, %v4199_v11  ;;  %v4224_v55 = vshll.u32 %v4067_v29, 16  ;;  %v12927_v47 = vld [vmem:[#allocation2 + $0x78] sm:$0xff]  }
 0x106   : > { %12463 = vmatmul.mubr.msk.bf16.gmra.mxu0 %vm690_vm3, %v12924_v34  ;;  %v4230_v6 = vshll.u32 %v14221_v30, 16  ;;  %v4213_v27 = vor.u32 %v4212_v59, %v4208_v37  ;;  %v12294_v14 = vpop.f32.mrf.mxu1  ;;  %v4234_v39 = vshrl.u32 %v14221_v30, 16  ;;  %v4240_v38 = vshll.u32 %v14228_v31, 16  ;;  %v14256_v23 = vpop.f32.mrf.mxu0  ;;  %v14262_v59 = vld [vmem:[#allocation2 + $0x68] sm:$0x1] }
 0x107   : > { %12466 = vmatprep.mubr.msk.bf16.mxu0 %vm690_vm3, %v12925_v51  ;;  %v4223_v26 = vrot.slane %v4221_v17, 4  ;;  %v4204_v43 = vrot.slane %v4203_v18, 4  ;;  %v14241_v2 = vadd.f32 %v12294_v14, %v914_v21  ;;  %v4226_v44 = vrot.slane %v4224_v55, 5  ;;  %v12926_v51 = vld [vmem:[#allocation2 + $0x6c] sm:$0xff]  }
 0x108   : > { %v4232_v1 = vrot.slane %v4230_v6, 5  ;;  %v915_v34 = vadd.f32 %v14161_v28, %v14068_v12  ;;  %v913_v9 = vadd.f32 %v14068_v12, %v14176_v41  ;;  %v4214_v61 = vrot.slane %v4213_v27, 4  ;;  %v1538_v29 = vpop.f32.mrf.mxu1  ;;  %v14254_v28 = vld [vmem:[#allocation2 + $0x64] sm:$0xf] }
 0x109   : > { %v4236_v56 = vrot.slane %v4234_v39, 4  ;;  %v918_v42 = vadd.f32 %v14183_v5, %v14068_v12  ;;  %v4209_v21 = vsel %vm13160_vm6, %v4204_v43, %v4208_v37  ;;  %v4227_v11 = vor.u32 %v4226_v44, %v4223_v26  ;;  %v4073_v26 = vld [vmem:[#allocation2 + $0x6c] sm:$0xf]  ;;  %v14275_v44 = vld [vmem:[#allocation2 + $0x70] sm:$0xf] }
 0x10a   : > { %12493 = vmatmul.mubr.msk.bf16.gmra.mxu1 %vm690_vm3, %v11382_v46  ;;  %v14252_v54 = vadd.f32 %v1538_v29, %v912_v33  ;;  %v4219_v41 = vsel %vm13160_vm6, %v4214_v61, %v4218_v25  ;;  %v4242_v57 = vrot.slane %v4240_v38, 5  ;;  %v916_v46 = vadd.f32 %v14068_v12, %v14187_v4  ;;  %v12295_v5 = vpop.f32.mrf.mxu1 }
 0x10b   : > { %v4237_v45 = vor.u32 %v4236_v56, %v4232_v1  ;;  %v11383_v37 = vcombine.low %v4209_v21, %v4219_v41  ;;  %v4228_v17 = vrot.slane %v4227_v11, 4  ;;  %v14264_v33 = vadd.f32 %v12295_v5, %v915_v34  ;;  %v14277_v34 = vpop.f32.mrf.mxu0  ;;  %v14282_v21 = vld [vmem:[#allocation2 + $0x74] sm:$0x1] }
 0x10c   : > { %v4245_v18 = vshrl.u32 %v4070_v24, 16  ;;  %v1541_v6 = vpop.f32.mrf.mxu1  ;;  %v4248_v27 = vshll.u32 %v4070_v24, 16  ;;  %v4254_v14 = vshll.u32 %v14254_v28, 16  ;;  %v4258_v25 = vshrl.u32 %v14254_v28, 16  ;;  %18302 = vst [vmem:[#allocation5_spill] sm:$0xff] %v14277_v34  ;;  %18303 = vst [vmem:[#allocation6_spill] sm:$0xff] %v14282_v21 }
 0x10d   : > { %v4238_v55 = vrot.slane %v4237_v45, 4  ;;  %12496 = vmatprep.mubr.msk.bf16.mxu1 %vm690_vm3, %v11383_v37  ;;  %v4233_v4 = vsel %vm13160_vm6, %v4228_v17, %v4232_v1  ;;  %v14272_v39 = vadd.f32 %v1541_v6, %v913_v9  ;;  %v4264_v43 = vshll.u32 %v14262_v59, 16  ;;  %v14310_v34 = vld [vmem:[#allocation2 + $0x80] sm:$0x1] }
 0x10e   : > { %12467 = vmatmul.mubr.msk.bf16.gmra.mxu0 %vm690_vm3, %v12926_v51  ;;  %v4247_v38 = vrot.slane %v4245_v18, 4  ;;  %v4250_v56 = vrot.slane %v4248_v27, 5  ;;  %v4256_v29 = vrot.slane %v4254_v14, 5  ;;  %v4260_v24 = vrot.slane %v4258_v25, 4  ;;  %v12298_v51 = vpop.f32.mrf.mxu1  ;;  %18307 = vst [vmem:[#allocation10_spill] sm:$0xff] %v14310_v34 }
 0x10f   : > { %v4243_v61 = vsel %vm13160_vm6, %v4238_v55, %v4242_v57  ;;  %12470 = vmatprep.mubr.msk.bf16.mxu0 %vm690_vm3, %v12927_v47  ;;  %v4266_v9 = vrot.slane %v4264_v43, 5  ;;  %v14284_v11 = vadd.f32 %v12298_v51, %v918_v42  ;;  %v4269_v41 = vshrl.u32 %v4073_v26, 16  ;;  %v12928_v47 = vld [vmem:[#allocation2 + $0x84] sm:$0xff]   ;;  %v12929_v43 = vld [vmem:[#allocation2 + $0x90] sm:$0xff]   ;;  %v4076_v51 = vld [vmem:[#allocation2 + $0x78] sm:$0xf] }
 0x110   : > { %v11384_v1 = vcombine.low %v4233_v4, %v4243_v61  ;;  %v4251_v45 = vor.u32 %v4250_v56, %v4247_v38  ;;  %v4261_v5 = vor.u32 %v4260_v24, %v4256_v29  ;;  %v4272_v37 = vshll.u32 %v4073_v26, 16  ;;  %v1554_v18 = vpop.f32.mrf.mxu1  ;;  %v14292_v42 = vpop.f32.mrf.mxu0 }
 0x111   : > { %v4278_v17 = vshll.u32 %v14275_v44, 16  ;;  %v919_v57 = vadd.f32 %v14205_v13, %v14068_v12  ;;  %v4271_v55 = vrot.slane %v4269_v41, 4  ;;  %v4282_v6 = vshrl.u32 %v14275_v44, 16 }
 0x112   : > { %12497 = vmatmul.mubr.msk.bf16.gmra.mxu1 %vm690_vm3, %v11384_v1  ;;  %v4288_v27 = vshll.u32 %v14282_v21, 16  ;;  %v4252_v14 = vrot.slane %v4251_v45, 4  ;;  %v4262_v25 = vrot.slane %v4261_v5, 4  ;;  %v4274_v4 = vrot.slane %v4272_v37, 5  ;;  %v12299_v38 = vpop.f32.mrf.mxu1  ;;  %v14300_v1 = vpop.f32.mrf.mxu0 }
 0x113   : > { %v4280_v26 = vrot.slane %v4278_v17, 5  ;;  %v917_v61 = vadd.f32 %v14068_v12, %v14214_v19  ;;  %v922_v13 = vadd.f32 %v14230_v52, %v14068_v12  ;;  %v4284_v56 = vrot.slane %v4282_v6, 4  ;;  %v14308_v19 = vld [vmem:[#allocation2 + $0x7c] sm:$0xf] }
 0x114   : > { %v14298_v24 = vadd.f32 %v1554_v18, %v916_v46  ;;  %v4257_v41 = vsel %vm13160_vm6, %v4252_v14, %v4256_v29  ;;  %v4267_v45 = vsel %vm13160_vm6, %v4262_v25, %v4266_v9  ;;  %v4275_v5 = vor.u32 %v4274_v4, %v4271_v55  ;;  %v1557_v17 = vpop.f32.mrf.mxu1  ;;  %18306 = vst [vmem:[#allocation9_spill] sm:$0xff] %v14308_v19  ;;  %v14315_v29 = vpop.f32.mrf.mxu0 }
 0x115   : > { %v14306_v37 = vadd.f32 %v12299_v38, %v919_v57  ;;  %v11385_v52 = vcombine.low %v4257_v41, %v4267_v45  ;;  %v4285_v46 = vor.u32 %v4284_v56, %v4280_v26  ;;  %v4290_v18 = vrot.slane %v4288_v27, 5  ;;  %v14328_v41 = vld [vmem:[#allocation2 + $0x88] sm:$0xf]  ;;  %v12930_v45 = vld [vmem:[#allocation2 + $0x9c] sm:$0xff]  }
 0x116   : > { %18304 = vst [vmem:[#allocation7_spill] sm:$0xff] %v14298_v24  ;;  %12471 = vmatmul.mubr.msk.bf16.gmra.mxu0 %vm690_vm3, %v12928_v47  ;;  %v14313_v6 = vadd.f32 %v1557_v17, %v917_v61  ;;  %v4079_v24 = vld [vmem:[#allocation2 + $0x84] sm:$0xf]  ;;  %v4276_v14 = vrot.slane %v4275_v5, 4  ;;  %v920_v9 = vadd.f32 %v14068_v12, %v14236_v10  ;;  %v4293_v57 = vshrl.u32 %v4076_v51, 16  ;;  %v14324_v38 = vpop.f32.mrf.mxu0  ;;  %18310 = vst [vmem:[#allocation13_spill] sm:$0xff] %v14328_v41 }
 0x117   : > { %18305 = vst [vmem:[#allocation8_spill] sm:$0xff] %v14306_v37  ;;  %12474 = vmatprep.mubr.msk.bf16.mxu0 %vm690_vm3, %v12929_v43  ;;  %v4296_v55 = vshll.u32 %v4076_v51, 16  ;;  %12500 = vmatprep.mubr.msk.bf16.mxu1 %vm690_vm3, %v11385_v52  ;;  %v4286_v25 = vrot.slane %v4285_v46, 4  ;;  %v4302_v47 = vshll.u32 %v14308_v19, 16  ;;  %v4306_v27 = vshrl.u32 %v14308_v19, 16  ;;  %18309 = vst [vmem:[#allocation12_spill] sm:$0xff] %v14324_v38 }
 0x118   : > { %18308 = vst [vmem:[#allocation11_spill] sm:$0xff] %v14313_v6  ;;  %v4312_v4 = vshll.u32 %v14310_v34, 16  ;;  %v4281_v61 = vsel %vm13160_vm6, %v4276_v14, %v4280_v26  ;;  %v4295_v56 = vrot.slane %v4293_v57, 4  ;;  %v4317_v43 = vshrl.u32 %v4079_v24, 16  ;;  %v14332_v46 = vld [vmem:[#allocation2 + $0x8c] sm:$0x1] }
 0x119   : > { %v4298_v10 = vrot.slane %v4296_v55, 5  ;;  %v4291_v51 = vsel %vm13160_vm6, %v4286_v25, %v4290_v18  ;;  %v4304_v5 = vrot.slane %v4302_v47, 5  ;;  %v4308_v17 = vrot.slane %v4306_v27, 4  ;;  %18311 = vst [vmem:[#allocation14_spill] sm:$0xff] %v14332_v46  ;;  %v12931_v26 = vld [vmem:[#allocation2 + $0xa8] sm:$0xff]   ;;  %v14334_v14 = vpop.f32.mrf.mxu0 }
 0x11a   : > { %v4314_v52 = vrot.slane %v4312_v4, 5  ;;  %v11386_v34 = vcombine.low %v4281_v61, %v4291_v51  ;;  %v12302_v38 = vpop.f32.mrf.mxu1  ;;  %v4319_v6 = vrot.slane %v4317_v43, 4  ;;  %v4320_v37 = vshll.u32 %v4079_v24, 16  ;;  %v4082_v43 = vld [vmem:[#allocation2 + $0x90] sm:$0xf] }
 0x11b   : > { %v4299_v19 = vor.u32 %v4298_v10, %v4295_v56  ;;  %v4309_v57 = vor.u32 %v4308_v17, %v4304_v5  ;;  %v14336_v55 = vadd.f32 %v12302_v38, %v922_v13  ;;  %v4326_v21 = vshll.u32 %v14328_v41, 16  ;;  %v14344_v61 = vpop.f32.mrf.mxu0 }
 0x11c   : > { %v4330_v18 = vshrl.u32 %v14328_v41, 16  ;;  %12501 = vmatmul.mubr.msk.bf16.gmra.mxu1 %vm690_vm3, %v11386_v34  ;;  %v923_v25 = vadd.f32 %v14256_v23, %v14068_v12  ;;  %v4322_v27 = vrot.slane %v4320_v37, 5  ;;  %v4336_v4 = vshll.u32 %v14332_v46, 16  ;;  %v1570_v24 = vpop.f32.mrf.mxu1  ;;  %v14352_v37 = vld [vmem:[#allocation2 + $0x94] sm:$0xf] }
 0x11d   : > { %v4300_v47 = vrot.slane %v4299_v19, 4  ;;  %v4310_v13 = vrot.slane %v4309_v57, 4  ;;  %v4328_v38 = vrot.slane %v4326_v21, 5  ;;  %v14347_v10 = vadd.f32 %v1570_v24, %v920_v9  ;;  %18313 = vst [vmem:[#allocation16_spill] sm:$0xff] %v14352_v37  ;;  %v14354_v19 = vpop.f32.mrf.mxu0  ;;  %v14360_v9 = vld [vmem:[#allocation2 + $0x98] sm:$0x1] }
 0x11e   : > { %12475 = vmatmul.mubr.msk.bf16.gmra.mxu0 %vm690_vm3, %v12930_v45  ;;  %v4332_v56 = vrot.slane %v4330_v18, 4  ;;  %v4323_v51 = vor.u32 %v4322_v27, %v4319_v6  ;;  %v12303_v23 = vpop.f32.mrf.mxu1  ;;  %v4338_v21 = vrot.slane %v4336_v4, 5  ;;  %18315 = vst [vmem:[#allocation18_spill] sm:$0xff] %v14360_v9  ;;  %v4085_v27 = vld [vmem:[#allocation2 + $0x9c] sm:$0xf]  ;;  %v924_v46 = vadd.f32 %v14068_v12, %v14300_v1 }
 0x11f   : > { %18312 = vst [vmem:[#allocation15_spill] sm:$0xff] %v14347_v10  ;;  %v4305_v34 = vsel %vm13160_vm6, %v4300_v47, %v4304_v5  ;;  %12478 = vmatprep.mubr.msk.bf16.mxu0 %vm690_vm3, %v12931_v26  ;;  %v4315_v45 = vsel %vm13160_vm6, %v4310_v13, %v4314_v52  ;;  %v14358_v57 = vadd.f32 %v12303_v23, %v923_v25  ;;  %v4341_v26 = vshrl.u32 %v4082_v43, 16  ;;  %v12932_v52 = vld [vmem:[#allocation2 + $0xb4] sm:$0xff]   ;;  %v14369_v4 = vpop.f32.mrf.mxu0  ;;  %v14376_v23 = vld [vmem:[#allocation2 + $0xa0] sm:$0xf] }
 0x120   : > { %v4333_v17 = vor.u32 %v4332_v56, %v4328_v38  ;;  %v926_v5 = vadd.f32 %v14292_v42, %v14068_v12  ;;  %v11387_v6 = vcombine.low %v4305_v34, %v4315_v45  ;;  %v4324_v18 = vrot.slane %v4323_v51, 4  ;;  %v14364_v47 = vpop.f32.mrf.mxu1  ;;  %18317 = vst [vmem:[#allocation20_spill] sm:$0xff] %v14369_v4  ;;  %18318 = vst [vmem:[#allocation21_spill] sm:$0xff] %v14376_v23  ;;  %v12933_v45 = vld [vmem:[#allocation2 + $0xc0] sm:$0xff]  }
 0x121   : > { %18314 = vst [vmem:[#allocation17_spill] sm:$0xff] %v14358_v57  ;;  %18316 = vst [vmem:[#allocation19_spill] sm:$0xff] %v14364_v47  ;;  %v4344_v13 = vshll.u32 %v4082_v43, 16  ;;  %v4350_v25 = vshll.u32 %v14352_v37, 16  ;;  %v4343_v56 = vrot.slane %v4341_v26, 4  ;;  %v4354_v34 = vshrl.u32 %v14352_v37, 16 }
 0x122   : > { %v4334_v24 = vrot.slane %v4333_v17, 4  ;;  %12504 = vmatprep.mubr.msk.bf16.mxu1 %vm690_vm3, %v11387_v6  ;;  %v4329_v42 = vsel %vm13160_vm6, %v4324_v18, %v4328_v38  ;;  %v4360_v51 = vshll.u32 %v14360_v9, 16  ;;  %v14380_v4 = vld [vmem:[#allocation2 + $0xa4] sm:$0x1]  ;;  %v4365_v6 = vshrl.u32 %v4085_v27, 16 }
 0x123   : > { %v4346_v43 = vrot.slane %v4344_v13, 5  ;;  %v4352_v17 = vrot.slane %v4350_v25, 5  ;;  %18319 = vst [vmem:[#allocation22_spill] sm:$0xff] %v14380_v4  ;;  %v927_v38 = vadd.f32 %v14315_v29, %v14068_v12  ;;  %v4356_v18 = vrot.slane %v4354_v34, 4 }
 0x124   : > { %v4339_v1 = vsel %vm13160_vm6, %v4334_v24, %v4338_v21  ;;  %v12306_v47 = vpop.f32.mrf.mxu1  ;;  %v4367_v37 = vrot.slane %v4365_v6, 4  ;;  %v4368_v10 = vshll.u32 %v4085_v27, 16  ;;  %v4374_v21 = vshll.u32 %v14376_v23, 16 }
 0x125   : > { %v11388_v57 = vcombine.low %v4329_v42, %v4339_v1  ;;  %v14384_v26 = vadd.f32 %v12306_v47, %v926_v5  ;;  %v4347_v9 = vor.u32 %v4346_v43, %v4343_v56  ;;  %v14388_v13 = vpop.f32.mrf.mxu0  ;;  %v4357_v25 = vor.u32 %v4356_v18, %v4352_v17  ;;  %v277_v18 = vld [vmem:[%s13065_s6 + $0x198] sm:$0xff] }
 0x126   : > { %12479 = vmatmul.mubr.msk.bf16.gmra.mxu0 %vm690_vm3, %v12932_v52  ;;  %v1586_v24 = vpop.f32.mrf.mxu1  ;;  %v4362_v42 = vrot.slane %v4360_v51, 5  ;;  %v4378_v29 = vshrl.u32 %v14376_v23, 16  ;;  %v4384_v5 = vshll.u32 %v14380_v4, 16  ;;  %v4370_v52 = vrot.slane %v4368_v10, 5  ;;  %v278_v51 = vld [vmem:[%s13065_s6 + $0x1a0] sm:$0xff] }
 0x127   : > { %18320 = vst [vmem:[#allocation23_spill] sm:$0xff] %v14384_v26  ;;  %12505 = vmatmul.mubr.msk.bf16.gmra.mxu1 %vm690_vm3, %v11388_v57  ;;  %12482 = vmatprep.mubr.msk.bf16.mxu0 %vm690_vm3, %v12933_v45  ;;  %v4348_v47 = vrot.slane %v4347_v9, 4  ;;  %v4376_v27 = vrot.slane %v4374_v21, 5  ;;  %v14394_v56 = vadd.f32 %v1586_v24, %v924_v46  ;;  %v14396_v1 = vpop.f32.mrf.mxu0  ;;  %v4358_v57 = vrot.slane %v4357_v25, 4  ;;  %v4088_v46 = vld [vmem:[#allocation2 + $0xa8] sm:$0xf] }
 0x128   : > { %v12307_v34 = vpop.f32.mrf.mxu1  ;;  %v4380_v6 = vrot.slane %v4378_v29, 4  ;;  %v930_v23 = vadd.f32 %v14334_v14, %v14068_v12  ;;  %v4371_v9 = vor.u32 %v4370_v52, %v4367_v37  ;;  %v14407_v21 = vld [vmem:[#allocation2 + $0xac] sm:$0xf]  ;;  %v4386_v43 = vrot.slane %v4384_v5, 5  ;;  %v14415_v14 = vld [vmem:[#allocation2 + $0xb0] sm:$0x1] }
 0x129   : > { %18321 = vst [vmem:[#allocation24_spill] sm:$0xff] %v14394_v56  ;;  %v4353_v45 = vsel %vm13160_vm6, %v4348_v47, %v4352_v17  ;;  %v14405_v10 = vadd.f32 %v12307_v34, %v927_v38  ;;  %18323 = vst [vmem:[#allocation26_spill] sm:$0xff] %v14407_v21  ;;  %v14409_v24 = vpop.f32.mrf.mxu0  ;;  %v4363_v25 = vsel %vm13160_vm6, %v4358_v57, %v4362_v42  ;;  %v4091_v56 = vld [vmem:[#allocation2 + $0xb4] sm:$0xf]  ;;  %v4389_v26 = vshrl.u32 %v4088_v46, 16 }
 0x12a   : > { %v4381_v29 = vor.u32 %v4380_v6, %v4376_v27  ;;  %v928_v4 = vadd.f32 %v14068_v12, %v14344_v61  ;;  %18324 = vst [vmem:[#allocation27_spill] sm:$0xff] %v14415_v14  ;;  %v11389_v17 = vcombine.low %v4353_v45, %v4363_v25  ;;  %v4372_v37 = vrot.slane %v4371_v9, 4  ;;  %v14417_v38 = vpop.f32.mrf.mxu1  ;;  %v14429_v6 = vld [vmem:[#allocation2 + $0xb8] sm:$0xf]  ;;  %v14433_v25 = vld [vmem:[#allocation2 + $0xbc] sm:$0x1] }
 0x12b   : > { %18322 = vst [vmem:[#allocation25_spill] sm:$0xff] %v14405_v10  ;;  %18325 = vst [vmem:[#allocation28_spill] sm:$0xff] %v14417_v38  ;;  %v11939_v47 = vpack.c.bf16 %v277_v18, %v277_v18  ;;  %v11940_v52 = vpack.c.bf16 %v278_v51, %v278_v51  ;;  %v14419_v34 = vpop.f32.mrf.mxu0  ;;  %v4392_v41 = vshll.u32 %v4088_v46, 16  ;;  %v4398_v42 = vshll.u32 %v14407_v21, 16 }
 0x12c   : > { %18326 = vst [vmem:[#allocation29_spill] sm:$0xff] %v14419_v34  ;;  %v4382_v10 = vrot.slane %v4381_v29, 4  ;;  %12508 = vmatprep.mubr.msk.bf16.mxu1 %vm690_vm3, %v11389_v17  ;;  %v4377_v61 = vsel %vm13160_vm6, %v4372_v37, %v4376_v27  ;;  %v4402_v5 = vshrl.u32 %v14407_v21, 16  ;;  %v4408_v57 = vshll.u32 %v14415_v14, 16  ;;  %18327 = vst [vmem:[#allocation30_spill] sm:$0xff] %v14429_v6 }
 0x12d   : > { %567 = vst.msk [vmem:[#allocation2 + $0xcc] sm:$0xf] %vm514_vm1, %v11939_v47  ;;  %568 = vst.msk [vmem:[#allocation2 + $0xd0] sm:$0xf] %vm514_vm1, %v11940_v52  ;;  %v4413_v18 = vshrl.u32 %v4091_v56, 16  ;;  %v4391_v45 = vrot.slane %v4389_v26, 4  ;;  %v931_v17 = vadd.f32 %v14354_v19, %v14068_v12 }
 0x12e   : > { %v4387_v51 = vsel %vm13160_vm6, %v4382_v10, %v4386_v43  ;;  %v4394_v9 = vrot.slane %v4392_v41, 5  ;;  %v4400_v46 = vrot.slane %v4398_v42, 5  ;;  %18328 = vst [vmem:[#allocation31_spill] sm:$0xff] %v14433_v25  ;;  %v4404_v37 = vrot.slane %v4402_v5, 4 }
 0x12f   : > { %v11390_v29 = vcombine.low %v4377_v61, %v4387_v51  ;;  %v4415_v52 = vrot.slane %v4413_v18, 4  ;;  %v4416_v14 = vshll.u32 %v4091_v56, 16  ;;  %v4422_v21 = vshll.u32 %v14429_v6, 16 }
 0x130   : > { %v12320_v27 = vpop.f32.mrf.mxu0  ;;  %v12310_v47 = vpop.f32.mrf.mxu1  ;;  %v4395_v38 = vor.u32 %v4394_v9, %v4391_v45  ;;  %v4405_v41 = vor.u32 %v4404_v37, %v4400_v46  ;;  %v4410_v26 = vrot.slane %v4408_v57, 5  ;;  %v4426_v10 = vshrl.u32 %v14429_v6, 16  ;;  %v14464_v6 = vld [vmem:[#allocation2 + $0xc4] sm:$0xf] }
 0x131   : > { %v14437_v34 = vadd.f32 %v12310_v47, %v930_v23  ;;  %12509 = vmatmul.mubr.msk.bf16.gmra.mxu1 %vm690_vm3, %v11390_v29  ;;  %v4432_v42 = vshll.u32 %v14433_v25, 16  ;;  %v4418_v5 = vrot.slane %v4416_v14, 5  ;;  %v4424_v18 = vrot.slane %v4422_v21, 5  ;;  %v4778_v23 = vld [vmem:[#allocation2 + $0x18] sm:$0xe] }
 0x132   : > { %v14440_v43 = vpop.f32.mrf.mxu0  ;;  %v1602_v19 = vpop.f32.mrf.mxu1  ;;  %v4396_v61 = vrot.slane %v4395_v38, 4  ;;  %v934_v45 = vadd.f32 %v14388_v13, %v14068_v12  ;;  %v4406_v9 = vrot.slane %v4405_v41, 4  ;;  %v4428_v29 = vrot.slane %v4426_v10, 4 }
 0x133   : > { %v14445_v51 = vadd.f32 %v1602_v19, %v928_v4  ;;  %v14453_v57 = vadd.f32 %v14068_v12, %v14396_v1  ;;  %v4419_v21 = vor.u32 %v4418_v5, %v4415_v52  ;;  %v4434_v4 = vrot.slane %v4432_v42, 5  ;;  %v4094_v1 = vld [vmem:[#allocation2 + $0xc0] sm:$0xf]  ;;  %v14474_v42 = vld [vmem:[#allocation2 + $0xc8] sm:$0x1] }
 0x134   : > { %v14447_v56 = vpop.f32.mrf.mxu0  ;;  %v12311_v37 = vpop.f32.mrf.mxu1  ;;  %v12934_v47 = vld [vmem:[#allocation2 + $0xcc] sm:$0xff]   ;;  %v4401_v14 = vsel %vm13160_vm6, %v4396_v61, %v4400_v46  ;;  %v4411_v19 = vsel %vm13160_vm6, %v4406_v9, %v4410_v26  ;;  %v4429_v25 = vor.u32 %v4428_v29, %v4424_v18  ;;  %v11411_v41 = vrot.slane %v4778_v23, 9  ;;  %18332 = vst [vmem:[#allocation35_spill] sm:$0xff] %v14474_v42  ;;  %v4779_v29 = vld [vmem:[#allocation2 + $0x24] sm:$0xe] }
 0x135   : > { %18329 = vst [vmem:[#allocation32_spill] sm:$0xff] %v14445_v51  ;;  %v14457_v38 = vadd.f32 %v12311_v37, %v931_v17  ;;  %v4844_v10 = vrot.slane %v14088_v40, 5  ;;  %12483 = vmatmul.mubr.msk.bf16.gmra.mxu0 %vm690_vm3, %v12934_v47  ;;  %v11391_v46 = vcombine.low %v4401_v14, %v4411_v19  ;;  %v4420_v52 = vrot.slane %v4419_v21, 4  ;;  %v279_v14 = vld [vmem:[%s13065_s6 + $0x1a8] sm:$0x3] }
 0x136   : > { %v14461_v13 = vpop.f32.mrf.mxu1  ;;  %v14466_v51 = vpop.f32.mrf.mxu0  ;;  %v14471_v17 = vadd.f32 %v14409_v24, %v14068_v12  ;;  %v4847_v26 = vrot.slane %v14094_v60, 5  ;;  %v4430_v61 = vrot.slane %v4429_v25, 4  ;;  %v14479_v23 = vadd.f32 %v12320_v27, %v14146_v8 }
 0x137   : > { %18330 = vst [vmem:[#allocation33_spill] sm:$0xff] %v14457_v38  ;;  %18331 = vst [vmem:[#allocation34_spill] sm:$0xff] %v14461_v13  ;;  %v4845_v40 = vsel %vm13369_vm9, %v11411_v41, %v4844_v10  ;;  %v4846_v5 = vrot.slane %v4844_v10, 4  ;;  %12512 = vmatprep.mubr.msk.bf16.mxu1 %vm690_vm3, %v11391_v46  ;;  %v4425_v9 = vsel %vm13160_vm6, %v4420_v52, %v4424_v18  ;;  %v4437_v12 = vshrl.u32 %v4094_v1, 16  ;;  %v14492_v46 = vld [vmem:[#allocation2 + $0xd0] sm:$0xf] }
 0x138   : > { %v4440_v24 = vshll.u32 %v4094_v1, 16  ;;  %v4446_v60 = vshll.u32 %v14464_v6, 16  ;;  %v4435_v25 = vsel %vm13160_vm6, %v4430_v61, %v4434_v4  ;;  %v4450_v47 = vshrl.u32 %v14464_v6, 16  ;;  %v4097_v1 = vld [vmem:[#allocation2 + $0xcc] sm:$0xf] }
 0x139   : > { %v4848_v37 = vsel %vm13369_vm9, %v4846_v5, %v4847_v26  ;;  %v4456_v8 = vshll.u32 %v14474_v42, 16  ;;  %v11392_v19 = vcombine.low %v4425_v9, %v4435_v25  ;;  %v4439_v41 = vrot.slane %v4437_v12, 4 }
 0x13a   : > { %v12314_v27 = vpop.f32.mrf.mxu1  ;;  %v11428_v18 = vcombine.low %v4845_v40, %v4848_v37  ;;  %v4442_v10 = vrot.slane %v4440_v24, 5  ;;  %v4448_v52 = vrot.slane %v4446_v60, 5  ;;  %v4452_v13 = vrot.slane %v4450_v47, 4 }
 0x13b   : > { %v12324_v21 = vpop.f32.mrf.mxu0  ;;  %v4458_v4 = vrot.slane %v4456_v8, 5  ;;  %v11412_v61 = vrot.slane %v4779_v29, 9  ;;  %12513 = vmatmul.mubr.msk.bf16.gmra.mxu1 %vm690_vm3, %v11392_v19  ;;  %v4851_v9 = vrot.slane %v14106_v3, 5  ;;  %v14499_v40 = vadd.f32 %v12314_v27, %v934_v45 }
 0x13c   : > { %v1618_v38 = vpop.f32.mrf.mxu1  ;;  %12522 = vmatprep.mubr.msk.bf16.mxu0 %vm690_vm3, %v11428_v18  ;;  %v4443_v5 = vor.u32 %v4442_v10, %v4439_v41  ;;  %v11941_v12 = vpack.c.bf16 %v279_v14, %v279_v14  ;;  %v4453_v24 = vor.u32 %v4452_v13, %v4448_v52  ;;  %v4461_v25 = vshrl.u32 %v4097_v1, 16 }
 0x13d   : > { %v14494_v26 = vpop.f32.mrf.mxu0  ;;  %v4464_v37 = vshll.u32 %v4097_v1, 16  ;;  %v4470_v60 = vshll.u32 %v14492_v46, 16  ;;  %v4852_v42 = vsel %vm13369_vm9, %v11412_v61, %v4851_v9  ;;  %v4853_v19 = vrot.slane %v4851_v9, 4 }
 0x13e   : > { %v12315_v47 = vpop.f32.mrf.mxu1  ;;  %v4444_v8 = vrot.slane %v4443_v5, 4  ;;  %569 = vst.msk [vmem:[#allocation2 + $0xd4] sm:$0x1] %vm517_vm2, %v11941_v12  ;;  %v4474_v18 = vshrl.u32 %v14492_v46, 16  ;;  %v4454_v3 = vrot.slane %v4453_v24, 4  ;;  %v4463_v45 = vrot.slane %v4461_v25, 4 }
 0x13f   : > { %v12325_v29 = vpop.f32.mrf.mxu0  ;;  %v4466_v27 = vrot.slane %v4464_v37, 5  ;;  %v14506_v14 = vrot.slane %v4470_v60, 5  ;;  %v18334_v1 = vrot.slane %v14114_v53, 5  ;;  %v2106_v9 = vadd.f32 %v14440_v43, %v14154_v22  ;;  %v4780_v12 = vld [vmem:[#allocation2 + $0x30] sm:$0xe] }
 0x140   : > { %v14508_v13 = vpop.f32.mrf.mxu1  ;;  %v4449_v10 = vsel %vm13160_vm6, %v4444_v8, %v4448_v52  ;;  %v4476_v5 = vrot.slane %v4474_v18, 4  ;;  %v4459_v24 = vsel %vm13160_vm6, %v4454_v3, %v4458_v4  ;;  %v14521_v60 = vadd.f32 %v1618_v38, %v14453_v57  ;;  %v4781_v22 = vld [vmem:[#allocation2 + $0x3c] sm:$0xe] }
 0x141   : > { %18333 = vst [vmem:[#allocation36_spill] sm:$0xff] %v14508_v13  ;;  %v1998_v41 = vpop.f32.mrf.mxu0  ;;  %v4855_v61 = vsel %vm13369_vm9, %v4853_v19, %v18334_v1  ;;  %v4467_v37 = vor.u32 %v4466_v27, %v4463_v45  ;;  %v11393_v8 = vcombine.low %v4449_v10, %v4459_v24  ;;  %v2109_v19 = vadd.f32 %v14447_v56, %v14172_v63 }
 0x142   : > { %v11429_v25 = vcombine.low %v4852_v42, %v4855_v61  ;;  %v12354_v13 = vpop.f32.mrf.mxu1  ;;  %v4477_v53 = vor.u32 %v4476_v5, %v14506_v14  ;;  %v14527_v18 = vadd.f32 %v12315_v47, %v14471_v17  ;;  %v14532_v42 = vadd.f32 %v14466_v51, %v14179_v62 }
 0x143   : > { %v12328_v52 = vpop.f32.mrf.mxu0  ;;  %v4468_v43 = vrot.slane %v4467_v37, 4  ;;  %v11413_v57 = vrot.slane %v4780_v12, 9  ;;  %12516 = vmatprep.mubr.msk.bf16.mxu1 %vm690_vm3, %v11393_v8  ;;  %v4858_v45 = vrot.slane %v14138_v16, 5  ;;  %v4861_v63 = vrot.slane %v14148_v49, 5  ;;  %v4782_v12 = vld [vmem:[#allocation2 + $0x48] sm:$0xe] }
 0x144   : > { %12523 = vmatmul.mubr.msk.bf16.vlgmr.msra.gmra.mxu0 %vm690_vm3, %v11429_v25  ;;  %v2338_v38 = vpop.f32.mrf.mxu1  ;;  %v4478_v3 = vrot.slane %v4477_v53, 4  ;;  %v2112_v56 = vadd.f32 %v12324_v21, %v14201_v32  ;;  %v11414_v62 = vrot.slane %v4781_v22, 9  ;;  %v4865_v51 = vrot.slane %v14167_v36, 5  ;;  %v4783_v8 = vld [vmem:[#allocation2 + $0x54] sm:$0xe] }
 0x145   : > { %v2011_v4 = vpop.f32.mrf.mxu0  ;;  %v14538_v17 = vld [vmem:[#allocation2 + $0xd4] sm:$0x1]  ;;  %v4473_v47 = vsel %vm13160_vm6, %v4468_v43, %v14506_v14  ;;  %v4868_v27 = vrot.slane %v14174_v7, 5  ;;  %v4859_v16 = vsel %vm13369_vm9, %v11413_v57, %v4858_v45  ;;  %v4860_v49 = vrot.slane %v4858_v45, 4 }
 0x146   : > { %v12355_v10 = vpop.f32.mrf.mxu1  ;;  %v4480_v61 = vshll.u32 %v14538_v17, 16  ;;  %v14549_v32 = vadd.f32 %v12354_v13, %v14479_v23  ;;  %v4866_v21 = vsel %vm13369_vm9, %v11414_v62, %v4865_v51  ;;  %v4867_v14 = vrot.slane %v4865_v51, 4 }
 0x147   : > { %v12329_v1 = vpop.f32.mrf.mxu0  ;;  %v2110_v36 = vadd.f32 %v14494_v26, %v14211_v50  ;;  %v14555_v5 = vadd.f32 %v2338_v38, %v2106_v9  ;;  %v4862_v37 = vsel %vm13369_vm9, %v4860_v49, %v4861_v63  ;;  %v2113_v23 = vadd.f32 %v12325_v29, %v14226_v48 }
 0x148   : > { %v14557_v7 = vpop.f32.mrf.mxu1  ;;  %v4482_v25 = vrot.slane %v4480_v61, 5  ;;  %v14562_v13 = vadd.f32 %v12355_v10, %v2109_v19  ;;  %v11430_v53 = vcombine.low %v4859_v16, %v4862_v37  ;;  %v4869_v22 = vsel %vm13369_vm9, %v4867_v14, %v4868_v27  ;;  %v4786_v37 = vld [vmem:[#allocation2 + $0x78] sm:$0xe] }
 0x149   : > { %v2014_v24 = vpop.f32.mrf.mxu0  ;;  %v14567_v50 = vadd.f32 %v1998_v41, %v14233_v20  ;;  %v11431_v57 = vcombine.low %v4866_v21, %v4869_v22  ;;  %v11415_v38 = vrot.slane %v4782_v12, 9  ;;  %v4872_v45 = vrot.slane %v14196_v58, 5  ;;  %v4785_v21 = vld [vmem:[#allocation2 + $0x6c] sm:$0xe] }
 0x14a   : > { %v12358_v26 = vpop.f32.mrf.mxu1  ;;  %v4483_v43 = vsel %vm13160_vm6, %v4478_v3, %v4482_v25  ;;  %12526 = vmatprep.mubr.msk.bf16.mxu0 %vm690_vm3, %v11430_v53  ;;  %v4875_v29 = vrot.slane %v14203_v0, 5  ;;  %v2116_v19 = vadd.f32 %v12328_v52, %v14241_v2  ;;  %v11416_v63 = vrot.slane %v4783_v8, 9 }
 0x14b   : > { %v12332_v9 = vpop.f32.mrf.mxu0  ;;  %v11394_v48 = vcombine.low %v4473_v47, %v4483_v43  ;;  %v4873_v41 = vsel %vm13369_vm9, %v11415_v38, %v4872_v45  ;;  %v4874_v3 = vrot.slane %v4872_v45, 4  ;;  %v4879_v51 = vrot.slane %v14221_v30, 5  ;;  %v4784_v47 = vld [vmem:[#allocation2 + $0x60] sm:$0xe] }
 0x14c   : > { %v2354_v62 = vpop.f32.mrf.mxu1  ;;  %12527 = vmatmul.mubr.msk.bf16.gmra.mxu0 %vm690_vm3, %v11431_v57  ;;  %v4882_v58 = vrot.slane %v14228_v31, 5  ;;  %v14581_v27 = vadd.f32 %v12358_v26, %v2112_v56  ;;  %v2114_v0 = vadd.f32 %v2011_v4, %v14252_v54  ;;  %v2117_v52 = vadd.f32 %v12329_v1, %v14264_v33  ;;  %v18335_v26 = vld [vmem:[#allocation6_spill] sm:$0xff]  ;;  %v18337_v45 = vld [vmem:[#allocation8_spill] sm:$0xff] }
 0x14d   : > { %v2027_v20 = vpop.f32.mrf.mxu0  ;;  %12517 = vmatmul.mubr.msk.bf16.gmra.mxu1 %vm690_vm3, %v11394_v48  ;;  %v14584_v2 = vadd.f32 %v2354_v62, %v2110_v36  ;;  %v4876_v16 = vsel %vm13369_vm9, %v4874_v3, %v4875_v29  ;;  %v4880_v30 = vsel %vm13369_vm9, %v11416_v63, %v4879_v51  ;;  %v4881_v31 = vrot.slane %v4879_v51, 4  ;;  %v18338_v29 = vld [vmem:[#allocation11_spill] sm:$0xff] }
 0x14e   : > { %v12359_v10 = vpop.f32.mrf.mxu1  ;;  %v11432_v56 = vcombine.low %v4873_v41, %v4876_v16  ;;  %v14594_v14 = vadd.f32 %v2014_v24, %v14272_v39  ;;  %v11417_v4 = vrot.slane %v4784_v47, 9  ;;  %v4886_v33 = vrot.slane %v14254_v28, 5 }
 0x14f   : > { %v12333_v61 = vpop.f32.mrf.mxu0  ;;  %v14591_v49 = vadd.f32 %v12359_v10, %v2113_v23  ;;  %v4883_v36 = vsel %vm13369_vm9, %v4881_v31, %v4882_v58  ;;  %v4889_v12 = vrot.slane %v14262_v59, 5  ;;  %v2120_v25 = vadd.f32 %v12332_v9, %v14284_v11  ;;  %v18336_v59 = vld [vmem:[#allocation7_spill] sm:$0xff]  ;;  %v18339_v58 = vld [vmem:[#allocation9_spill] sm:$0xff]  ;;  %v18340_v10 = vld [vmem:[#allocation10_spill] sm:$0xff] }
 0x150   : > { %v14596_v54 = vpop.f32.mrf.mxu1  ;;  %12530 = vmatprep.mubr.msk.bf16.mxu0 %vm690_vm3, %v11432_v56  ;;  %v11433_v23 = vcombine.low %v4880_v30, %v4883_v36  ;;  %v4887_v39 = vsel %vm13369_vm9, %v11417_v4, %v4886_v33  ;;  %v4888_v24 = vrot.slane %v4886_v33, 4  ;;  %v11418_v8 = vrot.slane %v4785_v21, 9  ;;  %v4787_v30 = vld [vmem:[#allocation2 + $0x84] sm:$0xe] }
 0x151   : > { %v2030_v1 = vpop.f32.mrf.mxu0  ;;  %v4893_v28 = vrot.slane %v14275_v44, 5  ;;  %v4896_v43 = vrot.slane %v18335_v26, 5  ;;  %v2118_v38 = vadd.f32 %v2027_v20, %v18336_v59  ;;  %v2121_v48 = vadd.f32 %v12333_v61, %v18337_v45  ;;  %v18345_v59 = vld [vmem:[#allocation16_spill] sm:$0xff] }
 0x152   : > { %v12362_v53 = vpop.f32.mrf.mxu1  ;;  %v4890_v11 = vsel %vm13369_vm9, %v4888_v24, %v4889_v12  ;;  %v14615_v63 = vadd.f32 %v2030_v1, %v18338_v29  ;;  %v11419_v62 = vrot.slane %v4786_v37, 9  ;;  %v4900_v47 = vrot.slane %v18339_v58, 5  ;;  %v18342_v12 = vld [vmem:[#allocation15_spill] sm:$0xff] }
 0x153   : > { %v12336_v22 = vpop.f32.mrf.mxu0  ;;  %v14608_v57 = vadd.f32 %v12362_v53, %v2116_v19  ;;  %v11434_v44 = vcombine.low %v4887_v39, %v4890_v11  ;;  %v4895_v3 = vrot.slane %v4893_v28, 4  ;;  %v4894_v19 = vsel %vm13369_vm9, %v11418_v8, %v4893_v28  ;;  %v18343_v8 = vld [vmem:[#allocation17_spill] sm:$0xff]  ;;  %v18344_v28 = vld [vmem:[#allocation14_spill] sm:$0xff] }
 0x154   : > { %v2370_v9 = vpop.f32.mrf.mxu1  ;;  %12531 = vmatmul.mubr.msk.bf16.gmra.mxu0 %vm690_vm3, %v11433_v23  ;;  %v4903_v16 = vrot.slane %v18340_v10, 5  ;;  %v2124_v61 = vadd.f32 %v12336_v22, %v14336_v55  ;;  %v4901_v1 = vsel %vm13369_vm9, %v11419_v62, %v4900_v47  ;;  %v4902_v36 = vrot.slane %v4900_v47, 4  ;;  %v4788_v23 = vld [vmem:[#allocation2 + $0x90] sm:$0xe] }
 0x155   : > { %v2043_v41 = vpop.f32.mrf.mxu0  ;;  %v14618_v51 = vadd.f32 %v2370_v9, %v2114_v0  ;;  %12534 = vmatprep.mubr.msk.bf16.mxu0 %vm690_vm3, %v11434_v44  ;;  %v4897_v21 = vsel %vm13369_vm9, %v4895_v3, %v4896_v43  ;;  %v18341_v0 = vld [vmem:[#allocation13_spill] sm:$0xff]  ;;  %v11420_v24 = vrot.slane %v4787_v30, 9  ;;  %v4910_v26 = vrot.slane %v18344_v28, 5 }
 0x156   : > { %v12363_v20 = vpop.f32.mrf.mxu1  ;;  %v4907_v4 = vrot.slane %v18341_v0, 5  ;;  %v2122_v37 = vadd.f32 %v2043_v41, %v18342_v12  ;;  %v11435_v39 = vcombine.low %v4894_v19, %v4897_v21  ;;  %v4914_v11 = vrot.slane %v18345_v59, 5  ;;  %v18346_v41 = vld [vmem:[#allocation18_spill] sm:$0xff]  ;;  %v18348_v21 = vld [vmem:[#allocation21_spill] sm:$0xff] }
 0x157   : > { %v12337_v31 = vpop.f32.mrf.mxu0  ;;  %v14628_v56 = vadd.f32 %v12363_v20, %v2117_v52  ;;  %v4904_v52 = vsel %vm13369_vm9, %v4902_v36, %v4903_v16  ;;  %v11421_v62 = vrot.slane %v4788_v23, 9  ;;  %v4917_v44 = vrot.slane %v18346_v41, 5  ;;  %v18347_v20 = vld [vmem:[#allocation23_spill] sm:$0xff] }
 0x158   : > { %v14631_v33 = vpop.f32.mrf.mxu1  ;;  %v2125_v53 = vadd.f32 %v12337_v31, %v18343_v8  ;;  %v4909_v22 = vrot.slane %v4907_v4, 4  ;;  %v11436_v45 = vcombine.low %v4901_v1, %v4904_v52  ;;  %v4916_v19 = vrot.slane %v4914_v11, 4  ;;  %v4789_v31 = vld [vmem:[#allocation2 + $0x9c] sm:$0xe]  ;;  %v18349_v1 = vld [vmem:[#allocation24_spill] sm:$0xff] }
 0x159   : > { %v14636_v55 = vpop.f32.mrf.mxu0  ;;  %v4908_v16 = vsel %vm13369_vm9, %v11420_v24, %v4907_v4  ;;  %v4921_v0 = vrot.slane %v18348_v21, 5  ;;  %v4790_v8 = vld [vmem:[#allocation2 + $0xa8] sm:$0xe]  ;;  %v18350_v4 = vld [vmem:[#allocation26_spill] sm:$0xff]  ;;  %v11422_v59 = vrot.slane %v4789_v31, 9 }
 0x15a   : > { %v12366_v43 = vpop.f32.mrf.mxu1  ;;  %v4928_v24 = vrot.slane %v18350_v4, 5 }
 0x15b   : > { %v12340_v9 = vpop.f32.mrf.mxu0  ;;  %v14643_v29 = vadd.f32 %v12366_v43, %v2120_v25  ;;  %v4911_v25 = vsel %vm13369_vm9, %v4909_v22, %v4910_v26  ;;  %v18351_v22 = vld [vmem:[#allocation25_spill] sm:$0xff] }
 0x15c   : > { %v2386_v3 = vpop.f32.mrf.mxu1  ;;  %v2128_v58 = vadd.f32 %v12340_v9, %v18347_v20  ;;  %12535 = vmatmul.mubr.msk.bf16.gmra.mxu0 %vm690_vm3, %v11435_v39  ;;  %v4918_v39 = vsel %vm13369_vm9, %v4916_v19, %v4917_v44  ;;  %v11437_v43 = vcombine.low %v4908_v16, %v4911_v25  ;;  %v4930_v44 = vrot.slane %v4928_v24, 4  ;;  %v18353_v19 = vld [vmem:[#allocation27_spill] sm:$0xff]  ;;  %v18354_v25 = vld [vmem:[#allocation32_spill] sm:$0xff] }
 0x15d   : > { %v2059_v47 = vpop.f32.mrf.mxu0  ;;  %v14648_v10 = vadd.f32 %v2386_v3, %v2118_v38  ;;  %12538 = vmatprep.mubr.msk.bf16.mxu0 %vm690_vm3, %v11436_v45  ;;  %v4915_v38 = vsel %vm13369_vm9, %v11421_v62, %v4914_v11  ;;  %v18352_v45 = vld [vmem:[#allocation22_spill] sm:$0xff]  ;;  %v11423_v11 = vrot.slane %v4790_v8, 9 }
 0x15e   : > { %v12367_v30 = vpop.f32.mrf.mxu1  ;;  %v2126_v36 = vadd.f32 %v2059_v47, %v18349_v1  ;;  %v11438_v9 = vcombine.low %v4915_v38, %v4918_v39  ;;  %v4924_v41 = vrot.slane %v18352_v45, 5  ;;  %v4931_v47 = vrot.slane %v18353_v19, 5  ;;  %v4791_v39 = vld [vmem:[#allocation2 + $0xb4] sm:$0xe]  ;;  %v18357_v19 = vld [vmem:[#allocation31_spill] sm:$0xff] }
 0x15f   : > { %v12341_v12 = vpop.f32.mrf.mxu0  ;;  %v14657_v23 = vadd.f32 %v12367_v30, %v2121_v48  ;;  %v4923_v48 = vrot.slane %v4921_v0, 4  ;;  %v18355_v8 = vld [vmem:[#allocation30_spill] sm:$0xff] }
 0x160   : > { %v14664_v52 = vpop.f32.mrf.mxu1  ;;  %v2129_v28 = vadd.f32 %v12341_v12, %v18351_v22  ;;  %v4922_v12 = vsel %vm13369_vm9, %v11422_v59, %v4921_v0  ;;  %v4935_v4 = vrot.slane %v18355_v8, 5  ;;  %v4942_v0 = vrot.slane %v14464_v6, 5 }
 0x161   : > { %v14667_v26 = vpop.f32.mrf.mxu0 }
 0x162   : > { %v12370_v3 = vpop.f32.mrf.mxu1 }
 0x163   : > { %v12344_v62 = vpop.f32.mrf.mxu0  ;;  %v14670_v20 = vadd.f32 %v12370_v3, %v2124_v61  ;;  %v4925_v61 = vsel %vm13369_vm9, %v4923_v48, %v4924_v41  ;;  %v4792_v3 = vld [vmem:[#allocation2 + $0xc0] sm:$0xe] }
 0x164   : > { %v2132_v30 = vadd.f32 %v12344_v62, %v14437_v34  ;;  %v2402_v21 = vpop.f32.mrf.mxu1  ;;  %12539 = vmatmul.mubr.msk.bf16.gmra.mxu0 %vm690_vm3, %v11437_v43  ;;  %v4929_v34 = vsel %vm13369_vm9, %v11423_v11, %v4928_v24  ;;  %v4932_v43 = vsel %vm13369_vm9, %v4930_v44, %v4931_v47  ;;  %v11439_v41 = vcombine.low %v4922_v12, %v4925_v61  ;;  %v18358_v47 = vld [vmem:[#allocation35_spill] sm:$0xff] }
 0x165   : > { %v2075_v1 = vpop.f32.mrf.mxu0  ;;  %v14675_v16 = vadd.f32 %v2402_v21, %v2122_v37  ;;  %12542 = vmatprep.mubr.msk.bf16.mxu0 %vm690_vm3, %v11438_v9  ;;  %v18356_v9 = vld [vmem:[#allocation33_spill] sm:$0xff]  ;;  %v11424_v24 = vrot.slane %v4791_v39, 9  ;;  %v11440_v11 = vcombine.low %v4929_v34, %v4932_v43  ;;  %v4937_v62 = vrot.slane %v4935_v4, 4 }
 0x166   : > { %v2130_v31 = vadd.f32 %v2075_v1, %v18354_v25  ;;  %v12371_v38 = vpop.f32.mrf.mxu1  ;;  %v4938_v21 = vrot.slane %v18357_v19, 5  ;;  %v11425_v1 = vrot.slane %v4792_v3, 9  ;;  %v4944_v44 = vrot.slane %v4942_v0, 4 }
 0x167   : > { %v12345_v22 = vpop.f32.mrf.mxu0  ;;  %v14686_v37 = vadd.f32 %v12371_v38, %v2125_v53  ;;  %v4945_v8 = vrot.slane %v18358_v47, 5  ;;  %v4936_v34 = vsel %vm13369_vm9, %v11424_v24, %v4935_v4  ;;  %v4949_v43 = vrot.slane %v14492_v46, 5 }
 0x168   : > { %v2133_v45 = vadd.f32 %v12345_v22, %v18356_v9  ;;  %v14692_v59 = vpop.f32.mrf.mxu1 }
 0x169   : > { %v14694_v48 = vpop.f32.mrf.mxu0  ;;  %v4951_v46 = vrot.slane %v4949_v43, 4 }
 0x16a   : > { %v12374_v53 = vpop.f32.mrf.mxu1 }
 0x16b   : > { %v12348_v25 = vpop.f32.mrf.mxu0  ;;  %v14697_v38 = vadd.f32 %v12374_v53, %v2128_v58  ;;  %v4939_v58 = vsel %vm13369_vm9, %v4937_v62, %v4938_v21 }
 0x16c   : > { %v2136_v6 = vadd.f32 %v12348_v25, %v14499_v40  ;;  %v2418_v22 = vpop.f32.mrf.mxu1  ;;  %12543 = vmatmul.mubr.msk.bf16.gmra.mxu0 %vm690_vm3, %v11439_v41  ;;  %v4793_v41 = vld [vmem:[#allocation2 + $0xcc] sm:$0xe]  ;;  %v11441_v24 = vcombine.low %v4936_v34, %v4939_v58 }
 0x16d   : > { %v2091_v9 = vpop.f32.mrf.mxu0  ;;  %v14702_v12 = vadd.f32 %v2418_v22, %v2126_v36  ;;  %12546 = vmatprep.mubr.msk.bf16.mxu0 %vm690_vm3, %v11440_v11  ;;  %v4943_v36 = vsel %vm13369_vm9, %v11425_v1, %v4942_v0  ;;  %v11426_v21 = vrot.slane %v4793_v41, 9 }
 0x16e   : > { %v2134_v61 = vadd.f32 %v2091_v9, %v14521_v60  ;;  %v12375_v39 = vpop.f32.mrf.mxu1  ;;  %v4946_v60 = vsel %vm13369_vm9, %v4944_v44, %v4945_v8 }
 0x16f   : > { %v12349_v40 = vpop.f32.mrf.mxu0  ;;  %v14711_v3 = vadd.f32 %v12375_v39, %v2129_v28  ;;  %v11442_v62 = vcombine.low %v4943_v36, %v4946_v60  ;;  %v4952_v28 = vrot.slane %v14538_v17, 5  ;;  %v4950_v22 = vsel %vm13369_vm9, %v11426_v21, %v4949_v43 }
 0x170   : > { %v2137_v11 = vadd.f32 %v12349_v40, %v14527_v18  ;;  %v14718_v19 = vpop.f32.mrf.mxu1 }
 0x171   : > { %v14720_v4 = vpop.f32.mrf.mxu0  ;;  %v4953_v17 = vsel %vm13369_vm9, %v4951_v46, %v4952_v28 }
 0x172   : > { %v12378_v53 = vpop.f32.mrf.mxu1  ;;  %v11443_v39 = vcombine.low %v4950_v22, %v4953_v17 }
 0x173   : > { %v12388_v25 = vpop.f32.mrf.mxu0  ;;  %v14723_v47 = vadd.f32 %v12378_v53, %v2132_v30 }
 0x174   : > { %v3193_v0 = vadd.f32 %v12388_v25, %v14549_v32  ;;  %v2434_v1 = vpop.f32.mrf.mxu1  ;;  %12547 = vmatmul.mubr.msk.bf16.gmra.mxu0 %vm690_vm3, %v11441_v24 }
 0x175   : > { %v3064_v44 = vpop.f32.mrf.mxu0  ;;  %v14727_v18 = vadd.f32 %v2434_v1, %v2130_v31  ;;  %12550 = vmatprep.mubr.msk.bf16.mxu0 %vm690_vm3, %v11442_v62 }
 0x176   : > { %v3191_v8 = vadd.f32 %v3064_v44, %v14555_v5  ;;  %v12379_v30 = vpop.f32.mrf.mxu1 }
 0x177   : > { %v12389_v9 = vpop.f32.mrf.mxu0  ;;  %v14735_v34 = vadd.f32 %v12379_v30, %v2133_v45 }
 0x178   : > { %v3194_v32 = vadd.f32 %v12389_v9, %v14562_v13  ;;  %v14738_v58 = vpop.f32.mrf.mxu1 }
 0x179   : > { %v14740_v31 = vpop.f32.mrf.mxu0 }
 0x17a   : > { %v12382_v5 = vpop.f32.mrf.mxu1 }
 0x17b   : > { %v12392_v40 = vpop.f32.mrf.mxu0  ;;  %v14742_v36 = vadd.f32 %v12382_v5, %v2136_v6 }
 0x17c   : > { %v3197_v43 = vadd.f32 %v12392_v40, %v14581_v27  ;;  %v2450_v60 = vpop.f32.mrf.mxu1  ;;  %12551 = vmatmul.mubr.msk.bf16.gmra.mxu0 %vm690_vm3, %v11443_v39 }
 0x17d   : > { %v3080_v41 = vpop.f32.mrf.mxu0  ;;  %v14746_v24 = vadd.f32 %v2450_v60, %v2134_v61 }
 0x17e   : > { %v14749_v45 = vadd.f32 %v3080_v41, %v14584_v2  ;;  %v12383_v13 = vpop.f32.mrf.mxu1 }
 0x17f   : > { %v12393_v62 = vpop.f32.mrf.mxu0  ;;  %v14751_v21 = vadd.f32 %v12383_v13, %v2137_v11 }
 0x180   : > { %v3198_v46 = vadd.f32 %v12393_v62, %v14591_v49  ;;  %v14754_v28 = vpop.f32.mrf.mxu1 }
 0x181   : > { %v14756_v6 = vpop.f32.mrf.mxu0 }
 0x182   : > { %v12422_v27 = vpop.f32.mrf.mxu1 }
 0x183   : > { %v12396_v53 = vpop.f32.mrf.mxu0  ;;  %v14758_v25 = vadd.f32 %v12422_v27, %v3193_v0 }
 0x184   : > { %v3201_v61 = vadd.f32 %v12396_v53, %v14608_v57  ;;  %v3534_v1 = vpop.f32.mrf.mxu1 }
 0x185   : > { %v3096_v44 = vpop.f32.mrf.mxu0  ;;  %v14761_v2 = vadd.f32 %v3534_v1, %v3191_v8 }
 0x186   : > { %v14764_v22 = vadd.f32 %v3096_v44, %v14618_v51  ;;  %v12423_v11 = vpop.f32.mrf.mxu1 }
 0x187   : > { %v12397_v17 = vpop.f32.mrf.mxu0  ;;  %v14766_v49 = vadd.f32 %v12423_v11, %v3194_v32 }
 0x188   : > { %v3202_v30 = vadd.f32 %v12397_v17, %v14628_v56  ;;  %v14769_v9 = vpop.f32.mrf.mxu1 }
 0x189   : > { %v14771_v39 = vpop.f32.mrf.mxu0 }
 0x18a   : > { %v12426_v0 = vpop.f32.mrf.mxu1 }
 0x18b   : > { %v12400_v5 = vpop.f32.mrf.mxu0  ;;  %v14773_v57 = vadd.f32 %v12426_v0, %v3197_v43 }
 0x18c   : > { %v3205_v8 = vadd.f32 %v12400_v5, %v14643_v29  ;;  %v14776_v40 = vpop.f32.mrf.mxu1 }
 0x18d   : > { %v3112_v51 = vpop.f32.mrf.mxu0 }
 0x18e   : > { %v14779_v60 = vadd.f32 %v3112_v51, %v14648_v10  ;;  %v12427_v32 = vpop.f32.mrf.mxu1 }
 0x18f   : > { %v12401_v41 = vpop.f32.mrf.mxu0  ;;  %v14781_v13 = vadd.f32 %v12427_v32, %v3198_v46 }
 0x190   : > { %v3206_v56 = vadd.f32 %v12401_v41, %v14657_v23  ;;  %v14784_v62 = vpop.f32.mrf.mxu1 }
 0x191   : > { %v14786_v27 = vpop.f32.mrf.mxu0 }
 0x192   : > { %v12430_v43 = vpop.f32.mrf.mxu1 }
 0x193   : > { %v12404_v53 = vpop.f32.mrf.mxu0  ;;  %v14788_v1 = vadd.f32 %v12430_v43, %v3201_v61 }
 0x194   : > { %v3209_v29 = vadd.f32 %v12404_v53, %v14670_v20  ;;  %v14791_v44 = vpop.f32.mrf.mxu1 }
 0x195   : > { %v3128_v10 = vpop.f32.mrf.mxu0 }
 0x196   : > { %v14794_v11 = vadd.f32 %v3128_v10, %v14675_v16  ;;  %v12431_v46 = vpop.f32.mrf.mxu1 }
 0x197   : > { %v12405_v17 = vpop.f32.mrf.mxu0  ;;  %v14796_v0 = vadd.f32 %v12431_v46, %v3202_v30 }
 0x198   : > { %18359 = vst [vmem:[#allocation6_spill] sm:$0xff] %v14794_v11  ;;  %v3210_v23 = vadd.f32 %v12405_v17, %v14686_v37  ;;  %v14799_v5 = vpop.f32.mrf.mxu1 }
 0x199   : > { %v14801_v51 = vpop.f32.mrf.mxu0 }
 0x19a   : > { %v12434_v61 = vpop.f32.mrf.mxu1 }
 0x19b   : > { %v12408_v32 = vpop.f32.mrf.mxu0  ;;  %v14803_v41 = vadd.f32 %v12434_v61, %v3205_v8 }
 0x19c   : > { %v3213_v20 = vadd.f32 %v12408_v32, %v14697_v38  ;;  %v14806_v43 = vpop.f32.mrf.mxu1 }
 0x19d   : > { %v3144_v16 = vpop.f32.mrf.mxu0 }
 0x19e   : > { %v14809_v53 = vadd.f32 %v3144_v16, %v14702_v12  ;;  %v12435_v30 = vpop.f32.mrf.mxu1 }
 0x19f   : > { %v12409_v10 = vpop.f32.mrf.mxu0  ;;  %v14811_v46 = vadd.f32 %v12435_v30, %v3206_v56 }
 0x1a0   : > { %18360 = vst [vmem:[#allocation7_spill] sm:$0xff] %v14809_v53  ;;  %v3214_v37 = vadd.f32 %v12409_v10, %v14711_v3  ;;  %v14814_v17 = vpop.f32.mrf.mxu1 }
 0x1a1   : > { %18361 = vst [vmem:[#allocation8_spill] sm:$0xff] %v14814_v17  ;;  %v14816_v15 = vpop.f32.mrf.mxu0 }
 0x1a2   : > { %18362 = vst [vmem:[#allocation11_spill] sm:$0xff] %v14816_v15  ;;  %v12438_v8 = vpop.f32.mrf.mxu1 }
 0x1a3   : > { %v12412_v61 = vpop.f32.mrf.mxu0  ;;  %v14818_v35 = vadd.f32 %v12438_v8, %v3209_v29 }
 0x1a4   : > { %v3217_v38 = vadd.f32 %v12412_v61, %v14723_v47  ;;  %v14821_v32 = vpop.f32.mrf.mxu1 }
 0x1a5   : > { %18363 = vst [vmem:[#allocation9_spill] sm:$0xff] %v14821_v32  ;;  %v3160_v12 = vpop.f32.mrf.mxu0 }
 0x1a6   : > { %v14824_v16 = vadd.f32 %v3160_v12, %v14727_v18  ;;  %v12439_v56 = vpop.f32.mrf.mxu1 }
 0x1a7   : > { %v12413_v30 = vpop.f32.mrf.mxu0  ;;  %v14826_v53 = vadd.f32 %v12439_v56, %v3210_v23 }
 0x1a8   : > { %18364 = vst [vmem:[#allocation10_spill] sm:$0xff] %v14824_v16  ;;  %v3218_v3 = vadd.f32 %v12413_v30, %v14735_v34  ;;  %v14829_v10 = vpop.f32.mrf.mxu1 }
 0x1a9   : > { %18365 = vst [vmem:[#allocation13_spill] sm:$0xff] %v14829_v10  ;;  %v14831_v15 = vpop.f32.mrf.mxu0 }
 0x1aa   : > { %v12442_v11 = vpop.f32.mrf.mxu1  ;;  %18366 = vst [vmem:[#allocation15_spill] sm:$0xff] %v14831_v15 }
 0x1ab   : > { %v14833_v29 = vadd.f32 %v12442_v11, %v3213_v20 }
 0x1ac   : > { %v14835_v47 = vpop.f32.mrf.mxu1 }
 0x1ad   : > { %18367 = vst [vmem:[#allocation17_spill] sm:$0xff] %v14835_v47 }
 0x1ae   : > { %v12443_v8 = vpop.f32.mrf.mxu1  ;;  %v12416_v61 = vpop.f32.mrf.mxu0 }
 0x1af   : > { %v14837_v32 = vadd.f32 %v12443_v8, %v3214_v37  ;;  %v3221_v18 = vadd.f32 %v12416_v61, %v14742_v36 }
 0x1b0   : > { %v14840_v12 = vpop.f32.mrf.mxu1  ;;  %v3176_v23 = vpop.f32.mrf.mxu0 }
 0x1b1   : > { %18368 = vst [vmem:[#allocation14_spill] sm:$0xff] %v14840_v12  ;;  %v14843_v34 = vadd.f32 %v3176_v23, %v14746_v24 }
 0x1b2   : > { %v12446_v56 = vpop.f32.mrf.mxu1  ;;  %v12417_v30 = vpop.f32.mrf.mxu0 }
 0x1b3   : > { %18369 = vst [vmem:[#allocation16_spill] sm:$0xff] %v14843_v34  ;;  %v3687_v16 = vadd.f32 %v12446_v56, %v3217_v38  ;;  %v3222_v11 = vadd.f32 %v12417_v30, %v14751_v21 }
 0x1b4   : > { %v14846_v20 = vpop.f32.mrf.mxu1  ;;  %v14848_v47 = vpop.f32.mrf.mxu0 }
 0x1b5   : > { %18370 = vst [vmem:[#allocation18_spill] sm:$0xff] %v14846_v20  ;;  %18371 = vst [vmem:[#allocation23_spill] sm:$0xff] %v14848_v47 }
 0x1b6   : > { %v12447_v15 = vpop.f32.mrf.mxu1  ;;  %v12456_v37 = vpop.f32.mrf.mxu0 }
 0x1b7   : > { %v3688_v8 = vadd.f32 %v12447_v15, %v3218_v3  ;;  %v14851_v36 = vadd.f32 %v12456_v37, %v14758_v25 }
 0x1b8   : > { %v14853_v61 = vpop.f32.mrf.mxu1  ;;  %v3893_v12 = vpop.f32.mrf.mxu0 }
 0x1b9   : > { %18372 = vst [vmem:[#allocation21_spill] sm:$0xff] %v14853_v61  ;;  %v14856_v24 = vadd.f32 %v3893_v12, %v14761_v2 }
 0x1ba   : > { %v12450_v23 = vpop.f32.mrf.mxu1  ;;  %v12457_v38 = vpop.f32.mrf.mxu0 }
 0x1bb   : > { %v3691_v56 = vadd.f32 %v12450_v23, %v3221_v18  ;;  %v14859_v21 = vadd.f32 %v12457_v38, %v14766_v49 }
 0x1bc   : > { %v14861_v30 = vpop.f32.mrf.mxu1  ;;  %v14863_v34 = vpop.f32.mrf.mxu0 }
 0x1bd   : > { %18373 = vst [vmem:[#allocation24_spill] sm:$0xff] %v14861_v30 }
 0x1be   : > { %v12451_v15 = vpop.f32.mrf.mxu1  ;;  %v12460_v3 = vpop.f32.mrf.mxu0 }
 0x1bf   : > { %v3692_v25 = vadd.f32 %v12451_v15, %v3222_v11  ;;  %v14866_v37 = vadd.f32 %v12460_v3, %v14773_v57 }
 0x1c0   : > { %v14868_v61 = vpop.f32.mrf.mxu1  ;;  %v14870_v2 = vpop.f32.mrf.mxu0 }
 0x1c1   : > { %18374 = vst [vmem:[#allocation26_spill] sm:$0xff] %v14868_v61 }
 0x1c2   : > { %v12461_v12 = vpop.f32.mrf.mxu0  ;;  %v14872_v47 = vpop.f32.mrf.mxu1 }
 0x1c3   : > { %v14875_v49 = vadd.f32 %v12461_v12, %v14781_v13 }
 0x1c4   : > { %v14877_v18 = vpop.f32.mrf.mxu0  ;;  %v14879_v38 = vpop.f32.mrf.mxu1 }
 0x1c6   : > { %v12464_v23 = vpop.f32.mrf.mxu0  ;;  %v14886_v3 = vpop.f32.mrf.mxu1 }
 0x1c7   : > { %v14882_v11 = vadd.f32 %v12464_v23, %v14788_v1 }
 0x1c8   : > { %v14884_v57 = vpop.f32.mrf.mxu0  ;;  %v14893_v12 = vpop.f32.mrf.mxu1 }
 0x1c9   : > { %18375 = vst [vmem:[#allocation25_spill] sm:$0xff] %v14882_v11  ;;  %18376 = vst [vmem:[#allocation22_spill] sm:$0xff] %v14884_v57 }
 0x1ca   : > { %v12465_v15 = vpop.f32.mrf.mxu0  ;;  %v14900_v23 = vpop.f32.mrf.mxu1 }
 0x1cb   : > { %v14889_v61 = vadd.f32 %v12465_v15, %v14796_v0 }
 0x1cc   : > { %v14891_v30 = vpop.f32.mrf.mxu0  ;;  %v14907_v15 = vpop.f32.mrf.mxu1 }
 0x1cd   : > { %18377 = vst [vmem:[#allocation27_spill] sm:$0xff] %v14889_v61  ;;  %18378 = vst [vmem:[#allocation32_spill] sm:$0xff] %v14891_v30 }
 0x1ce   : > { %v12468_v13 = vpop.f32.mrf.mxu0 }
 0x1cf   : > { %v14896_v20 = vadd.f32 %v12468_v13, %v14803_v41  ;;  %v14914_v13 = vpop.f32.mrf.mxu1 }
 0x1d0   : > { %v14898_v10 = vpop.f32.mrf.mxu0 }
 0x1d1   : > { %18379 = vst [vmem:[#allocation30_spill] sm:$0xff] %v14896_v20  ;;  %18380 = vst [vmem:[#allocation33_spill] sm:$0xff] %v14898_v10 }
 0x1d2   : > { %v12469_v1 = vpop.f32.mrf.mxu0 }
 0x1d3   : > { %v14903_v11 = vadd.f32 %v12469_v1, %v14811_v46  ;;  %v14921_v1 = vpop.f32.mrf.mxu1 }
 0x1d4   : > { %v14905_v57 = vpop.f32.mrf.mxu0 }
 0x1d5   : > { %18381 = vst [vmem:[#allocation31_spill] sm:$0xff] %v14903_v11  ;;  %18382 = vst [vmem:[#allocation35_spill] sm:$0xff] %v14905_v57 }
 0x1d6   : > { %v12472_v0 = vpop.f32.mrf.mxu0 }
 0x1d7   : > { %v14910_v61 = vadd.f32 %v12472_v0, %v14818_v35  ;;  %v14928_v0 = vpop.f32.mrf.mxu1 }
 0x1d8   : > { %v14912_v30 = vpop.f32.mrf.mxu0  ;;  %18389 = vst [vmem:[#allocation43_spill] sm:$0xff] %v14928_v0 }
 0x1d9   : > { %18383 = vst [vmem:[#allocation37_spill] sm:$0xff] %v14910_v61  ;;  %18384 = vst [vmem:[#allocation38_spill] sm:$0xff] %v14912_v30 }
 0x1da   : > { %v12473_v41 = vpop.f32.mrf.mxu0 }
 0x1db   : > { %v14917_v20 = vadd.f32 %v12473_v41, %v14826_v53  ;;  %v14935_v41 = vpop.f32.mrf.mxu1 }
 0x1dc   : > { %v14919_v10 = vpop.f32.mrf.mxu0  ;;  %18392 = vst [vmem:[#allocation46_spill] sm:$0xff] %v14935_v41 }
 0x1dd   : > { %18385 = vst [vmem:[#allocation39_spill] sm:$0xff] %v14917_v20  ;;  %18386 = vst [vmem:[#allocation40_spill] sm:$0xff] %v14919_v10 }
 0x1de   : > { %v12476_v46 = vpop.f32.mrf.mxu0 }
 0x1df   : > { %v14924_v11 = vadd.f32 %v12476_v46, %v14833_v29  ;;  %v14941_v29 = vpop.f32.mrf.mxu1 }
 0x1e0   : > { %v14926_v57 = vpop.f32.mrf.mxu0  ;;  %18395 = vst [vmem:[#allocation49_spill] sm:$0xff] %v14941_v29  ;;  %v18413_v29 = vld [vmem:[#allocation34_spill] sm:$0xff] }
 0x1e1   : > { %18387 = vst [vmem:[#allocation41_spill] sm:$0xff] %v14924_v11  ;;  %18388 = vst [vmem:[#allocation42_spill] sm:$0xff] %v14926_v57  ;;  %v14945_v11 = vpop.f32.mrf.mxu1 }
 0x1e2   : > { %v12477_v35 = vpop.f32.mrf.mxu0  ;;  %18397 = vst [vmem:[#allocation51_spill] sm:$0xff] %v14945_v11 }
 0x1e3   : > { %v14931_v61 = vadd.f32 %v12477_v35, %v14837_v32  ;;  %v14947_v57 = vpop.f32.mrf.mxu1 }
 0x1e4   : > { %v14933_v30 = vpop.f32.mrf.mxu0  ;;  %18398 = vst [vmem:[#allocation52_spill] sm:$0xff] %v14947_v57  ;;  %v18409_v57 = vld [vmem:[#allocation20_spill] sm:$0xff] }
 0x1e5   : > { %18390 = vst [vmem:[#allocation44_spill] sm:$0xff] %v14931_v61  ;;  %18391 = vst [vmem:[#allocation45_spill] sm:$0xff] %v14933_v30  ;;  %v14951_v35 = vpop.f32.mrf.mxu1 }
 0x1e6   : > { %v12480_v53 = vpop.f32.mrf.mxu0  ;;  %18400 = vst [vmem:[#allocation54_spill] sm:$0xff] %v14951_v35 }
 0x1e7   : > { %v14937_v20 = vadd.f32 %v12480_v53, %v3687_v16  ;;  %v14957_v53 = vpop.f32.mrf.mxu1 }
 0x1e8   : > { %v14939_v10 = vpop.f32.mrf.mxu0  ;;  %18403 = vst [vmem:[#allocation57_spill] sm:$0xff] %v14957_v53 }
 0x1e9   : > { %18393 = vst [vmem:[#allocation47_spill] sm:$0xff] %v14937_v20  ;;  %18394 = vst [vmem:[#allocation48_spill] sm:$0xff] %v14939_v10 }
 0x1ea   : > { %v12481_v17 = vpop.f32.mrf.mxu0 }
 0x1eb   : > { %v14943_v46 = vadd.f32 %v12481_v17, %v3688_v8  ;;  %v14961_v17 = vpop.f32.mrf.mxu1 }
 0x1ec   : > { %v14949_v32 = vpop.f32.mrf.mxu0  ;;  %18405 = vst [vmem:[#allocation59_spill] sm:$0xff] %v14961_v17 }
 0x1ed   : > { %18396 = vst [vmem:[#allocation50_spill] sm:$0xff] %v14943_v46  ;;  %18399 = vst [vmem:[#allocation53_spill] sm:$0xff] %v14949_v32  ;;  %v2466_v46 = vadd.f32 %v14557_v7, %v14532_v42  ;;  %v12987_v32 = vld [vmem:[%s18230_s2] ss:$0 sm:$0xff] }
 0x1ee   : > { %v929_v53 = vadd.f32 %v12987_v32, %v18409_v57  ;;  %v18412_v42 = vld [vmem:[#allocation28_spill] sm:$0xff] }
 0x1f0   : > { %v1658_v0 = vadd.f32 %v18413_v29, %v929_v53 }
 0x1f5   : > { %v12484_v61 = vpop.f32.mrf.mxu0 }
 0x1f6   : > { %v14953_v30 = vadd.f32 %v12484_v61, %v3691_v56  ;;  %v18407_v61 = vld [vmem:[#allocation5_spill] sm:$0xff] }
 0x1f7   : > { %v14955_v16 = vpop.f32.mrf.mxu0  ;;  %v921_v56 = vadd.f32 %v12987_v32, %v18407_v61  ;;  %v18414_v61 = vld [vmem:[#allocation36_spill] sm:$0xff] }
 0x1f8   : > { %18401 = vst [vmem:[#allocation55_spill] sm:$0xff] %v14953_v30  ;;  %18402 = vst [vmem:[#allocation56_spill] sm:$0xff] %v14955_v16  ;;  %v18408_v30 = vld [vmem:[#allocation12_spill] sm:$0xff] }
 0x1f9   : > { %v12485_v20 = vpop.f32.mrf.mxu0  ;;  %v925_v16 = vadd.f32 %v12987_v32, %v18408_v30  ;;  %v4746_v30 = vadd.f32 %v14879_v38, %v14856_v24 }
 0x1fa   : > { %v14959_v10 = vadd.f32 %v12485_v20, %v3692_v25  ;;  %v3192_v20 = vadd.f32 %v14740_v31, %v2466_v46  ;;  %v14974_v25 = vpop.f32.mrf.mxu1  ;;  %v2470_v31 = vadd.f32 %v14596_v54, %v14567_v50  ;;  %v2478_v50 = vadd.f32 %v14664_v52, %v14615_v63 }
 0x1fb   : > { %v14963_v8 = vpop.f32.mrf.mxu0  ;;  %v1654_v7 = vadd.f32 %v18412_v42, %v925_v16 }
 0x1fc   : > { %18404 = vst [vmem:[#allocation58_spill] sm:$0xff] %v14959_v10  ;;  %18406 = vst [vmem:[#allocation60_spill] sm:$0xff] %v14963_v8  ;;  %v18410_v10 = vld [vmem:[#allocation19_spill] sm:$0xff]  ;;  %v18411_v8 = vld [vmem:[#allocation29_spill] sm:$0xff]  ;;  %v3662_v41 = vadd.f32 %v14769_v9, %v3192_v20  ;;  %v4748_v9 = vadd.f32 %v14872_v47, %v14851_v36  ;;  %v14993_v53 = vpop.f32.mrf.mxu1  ;;  %v3196_v52 = vadd.f32 %v14756_v6, %v2470_v31 }
 0x1fd   : > { %v1650_v17 = vadd.f32 %v18410_v10, %v921_v56  ;;  %v933_v35 = vadd.f32 %v12987_v32, %v18411_v8  ;;  %v2474_v10 = vadd.f32 %v14631_v33, %v14594_v14  ;;  %v2127_v16 = vadd.f32 %v14667_v26, %v1654_v7 }
 0x1fe   : > { %v4021_v29 = vadd.f32 %v14863_v34, %v3662_v41  ;;  %v2131_v14 = vadd.f32 %v14694_v48, %v1658_v0  ;;  %v4749_v34 = vadd.f32 %v14886_v3, %v14859_v21  ;;  %v3204_v6 = vadd.f32 %v14786_v27, %v2478_v50 }
 0x1ff   : > { %v1662_v57 = vadd.f32 %v18414_v61, %v933_v35  ;;  %v2123_v46 = vadd.f32 %v14636_v55, %v1650_v17  ;;  %v2486_v26 = vadd.f32 %v14718_v19, %v2127_v16  ;;  %v3200_v19 = vadd.f32 %v14771_v39, %v2474_v10 }
 0x200   : > { %v4747_v47 = vadd.f32 %v14893_v12, %v4021_v29  ;;  %v2490_v38 = vadd.f32 %v14738_v58, %v2131_v14  ;;  %v3666_v58 = vadd.f32 %v14784_v62, %v3196_v52  ;;  %v4752_v7 = vadd.f32 %v14900_v23, %v14866_v37  ;;  %v18417_v14 = vld [vmem:[#allocation11_spill] sm:$0xff] }
 0x201   : > { %v2482_v54 = vadd.f32 %v14692_v59, %v2123_v46  ;;  %v2135_v33 = vadd.f32 %v14720_v4, %v1662_v57  ;;  %v3665_v59 = vadd.f32 %v14776_v40, %v14749_v45  ;;  %v15016_v4 = vpop.f32.mrf.mxu1  ;;  %v3670_v41 = vadd.f32 %v14799_v5, %v3200_v19 }
 0x202   : > { %v3673_v5 = vadd.f32 %v14806_v43, %v14779_v60  ;;  %v4753_v10 = vadd.f32 %v14914_v13, %v14875_v49  ;;  %v18416_v49 = vld [vmem:[#allocation22_spill] sm:$0xff] }
 0x203   : > { %v15010_v63 = vadd.f32 %v14754_v28, %v2135_v33  ;;  %v3669_v28 = vadd.f32 %v14791_v44, %v14764_v22  ;;  %v4024_v45 = vadd.f32 %v14870_v2, %v3665_v59  ;;  %v3208_v22 = vadd.f32 %v14801_v51, %v2482_v54  ;;  %v15040_v2 = vpop.f32.mrf.mxu1  ;;  %v18418_v59 = vld [vmem:[#allocation6_spill] sm:$0xff] }
 0x204   : > { %v12524_v11 = vpop.f32.mrf.mxu0  ;;  %v4025_v51 = vadd.f32 %v14877_v18, %v3666_v58  ;;  %v3212_v33 = vadd.f32 %v18417_v14, %v2486_v26 }
 0x205   : > { %v15006_v36 = vadd.f32 %v12524_v11, %v4748_v9  ;;  %v4750_v27 = vadd.f32 %v14907_v15, %v4024_v45  ;;  %v15061_v46 = vpop.f32.mrf.mxu1  ;;  %v18415_v9 = vld [vmem:[#allocation8_spill] sm:$0xff]  ;;  %v4028_v13 = vadd.f32 %v18416_v49, %v3669_v28  ;;  %v18430_v49 = vld [vmem:[#allocation7_spill] sm:$0xff] }
 0x206   : > { %v5089_v32 = vpop.f32.mrf.mxu0  ;;  %v4751_v60 = vadd.f32 %v14921_v1, %v4025_v51  ;;  %v3674_v50 = vadd.f32 %v18415_v9, %v3204_v6  ;;  %v18421_v6 = vld [vmem:[#allocation46_spill] sm:$0xff] }
 0x207   : > { %v14995_v24 = vadd.f32 %v5089_v32, %v4746_v30  ;;  %v5319_v39 = vmul.f32 %v15006_v36, %v15006_v36  ;;  %v5251_v35 = vsel %vm690_vm3, %v15006_v36, 0.0  ;;  %v4754_v45 = vadd.f32 %v18421_v6, %v4028_v13  ;;  %v15087_v26 = vpop.f32.mrf.mxu1  ;;  %v18431_v13 = vld [vmem:[#allocation17_spill] sm:$0xff] }
 0x208   : > { %v12525_v55 = vpop.f32.mrf.mxu0 }
 0x209   : > { %v5317_v21 = vmul.f32 %v14995_v24, %v14995_v24  ;;  %v15020_v11 = vadd.f32 %v12525_v55, %v4749_v34  ;;  %v5248_v40 = vsel %vm690_vm3, %v14995_v24, 0.0  ;;  %v5352_v30 = vsel %vm690_vm3, %v5319_v39, 0.0  ;;  %v18422_v39 = vld [vmem:[#allocation15_spill] sm:$0xff] }
 0x20a   : > { %v5092_v48 = vpop.f32.mrf.mxu0 }
 0x20b   : > { %v15022_v3 = vadd.f32 %v5092_v48, %v4747_v47  ;;  %v5349_v17 = vsel %vm690_vm3, %v5317_v21, 0.0  ;;  %v5320_v8 = vmul.f32 %v15020_v11, %v15020_v11  ;;  %v5253_v61 = vsel %vm690_vm3, %v15020_v11, 0.0  ;;  %v18419_v48 = vld [vmem:[#allocation9_spill] sm:$0xff] }
 0x20c   : > { %v12528_v62 = vpop.f32.mrf.mxu0  ;;  %v3677_v19 = vadd.f32 %v18419_v48, %v18418_v59  ;;  %v18420_v21 = vld [vmem:[#allocation13_spill] sm:$0xff]  ;;  %v18432_v59 = vld [vmem:[#allocation54_spill] sm:$0xff] }
 0x20d   : > { %v5249_v12 = vsel %vm690_vm3, %v15022_v3, 0.0  ;;  %v5318_v0 = vmul.f32 %v15022_v3, %v15022_v3  ;;  %v5354_v32 = vsel %vm690_vm3, %v5320_v8, 0.0  ;;  %v15064_v37 = vadd.f32 %v12528_v62, %v4752_v7 }
 0x20e   : > { %v5250_v44 = vadd.f32 %v5249_v12, %v5248_v40  ;;  %v5105_v20 = vpop.f32.mrf.mxu0  ;;  %v15081_v58 = vadd.f32 %v18420_v21, %v3208_v22  ;;  %v15085_v40 = vadd.f32 %v18422_v39, %v2490_v38  ;;  %v18423_v22 = vld [vmem:[#allocation32_spill] sm:$0xff]  ;;  %v18425_v38 = vld [vmem:[#allocation25_spill] sm:$0xff] }
 0x20f   : > { %v5350_v56 = vsel %vm690_vm3, %v5318_v0, 0.0  ;;  %v15056_v57 = vadd.f32 %v5105_v20, %v4750_v27  ;;  %v5323_v12 = vmul.f32 %v15064_v37, %v15064_v37  ;;  %v18426_v20 = vld [vmem:[#allocation43_spill] sm:$0xff] }
 0x210   : > { %v5252_v15 = vadd.f32 %v5251_v35, %v5250_v44  ;;  %v5351_v42 = vadd.f32 %v5350_v56, %v5349_v17  ;;  %v12529_v31 = vpop.f32.mrf.mxu0  ;;  %v4029_v44 = vadd.f32 %v18423_v22, %v3670_v41  ;;  %v18424_v35 = vld [vmem:[#allocation33_spill] sm:$0xff]  ;;  %v4756_v51 = vadd.f32 %v18426_v20, %v18425_v38  ;;  %v18434_v22 = vld [vmem:[#allocation35_spill] sm:$0xff] }
 0x211   : > { %v5255_v23 = vsel %vm690_vm3, %v15056_v57, 0.0  ;;  %v5321_v16 = vmul.f32 %v15056_v57, %v15056_v57  ;;  %v15074_v34 = vadd.f32 %v12529_v31, %v4753_v10  ;;  %v4032_v17 = vadd.f32 %v18424_v35, %v3673_v5  ;;  %v18428_v31 = vld [vmem:[#allocation49_spill] sm:$0xff]  ;;  %v18429_v10 = vld [vmem:[#allocation51_spill] sm:$0xff] }
 0x212   : > { %v5353_v43 = vadd.f32 %v5352_v30, %v5351_v42  ;;  %v5254_v18 = vadd.f32 %v5253_v61, %v5252_v15  ;;  %v5108_v29 = vpop.f32.mrf.mxu0  ;;  %v5259_v15 = vsel %vm690_vm3, %v15064_v37, 0.0  ;;  %v18427_v61 = vld [vmem:[#allocation27_spill] sm:$0xff]  ;;  %v4755_v5 = vadd.f32 %v18429_v10, %v4029_v44 }
 0x213   : > { %v5356_v55 = vsel %vm690_vm3, %v5321_v16, 0.0  ;;  %v15076_v47 = vadd.f32 %v5108_v29, %v4751_v60  ;;  %v5324_v42 = vmul.f32 %v15074_v34, %v15074_v34  ;;  %v4757_v41 = vadd.f32 %v18428_v31, %v18427_v61  ;;  %v18437_v61 = vld [vmem:[#allocation38_spill] sm:$0xff] }
 0x214   : > { %v5256_v1 = vadd.f32 %v5255_v23, %v5254_v18  ;;  %v5355_v54 = vadd.f32 %v5354_v32, %v5353_v43  ;;  %v12532_v52 = vpop.f32.mrf.mxu0  ;;  %v15109_v18 = vpop.f32.mrf.mxu1  ;;  %v5360_v32 = vsel %vm690_vm3, %v5323_v12, 0.0  ;;  %v5261_v23 = vsel %vm690_vm3, %v15074_v34, 0.0 }
 0x215   : > { %v5257_v0 = vsel %vm690_vm3, %v15076_v47, 0.0  ;;  %v5322_v62 = vmul.f32 %v15076_v47, %v15076_v47  ;;  %v15114_v16 = vadd.f32 %v12532_v52, %v4756_v51  ;;  %v4758_v48 = vadd.f32 %v18432_v59, %v4032_v17 }
 0x216   : > { %v5357_v28 = vadd.f32 %v5356_v55, %v5355_v54  ;;  %v5121_v27 = vpop.f32.mrf.mxu0  ;;  %v5258_v8 = vadd.f32 %v5257_v0, %v5256_v1  ;;  %v3681_v1 = vadd.f32 %v18431_v13, %v18430_v49  ;;  %v5362_v21 = vsel %vm690_vm3, %v5324_v42, 0.0  ;;  %v15136_v35 = vpop.f32.mrf.mxu1 }
 0x217   : > { %v15097_v56 = vadd.f32 %v5121_v27, %v4754_v45  ;;  %v5358_v7 = vsel %vm690_vm3, %v5322_v62, 0.0  ;;  %v18433_v62 = vld [vmem:[#allocation14_spill] sm:$0xff]  ;;  %v4033_v44 = vadd.f32 %v18434_v22, %v3674_v50  ;;  %v5327_v17 = vmul.f32 %v15114_v16, %v15114_v16 }
 0x218   : > { %v12533_v30 = vpop.f32.mrf.mxu0  ;;  %v5260_v60 = vadd.f32 %v5259_v15, %v5258_v8  ;;  %v5359_v43 = vadd.f32 %v5358_v7, %v5357_v28  ;;  %v15133_v27 = vadd.f32 %v18433_v62, %v3212_v33  ;;  %v18435_v7 = vld [vmem:[#allocation30_spill] sm:$0xff]  ;;  %v4036_v31 = vadd.f32 %v18437_v61, %v3677_v19  ;;  %v15154_v49 = vpop.f32.mrf.mxu1 }
 0x219   : > { %v5325_v29 = vmul.f32 %v15097_v56, %v15097_v56  ;;  %v5263_v6 = vsel %vm690_vm3, %v15097_v56, 0.0  ;;  %v15126_v52 = vadd.f32 %v12533_v30, %v4757_v41  ;;  %v18436_v30 = vld [vmem:[#allocation52_spill] sm:$0xff]  ;;  %v5267_v50 = vsel %vm690_vm3, %v15114_v16, 0.0 }
 0x21a   : > { %v5124_v9 = vpop.f32.mrf.mxu0  ;;  %v5361_v54 = vadd.f32 %v5360_v32, %v5359_v43  ;;  %v5262_v14 = vadd.f32 %v5261_v23, %v5260_v60  ;;  %v4760_v33 = vadd.f32 %v18436_v30, %v18435_v7  ;;  %v18439_v60 = vld [vmem:[#allocation57_spill] sm:$0xff]  ;;  %v18440_v32 = vld [vmem:[#allocation59_spill] sm:$0xff]  ;;  %v5368_v13 = vsel %vm690_vm3, %v5327_v17, 0.0  ;;  %v15185_v30 = vpop.f32.mrf.mxu1 }
 0x21b   : > { %v15120_v55 = vadd.f32 %v5124_v9, %v4755_v5  ;;  %v5364_v8 = vsel %vm690_vm3, %v5325_v29, 0.0  ;;  %v5328_v41 = vmul.f32 %v15126_v52, %v15126_v52  ;;  %v18438_v5 = vld [vmem:[#allocation31_spill] sm:$0xff]  ;;  %v4759_v23 = vadd.f32 %v18440_v32, %v4033_v44 }
 0x21c   : > { %v12536_v45 = vpop.f32.mrf.mxu0  ;;  %v5264_v28 = vadd.f32 %v5263_v6, %v5262_v14  ;;  %v5363_v39 = vadd.f32 %v5362_v21, %v5361_v54  ;;  %v4761_v43 = vadd.f32 %v18439_v60, %v18438_v5  ;;  %v5269_v19 = vsel %vm690_vm3, %v15126_v52, 0.0  ;;  %v18442_v21 = vld [vmem:[#allocation18_spill] sm:$0xff]  ;;  %v18445_v60 = vld [vmem:[#allocation37_spill] sm:$0xff] }
 0x21d   : > { %v5265_v12 = vsel %vm690_vm3, %v15120_v55, 0.0  ;;  %v5326_v0 = vmul.f32 %v15120_v55, %v15120_v55  ;;  %v15159_v54 = vadd.f32 %v12536_v45, %v4760_v33  ;;  %v5370_v62 = vsel %vm690_vm3, %v5328_v41, 0.0 }
 0x21e   : > { %v5137_v38 = vpop.f32.mrf.mxu0  ;;  %v5365_v20 = vadd.f32 %v5364_v8, %v5363_v39  ;;  %v5266_v51 = vadd.f32 %v5265_v12, %v5264_v28 }
 0x21f   : > { %v5366_v15 = vsel %vm690_vm3, %v5326_v0, 0.0  ;;  %v15142_v42 = vadd.f32 %v5137_v38, %v4758_v48  ;;  %v18441_v48 = vld [vmem:[#allocation10_spill] sm:$0xff]  ;;  %v4762_v0 = vadd.f32 %v14993_v53, %v4036_v31  ;;  %v18444_v53 = vld [vmem:[#allocation40_spill] sm:$0xff]  ;;  %v5331_v33 = vmul.f32 %v15159_v54, %v15159_v54 }
 0x220   : > { %v12537_v10 = vpop.f32.mrf.mxu0  ;;  %v5268_v29 = vadd.f32 %v5267_v50, %v5266_v51  ;;  %v5367_v9 = vadd.f32 %v5366_v15, %v5365_v20  ;;  %v15165_v6 = vadd.f32 %v18442_v21, %v18441_v48  ;;  %v18443_v51 = vld [vmem:[#allocation23_spill] sm:$0xff]  ;;  %v4037_v7 = vadd.f32 %v18444_v53, %v15081_v58  ;;  %v15203_v48 = vpop.f32.mrf.mxu1 }
 0x221   : > { %v5329_v14 = vmul.f32 %v15142_v42, %v15142_v42  ;;  %v5271_v45 = vsel %vm690_vm3, %v15142_v42, 0.0  ;;  %v15173_v22 = vadd.f32 %v12537_v10, %v4761_v43  ;;  %v15181_v15 = vadd.f32 %v18443_v51, %v15010_v63  ;;  %v18446_v43 = vld [vmem:[#allocation42_spill] sm:$0xff]  ;;  %v6032_v51 = vld [vmem:[%s18231_s3] sm:$0x3] }
 0x222   : > { %v5140_v59 = vpop.f32.mrf.mxu0  ;;  %v5369_v28 = vadd.f32 %v5368_v13, %v5367_v9  ;;  %v5270_v39 = vadd.f32 %v5269_v19, %v5268_v29  ;;  %v4764_v63 = vadd.f32 %v14974_v25, %v18445_v60  ;;  %v4040_v32 = vadd.f32 %v18446_v43, %v3681_v1  ;;  %v18447_v9 = vld [vmem:[#allocation39_spill] sm:$0xff]  ;;  %12869 = vmatprep.subr.msk.bf16.mxu1 %vm739_vm0, %v6032_v51 }
 0x223   : > { %v15167_v12 = vadd.f32 %v5140_v59, %v4759_v23  ;;  %v5372_v61 = vsel %vm690_vm3, %v5329_v14, 0.0  ;;  %v5275_v58 = vsel %vm690_vm3, %v15159_v54, 0.0  ;;  %v5332_v23 = vmul.f32 %v15173_v22, %v15173_v22 }
 0x224   : > { %v12540_v44 = vpop.f32.mrf.mxu0  ;;  %v5272_v17 = vadd.f32 %v5271_v45, %v5270_v39  ;;  %v5371_v8 = vadd.f32 %v5370_v62, %v5369_v28  ;;  %v4765_v13 = vadd.f32 %v15016_v4, %v18447_v9  ;;  %v4763_v19 = vadd.f32 %v15040_v2, %v4037_v7 }
 0x225   : > { %v5273_v38 = vsel %vm690_vm3, %v15167_v12, 0.0  ;;  %v5330_v20 = vmul.f32 %v15167_v12, %v15167_v12  ;;  %v5376_v25 = vsel %vm690_vm3, %v5331_v33, 0.0  ;;  %v5277_v1 = vsel %vm690_vm3, %v15173_v22, 0.0 }
 0x226   : > { %v5153_v31 = vpop.f32.mrf.mxu0  ;;  %v5373_v50 = vadd.f32 %v5372_v61, %v5371_v8  ;;  %v5274_v41 = vadd.f32 %v5273_v38, %v5272_v17  ;;  %v15208_v21 = vadd.f32 %v12540_v44, %v4764_v63  ;;  %v4766_v17 = vadd.f32 %v15087_v26, %v4040_v32  ;;  %v15237_v61 = vld [vmem:[%s18231_s3 + $0x4] sm:$0x3] }
 0x227   : > { %v5374_v10 = vsel %vm690_vm3, %v5330_v20, 0.0  ;;  %v15191_v5 = vadd.f32 %v5153_v31, %v4762_v0  ;;  %v18448_v0 = vld [vmem:[#allocation45_spill] sm:$0xff]  ;;  %v5378_v8 = vsel %vm690_vm3, %v5332_v23, 0.0  ;;  %v4718_v31 = vpop.f32.mrf.mxu1  ;;  %v6162_v60 = vsel %vm739_vm0, %v6032_v51, 0 }
 0x228   : > { %v12541_v29 = vpop.f32.mrf.mxu0  ;;  %v5276_v14 = vadd.f32 %v5275_v58, %v5274_v41  ;;  %v5375_v59 = vadd.f32 %v5374_v10, %v5373_v50  ;;  %v4041_v4 = vadd.f32 %v18448_v0, %v15133_v27  ;;  %v11541_v27 = vld [vmem:[%s18231_s3 + $0x2] sm:$0x3]  ;;  %v5335_v50 = vmul.f32 %v15208_v21, %v15208_v21  ;;  %12555 = vmatpush3.bf16.msra.mxu1 %v6162_v60  ;;  %v18452_v51 = vld [vmem:[#allocation21_spill] sm:$0xff] }
 0x229   : > { %v5333_v28 = vmul.f32 %v15191_v5, %v15191_v5  ;;  %v5279_v38 = vsel %vm690_vm3, %v15191_v5, 0.0  ;;  %v15220_v44 = vadd.f32 %v12541_v29, %v4765_v13  ;;  %12870 = vmatprep.subr.msk.bf16.mxu0 %vm739_vm0, %v11541_v27  ;;  %v6888_v63 = vsel %vm739_vm0, %v11541_v27, 0  ;;  %v18449_v29 = vld [vmem:[#allocation41_spill] sm:$0xff]  ;;  %v18450_v13 = vld [vmem:[#allocation48_spill] sm:$0xff]  ;;  %12871 = vmatprep.subr.msk.bf16.mxu1 %vm739_vm0, %v15237_v61 }
 0x22a   : > { %v5156_v39 = vpop.f32.mrf.mxu0  ;;  %v5377_v62 = vadd.f32 %v5376_v25, %v5375_v59  ;;  %v5278_v2 = vadd.f32 %v5277_v1, %v5276_v14  ;;  %12589 = vmatpush3.bf16.msra.mxu0 %v6888_v63  ;;  %v4768_v9 = vadd.f32 %v15061_v46, %v18449_v29  ;;  %v5283_v14 = vsel %vm690_vm3, %v15208_v21, 0.0  ;;  %v18451_v1 = vld [vmem:[#allocation44_spill] sm:$0xff] }
 0x22b   : > { %v15214_v45 = vadd.f32 %v5156_v39, %v4763_v19  ;;  %v5380_v41 = vsel %vm690_vm3, %v5333_v28, 0.0  ;;  %v4044_v19 = vadd.f32 %v18450_v13, %v15165_v6  ;;  %v5336_v59 = vmul.f32 %v15220_v44, %v15220_v44  ;;  %v18453_v60 = vld [vmem:[#allocation16_spill] sm:$0xff] }
 0x22c   : > { %v12544_v20 = vpop.f32.mrf.mxu0  ;;  %v5280_v53 = vadd.f32 %v5279_v38, %v5278_v2  ;;  %v5379_v7 = vadd.f32 %v5378_v8, %v5377_v62  ;;  %v4769_v28 = vadd.f32 %v15109_v18, %v18451_v1  ;;  %v4767_v39 = vadd.f32 %v15136_v35, %v4041_v4  ;;  %v15260_v62 = vpop.f32.mrf.mxu1  ;;  %v18454_v63 = vld [vmem:[#allocation24_spill] sm:$0xff]  ;;  %v18456_v1 = vld [vmem:[#allocation47_spill] sm:$0xff] }
 0x22d   : > { %v5281_v26 = vsel %vm690_vm3, %v15214_v45, 0.0  ;;  %v5334_v33 = vmul.f32 %v15214_v45, %v15214_v45  ;;  %v5384_v6 = vsel %vm690_vm3, %v5335_v50, 0.0  ;;  %v5285_v2 = vsel %vm690_vm3, %v15220_v44, 0.0 }
 0x22e   : > { %v5169_v10 = vpop.f32.mrf.mxu0  ;;  %v5381_v43 = vadd.f32 %v5380_v41, %v5379_v7  ;;  %v5282_v32 = vadd.f32 %v5281_v26, %v5280_v53  ;;  %v3686_v18 = vadd.f32 %v18452_v51, %v15085_v40  ;;  %v4770_v53 = vadd.f32 %v15185_v30, %v4044_v19  ;;  %v18455_v30 = vld [vmem:[#allocation53_spill] sm:$0xff] }
 0x22f   : > { %v5382_v58 = vsel %vm690_vm3, %v5334_v33, 0.0  ;;  %v15245_v23 = vadd.f32 %v5169_v10, %v4766_v17  ;;  %v15265_v17 = vadd.f32 %v12544_v20, %v4768_v9  ;;  %v5386_v7 = vsel %vm690_vm3, %v5336_v59, 0.0 }
 0x230   : > { %v12545_v25 = vpop.f32.mrf.mxu0  ;;  %v5284_v0 = vadd.f32 %v5283_v14, %v5282_v32  ;;  %v5383_v46 = vadd.f32 %v5382_v58, %v5381_v43  ;;  %v3689_v43 = vadd.f32 %v18454_v63, %v18453_v60  ;;  %v4045_v32 = vadd.f32 %v18455_v30, %v3686_v18  ;;  %v4731_v58 = vpop.f32.mrf.mxu1 }
 0x231   : > { %v5337_v8 = vmul.f32 %v15245_v23, %v15245_v23  ;;  %v5287_v26 = vsel %vm690_vm3, %v15245_v23, 0.0  ;;  %v15277_v20 = vadd.f32 %v12545_v25, %v4769_v28  ;;  %v5339_v29 = vmul.f32 %v15265_v17, %v15265_v17 }
 0x232   : > { %v5172_v38 = vpop.f32.mrf.mxu0  ;;  %v5385_v27 = vadd.f32 %v5384_v6, %v5383_v46  ;;  %v5286_v35 = vadd.f32 %v5285_v2, %v5284_v0  ;;  %v4772_v28 = vadd.f32 %v15154_v49, %v18456_v1  ;;  %v5291_v46 = vsel %vm690_vm3, %v15265_v17, 0.0 }
 0x233   : > { %v15271_v4 = vadd.f32 %v5172_v38, %v4767_v39  ;;  %v5388_v9 = vsel %vm690_vm3, %v5337_v8, 0.0  ;;  %v18457_v39 = vld [vmem:[#allocation56_spill] sm:$0xff]  ;;  %v5340_v6 = vmul.f32 %v15277_v20, %v15277_v20  ;;  %v18458_v8 = vld [vmem:[#allocation50_spill] sm:$0xff]  ;;  %v4771_v51 = vadd.f32 %v4718_v31, %v4045_v32 }
 0x234   : > { %v12548_v33 = vpop.f32.mrf.mxu0  ;;  %v5288_v50 = vadd.f32 %v5287_v26, %v5286_v35  ;;  %v5387_v41 = vadd.f32 %v5386_v7, %v5385_v27  ;;  %v4048_v0 = vadd.f32 %v18457_v39, %v3689_v43  ;;  %v4773_v38 = vadd.f32 %v15203_v48, %v18458_v8  ;;  %v12519_v35 = vpop.f32.mrf.mxu1 }
 0x235   : > { %v5289_v10 = vsel %vm690_vm3, %v15271_v4, 0.0  ;;  %v5338_v40 = vmul.f32 %v15271_v4, %v15271_v4  ;;  %v5293_v49 = vsel %vm690_vm3, %v15277_v20, 0.0  ;;  %v15304_v7 = vadd.f32 %v12548_v33, %v4772_v28 }
 0x236   : > { %v5185_v13 = vpop.f32.mrf.mxu0  ;;  %v5389_v19 = vadd.f32 %v5388_v9, %v5387_v41  ;;  %v5290_v14 = vadd.f32 %v5289_v10, %v5288_v50  ;;  %v18459_v41 = vld [vmem:[#allocation26_spill] sm:$0xff]  ;;  %v4774_v60 = vadd.f32 %v4731_v58, %v4048_v0  ;;  %v5394_v63 = vsel %vm690_vm3, %v5340_v6, 0.0  ;;  %v18461_v6 = vld [vmem:[#allocation55_spill] sm:$0xff] }
 0x237   : > { %v5390_v59 = vsel %vm690_vm3, %v5338_v40, 0.0  ;;  %v15290_v25 = vadd.f32 %v5185_v13, %v4770_v53  ;;  %v5392_v53 = vsel %vm690_vm3, %v5339_v29, 0.0  ;;  %v3690_v10 = vadd.f32 %v18459_v41, %v15181_v15  ;;  %v18460_v13 = vld [vmem:[#allocation60_spill] sm:$0xff] }
 0x238   : > { %v12549_v2 = vpop.f32.mrf.mxu0  ;;  %v5292_v18 = vadd.f32 %v5291_v46, %v5290_v14  ;;  %v5391_v27 = vadd.f32 %v5390_v59, %v5389_v19  ;;  %v4734_v14 = vpop.f32.mrf.mxu1  ;;  %v5343_v58 = vmul.f32 %v15304_v7, %v15304_v7  ;;  %v5299_v8 = vsel %vm690_vm3, %v15304_v7, 0.0 }
 0x239   : > { %v5341_v26 = vmul.f32 %v15290_v25, %v15290_v25  ;;  %v5295_v43 = vsel %vm690_vm3, %v15290_v25, 0.0  ;;  %v15315_v30 = vadd.f32 %v12549_v2, %v4773_v38  ;;  %v4049_v19 = vadd.f32 %v18460_v13, %v3690_v10 }
 0x23a   : > { %v5188_v50 = vpop.f32.mrf.mxu0  ;;  %v5393_v40 = vadd.f32 %v5392_v53, %v5391_v27  ;;  %v5294_v48 = vadd.f32 %v5293_v49, %v5292_v18  ;;  %v4776_v2 = vadd.f32 %v15260_v62, %v18461_v6  ;;  %v18462_v18 = vld [vmem:[#allocation58_spill] sm:$0xff] }
 0x23b   : > { %v15310_v31 = vadd.f32 %v5188_v50, %v4771_v51  ;;  %v5396_v59 = vsel %vm690_vm3, %v5341_v26, 0.0  ;;  %v5344_v38 = vmul.f32 %v15315_v30, %v15315_v30  ;;  %v4777_v27 = vadd.f32 %v12519_v35, %v18462_v18 }
 0x23c   : > { %v12552_v33 = vpop.f32.mrf.mxu0  ;;  %v5296_v32 = vadd.f32 %v5295_v43, %v5294_v48  ;;  %v5395_v29 = vadd.f32 %v5394_v63, %v5393_v40  ;;  %v4775_v53 = vadd.f32 %v4734_v14, %v4049_v19  ;;  %v5400_v50 = vsel %vm690_vm3, %v5343_v58, 0.0 }
 0x23d   : > { %v5297_v9 = vsel %vm690_vm3, %v15310_v31, 0.0  ;;  %v5342_v15 = vmul.f32 %v15310_v31, %v15310_v31  ;;  %v5301_v41 = vsel %vm690_vm3, %v15315_v30, 0.0  ;;  %v15338_v10 = vadd.f32 %v12552_v33, %v4776_v2 }
 0x23e   : > { %v5201_v1 = vpop.f32.mrf.mxu0  ;;  %v5397_v28 = vadd.f32 %v5396_v59, %v5395_v29  ;;  %v5298_v39 = vadd.f32 %v5297_v9, %v5296_v32  ;;  %v5402_v35 = vsel %vm690_vm3, %v5344_v38, 0.0 }
 0x23f   : > { %v5398_v0 = vsel %vm690_vm3, %v5342_v15, 0.0  ;;  %v15326_v46 = vadd.f32 %v5201_v1, %v4774_v60  ;;  %v5347_v13 = vmul.f32 %v15338_v10, %v15338_v10  ;;  %v5307_v1 = vsel %vm690_vm3, %v15338_v10, 0.0 }
 0x240   : > { %v12553_v51 = vpop.f32.mrf.mxu0  ;;  %v5300_v49 = vadd.f32 %v5299_v8, %v5298_v39  ;;  %v5399_v26 = vadd.f32 %v5398_v0, %v5397_v28 }
 0x241   : > { %v5345_v62 = vmul.f32 %v15326_v46, %v15326_v46  ;;  %v5303_v43 = vsel %vm690_vm3, %v15326_v46, 0.0  ;;  %v15347_v32 = vadd.f32 %v12553_v51, %v4777_v27  ;;  %v5408_v6 = vsel %vm690_vm3, %v5347_v13, 0.0 }
 0x242   : > { %v5204_v40 = vpop.f32.mrf.mxu0  ;;  %v5401_v48 = vadd.f32 %v5400_v50, %v5399_v26  ;;  %v5302_v60 = vadd.f32 %v5301_v41, %v5300_v49 }
 0x243   : > { %v15342_v63 = vadd.f32 %v5204_v40, %v4775_v53  ;;  %v5404_v19 = vsel %vm690_vm3, %v5345_v62, 0.0  ;;  %v5348_v28 = vmul.f32 %v15347_v32, %v15347_v32  ;;  %v5309_v2 = vsel %vm690_vm3, %v15347_v32, 0.0 }
 0x244   : > { %v5304_v29 = vadd.f32 %v5303_v43, %v5302_v60  ;;  %v5403_v9 = vadd.f32 %v5402_v35, %v5401_v48 }
 0x245   : > { %v5305_v33 = vsel %vm690_vm3, %v15342_v63, 0.0  ;;  %v5346_v15 = vmul.f32 %v15342_v63, %v15342_v63  ;;  %v5410_v51 = vsel %vm690_vm3, %v5348_v28, 0.0 }
 0x246   : > { %v5405_v14 = vadd.f32 %v5404_v19, %v5403_v9  ;;  %v5306_v58 = vadd.f32 %v5305_v33, %v5304_v29 }
 0x247   : > { %v5406_v59 = vsel %vm690_vm3, %v5346_v15, 0.0 }
 0x248   : > { %v5308_v39 = vadd.f32 %v5307_v1, %v5306_v58  ;;  %v5407_v0 = vadd.f32 %v5406_v59, %v5405_v14 }
 0x24a   : > { %v5310_v8 = vadd.f32 %v5309_v2, %v5308_v39  ;;  %v5409_v38 = vadd.f32 %v5408_v6, %v5407_v0 }
 0x24c   : > { %v5311_v18 = vrot.slane %v5310_v8, 4  ;;  %v5411_v27 = vadd.f32 %v5410_v51, %v5409_v38 }
 0x24e   : > { %v5312_v53 = vadd.f32 %v5311_v18, %v5310_v8  ;;  %v5412_v49 = vrot.slane %v5411_v27, 4 }
 0x250   : > { %v5313_v26 = vrot.slane %v5312_v53, 2  ;;  %v5413_v50 = vadd.f32 %v5412_v49, %v5411_v27 }
 0x252   : > { %v5314_v41 = vadd.f32 %v5313_v26, %v5312_v53  ;;  %v5414_v62 = vrot.slane %v5413_v50, 2 }
 0x254   : > { %v5315_v40 = vrot.slane %v5314_v41, 1  ;;  %v5415_v48 = vadd.f32 %v5414_v62, %v5413_v50 }
 0x256   : > { %v5316_v60 = vadd.f32 %v5315_v40, %v5314_v41  ;;  %v5416_v35 = vrot.slane %v5415_v48, 1 }
 0x258   : > { %v5417_v43 = vadd.f32 %v5416_v35, %v5415_v48  ;;  %v15365_v29 = vmul.f32 0.00390625, %v5316_v60 }
 0x25a   : > { %v5419_v9 = vmul.f32 0.00390625, %v5417_v43  ;;  %v5420_v33 = vmul.f32 %v15365_v29, %v15365_v29  ;;  %v5450_v15 = vsub.f32 %v15326_v46, %v15365_v29  ;;  %v5451_v13 = vsub.f32 %v15342_v63, %v15365_v29 }
 0x25b   : > { %v5434_v58 = vsub.f32 %v15142_v42, %v15365_v29  ;;  %v5435_v59 = vsub.f32 %v15167_v12, %v15365_v29  ;;  %v5436_v1 = vsub.f32 %v15159_v54, %v15365_v29  ;;  %v5437_v28 = vsub.f32 %v15173_v22, %v15365_v29 }
 0x25c   : > { %v5421_v19 = vsub.f32 %v5419_v9, %v5420_v33  ;;  %v5438_v46 = vsub.f32 %v15191_v5, %v15365_v29  ;;  %v5439_v63 = vsub.f32 %v15214_v45, %v15365_v29  ;;  %v5440_v39 = vsub.f32 %v15208_v21, %v15365_v29 }
 0x25d   : > { %v5441_v42 = vsub.f32 %v15220_v44, %v15365_v29  ;;  %v5442_v12 = vsub.f32 %v15245_v23, %v15365_v29  ;;  %v5443_v54 = vsub.f32 %v15271_v4, %v15365_v29  ;;  %v5444_v22 = vsub.f32 %v15265_v17, %v15365_v29 }
 0x25e   : > { %v5454_v14 = vadd.f32 1e-05, %v5421_v19  ;;  %v5445_v5 = vsub.f32 %v15277_v20, %v15365_v29  ;;  %v5446_v45 = vsub.f32 %v15290_v25, %v15365_v29  ;;  %v5447_v21 = vsub.f32 %v15310_v31, %v15365_v29 }
 0x25f   : > { %v5448_v44 = vsub.f32 %v15304_v7, %v15365_v29  ;;  %v5449_v23 = vsub.f32 %v15315_v30, %v15365_v29  ;;  %v5452_v4 = vsub.f32 %v15338_v10, %v15365_v29  ;;  %v5453_v17 = vsub.f32 %v15347_v32, %v15365_v29 }
 0x260   : > { %12983 = vrsqrt.f32 %v5454_v14  ;;  %v15411_v20 = vsel %vm739_vm0, %v15237_v61, 0  ;;  %v5422_v25 = vsub.f32 %v14995_v24, %v15365_v29  ;;  %v5423_v7 = vsub.f32 %v15022_v3, %v15365_v29 }
 0x261   : > { %18463 = vst [vmem:[#allocation5_spill] sm:$0xff] %v15411_v20  ;;  %v5424_v31 = vsub.f32 %v15006_v36, %v15365_v29  ;;  %v5425_v30 = vsub.f32 %v15020_v11, %v15365_v29  ;;  %v5426_v10 = vsub.f32 %v15056_v57, %v15365_v29  ;;  %v5427_v32 = vsub.f32 %v15076_v47, %v15365_v29 }
 0x262   : > { %v5428_v61 = vsub.f32 %v15064_v37, %v15365_v29  ;;  %v5429_v24 = vsub.f32 %v15074_v34, %v15365_v29  ;;  %v5430_v3 = vsub.f32 %v15097_v56, %v15365_v29  ;;  %v5431_v36 = vsub.f32 %v15120_v55, %v15365_v29 }
 0x263   : > { %v5432_v11 = vsub.f32 %v15114_v16, %v15365_v29  ;;  %v5433_v57 = vsub.f32 %v15126_v52, %v15365_v29 }
 0x26d   : > { %v12984_v0 = vpop.eup %12983 }
 0x26e   : > { %v5484_v47 = vmul.f32 %v12984_v0, %v5450_v15  ;;  %v5485_v6 = vmul.f32 %v12984_v0, %v5451_v13  ;;  %v15437_v2 = vmul.f32 %v12984_v0, %v5422_v25  ;;  %v15439_v37 = vmul.f32 %v12984_v0, %v5423_v7  ;;  %v11623_v15 = vld [vmem:[%s18231_s3 + $0x6] sm:$0x3] }
 0x26f   : > { %v15441_v34 = vmul.f32 %v12984_v0, %v5424_v31  ;;  %v15443_v8 = vmul.f32 %v12984_v0, %v5425_v30  ;;  %v15445_v56 = vmul.f32 %v12984_v0, %v5426_v10  ;;  %v15447_v38 = vmul.f32 %v12984_v0, %v5427_v32  ;;  %12872 = vmatprep.subr.msk.bf16.mxu0 %vm739_vm0, %v11623_v15 }
 0x270   : > { %v5516_v55 = vmax.f32 %v5484_v47, 0.0  ;;  %v5517_v51 = vmax.f32 %v5485_v6, 0.0  ;;  %v15449_v16 = vmul.f32 %v12984_v0, %v5428_v61  ;;  %v15451_v18 = vmul.f32 %v12984_v0, %v5429_v24 }
 0x271   : > { %v15453_v52 = vmul.f32 %v12984_v0, %v5430_v3  ;;  %v15455_v27 = vmul.f32 %v12984_v0, %v5431_v36  ;;  %v15457_v53 = vmul.f32 %v12984_v0, %v5432_v11  ;;  %v15459_v49 = vmul.f32 %v12984_v0, %v5433_v57 }
 0x272   : > { %v5534_v26 = vpack.c.bf16 %v5517_v51, %v5516_v55  ;;  %v15461_v50 = vmul.f32 %v12984_v0, %v5434_v58  ;;  %v15463_v41 = vmul.f32 %v12984_v0, %v5435_v59  ;;  %v15465_v62 = vmul.f32 %v12984_v0, %v5436_v1 }
 0x273   : > { %v15467_v40 = vmul.f32 %v12984_v0, %v5437_v28  ;;  %v15469_v48 = vmul.f32 %v12984_v0, %v5438_v46  ;;  %v15471_v60 = vmul.f32 %v12984_v0, %v5439_v63  ;;  %v15473_v35 = vmul.f32 %v12984_v0, %v5440_v39 }
 0x274   : > { %v5579_v43 = vshrl.u32 %v5534_v26, 16  ;;  %v5657_v29 = vshll.u32 %v5534_v26, 16  ;;  %v15475_v9 = vmul.f32 %v12984_v0, %v5441_v42  ;;  %v15477_v33 = vmul.f32 %v12984_v0, %v5442_v12 }
 0x275   : > { %v15488_v19 = vmul.f32 %v12984_v0, %v5443_v54  ;;  %v15490_v14 = vmul.f32 %v12984_v0, %v5444_v22  ;;  %v15492_v58 = vmul.f32 %v12984_v0, %v5445_v5  ;;  %v15494_v59 = vmul.f32 %v12984_v0, %v5446_v45 }
 0x276   : > { %v5656_v1 = vrot.slane %v5579_v43, 7  ;;  %v5710_v28 = vrot.slane %v5657_v29, 7  ;;  %v5481_v46 = vmul.f32 %v12984_v0, %v5447_v21  ;;  %v5482_v63 = vmul.f32 %v12984_v0, %v5448_v44 }
 0x277   : > { %v5483_v39 = vmul.f32 %v12984_v0, %v5449_v23  ;;  %v5486_v42 = vmul.f32 %v12984_v0, %v5452_v4  ;;  %v5487_v12 = vmul.f32 %v12984_v0, %v5453_v17  ;;  %v5488_v25 = vmax.f32 %v15437_v2, 0.0 }
 0x278   : > { %v5659_v7 = vor.u32 %v5657_v29, %v5656_v1  ;;  %v5761_v54 = vsel %vm15484_vm12, %v5656_v1, %v5710_v28  ;;  %v5489_v22 = vmax.f32 %v15439_v37, 0.0  ;;  %v5490_v5 = vmax.f32 %v15441_v34, 0.0 }
 0x279   : > { %v11504_v45 = vcombine.low %v5761_v54, %v5761_v54  ;;  %v5491_v31 = vmax.f32 %v15443_v8, 0.0  ;;  %v5492_v30 = vmax.f32 %v15445_v56, 0.0  ;;  %v5493_v21 = vmax.f32 %v15447_v38, 0.0 }
 0x27a   : > { %v5745_v44 = vsel %vm15484_vm12, %v5579_v43, %v5659_v7  ;;  %v5494_v23 = vmax.f32 %v15449_v16, 0.0  ;;  %v5495_v4 = vmax.f32 %v15451_v18, 0.0  ;;  %v5496_v17 = vmax.f32 %v15453_v52, 0.0 }
 0x27b   : > { %v11502_v10 = vcombine.low %v5745_v44, %v5745_v44  ;;  %v11503_v32 = vcombine.high %v5745_v44, %v5745_v44  ;;  %5986 = vst.msk [vmem:[#allocation2 + $0xbc] sm:$0x1] %vm517_vm2, %v11504_v45  ;;  %5992 = vst.msk [vmem:[#allocation2 + $0xd4] sm:$0x1] %vm517_vm2, %v11504_v45  ;;  %v5497_v61 = vmax.f32 %v15455_v27, 0.0  ;;  %v5498_v24 = vmax.f32 %v15457_v53, 0.0 }
 0x27c   : > { %v5499_v0 = vmax.f32 %v15459_v49, 0.0  ;;  %v5500_v3 = vmax.f32 %v15461_v50, 0.0  ;;  %v5501_v36 = vmax.f32 %v15463_v41, 0.0  ;;  %v5502_v11 = vmax.f32 %v15465_v62, 0.0 }
 0x27d   : > { %5990 = vst.msk [vmem:[#allocation2 + $0xcc] sm:$0xf] %vm514_vm1, %v11502_v10  ;;  %5991 = vst.msk [vmem:[#allocation2 + $0xd0] sm:$0xf] %vm514_vm1, %v11503_v32  ;;  %v5503_v57 = vmax.f32 %v15467_v40, 0.0  ;;  %v5504_v47 = vmax.f32 %v15469_v48, 0.0  ;;  %v15532_v53 = vpack.c.bf16 %v5489_v22, %v5488_v25  ;;  %v15534_v49 = vpack.c.bf16 %v5491_v31, %v5490_v5 }
 0x27e   : > { %5984 = vst.msk [vmem:[#allocation2 + $0xb4] sm:$0xf] %vm514_vm1, %v11502_v10  ;;  %5985 = vst.msk [vmem:[#allocation2 + $0xb8] sm:$0xf] %vm514_vm1, %v11503_v32  ;;  %v5505_v6 = vmax.f32 %v15471_v60, 0.0  ;;  %v5506_v2 = vmax.f32 %v15473_v35, 0.0  ;;  %v15536_v26 = vpack.c.bf16 %v5493_v21, %v5492_v30  ;;  %v15538_v50 = vpack.c.bf16 %v5495_v4, %v5494_v23 }
 0x27f   : > { %v5507_v37 = vmax.f32 %v15475_v9, 0.0  ;;  %v5508_v34 = vmax.f32 %v15477_v33, 0.0  ;;  %v5509_v8 = vmax.f32 %v15488_v19, 0.0  ;;  %v5510_v56 = vmax.f32 %v15490_v14, 0.0 }
 0x280   : > { %v5511_v38 = vmax.f32 %v15492_v58, 0.0  ;;  %v5512_v55 = vmax.f32 %v15494_v59, 0.0  ;;  %v5513_v51 = vmax.f32 %v5481_v46, 0.0  ;;  %v5514_v16 = vmax.f32 %v5482_v63, 0.0 }
 0x281   : > { %v5515_v18 = vmax.f32 %v5483_v39, 0.0  ;;  %v5518_v52 = vmax.f32 %v5486_v42, 0.0  ;;  %v5519_v27 = vmax.f32 %v5487_v12, 0.0  ;;  %v15540_v41 = vpack.c.bf16 %v5497_v61, %v5496_v17 }
 0x282   : > { %v15542_v62 = vpack.c.bf16 %v5499_v0, %v5498_v24  ;;  %v15544_v40 = vpack.c.bf16 %v5501_v36, %v5500_v3  ;;  %v15546_v48 = vpack.c.bf16 %v5503_v57, %v5502_v11  ;;  %v15548_v60 = vpack.c.bf16 %v5505_v6, %v5504_v47 }
 0x283   : > { %v15550_v35 = vpack.c.bf16 %v5507_v37, %v5506_v2  ;;  %v15552_v43 = vpack.c.bf16 %v5509_v8, %v5508_v34  ;;  %v15554_v29 = vpack.c.bf16 %v5511_v38, %v5510_v56  ;;  %v15556_v9 = vpack.c.bf16 %v5513_v51, %v5512_v55 }
 0x284   : > { %v15558_v33 = vpack.c.bf16 %v5515_v18, %v5514_v16  ;;  %v15560_v15 = vpack.c.bf16 %v5519_v27, %v5518_v52  ;;  %v18263_v19 = vshrl.u32 %v15534_v49, 16  ;;  %v18262_v14 = vshrl.u32 %v15532_v53, 16 }
 0x285   : > { %18466 = vst [vmem:[#allocation12_spill] sm:$0xff] %v15552_v43  ;;  %18467 = vst [vmem:[#allocation20_spill] sm:$0xff] %v15554_v29  ;;  %v18260_v58 = vshrl.u32 %v15536_v26, 16  ;;  %v18259_v59 = vshrl.u32 %v15538_v50, 16  ;;  %v18257_v1 = vshrl.u32 %v15540_v41, 16  ;;  %v18256_v28 = vshrl.u32 %v15542_v62, 16 }
 0x286   : > { %18468 = vst [vmem:[#allocation19_spill] sm:$0xff] %v15556_v9  ;;  %18469 = vst [vmem:[#allocation29_spill] sm:$0xff] %v15558_v33  ;;  %v18254_v46 = vshrl.u32 %v15544_v40, 16  ;;  %v18253_v63 = vshrl.u32 %v15546_v48, 16  ;;  %v18252_v39 = vshrl.u32 %v15548_v60, 16  ;;  %v18255_v42 = vshrl.u32 %v15550_v35, 16 }
 0x287   : > { %18470 = vst [vmem:[#allocation28_spill] sm:$0xff] %v15560_v15  ;;  %v18258_v12 = vshrl.u32 %v15552_v43, 16  ;;  %v18261_v25 = vshrl.u32 %v15554_v29, 16  ;;  %v18266_v7 = vshrl.u32 %v15556_v9, 16  ;;  %v18272_v54 = vshrl.u32 %v15558_v33, 16 }
 0x288   : > { %v18278_v22 = vshrl.u32 %v15560_v15, 16  ;;  %v15579_v5 = vrot.slane %v18263_v19, 7  ;;  %v5601_v45 = vshll.u32 %v15534_v49, 16  ;;  %v15584_v31 = vrot.slane %v18262_v14, 7 }
 0x289   : > { %v5605_v30 = vshll.u32 %v15532_v53, 16  ;;  %v15589_v21 = vrot.slane %v18260_v58, 7  ;;  %v5609_v44 = vshll.u32 %v15536_v26, 16  ;;  %v15594_v23 = vrot.slane %v18259_v59, 7 }
 0x28a   : > { %18471 = vst [vmem:[#allocation34_spill] sm:$0xff] %v15579_v5  ;;  %18472 = vst [vmem:[#allocation36_spill] sm:$0xff] %v15584_v31  ;;  %v5603_v4 = vor.u32 %v5601_v45, %v15579_v5  ;;  %v5613_v17 = vshll.u32 %v15538_v50, 16  ;;  %v15600_v10 = vrot.slane %v18257_v1, 7  ;;  %v5617_v32 = vshll.u32 %v15540_v41, 16 }
 0x28b   : > { %18473 = vst [vmem:[#allocation8_spill] sm:$0xff] %v15589_v21  ;;  %18474 = vst [vmem:[#allocation22_spill] sm:$0xff] %v15594_v23  ;;  %v5607_v61 = vor.u32 %v5605_v30, %v15584_v31  ;;  %v5611_v24 = vor.u32 %v5609_v44, %v15589_v21  ;;  %v15607_v0 = vrot.slane %v18256_v28, 7  ;;  %v5621_v3 = vshll.u32 %v15542_v62, 16 }
 0x28c   : > { %18475 = vst [vmem:[#allocation11_spill] sm:$0xff] %v15600_v10  ;;  %v5615_v36 = vor.u32 %v5613_v17, %v15594_v23  ;;  %v5619_v11 = vor.u32 %v5617_v32, %v15600_v10  ;;  %v15614_v57 = vrot.slane %v18254_v46, 7  ;;  %v5625_v47 = vshll.u32 %v15544_v40, 16 }
 0x28d   : > { %18476 = vst [vmem:[#allocation6_spill] sm:$0xff] %v15607_v0  ;;  %v5623_v6 = vor.u32 %v5621_v3, %v15607_v0  ;;  %v15620_v2 = vrot.slane %v18253_v63, 7  ;;  %v5629_v37 = vshll.u32 %v15546_v48, 16  ;;  %v5632_v34 = vrot.slane %v18252_v39, 7 }
 0x28e   : > { %18477 = vst [vmem:[#allocation9_spill] sm:$0xff] %v15614_v57  ;;  %v5627_v8 = vor.u32 %v5625_v47, %v15614_v57  ;;  %v5633_v56 = vshll.u32 %v15548_v60, 16  ;;  %v5636_v38 = vrot.slane %v18255_v42, 7  ;;  %v5637_v55 = vshll.u32 %v15550_v35, 16 }
 0x28f   : > { %18478 = vst [vmem:[#allocation13_spill] sm:$0xff] %v15620_v2  ;;  %v5631_v51 = vor.u32 %v5629_v37, %v15620_v2  ;;  %v5640_v16 = vrot.slane %v18258_v12, 7  ;;  %v5641_v18 = vshll.u32 %v15552_v43, 16  ;;  %v5644_v52 = vrot.slane %v18261_v25, 7 }
 0x290   : > { %v5635_v27 = vor.u32 %v5633_v56, %v5632_v34  ;;  %v5639_v39 = vor.u32 %v5637_v55, %v5636_v38  ;;  %v5645_v63 = vshll.u32 %v15554_v29, 16  ;;  %v5648_v46 = vrot.slane %v18266_v7, 7 }
 0x291   : > { %v5643_v42 = vor.u32 %v5641_v18, %v5640_v16  ;;  %v5649_v28 = vshll.u32 %v15556_v9, 16  ;;  %v5652_v1 = vrot.slane %v18272_v54, 7  ;;  %v5653_v12 = vshll.u32 %v15558_v33, 16 }
 0x292   : > { %v5647_v59 = vor.u32 %v5645_v63, %v5644_v52  ;;  %v5660_v58 = vrot.slane %v18278_v22, 7  ;;  %v5661_v25 = vshll.u32 %v15560_v15, 16  ;;  %v5696_v14 = vrot.slane %v5601_v45, 7 }
 0x293   : > { %v5651_v19 = vor.u32 %v5649_v28, %v5648_v46  ;;  %v5655_v20 = vor.u32 %v5653_v12, %v5652_v1  ;;  %v5697_v2 = vrot.slane %v5605_v30, 7  ;;  %v5698_v57 = vrot.slane %v5609_v44, 7 }
 0x294   : > { %v5663_v7 = vor.u32 %v5661_v25, %v5660_v58  ;;  %v5699_v0 = vrot.slane %v5613_v17, 7  ;;  %v5700_v10 = vrot.slane %v5617_v32, 7  ;;  %v5701_v23 = vrot.slane %v5621_v3, 7 }
 0x295   : > { %v5702_v21 = vrot.slane %v5625_v47, 7  ;;  %v5703_v31 = vrot.slane %v5629_v37, 7  ;;  %v5704_v54 = vrot.slane %v5633_v56, 7  ;;  %v5705_v5 = vrot.slane %v5637_v55, 7  ;;  %v18493_v47 = vld [vmem:[#allocation19_spill] sm:$0xff] }
 0x296   : > { %v5706_v33 = vrot.slane %v5641_v18, 7  ;;  %v5707_v9 = vrot.slane %v5645_v63, 7  ;;  %v5708_v29 = vrot.slane %v5649_v28, 7  ;;  %v5709_v43 = vrot.slane %v5653_v12, 7  ;;  %v18500_v18 = vld [vmem:[#allocation36_spill] sm:$0xff] }
 0x297   : > { %v5711_v22 = vrot.slane %v5661_v25, 7  ;;  %v18479_v15 = vshrl.u32 %v15534_v49, 16  ;;  %v18480_v30 = vshrl.u32 %v15532_v53, 16  ;;  %v18481_v17 = vshrl.u32 %v15536_v26, 16 }
 0x298   : > { %v18482_v63 = vshrl.u32 %v15538_v50, 16  ;;  %v18483_v49 = vshrl.u32 %v15540_v41, 16  ;;  %v18484_v53 = vshrl.u32 %v15542_v62, 16  ;;  %v18485_v12 = vshrl.u32 %v15544_v40, 16 }
 0x299   : > { %v5731_v45 = vsel %vm15484_vm12, %v18479_v15, %v5603_v4  ;;  %v5732_v44 = vsel %vm15484_vm12, %v18480_v30, %v5607_v61  ;;  %v5733_v32 = vsel %vm15484_vm12, %v18481_v17, %v5611_v24  ;;  %v18486_v25 = vshrl.u32 %v15546_v48, 16  ;;  %v18489_v24 = vld [vmem:[#allocation12_spill] sm:$0xff] }
 0x29a   : > { %v15662_v28 = vsel %vm15484_vm12, %v18482_v63, %v5615_v36  ;;  %v15668_v15 = vsel %vm15484_vm12, %v18483_v49, %v5619_v11  ;;  %v15674_v26 = vsel %vm15484_vm12, %v18484_v53, %v5623_v6  ;;  %v15680_v50 = vsel %vm15484_vm12, %v18485_v12, %v5627_v8  ;;  %v18491_v36 = vld [vmem:[#allocation20_spill] sm:$0xff]  ;;  %v18503_v63 = vld [vmem:[#allocation11_spill] sm:$0xff]  ;;  %v18504_v49 = vld [vmem:[#allocation6_spill] sm:$0xff] }
 0x29b   : > { %v15686_v41 = vsel %vm15484_vm12, %v18486_v25, %v5631_v51  ;;  %v18487_v4 = vshrl.u32 %v15548_v60, 16  ;;  %v18488_v61 = vshrl.u32 %v15550_v35, 16  ;;  %v18490_v3 = vshrl.u32 %v18489_v24, 16  ;;  %v18505_v53 = vld [vmem:[#allocation9_spill] sm:$0xff] }
 0x29c   : > { %v18492_v11 = vshrl.u32 %v18491_v36, 16  ;;  %v18494_v6 = vshrl.u32 %v18493_v47, 16  ;;  %v18506_v12 = vld [vmem:[#allocation13_spill] sm:$0xff]  ;;  %v11464_v25 = vcombine.high %v5732_v44, %v5732_v44  ;;  %v11470_v13 = vcombine.high %v15662_v28, %v15662_v28 }
 0x29d   : > { %v15692_v62 = vsel %vm15484_vm12, %v18487_v4, %v5635_v27  ;;  %v15698_v40 = vsel %vm15484_vm12, %v18488_v61, %v5639_v39  ;;  %v15704_v48 = vsel %vm15484_vm12, %v18490_v3, %v5643_v42  ;;  %v18495_v39 = vld [vmem:[#allocation29_spill] sm:$0xff]  ;;  %v18497_v42 = vld [vmem:[#allocation28_spill] sm:$0xff]  ;;  %v11482_v24 = vcombine.high %v15686_v41, %v15686_v41 }
 0x29e   : > { %v15710_v60 = vsel %vm15484_vm12, %v18492_v11, %v5647_v59  ;;  %v15716_v35 = vsel %vm15484_vm12, %v18494_v6, %v5651_v19  ;;  %v18496_v37 = vshrl.u32 %v18495_v39, 16  ;;  %v18498_v56 = vshrl.u32 %v18497_v42, 16  ;;  %v18499_v59 = vld [vmem:[#allocation34_spill] sm:$0xff]  ;;  %v18501_v27 = vld [vmem:[#allocation8_spill] sm:$0xff]  ;;  %5943 = vst.msk [vmem:[#allocation2 + $0x10] sm:$0xf] %vm514_vm1, %v11464_v25 }
 0x29f   : > { %v5747_v51 = vsel %vm15484_vm12, %v18499_v59, %v5696_v14  ;;  %v5748_v19 = vsel %vm15484_vm12, %v18500_v18, %v5697_v2  ;;  %v5749_v30 = vsel %vm15484_vm12, %v18501_v27, %v5698_v57  ;;  %v5752_v14 = vsel %vm15484_vm12, %v18504_v49, %v5701_v23  ;;  %5952 = vst.msk [vmem:[#allocation2 + $0x34] sm:$0xf] %vm514_vm1, %v11470_v13 }
 0x2a0   : > { %v15722_v8 = vsel %vm15484_vm12, %v18496_v37, %v5655_v20  ;;  %v15728_v55 = vsel %vm15484_vm12, %v18498_v56, %v5663_v7  ;;  %v18502_v20 = vld [vmem:[#allocation22_spill] sm:$0xff]  ;;  %v5751_v7 = vsel %vm15484_vm12, %v18503_v63, %v5700_v10  ;;  %v5753_v2 = vsel %vm15484_vm12, %v18505_v53, %v5702_v21  ;;  %5964 = vst.msk [vmem:[#allocation2 + $0x64] sm:$0xf] %vm514_vm1, %v11482_v24 }
 0x2a1   : > { %v5750_v17 = vsel %vm15484_vm12, %v18502_v20, %v5699_v0  ;;  %v15754_v57 = vsel %vm15484_vm12, %v18506_v12, %v5703_v31  ;;  %v15758_v0 = vsel %vm15484_vm12, %v5632_v34, %v5704_v54  ;;  %v15762_v10 = vsel %vm15484_vm12, %v5636_v38, %v5705_v5 }
 0x2a2   : > { %v15766_v23 = vsel %vm15484_vm12, %v5640_v16, %v5706_v33  ;;  %v15770_v21 = vsel %vm15484_vm12, %v5644_v52, %v5707_v9  ;;  %v15774_v31 = vsel %vm15484_vm12, %v5648_v46, %v5708_v29  ;;  %v15778_v54 = vsel %vm15484_vm12, %v5652_v1, %v5709_v43 }
 0x2a3   : > { %v15782_v5 = vsel %vm15484_vm12, %v5660_v58, %v5711_v22  ;;  %v11460_v34 = vcombine.low %v5731_v45, %v5731_v45  ;;  %v11461_v38 = vcombine.high %v5731_v45, %v5731_v45  ;;  %v11462_v33 = vcombine.low %v5747_v51, %v5747_v51 }
 0x2a4   : > { %v11463_v16 = vcombine.low %v5732_v44, %v5732_v44  ;;  %v11465_v4 = vcombine.low %v5748_v19, %v5748_v19  ;;  %v11466_v9 = vcombine.low %v5733_v32, %v5733_v32  ;;  %v11467_v52 = vcombine.high %v5733_v32, %v5733_v32 }
 0x2a5   : > { %v11468_v61 = vcombine.low %v5749_v30, %v5749_v30  ;;  %5939 = vst.msk [vmem:[#allocation2] sm:$0xf] %vm514_vm1, %v11460_v34  ;;  %5945 = vst.msk [vmem:[#allocation2 + $0x18] sm:$0xf] %vm514_vm1, %v11460_v34  ;;  %v11469_v43 = vcombine.low %v15662_v28, %v15662_v28  ;;  %v11471_v29 = vcombine.low %v5750_v17, %v5750_v17  ;;  %v15914_v34 = vld [vmem:[#allocation2 + $0x10] sm:$0xf] }
 0x2a6   : > { %v11472_v58 = vcombine.low %v15668_v15, %v15668_v15  ;;  %5940 = vst.msk [vmem:[#allocation2 + $0x4] sm:$0xf] %vm514_vm1, %v11461_v38  ;;  %5942 = vst.msk [vmem:[#allocation2 + $0xc] sm:$0xf] %vm514_vm1, %v11463_v16  ;;  %v11473_v1 = vcombine.high %v15668_v15, %v15668_v15  ;;  %v11474_v46 = vcombine.low %v5751_v7, %v5751_v7 }
 0x2a7   : > { %5941 = vst.msk [vmem:[#allocation2 + $0x8] sm:$0x1] %vm517_vm2, %v11462_v33  ;;  %5947 = vst.msk [vmem:[#allocation2 + $0x20] sm:$0x1] %vm517_vm2, %v11462_v33  ;;  %v11475_v22 = vcombine.low %v15674_v26, %v15674_v26  ;;  %v11476_v45 = vcombine.high %v15674_v26, %v15674_v26  ;;  %v11477_v44 = vcombine.low %v5752_v14, %v5752_v14 }
 0x2a8   : > { %5946 = vst.msk [vmem:[#allocation2 + $0x1c] sm:$0xf] %vm514_vm1, %v11461_v38  ;;  %5948 = vst.msk [vmem:[#allocation2 + $0x24] sm:$0xf] %vm514_vm1, %v11466_v9  ;;  %v11478_v32 = vcombine.low %v15680_v50, %v15680_v50  ;;  %v11479_v28 = vcombine.high %v15680_v50, %v15680_v50  ;;  %v11480_v15 = vcombine.low %v5753_v2, %v5753_v2  ;;  %v18507_v2 = vld [vmem:[#allocation5_spill] sm:$0xff]  ;;  %v6439_v9 = vshll.u32 %v15914_v34, 16 }
 0x2a9   : > { %5944 = vst.msk [vmem:[#allocation2 + $0x14] sm:$0x1] %vm517_vm2, %v11465_v4  ;;  %5950 = vst.msk [vmem:[#allocation2 + $0x2c] sm:$0x1] %vm517_vm2, %v11468_v61  ;;  %v11481_v26 = vcombine.low %v15686_v41, %v15686_v41  ;;  %v11483_v3 = vcombine.low %v15754_v57, %v15754_v57  ;;  %v11484_v50 = vcombine.low %v15692_v62, %v15692_v62 }
 0x2aa   : > { %5949 = vst.msk [vmem:[#allocation2 + $0x28] sm:$0xf] %vm514_vm1, %v11467_v52  ;;  %5951 = vst.msk [vmem:[#allocation2 + $0x30] sm:$0xf] %vm514_vm1, %v11469_v43  ;;  %v11485_v36 = vcombine.high %v15692_v62, %v15692_v62  ;;  %v11486_v41 = vcombine.low %v15758_v0, %v15758_v0  ;;  %v11487_v11 = vcombine.low %v15698_v40, %v15698_v40  ;;  %v6443_v52 = vshrl.u32 %v15914_v34, 16 }
 0x2ab   : > { %5953 = vst.msk [vmem:[#allocation2 + $0x38] sm:$0x1] %vm517_vm2, %v11471_v29  ;;  %5956 = vst.msk [vmem:[#allocation2 + $0x44] sm:$0x1] %vm517_vm2, %v11474_v46  ;;  %v11488_v47 = vcombine.high %v15698_v40, %v15698_v40  ;;  %v11489_v62 = vcombine.low %v15762_v10, %v15762_v10  ;;  %v11490_v6 = vcombine.low %v15704_v48, %v15704_v48 }
 0x2ac   : > { %5954 = vst.msk [vmem:[#allocation2 + $0x3c] sm:$0xf] %vm514_vm1, %v11472_v58  ;;  %5955 = vst.msk [vmem:[#allocation2 + $0x40] sm:$0xf] %vm514_vm1, %v11473_v1  ;;  %v11491_v39 = vcombine.high %v15704_v48, %v15704_v48  ;;  %v11492_v40 = vcombine.low %v15766_v23, %v15766_v23  ;;  %v11493_v37 = vcombine.low %v15710_v60, %v15710_v60  ;;  %v6357_v59 = vld [vmem:[#allocation2] sm:$0xf] }
 0x2ad   : > { %5957 = vst.msk [vmem:[#allocation2 + $0x48] sm:$0xf] %vm514_vm1, %v11475_v22  ;;  %5958 = vst.msk [vmem:[#allocation2 + $0x4c] sm:$0xf] %vm514_vm1, %v11476_v45  ;;  %v11494_v42 = vcombine.high %v15710_v60, %v15710_v60  ;;  %v11495_v48 = vcombine.low %v15770_v21, %v15770_v21  ;;  %v11496_v56 = vcombine.low %v15716_v35, %v15716_v35  ;;  %v12935_v27 = vld [vmem:[#allocation2] sm:$0xff]   ;;  %v12936_v63 = vld [vmem:[#allocation2 + $0xc] sm:$0xff]  }
 0x2ae   : > { %5959 = vst.msk [vmem:[#allocation2 + $0x50] sm:$0x1] %vm517_vm2, %v11477_v44  ;;  %5962 = vst.msk [vmem:[#allocation2 + $0x5c] sm:$0x1] %vm517_vm2, %v11480_v15  ;;  %v11497_v51 = vcombine.high %v15716_v35, %v15716_v35  ;;  %v11498_v60 = vcombine.low %v15774_v31, %v15774_v31  ;;  %v11499_v18 = vcombine.low %v15722_v8, %v15722_v8  ;;  %v15879_v35 = vld [vmem:[%s18231_s3 + $0x8] sm:$0x3]  ;;  %12556 = vmatprep.mubr.msk.bf16.mxu1 %vm690_vm3, %v12935_v27 }
 0x2af   : > { %5960 = vst.msk [vmem:[#allocation2 + $0x54] sm:$0xf] %vm514_vm1, %v11478_v32  ;;  %5961 = vst.msk [vmem:[#allocation2 + $0x58] sm:$0xf] %vm514_vm1, %v11479_v28  ;;  %v11500_v19 = vcombine.high %v15722_v8, %v15722_v8  ;;  %v11501_v30 = vcombine.low %v15778_v54, %v15778_v54  ;;  %v11505_v8 = vcombine.low %v15728_v55, %v15728_v55  ;;  %v6406_v7 = vshrl.u32 %v6357_v59, 16 }
 0x2b0   : > { %5965 = vst.msk [vmem:[#allocation2 + $0x68] sm:$0x1] %vm517_vm2, %v11483_v3  ;;  %5968 = vst.msk [vmem:[#allocation2 + $0x74] sm:$0x1] %vm517_vm2, %v11486_v41  ;;  %v11506_v20 = vcombine.high %v15728_v55, %v15728_v55  ;;  %v11507_v17 = vcombine.low %v15782_v5, %v15782_v5  ;;  %v12937_v55 = vld [vmem:[#allocation2 + $0x18] sm:$0xff]   ;;  %12557 = vmatmul.mubr.msk.bf16.vlgmr.msra.gmra.mxu1 %vm690_vm3, %v12936_v63  ;;  %v6409_v53 = vshll.u32 %v6357_v59, 16 }
 0x2b1   : > { %5963 = vst.msk [vmem:[#allocation2 + $0x60] sm:$0xf] %vm514_vm1, %v11481_v26  ;;  %5966 = vst.msk [vmem:[#allocation2 + $0x6c] sm:$0xf] %vm514_vm1, %v11484_v50  ;;  %v15903_v49 = vld [vmem:[#allocation2 + $0x4] sm:$0xf]  ;;  %12623 = vmatpush3.bf16.msra.mxu1 %v18507_v2  ;;  %12560 = vmatprep.mubr.msk.bf16.mxu1 %vm690_vm3, %v12937_v55 }
 0x2b2   : > { %5967 = vst.msk [vmem:[#allocation2 + $0x70] sm:$0xf] %vm514_vm1, %v11485_v36  ;;  %5969 = vst.msk [vmem:[#allocation2 + $0x78] sm:$0xf] %vm514_vm1, %v11487_v11  ;;  %v15905_v14 = vld [vmem:[#allocation2 + $0x8] sm:$0x1]  ;;  %12873 = vmatprep.subr.msk.bf16.mxu1 %vm739_vm0, %v15879_v35 }
 0x2b3   : > { %5970 = vst.msk [vmem:[#allocation2 + $0x7c] sm:$0xf] %vm514_vm1, %v11488_v47  ;;  %5972 = vst.msk [vmem:[#allocation2 + $0x84] sm:$0xf] %vm514_vm1, %v11490_v6  ;;  %v6408_v12 = vrot.slane %v6406_v7, 4  ;;  %v6415_v57 = vshll.u32 %v15903_v49, 16 }
 0x2b4   : > { %5971 = vst.msk [vmem:[#allocation2 + $0x80] sm:$0x1] %vm517_vm2, %v11489_v62  ;;  %5974 = vst.msk [vmem:[#allocation2 + $0x8c] sm:$0x1] %vm517_vm2, %v11492_v40  ;;  %v6419_v0 = vshrl.u32 %v15903_v49, 16  ;;  %v6425_v10 = vshll.u32 %v15905_v14, 16 }
 0x2b5   : > { %5973 = vst.msk [vmem:[#allocation2 + $0x88] sm:$0xf] %vm514_vm1, %v11491_v39  ;;  %5975 = vst.msk [vmem:[#allocation2 + $0x90] sm:$0xf] %vm514_vm1, %v11493_v37  ;;  %v6411_v23 = vrot.slane %v6409_v53, 5  ;;  %v6417_v31 = vrot.slane %v6415_v57, 5 }
 0x2b6   : > { %5977 = vst.msk [vmem:[#allocation2 + $0x98] sm:$0x1] %vm517_vm2, %v11495_v48  ;;  %5980 = vst.msk [vmem:[#allocation2 + $0xa4] sm:$0x1] %vm517_vm2, %v11498_v60  ;;  %v6360_v21 = vld [vmem:[#allocation2 + $0xc] sm:$0xf] }
 0x2b7   : > { %5976 = vst.msk [vmem:[#allocation2 + $0x94] sm:$0xf] %vm514_vm1, %v11494_v42  ;;  %5978 = vst.msk [vmem:[#allocation2 + $0x9c] sm:$0xf] %vm514_vm1, %v11496_v56  ;;  %v6421_v54 = vrot.slane %v6419_v0, 4  ;;  %v6427_v5 = vrot.slane %v6425_v10, 5  ;;  %v6412_v16 = vor.u32 %v6411_v23, %v6408_v12 }
 0x2b8   : > { %5979 = vst.msk [vmem:[#allocation2 + $0xa0] sm:$0xf] %vm514_vm1, %v11497_v51  ;;  %5981 = vst.msk [vmem:[#allocation2 + $0xa8] sm:$0xf] %vm514_vm1, %v11499_v18  ;;  %v6430_v38 = vshrl.u32 %v6360_v21, 16  ;;  %v12938_v33 = vld [vmem:[#allocation2 + $0x24] sm:$0xff]  }
 0x2b9   : > { %5982 = vst.msk [vmem:[#allocation2 + $0xac] sm:$0xf] %vm514_vm1, %v11500_v19  ;;  %5988 = vst.msk [vmem:[#allocation2 + $0xc4] sm:$0xf] %vm514_vm1, %v11506_v20  ;;  %v15916_v25 = vld [vmem:[#allocation2 + $0x14] sm:$0x1]  ;;  %v6422_v61 = vor.u32 %v6421_v54, %v6417_v31  ;;  %12561 = vmatmul.mubr.msk.bf16.gmra.mxu1 %vm690_vm3, %v12938_v33 }
 0x2ba   : > { %5983 = vst.msk [vmem:[#allocation2 + $0xb0] sm:$0x1] %vm517_vm2, %v11501_v30  ;;  %5989 = vst.msk [vmem:[#allocation2 + $0xc8] sm:$0x1] %vm517_vm2, %v11507_v17  ;;  %v6433_v4 = vshll.u32 %v6360_v21, 16  ;;  %v12939_v43 = vld [vmem:[#allocation2 + $0x30] sm:$0xff]  }
 0x2bb   : > { %5987 = vst.msk [vmem:[#allocation2 + $0xc0] sm:$0xf] %vm514_vm1, %v11505_v8  ;;  %v6432_v13 = vrot.slane %v6430_v38, 4  ;;  %v6449_v29 = vshll.u32 %v15916_v25, 16  ;;  %v6363_v58 = vld [vmem:[#allocation2 + $0x18] sm:$0xf]  ;;  %12564 = vmatprep.mubr.msk.bf16.mxu1 %vm690_vm3, %v12939_v43 }
 0x2bc   : > { %v15921_v1 = vld [vmem:[#allocation2 + $0x1c] sm:$0xf]  ;;  %v6413_v46 = vrot.slane %v6412_v16, 4  ;;  %v6435_v22 = vrot.slane %v6433_v4, 5  ;;  %v6441_v45 = vrot.slane %v6439_v9, 5  ;;  %v6445_v44 = vrot.slane %v6443_v52, 4 }
 0x2bd   : > { %v15923_v32 = vld [vmem:[#allocation2 + $0x20] sm:$0x1]  ;;  %v6423_v28 = vrot.slane %v6422_v61, 4  ;;  %v6451_v15 = vrot.slane %v6449_v29, 5  ;;  %v6454_v26 = vshrl.u32 %v6363_v58, 16  ;;  %v6457_v24 = vshll.u32 %v6363_v58, 16 }
 0x2be   : > { %v6418_v50 = vsel %vm13160_vm6, %v6413_v46, %v6417_v31  ;;  %v6436_v36 = vor.u32 %v6435_v22, %v6432_v13  ;;  %v6446_v41 = vor.u32 %v6445_v44, %v6441_v45  ;;  %v6463_v11 = vshll.u32 %v15921_v1, 16  ;;  %v6366_v56 = vld [vmem:[#allocation2 + $0x24] sm:$0xf]  ;;  %v15934_v18 = vld [vmem:[#allocation2 + $0x28] sm:$0xf]  ;;  %v12940_v30 = vld [vmem:[#allocation2 + $0x3c] sm:$0xff]  }
 0x2bf   : > { %v6428_v47 = vsel %vm13160_vm6, %v6423_v28, %v6427_v5  ;;  %v6456_v62 = vrot.slane %v6454_v26, 4  ;;  %v6459_v6 = vrot.slane %v6457_v24, 5  ;;  %v6467_v39 = vshrl.u32 %v15921_v1, 16  ;;  %v15941_v8 = vld [vmem:[#allocation2 + $0x2c] sm:$0x1] }
 0x2c0   : > { %v11542_v40 = vcombine.low %v6418_v50, %v6428_v47  ;;  %v6437_v37 = vrot.slane %v6436_v36, 4  ;;  %v6447_v42 = vrot.slane %v6446_v41, 4  ;;  %v6465_v48 = vrot.slane %v6463_v11, 5  ;;  %v6369_v63 = vld [vmem:[#allocation2 + $0x30] sm:$0xf]  ;;  %v12941_v5 = vld [vmem:[#allocation2 + $0x48] sm:$0xff]  }
 0x2c1   : > { %v6460_v59 = vor.u32 %v6459_v6, %v6456_v62  ;;  %v6469_v51 = vrot.slane %v6467_v39, 4  ;;  %v6473_v60 = vshll.u32 %v15923_v32, 16  ;;  %v6478_v20 = vshrl.u32 %v6366_v56, 16  ;;  %v15943_v12 = vld [vmem:[#allocation2 + $0x34] sm:$0xf]  ;;  %12565 = vmatmul.mubr.msk.bf16.gmra.mxu1 %vm690_vm3, %v12940_v30 }
 0x2c2   : > { %12590 = vmatprep.mubr.msk.bf16.mxu0 %vm690_vm3, %v11542_v40  ;;  %v6442_v19 = vsel %vm13160_vm6, %v6437_v37, %v6441_v45  ;;  %v6452_v27 = vsel %vm13160_vm6, %v6447_v42, %v6451_v15  ;;  %v6481_v17 = vshll.u32 %v6366_v56, 16  ;;  %v6487_v10 = vshll.u32 %v15934_v18, 16  ;;  %v15947_v21 = vld [vmem:[#allocation2 + $0x38] sm:$0x1]  ;;  %12568 = vmatprep.mubr.msk.bf16.mxu1 %vm690_vm3, %v12941_v5  ;;  %v6372_v58 = vld [vmem:[#allocation2 + $0x3c] sm:$0xf] }
 0x2c3   : > { %v11543_v55 = vcombine.low %v6442_v19, %v6452_v27  ;;  %v6461_v7 = vrot.slane %v6460_v59, 4  ;;  %v6470_v53 = vor.u32 %v6469_v51, %v6465_v48  ;;  %v6475_v2 = vrot.slane %v6473_v60, 5  ;;  %v15958_v28 = vld [vmem:[#allocation2 + $0x40] sm:$0xf]  ;;  %v15962_v50 = vld [vmem:[#allocation2 + $0x44] sm:$0x1] }
 0x2c4   : > { %v6480_v57 = vrot.slane %v6478_v20, 4  ;;  %v6483_v0 = vrot.slane %v6481_v17, 5  ;;  %v6491_v23 = vshrl.u32 %v15934_v18, 16  ;;  %v6497_v38 = vshll.u32 %v15941_v8, 16  ;;  %v12942_v62 = vld [vmem:[#allocation2 + $0x54] sm:$0xff]   ;;  %v12943_v60 = vld [vmem:[#allocation2 + $0x60] sm:$0xff]  }
 0x2c5   : > { %12591 = vmatmul.mubr.msk.bf16.vlgmr.msra.gmra.mxu0 %vm690_vm3, %v11543_v55  ;;  %v6466_v31 = vsel %vm13160_vm6, %v6461_v7, %v6465_v48  ;;  %v6471_v54 = vrot.slane %v6470_v53, 4  ;;  %v6502_v33 = vshrl.u32 %v6369_v63, 16  ;;  %v6489_v4 = vrot.slane %v6487_v10, 5  ;;  %v6375_v39 = vld [vmem:[#allocation2 + $0x48] sm:$0xf] }
 0x2c6   : > { %v6484_v16 = vor.u32 %v6483_v0, %v6480_v57  ;;  %v6493_v9 = vrot.slane %v6491_v23, 4  ;;  %v6505_v52 = vshll.u32 %v6369_v63, 16  ;;  %v6499_v43 = vrot.slane %v6497_v38, 5  ;;  %v15967_v40 = vld [vmem:[#allocation2 + $0x4c] sm:$0xf] }
 0x2c7   : > { %v6476_v61 = vsel %vm13160_vm6, %v6471_v54, %v6475_v2  ;;  %v6504_v13 = vrot.slane %v6502_v33, 4  ;;  %v6511_v29 = vshll.u32 %v15943_v12, 16  ;;  %v6515_v26 = vshrl.u32 %v15943_v12, 16  ;;  %v15977_v2 = vld [vmem:[#allocation2 + $0x50] sm:$0x1] }
 0x2c8   : > { %v11544_v46 = vcombine.low %v6466_v31, %v6476_v61  ;;  %v6485_v22 = vrot.slane %v6484_v16, 4  ;;  %v6494_v45 = vor.u32 %v6493_v9, %v6489_v4  ;;  %v6507_v44 = vrot.slane %v6505_v52, 5  ;;  %v6378_v54 = vld [vmem:[#allocation2 + $0x54] sm:$0xf] }
 0x2c9   : > { %v6513_v15 = vrot.slane %v6511_v29, 5  ;;  %v6521_v24 = vshll.u32 %v15947_v21, 16  ;;  %v6526_v36 = vshrl.u32 %v6372_v58, 16  ;;  %v6529_v6 = vshll.u32 %v6372_v58, 16  ;;  %12569 = vmatmul.mubr.msk.bf16.gmra.mxu1 %vm690_vm3, %v12942_v62 }
 0x2ca   : > { %12594 = vmatprep.mubr.msk.bf16.mxu0 %vm690_vm3, %v11544_v46  ;;  %v6490_v41 = vsel %vm13160_vm6, %v6485_v22, %v6489_v4  ;;  %v6495_v11 = vrot.slane %v6494_v45, 4  ;;  %v6508_v47 = vor.u32 %v6507_v44, %v6504_v13  ;;  %v6517_v37 = vrot.slane %v6515_v26, 4  ;;  %12572 = vmatprep.mubr.msk.bf16.mxu1 %vm690_vm3, %v12943_v60  ;;  %v15983_v4 = vld [vmem:[#allocation2 + $0x58] sm:$0xf]  ;;  %v15988_v13 = vld [vmem:[#allocation2 + $0x5c] sm:$0x1] }
 0x2cb   : > { %v6523_v42 = vrot.slane %v6521_v24, 5  ;;  %v6528_v48 = vrot.slane %v6526_v36, 4  ;;  %v6535_v56 = vshll.u32 %v15958_v28, 16  ;;  %v6531_v19 = vrot.slane %v6529_v6, 5  ;;  %v6381_v45 = vld [vmem:[#allocation2 + $0x60] sm:$0xf] }
 0x2cc   : > { %v6500_v59 = vsel %vm13160_vm6, %v6495_v11, %v6499_v43  ;;  %v6509_v51 = vrot.slane %v6508_v47, 4  ;;  %v6539_v27 = vshrl.u32 %v15958_v28, 16  ;;  %v6518_v20 = vor.u32 %v6517_v37, %v6513_v15  ;;  %v12944_v26 = vld [vmem:[#allocation2 + $0x6c] sm:$0xff]   ;;  %v12945_v37 = vld [vmem:[#allocation2 + $0x78] sm:$0xff]  }
 0x2cd   : > { %v11545_v30 = vcombine.low %v6490_v41, %v6500_v59  ;;  %v6537_v17 = vrot.slane %v6535_v56, 5  ;;  %v6545_v63 = vshll.u32 %v15962_v50, 16  ;;  %v6532_v7 = vor.u32 %v6531_v19, %v6528_v48  ;;  %v15997_v56 = vld [vmem:[#allocation2 + $0x64] sm:$0xf] }
 0x2ce   : > { %v6514_v55 = vsel %vm13160_vm6, %v6509_v51, %v6513_v15  ;;  %v6541_v53 = vrot.slane %v6539_v27, 4  ;;  %v6550_v57 = vshrl.u32 %v6375_v39, 16  ;;  %v6519_v0 = vrot.slane %v6518_v20, 4  ;;  %v16005_v20 = vld [vmem:[#allocation2 + $0x68] sm:$0x1] }
 0x2cf   : > { %12595 = vmatmul.mubr.msk.bf16.gmra.mxu0 %vm690_vm3, %v11545_v30  ;;  %v6547_v10 = vrot.slane %v6545_v63, 5  ;;  %v6553_v23 = vshll.u32 %v6375_v39, 16  ;;  %v6559_v31 = vshll.u32 %v15967_v40, 16  ;;  %v6533_v5 = vrot.slane %v6532_v7, 4 }
 0x2d0   : > { %v6542_v38 = vor.u32 %v6541_v53, %v6537_v17  ;;  %v6552_v33 = vrot.slane %v6550_v57, 4  ;;  %v6563_v16 = vshrl.u32 %v15967_v40, 16  ;;  %v6524_v9 = vsel %vm13160_vm6, %v6519_v0, %v6523_v42  ;;  %v6384_v0 = vld [vmem:[#allocation2 + $0x6c] sm:$0xf] }
 0x2d1   : > { %v6555_v52 = vrot.slane %v6553_v23, 5  ;;  %v6561_v61 = vrot.slane %v6559_v31, 5  ;;  %v6569_v43 = vshll.u32 %v15977_v2, 16  ;;  %v11546_v29 = vcombine.low %v6514_v55, %v6524_v9  ;;  %12573 = vmatmul.mubr.msk.bf16.gmra.mxu1 %vm690_vm3, %v12944_v26  ;;  %v6387_v26 = vld [vmem:[#allocation2 + $0x78] sm:$0xf] }
 0x2d2   : > { %v6538_v58 = vsel %vm13160_vm6, %v6533_v5, %v6537_v17  ;;  %v6543_v46 = vrot.slane %v6542_v38, 4  ;;  %v6565_v22 = vrot.slane %v6563_v16, 4  ;;  %v6574_v24 = vshrl.u32 %v6378_v54, 16  ;;  %12576 = vmatprep.mubr.msk.bf16.mxu1 %vm690_vm3, %v12945_v37  ;;  %v16012_v38 = vld [vmem:[#allocation2 + $0x74] sm:$0x1] }
 0x2d3   : > { %v6556_v44 = vor.u32 %v6555_v52, %v6552_v33  ;;  %v6571_v15 = vrot.slane %v6569_v43, 5  ;;  %v6577_v36 = vshll.u32 %v6378_v54, 16  ;;  %12598 = vmatprep.mubr.msk.bf16.mxu0 %vm690_vm3, %v11546_v29  ;;  %v6583_v47 = vshll.u32 %v15983_v4, 16 }
 0x2d4   : > { %v6548_v41 = vsel %vm13160_vm6, %v6543_v46, %v6547_v10  ;;  %v6566_v11 = vor.u32 %v6565_v22, %v6561_v61  ;;  %v6587_v62 = vshrl.u32 %v15983_v4, 16  ;;  %v6576_v42 = vrot.slane %v6574_v24, 4  ;;  %v16010_v10 = vld [vmem:[#allocation2 + $0x70] sm:$0xf] }
 0x2d5   : > { %v11547_v6 = vcombine.low %v6538_v58, %v6548_v41  ;;  %v6557_v39 = vrot.slane %v6556_v44, 4  ;;  %v6579_v48 = vrot.slane %v6577_v36, 5  ;;  %v6585_v51 = vrot.slane %v6583_v47, 5  ;;  %v12946_v44 = vld [vmem:[#allocation2 + $0x84] sm:$0xff]   ;;  %v12947_v41 = vld [vmem:[#allocation2 + $0x90] sm:$0xff]  }
 0x2d6   : > { %v6567_v59 = vrot.slane %v6566_v11, 4  ;;  %v6589_v60 = vrot.slane %v6587_v62, 4  ;;  %v6593_v19 = vshll.u32 %v15988_v13, 16  ;;  %v6598_v17 = vshrl.u32 %v6381_v45, 16  ;;  %v16022_v62 = vld [vmem:[#allocation2 + $0x7c] sm:$0xf] }
 0x2d7   : > { %12599 = vmatmul.mubr.msk.bf16.gmra.mxu0 %vm690_vm3, %v11547_v6  ;;  %v6562_v27 = vsel %vm13160_vm6, %v6557_v39, %v6561_v61  ;;  %v6580_v30 = vor.u32 %v6579_v48, %v6576_v42  ;;  %v6601_v63 = vshll.u32 %v6381_v45, 16  ;;  %v6607_v57 = vshll.u32 %v15997_v56, 16 }
 0x2d8   : > { %v6572_v55 = vsel %vm13160_vm6, %v6567_v59, %v6571_v15  ;;  %v6590_v7 = vor.u32 %v6589_v60, %v6585_v51  ;;  %v6595_v53 = vrot.slane %v6593_v19, 5  ;;  %v6600_v54 = vrot.slane %v6598_v17, 4 }
 0x2d9   : > { %v11548_v23 = vcombine.low %v6562_v27, %v6572_v55  ;;  %v6581_v31 = vrot.slane %v6580_v30, 4  ;;  %v6603_v5 = vrot.slane %v6601_v63, 5  ;;  %v6609_v16 = vrot.slane %v6607_v57, 5  ;;  %12577 = vmatmul.mubr.msk.bf16.gmra.mxu1 %vm690_vm3, %v12946_v44 }
 0x2da   : > { %v6591_v33 = vrot.slane %v6590_v7, 4  ;;  %v6611_v9 = vshrl.u32 %v15997_v56, 16  ;;  %v6617_v52 = vshll.u32 %v16005_v20, 16  ;;  %v6622_v29 = vshrl.u32 %v6384_v0, 16  ;;  %12580 = vmatprep.mubr.msk.bf16.mxu1 %vm690_vm3, %v12947_v41  ;;  %v6393_v41 = vld [vmem:[#allocation2 + $0x90] sm:$0xf] }
 0x2db   : > { %12602 = vmatprep.mubr.msk.bf16.mxu0 %vm690_vm3, %v11548_v23  ;;  %v6586_v61 = vsel %vm13160_vm6, %v6581_v31, %v6585_v51  ;;  %v6604_v43 = vor.u32 %v6603_v5, %v6600_v54  ;;  %v6625_v58 = vshll.u32 %v6384_v0, 16  ;;  %v6631_v15 = vshll.u32 %v16010_v10, 16  ;;  %v16031_v51 = vld [vmem:[#allocation2 + $0x80] sm:$0x1]  ;;  %v6390_v0 = vld [vmem:[#allocation2 + $0x84] sm:$0xf] }
 0x2dc   : > { %v6596_v46 = vsel %vm13160_vm6, %v6591_v33, %v6595_v53  ;;  %v6613_v22 = vrot.slane %v6611_v9, 4  ;;  %v6619_v45 = vrot.slane %v6617_v52, 5  ;;  %v6624_v11 = vrot.slane %v6622_v29, 4  ;;  %v16038_v33 = vld [vmem:[#allocation2 + $0x88] sm:$0xf] }
 0x2dd   : > { %v11549_v24 = vcombine.low %v6586_v61, %v6596_v46  ;;  %v6605_v36 = vrot.slane %v6604_v43, 4  ;;  %v6627_v47 = vrot.slane %v6625_v58, 5  ;;  %v6633_v39 = vrot.slane %v6631_v15, 5  ;;  %v16042_v43 = vld [vmem:[#allocation2 + $0x8c] sm:$0x1]  ;;  %v12948_v46 = vld [vmem:[#allocation2 + $0x9c] sm:$0xff]  }
 0x2de   : > { %v6614_v6 = vor.u32 %v6613_v22, %v6609_v16  ;;  %v6635_v37 = vshrl.u32 %v16010_v10, 16  ;;  %v6641_v42 = vshll.u32 %v16012_v38, 16  ;;  %v6646_v60 = vshrl.u32 %v6387_v26, 16 }
 0x2df   : > { %12603 = vmatmul.mubr.msk.bf16.gmra.mxu0 %vm690_vm3, %v11549_v24  ;;  %v6610_v48 = vsel %vm13160_vm6, %v6605_v36, %v6609_v16  ;;  %v6628_v59 = vor.u32 %v6627_v47, %v6624_v11  ;;  %v6649_v19 = vshll.u32 %v6387_v26, 16  ;;  %v6655_v63 = vshll.u32 %v16022_v62, 16  ;;  %v12949_v26 = vld [vmem:[#allocation2 + $0xa8] sm:$0xff]  }
 0x2e0   : > { %v6615_v27 = vrot.slane %v6614_v6, 4  ;;  %v6637_v30 = vrot.slane %v6635_v37, 4  ;;  %v6643_v17 = vrot.slane %v6641_v42, 5  ;;  %v6648_v7 = vrot.slane %v6646_v60, 4  ;;  %v16051_v37 = vld [vmem:[#allocation2 + $0x94] sm:$0xf] }
 0x2e1   : > { %v6629_v55 = vrot.slane %v6628_v59, 4  ;;  %v6651_v53 = vrot.slane %v6649_v19, 5  ;;  %v6659_v57 = vshrl.u32 %v16022_v62, 16  ;;  %v6657_v54 = vrot.slane %v6655_v63, 5  ;;  %12581 = vmatmul.mubr.msk.bf16.gmra.mxu1 %vm690_vm3, %v12948_v46  ;;  %v16056_v19 = vld [vmem:[#allocation2 + $0x98] sm:$0x1] }
 0x2e2   : > { %v6620_v23 = vsel %vm13160_vm6, %v6615_v27, %v6619_v45  ;;  %v6638_v31 = vor.u32 %v6637_v30, %v6633_v39  ;;  %v6665_v5 = vshll.u32 %v16031_v51, 16  ;;  %v6670_v22 = vshrl.u32 %v6390_v0, 16  ;;  %12584 = vmatprep.mubr.msk.bf16.mxu1 %vm690_vm3, %v12949_v26  ;;  %v16066_v46 = vld [vmem:[#allocation2 + $0xa4] sm:$0x1] }
 0x2e3   : > { %v11550_v16 = vcombine.low %v6610_v48, %v6620_v23  ;;  %v6634_v9 = vsel %vm13160_vm6, %v6629_v55, %v6633_v39  ;;  %v6652_v52 = vor.u32 %v6651_v53, %v6648_v7  ;;  %v6661_v61 = vrot.slane %v6659_v57, 4 }
 0x2e4   : > { %v6639_v29 = vrot.slane %v6638_v31, 4  ;;  %v6667_v58 = vrot.slane %v6665_v5, 5  ;;  %v6673_v44 = vshll.u32 %v6390_v0, 16  ;;  %v6679_v24 = vshll.u32 %v16038_v33, 16  ;;  %v6396_v0 = vld [vmem:[#allocation2 + $0x9c] sm:$0xf] }
 0x2e5   : > { %12606 = vmatprep.mubr.msk.bf16.mxu0 %vm690_vm3, %v11550_v16  ;;  %v6653_v45 = vrot.slane %v6652_v52, 4  ;;  %v6662_v15 = vor.u32 %v6661_v61, %v6657_v54  ;;  %v6683_v36 = vshrl.u32 %v16038_v33, 16  ;;  %v6672_v47 = vrot.slane %v6670_v22, 4  ;;  %v16063_v16 = vld [vmem:[#allocation2 + $0xa0] sm:$0xf] }
 0x2e6   : > { %v6644_v11 = vsel %vm13160_vm6, %v6639_v29, %v6643_v17  ;;  %v6675_v6 = vrot.slane %v6673_v44, 5  ;;  %v6689_v39 = vshll.u32 %v16042_v43, 16  ;;  %v6681_v60 = vrot.slane %v6679_v24, 5  ;;  %v12950_v44 = vld [vmem:[#allocation2 + $0xb4] sm:$0xff]  }
 0x2e7   : > { %v11551_v42 = vcombine.low %v6634_v9, %v6644_v11  ;;  %v6658_v48 = vsel %vm13160_vm6, %v6653_v45, %v6657_v54  ;;  %v6663_v59 = vrot.slane %v6662_v15, 4  ;;  %v6685_v30 = vrot.slane %v6683_v36, 4  ;;  %v7083_v11 = vld [vmem:[#allocation2] sm:$0xe] }
 0x2e8   : > { %v6676_v27 = vor.u32 %v6675_v6, %v6672_v47  ;;  %v6691_v17 = vrot.slane %v6689_v39, 5  ;;  %v6694_v63 = vshrl.u32 %v6393_v41, 16  ;;  %v6697_v7 = vshll.u32 %v6393_v41, 16 }
 0x2e9   : > { %12607 = vmatmul.mubr.msk.bf16.gmra.mxu0 %vm690_vm3, %v11551_v42  ;;  %v6668_v55 = vsel %vm13160_vm6, %v6663_v59, %v6667_v58  ;;  %v6703_v53 = vshll.u32 %v16051_v37, 16  ;;  %v6707_v57 = vshrl.u32 %v16051_v37, 16  ;;  %v6686_v54 = vor.u32 %v6685_v30, %v6681_v60  ;;  %12585 = vmatmul.mubr.msk.bf16.gmra.mxu1 %vm690_vm3, %v12950_v44 }
 0x2ea   : > { %v11552_v23 = vcombine.low %v6658_v48, %v6668_v55  ;;  %v6677_v31 = vrot.slane %v6676_v27, 4  ;;  %v6696_v5 = vrot.slane %v6694_v63, 4  ;;  %v6699_v9 = vrot.slane %v6697_v7, 5  ;;  %v6399_v48 = vld [vmem:[#allocation2 + $0xa8] sm:$0xf] }
 0x2eb   : > { %v6705_v52 = vrot.slane %v6703_v53, 5  ;;  %v6709_v61 = vrot.slane %v6707_v57, 4  ;;  %v6713_v29 = vshll.u32 %v16056_v19, 16  ;;  %v6687_v22 = vrot.slane %v6686_v54, 4  ;;  %v16076_v63 = vld [vmem:[#allocation2 + $0xac] sm:$0xf] }
 0x2ec   : > { %12610 = vmatprep.mubr.msk.bf16.mxu0 %vm690_vm3, %v11552_v23  ;;  %v6682_v58 = vsel %vm13160_vm6, %v6677_v31, %v6681_v60  ;;  %v6718_v45 = vshrl.u32 %v6396_v0, 16  ;;  %v6721_v15 = vshll.u32 %v6396_v0, 16  ;;  %v6700_v26 = vor.u32 %v6699_v9, %v6696_v5 }
 0x2ed   : > { %v6710_v24 = vor.u32 %v6709_v61, %v6705_v52  ;;  %v6715_v36 = vrot.slane %v6713_v29, 5  ;;  %v6727_v41 = vshll.u32 %v16063_v16, 16  ;;  %v6692_v47 = vsel %vm13160_vm6, %v6687_v22, %v6691_v17  ;;  %v16086_v29 = vld [vmem:[#allocation2 + $0xb0] sm:$0x1] }
 0x2ee   : > { %v6720_v6 = vrot.slane %v6718_v45, 4  ;;  %v6723_v39 = vrot.slane %v6721_v15, 5  ;;  %v6731_v42 = vshrl.u32 %v16063_v16, 16  ;;  %v11553_v59 = vcombine.low %v6682_v58, %v6692_v47 }
 0x2ef   : > { %v6701_v60 = vrot.slane %v6700_v26, 4  ;;  %v6711_v27 = vrot.slane %v6710_v24, 4  ;;  %v6729_v30 = vrot.slane %v6727_v41, 5  ;;  %v6737_v53 = vshll.u32 %v16066_v46, 16 }
 0x2f0   : > { %v6724_v55 = vor.u32 %v6723_v39, %v6720_v6  ;;  %v6733_v7 = vrot.slane %v6731_v42, 4  ;;  %v11574_v57 = vrot.slane %v7083_v11, 9  ;;  %v7149_v23 = vrot.slane %v15903_v49, 5 }
 0x2f1   : > { %12611 = vmatmul.mubr.msk.bf16.gmra.mxu0 %vm690_vm3, %v11553_v59  ;;  %v6706_v17 = vsel %vm13160_vm6, %v6701_v60, %v6705_v52  ;;  %v6716_v0 = vsel %vm13160_vm6, %v6711_v27, %v6715_v36  ;;  %v7152_v31 = vrot.slane %v15905_v14, 5  ;;  %v6739_v61 = vrot.slane %v6737_v53, 5  ;;  %v7084_v52 = vld [vmem:[#allocation2 + $0xc] sm:$0xe]  ;;  %v6402_v59 = vld [vmem:[#allocation2 + $0xb4] sm:$0xf] }
 0x2f2   : > { %v11554_v54 = vcombine.low %v6706_v17, %v6716_v0  ;;  %v6725_v5 = vrot.slane %v6724_v55, 4  ;;  %v6734_v9 = vor.u32 %v6733_v7, %v6729_v30  ;;  %v7150_v22 = vsel %vm13369_vm9, %v11574_v57, %v7149_v23  ;;  %v12988_v55 = vld [vmem:[%s18231_s3 + $0x6] sm:$0x3]  ;;  %v16104_v53 = vld [vmem:[#allocation2 + $0xb8] sm:$0xf] }
 0x2f3   : > { %v7151_v44 = vrot.slane %v7149_v23, 4  ;;  %v6742_v45 = vshrl.u32 %v6399_v48, 16  ;;  %v6745_v15 = vshll.u32 %v6399_v48, 16  ;;  %v6751_v14 = vshll.u32 %v16076_v63, 16  ;;  %v16106_v57 = vld [vmem:[#allocation2 + $0xbc] sm:$0x1] }
 0x2f4   : > { %12614 = vmatprep.mubr.msk.bf16.mxu0 %vm690_vm3, %v11554_v54  ;;  %v6730_v49 = vsel %vm13160_vm6, %v6725_v5, %v6729_v30  ;;  %v6735_v26 = vrot.slane %v6734_v9, 4  ;;  %v6755_v24 = vshrl.u32 %v16076_v63, 16  ;;  %v6761_v47 = vshll.u32 %v16086_v29, 16 }
 0x2f5   : > { %v7153_v36 = vsel %vm13369_vm9, %v7151_v44, %v7152_v31  ;;  %v6744_v41 = vrot.slane %v6742_v45, 4  ;;  %v6747_v11 = vrot.slane %v6745_v15, 5  ;;  %v6753_v42 = vrot.slane %v6751_v14, 5  ;;  %v7086_v14 = vld [vmem:[#allocation2 + $0x24] sm:$0xe] }
 0x2f6   : > { %v6740_v6 = vsel %vm13160_vm6, %v6735_v26, %v6739_v61  ;;  %v11591_v39 = vcombine.low %v7150_v22, %v7153_v36  ;;  %v6757_v48 = vrot.slane %v6755_v24, 4  ;;  %v6763_v30 = vrot.slane %v6761_v47, 5  ;;  %v7085_v22 = vld [vmem:[#allocation2 + $0x18] sm:$0xe] }
 0x2f7   : > { %v11555_v60 = vcombine.low %v6730_v49, %v6740_v6  ;;  %v6748_v27 = vor.u32 %v6747_v11, %v6744_v41  ;;  %v7716_v7 = vsel %vm739_vm0, %v12988_v55, 0  ;;  %v11575_v0 = vrot.slane %v7084_v52, 9  ;;  %v7087_v11 = vld [vmem:[#allocation2 + $0x30] sm:$0xe] }
 0x2f8   : > { %12624 = vmatprep.mubr.msk.bf16.mxu1 %vm690_vm3, %v11591_v39  ;;  %v6758_v17 = vor.u32 %v6757_v48, %v6753_v42  ;;  %12657 = vmatpush3.bf16.msra.mxu0 %v7716_v7  ;;  %v7156_v23 = vrot.slane %v15914_v34, 5  ;;  %v7159_v31 = vrot.slane %v15916_v25, 5  ;;  %v8442_v5 = vsel %vm739_vm0, %v15879_v35, 0 }
 0x2f9   : > { %12615 = vmatmul.mubr.msk.bf16.gmra.mxu0 %vm690_vm3, %v11555_v60  ;;  %v6749_v54 = vrot.slane %v6748_v27, 4  ;;  %v6766_v9 = vshrl.u32 %v6402_v59, 16  ;;  %v6769_v61 = vshll.u32 %v6402_v59, 16  ;;  %v6775_v52 = vshll.u32 %v16104_v53, 16 }
 0x2fa   : > { %v6759_v44 = vrot.slane %v6758_v17, 4  ;;  %v7157_v45 = vsel %vm13369_vm9, %v11575_v0, %v7156_v23  ;;  %v7158_v15 = vrot.slane %v7156_v23, 4  ;;  %v6779_v26 = vshrl.u32 %v16104_v53, 16  ;;  %v7088_v0 = vld [vmem:[#allocation2 + $0x3c] sm:$0xe] }
 0x2fb   : > { %v6754_v34 = vsel %vm13160_vm6, %v6749_v54, %v6753_v42  ;;  %v6768_v25 = vrot.slane %v6766_v9, 4  ;;  %v6771_v49 = vrot.slane %v6769_v61, 5  ;;  %v6777_v36 = vrot.slane %v6775_v52, 5  ;;  %v7089_v9 = vld [vmem:[#allocation2 + $0x48] sm:$0xe] }
 0x2fc   : > { %v6764_v35 = vsel %vm13160_vm6, %v6759_v44, %v6763_v30  ;;  %v7160_v24 = vsel %vm13369_vm9, %v7158_v15, %v7159_v31  ;;  %v6785_v41 = vshll.u32 %v16106_v57, 16  ;;  %v6781_v48 = vrot.slane %v6779_v26, 4 }
 0x2fd   : > { %v11556_v47 = vcombine.low %v6754_v34, %v6764_v35  ;;  %v11592_v6 = vcombine.low %v7157_v45, %v7160_v24  ;;  %v6772_v39 = vor.u32 %v6771_v49, %v6768_v25  ;;  %v11576_v59 = vrot.slane %v7085_v22, 9  ;;  %v7090_v45 = vld [vmem:[#allocation2 + $0x54] sm:$0xe] }
 0x2fe   : > { %v6787_v42 = vrot.slane %v6785_v41, 5  ;;  %v7163_v60 = vrot.slane %v15921_v1, 5  ;;  %v7166_v27 = vrot.slane %v15923_v32, 5  ;;  %v6782_v55 = vor.u32 %v6781_v48, %v6777_v36 }
 0x2ff   : > { %12618 = vmatprep.mubr.msk.bf16.mxu0 %vm690_vm3, %v11556_v47  ;;  %12625 = vmatmul.mubr.msk.bf16.vlgmr.msra.gmra.mxu1 %vm690_vm3, %v11592_v6  ;;  %v6773_v30 = vrot.slane %v6772_v39, 4  ;;  %v11577_v7 = vrot.slane %v7086_v14, 9  ;;  %v7170_v17 = vrot.slane %v15934_v18, 5  ;;  %v7173_v54 = vrot.slane %v15941_v8, 5  ;;  %v7091_v47 = vld [vmem:[#allocation2 + $0x60] sm:$0xe] }
 0x300   : > { %12691 = vmatpush3.bf16.msra.mxu1 %v8442_v5  ;;  %v7164_v23 = vsel %vm13369_vm9, %v11576_v59, %v7163_v60  ;;  %v7165_v31 = vrot.slane %v7163_v60, 4  ;;  %v11578_v1 = vrot.slane %v7087_v11, 9  ;;  %v6783_v61 = vrot.slane %v6782_v55, 4 }
 0x301   : > { %v6778_v32 = vsel %vm13160_vm6, %v6773_v30, %v6777_v36  ;;  %v7171_v22 = vsel %vm13369_vm9, %v11577_v7, %v7170_v17  ;;  %v7172_v44 = vrot.slane %v7170_v17, 4  ;;  %v7177_v5 = vrot.slane %v15943_v12, 5  ;;  %v12951_v12 = vld [vmem:[#allocation2 + $0xc] sm:$0xff]  }
 0x302   : > { %v7167_v18 = vsel %vm13369_vm9, %v7165_v31, %v7166_v27  ;;  %v7180_v15 = vrot.slane %v15947_v21, 5  ;;  %v11579_v52 = vrot.slane %v7088_v0, 9  ;;  %v6788_v8 = vsel %vm13160_vm6, %v6783_v61, %v6787_v42  ;;  %v7092_v42 = vld [vmem:[#allocation2 + $0x6c] sm:$0xe]  ;;  %v7093_v0 = vld [vmem:[#allocation2 + $0x78] sm:$0xe] }
 0x303   : > { %v11593_v34 = vcombine.low %v7164_v23, %v7167_v18  ;;  %v7174_v25 = vsel %vm13369_vm9, %v7172_v44, %v7173_v54  ;;  %v7184_v49 = vrot.slane %v15958_v28, 5  ;;  %v11557_v26 = vcombine.low %v6778_v32, %v6788_v8  ;;  %v7094_v54 = vld [vmem:[#allocation2 + $0x84] sm:$0xe] }
 0x304   : > { %v11594_v14 = vcombine.low %v7171_v22, %v7174_v25  ;;  %v7178_v35 = vsel %vm13369_vm9, %v11578_v1, %v7177_v5  ;;  %v7179_v24 = vrot.slane %v7177_v5, 4  ;;  %v7187_v41 = vrot.slane %v15962_v50, 5 }
 0x305   : > { %12628 = vmatprep.mubr.msk.bf16.mxu1 %vm690_vm3, %v11593_v34  ;;  %v7185_v21 = vsel %vm13369_vm9, %v11579_v52, %v7184_v49  ;;  %v7186_v36 = vrot.slane %v7184_v49, 4  ;;  %v11580_v11 = vrot.slane %v7089_v9, 9  ;;  %12619 = vmatmul.mubr.msk.bf16.gmra.mxu0 %vm690_vm3, %v11557_v26  ;;  %v7191_v6 = vrot.slane %v15967_v40, 5  ;;  %v16166_v40 = vld [vmem:[%s18231_s3 + $0xa] sm:$0x3] }
 0x306   : > { %v7181_v28 = vsel %vm13369_vm9, %v7179_v24, %v7180_v15  ;;  %v7194_v39 = vrot.slane %v15977_v2, 5  ;;  %v11581_v48 = vrot.slane %v7090_v45, 9  ;;  %12658 = vmatprep.mubr.msk.bf16.mxu0 %vm690_vm3, %v12951_v12  ;;  %v7198_v60 = vrot.slane %v15983_v4, 5  ;;  %v16171_v2 = vld [vmem:[%s18231_s3 + $0xc] sm:$0x3]  ;;  %12874 = vmatprep.subr.msk.bf16.mxu0 %vm739_vm0, %v16166_v40  ;;  %v12953_v52 = vld [vmem:[#allocation2 + $0x24] sm:$0xff]  }
 0x307   : > { %12629 = vmatmul.mubr.msk.bf16.gmra.mxu1 %vm690_vm3, %v11594_v14  ;;  %v11595_v59 = vcombine.low %v7178_v35, %v7181_v28  ;;  %v7188_v50 = vsel %vm13369_vm9, %v7186_v36, %v7187_v41  ;;  %v7201_v27 = vrot.slane %v15988_v13, 5  ;;  %v7192_v55 = vsel %vm13369_vm9, %v11580_v11, %v7191_v6  ;;  %12875 = vmatprep.subr.msk.bf16.mxu1 %vm739_vm0, %v16171_v2  ;;  %v7095_v15 = vld [vmem:[#allocation2 + $0x90] sm:$0xe]  ;;  %v7096_v12 = vld [vmem:[#allocation2 + $0x9c] sm:$0xe] }
 0x308   : > { %v11596_v30 = vcombine.low %v7185_v21, %v7188_v50  ;;  %v7193_v7 = vrot.slane %v7191_v6, 4  ;;  %v11582_v17 = vrot.slane %v7091_v47, 9  ;;  %v16182_v4 = vsel %vm13369_vm9, %v11581_v48, %v7198_v60  ;;  %v7097_v47 = vld [vmem:[#allocation2 + $0xa8] sm:$0xe] }
 0x309   : > { %12632 = vmatprep.mubr.msk.bf16.mxu1 %vm690_vm3, %v11595_v59  ;;  %v7200_v13 = vrot.slane %v7198_v60, 4  ;;  %v7205_v23 = vrot.slane %v15997_v56, 5  ;;  %v7208_v31 = vrot.slane %v16005_v20, 5  ;;  %v11583_v9 = vrot.slane %v7092_v42, 9  ;;  %v12952_v20 = vld [vmem:[#allocation2 + $0x18] sm:$0xff]  }
 0x30a   : > { %v7195_v1 = vsel %vm13369_vm9, %v7193_v7, %v7194_v39  ;;  %v7212_v32 = vrot.slane %v16010_v10, 5  ;;  %v7215_v61 = vrot.slane %v16012_v38, 5  ;;  %v11584_v38 = vrot.slane %v7093_v0, 9  ;;  %v7098_v42 = vld [vmem:[#allocation2 + $0xb4] sm:$0xe] }
 0x30b   : > { %v11597_v22 = vcombine.low %v7192_v55, %v7195_v1  ;;  %v16192_v44 = vsel %vm13369_vm9, %v7200_v13, %v7201_v27  ;;  %v16196_v45 = vsel %vm13369_vm9, %v11582_v17, %v7205_v23  ;;  %v7207_v56 = vrot.slane %v7205_v23, 4  ;;  %v12954_v55 = vld [vmem:[#allocation2 + $0x30] sm:$0xff]   ;;  %v12955_v23 = vld [vmem:[#allocation2 + $0x3c] sm:$0xff]  }
 0x30c   : > { %v11598_v18 = vcombine.low %v16182_v4, %v16192_v44  ;;  %v16202_v5 = vsel %vm13369_vm9, %v11583_v9, %v7212_v32  ;;  %v7214_v10 = vrot.slane %v7212_v32, 4  ;;  %v7219_v34 = vrot.slane %v16022_v62, 5  ;;  %v16259_v13 = vld [vmem:[#allocation2 + $0x10] sm:$0xf]  ;;  %v16269_v32 = vld [vmem:[#allocation2 + $0x14] sm:$0x1] }
 0x30d   : > { %v7209_v8 = vsel %vm13369_vm9, %v7207_v56, %v7208_v31  ;;  %v7222_v25 = vrot.slane %v16031_v51, 5  ;;  %v11585_v49 = vrot.slane %v7094_v54, 9  ;;  %12659 = vmatmul.mubr.msk.bf16.vlgmr.msra.gmra.mxu0 %vm690_vm3, %v12952_v20  ;;  %v7226_v35 = vrot.slane %v16038_v33, 5  ;;  %v7914_v56 = vld [vmem:[#allocation2 + $0x18] sm:$0xf] }
 0x30e   : > { %v11599_v26 = vcombine.low %v16196_v45, %v7209_v8  ;;  %v16212_v14 = vsel %vm13369_vm9, %v7214_v10, %v7215_v61  ;;  %v7229_v24 = vrot.slane %v16042_v43, 5  ;;  %12662 = vmatprep.mubr.msk.bf16.mxu0 %vm690_vm3, %v12953_v52  ;;  %v16222_v51 = vsel %vm13369_vm9, %v11584_v38, %v7219_v34 }
 0x30f   : > { %12633 = vmatmul.mubr.msk.bf16.gmra.mxu1 %vm690_vm3, %v11596_v30  ;;  %v11600_v62 = vcombine.low %v16202_v5, %v16212_v14  ;;  %v7221_v21 = vrot.slane %v7219_v34, 4  ;;  %v11586_v36 = vrot.slane %v7095_v15, 9  ;;  %v16227_v33 = vsel %vm13369_vm9, %v11585_v49, %v7226_v35  ;;  %v7911_v30 = vld [vmem:[#allocation2 + $0xc] sm:$0xf]  ;;  %v16292_v15 = vld [vmem:[#allocation2 + $0x1c] sm:$0xf] }
 0x310   : > { %12636 = vmatprep.mubr.msk.bf16.mxu1 %vm690_vm3, %v11597_v22  ;;  %v7228_v43 = vrot.slane %v7226_v35, 4  ;;  %v7233_v41 = vrot.slane %v16051_v37, 5  ;;  %v7236_v11 = vrot.slane %v16056_v19, 5  ;;  %v11587_v6 = vrot.slane %v7096_v12, 9  ;;  %v16300_v49 = vld [vmem:[#allocation2 + $0x20] sm:$0x1] }
 0x311   : > { %v16233_v28 = vsel %vm13369_vm9, %v7221_v21, %v7222_v25  ;;  %v7240_v39 = vrot.slane %v16063_v16, 5  ;;  %v7243_v48 = vrot.slane %v16066_v46, 5  ;;  %v11588_v27 = vrot.slane %v7097_v47, 9  ;;  %v12956_v47 = vld [vmem:[#allocation2 + $0x48] sm:$0xff]  }
 0x312   : > { %v11601_v59 = vcombine.low %v16222_v51, %v16233_v28  ;;  %v16241_v50 = vsel %vm13369_vm9, %v7228_v43, %v7229_v24  ;;  %v16245_v37 = vsel %vm13369_vm9, %v11586_v36, %v7233_v41  ;;  %v7235_v19 = vrot.slane %v7233_v41, 4 }
 0x313   : > { %v11602_v60 = vcombine.low %v16227_v33, %v16241_v50  ;;  %v16251_v16 = vsel %vm13369_vm9, %v11587_v6, %v7240_v39  ;;  %v7242_v46 = vrot.slane %v7240_v39, 4  ;;  %v7247_v17 = vrot.slane %v16076_v63, 5 }
 0x314   : > { %v16255_v7 = vsel %vm13369_vm9, %v7235_v19, %v7236_v11  ;;  %v7250_v0 = vrot.slane %v16086_v29, 5  ;;  %v11589_v4 = vrot.slane %v7098_v42, 9  ;;  %v7254_v1 = vrot.slane %v16104_v53, 5  ;;  %v7917_v11 = vld [vmem:[#allocation2 + $0x24] sm:$0xf] }
 0x315   : > { %v11603_v31 = vcombine.low %v16245_v37, %v16255_v7  ;;  %v16265_v54 = vsel %vm13369_vm9, %v7242_v46, %v7243_v48  ;;  %v7257_v9 = vrot.slane %v16106_v57, 5  ;;  %12663 = vmatmul.mubr.msk.bf16.gmra.mxu0 %vm690_vm3, %v12954_v55  ;;  %v16276_v29 = vsel %vm13369_vm9, %v11588_v27, %v7247_v17  ;;  %v16313_v19 = vld [vmem:[#allocation2 + $0x28] sm:$0xf] }
 0x316   : > { %v11604_v63 = vcombine.low %v16251_v16, %v16265_v54  ;;  %v7249_v61 = vrot.slane %v7247_v17, 4  ;;  %v7960_v22 = vshrl.u32 %v7911_v30, 16  ;;  %12666 = vmatprep.mubr.msk.bf16.mxu0 %vm690_vm3, %v12955_v23  ;;  %v16282_v53 = vsel %vm13369_vm9, %v11589_v4, %v7254_v1 }
 0x317   : > { %12637 = vmatmul.mubr.msk.bf16.gmra.mxu1 %vm690_vm3, %v11598_v18  ;;  %v7256_v57 = vrot.slane %v7254_v1, 4  ;;  %v7963_v44 = vshll.u32 %v7911_v30, 16  ;;  %v7969_v45 = vshll.u32 %v16259_v13, 16  ;;  %v7973_v38 = vshrl.u32 %v16259_v13, 16 }
 0x318   : > { %12640 = vmatprep.mubr.msk.bf16.mxu1 %vm690_vm3, %v11599_v26  ;;  %v16288_v20 = vsel %vm13369_vm9, %v7249_v61, %v7250_v0  ;;  %v7962_v10 = vrot.slane %v7960_v22, 4  ;;  %v7979_v18 = vshll.u32 %v16269_v32, 16  ;;  %v8912_v12 = vsel %vm739_vm0, %v16166_v40, 0  ;;  %v12957_v40 = vld [vmem:[#allocation2 + $0x54] sm:$0xff]  }
 0x319   : > { %v11605_v52 = vcombine.low %v16276_v29, %v16288_v20  ;;  %v16298_v8 = vsel %vm13369_vm9, %v7256_v57, %v7257_v9  ;;  %v7965_v34 = vrot.slane %v7963_v44, 5  ;;  %v7971_v25 = vrot.slane %v7969_v45, 5  ;;  %12725 = vmatpush3.bf16.msra.mxu0 %v8912_v12  ;;  %v16323_v9 = vld [vmem:[#allocation2 + $0x2c] sm:$0x1]  ;;  %v8637_v57 = vld [vmem:[#allocation2 + $0xc] sm:$0xe] }
 0x31a   : > { %v11606_v26 = vcombine.low %v16282_v53, %v16298_v8  ;;  %v7975_v35 = vrot.slane %v7973_v38, 4  ;;  %v7981_v24 = vrot.slane %v7979_v18, 5  ;;  %v7984_v36 = vshrl.u32 %v7914_v56, 16  ;;  %v7920_v18 = vld [vmem:[#allocation2 + $0x30] sm:$0xf] }
 0x31b   : > { %v7966_v21 = vor.u32 %v7965_v34, %v7962_v10  ;;  %v7987_v43 = vshll.u32 %v7914_v56, 16  ;;  %v7993_v41 = vshll.u32 %v16292_v15, 16  ;;  %v7997_v39 = vshrl.u32 %v16292_v15, 16  ;;  %v7929_v20 = vld [vmem:[#allocation2 + $0x54] sm:$0xf] }
 0x31c   : > { %v7976_v6 = vor.u32 %v7975_v35, %v7971_v25  ;;  %v8003_v48 = vshll.u32 %v16300_v49, 16  ;;  %v16311_v42 = vsel %vm739_vm0, %v16171_v2, 0  ;;  %v7986_v27 = vrot.slane %v7984_v36, 4  ;;  %v12958_v36 = vld [vmem:[#allocation2 + $0x60] sm:$0xff]  }
 0x31d   : > { %v7967_v46 = vrot.slane %v7966_v21, 4  ;;  %v7989_v30 = vrot.slane %v7987_v43, 5  ;;  %v7995_v55 = vrot.slane %v7993_v41, 5  ;;  %12667 = vmatmul.mubr.msk.bf16.gmra.mxu0 %vm690_vm3, %v12956_v47  ;;  %v7999_v0 = vrot.slane %v7997_v39, 4  ;;  %v16340_v21 = vld [vmem:[#allocation2 + $0x34] sm:$0xf] }
 0x31e   : > { %v7977_v17 = vrot.slane %v7976_v6, 4  ;;  %v8005_v4 = vrot.slane %v8003_v48, 5  ;;  %v8008_v23 = vshrl.u32 %v7917_v11, 16  ;;  %12670 = vmatprep.mubr.msk.bf16.mxu0 %vm690_vm3, %v12957_v40  ;;  %v8011_v61 = vshll.u32 %v7917_v11, 16  ;;  %v16344_v47 = vld [vmem:[#allocation2 + $0x38] sm:$0x1] }
 0x31f   : > { %12641 = vmatmul.mubr.msk.bf16.gmra.mxu1 %vm690_vm3, %v11600_v62  ;;  %v7972_v2 = vsel %vm13160_vm6, %v7967_v46, %v7971_v25  ;;  %v7990_v1 = vor.u32 %v7989_v30, %v7986_v27  ;;  %v8017_v22 = vshll.u32 %v16313_v19, 16  ;;  %v8000_v14 = vor.u32 %v7999_v0, %v7995_v55  ;;  %v12959_v39 = vld [vmem:[#allocation2 + $0x6c] sm:$0xff]  }
 0x320   : > { %12644 = vmatprep.mubr.msk.bf16.mxu1 %vm690_vm3, %v11601_v59  ;;  %v7982_v5 = vsel %vm13160_vm6, %v7977_v17, %v7981_v24  ;;  %v8010_v62 = vrot.slane %v8008_v23, 4  ;;  %v8021_v44 = vshrl.u32 %v16313_v19, 16  ;;  %v8013_v10 = vrot.slane %v8011_v61, 5  ;;  %v7923_v17 = vld [vmem:[#allocation2 + $0x3c] sm:$0xf] }
 0x321   : > { %v16333_v45 = vcombine.low %v7972_v2, %v7982_v5  ;;  %v7991_v56 = vrot.slane %v7990_v1, 4  ;;  %v8019_v38 = vrot.slane %v8017_v22, 5  ;;  %v8001_v34 = vrot.slane %v8000_v14, 4  ;;  %v16367_v1 = vld [vmem:[#allocation2 + $0x40] sm:$0xf] }
 0x322   : > { %v8023_v25 = vrot.slane %v8021_v44, 4  ;;  %v8027_v35 = vshll.u32 %v16323_v9, 16  ;;  %v11689_v51 = vrot.slane %v8637_v57, 9  ;;  %v8014_v59 = vor.u32 %v8013_v10, %v8010_v62  ;;  %v16377_v22 = vld [vmem:[#allocation2 + $0x44] sm:$0x1] }
 0x323   : > { %v7996_v28 = vsel %vm13160_vm6, %v7991_v56, %v7995_v55  ;;  %v8703_v24 = vrot.slane %v16259_v13, 5  ;;  %v8706_v12 = vrot.slane %v16269_v32, 5  ;;  %v8006_v43 = vsel %vm13160_vm6, %v8001_v34, %v8005_v4  ;;  %v8638_v57 = vld [vmem:[#allocation2 + $0x18] sm:$0xe] }
 0x324   : > { %v8024_v41 = vor.u32 %v8023_v25, %v8019_v38  ;;  %v8029_v11 = vrot.slane %v8027_v35, 5  ;;  %v8032_v6 = vshrl.u32 %v7920_v18, 16  ;;  %v16346_v48 = vcombine.low %v7996_v28, %v8006_v43  ;;  %v8639_v25 = vld [vmem:[#allocation2 + $0x24] sm:$0xe]  ;;  %v12960_v35 = vld [vmem:[#allocation2 + $0x78] sm:$0xff]  }
 0x325   : > { %v8015_v40 = vrot.slane %v8014_v59, 4  ;;  %v16350_v13 = vsel %vm13369_vm9, %v11689_v51, %v8703_v24  ;;  %v8705_v32 = vrot.slane %v8703_v24, 4  ;;  %12671 = vmatmul.mubr.msk.bf16.gmra.mxu0 %vm690_vm3, %v12958_v36  ;;  %v8035_v30 = vshll.u32 %v7920_v18, 16 }
 0x326   : > { %v8025_v46 = vrot.slane %v8024_v41, 4  ;;  %v8034_v27 = vrot.slane %v8032_v6, 4  ;;  %v8041_v55 = vshll.u32 %v16340_v21, 16  ;;  %12674 = vmatprep.mubr.msk.bf16.mxu0 %vm690_vm3, %v12959_v39  ;;  %v8045_v23 = vshrl.u32 %v16340_v21, 16 }
 0x327   : > { %12645 = vmatmul.mubr.msk.bf16.gmra.mxu1 %vm690_vm3, %v11602_v60  ;;  %v8020_v0 = vsel %vm13160_vm6, %v8015_v40, %v8019_v38  ;;  %v16363_v4 = vsel %vm13369_vm9, %v8705_v32, %v8706_v12  ;;  %v8051_v2 = vshll.u32 %v16344_v47, 16  ;;  %v8037_v60 = vrot.slane %v8035_v30, 5  ;;  %v12961_v12 = vld [vmem:[#allocation2 + $0x84] sm:$0xff]  }
 0x328   : > { %12648 = vmatprep.mubr.msk.bf16.mxu1 %vm690_vm3, %v11603_v31  ;;  %v8030_v33 = vsel %vm13160_vm6, %v8025_v46, %v8029_v11  ;;  %v11706_v50 = vcombine.low %v16350_v13, %v16363_v4  ;;  %v8043_v61 = vrot.slane %v8041_v55, 5  ;;  %v8047_v14 = vrot.slane %v8045_v23, 4  ;;  %v7926_v46 = vld [vmem:[#allocation2 + $0x48] sm:$0xf]  ;;  %v16401_v55 = vld [vmem:[#allocation2 + $0x4c] sm:$0xf] }
 0x329   : > { %v16379_v5 = vcombine.low %v8020_v0, %v8030_v33  ;;  %v8053_v62 = vrot.slane %v8051_v2, 5  ;;  %v8056_v44 = vshrl.u32 %v7923_v17, 16  ;;  %v8038_v56 = vor.u32 %v8037_v60, %v8034_v27  ;;  %v16410_v0 = vld [vmem:[#allocation2 + $0x50] sm:$0x1] }
 0x32a   : > { %v8059_v37 = vshll.u32 %v7923_v17, 16  ;;  %v8065_v7 = vshll.u32 %v16367_v1, 16  ;;  %v8069_v31 = vshrl.u32 %v16367_v1, 16  ;;  %v8048_v10 = vor.u32 %v8047_v14, %v8043_v61 }
 0x32b   : > { %v8058_v38 = vrot.slane %v8056_v44, 4  ;;  %v8075_v18 = vshll.u32 %v16377_v22, 16  ;;  %v11690_v34 = vrot.slane %v8638_v57, 9  ;;  %v8039_v51 = vrot.slane %v8038_v56, 4  ;;  %v16426_v57 = vld [vmem:[#allocation2 + $0x58] sm:$0xf] }
 0x32c   : > { %v8061_v28 = vrot.slane %v8059_v37, 5  ;;  %v8067_v59 = vrot.slane %v8065_v7, 5  ;;  %v8071_v24 = vrot.slane %v8069_v31, 4  ;;  %v8049_v36 = vrot.slane %v8048_v10, 4  ;;  %v16435_v37 = vld [vmem:[#allocation2 + $0x5c] sm:$0x1] }
 0x32d   : > { %v8077_v43 = vrot.slane %v8075_v18, 5  ;;  %v8710_v41 = vrot.slane %v16292_v15, 5  ;;  %v8713_v11 = vrot.slane %v16300_v49, 5  ;;  %12675 = vmatmul.mubr.msk.bf16.gmra.mxu0 %vm690_vm3, %v12960_v35  ;;  %v8044_v6 = vsel %vm13160_vm6, %v8039_v51, %v8043_v61  ;;  %v16440_v7 = vld [vmem:[%s18231_s3 + $0xe] sm:$0x3]  ;;  %v12963_v31 = vld [vmem:[#allocation2 + $0x9c] sm:$0xff]  }
 0x32e   : > { %v8062_v39 = vor.u32 %v8061_v28, %v8058_v38  ;;  %v8072_v40 = vor.u32 %v8071_v24, %v8067_v59  ;;  %v11691_v32 = vrot.slane %v8639_v25, 9  ;;  %12678 = vmatprep.mubr.msk.bf16.mxu0 %vm690_vm3, %v12961_v12  ;;  %v8054_v15 = vsel %vm13160_vm6, %v8049_v36, %v8053_v62  ;;  %v8640_v25 = vld [vmem:[#allocation2 + $0x30] sm:$0xe]  ;;  %12876 = vmatprep.subr.msk.bf16.mxu0 %vm739_vm0, %v16440_v7  ;;  %v8641_v24 = vld [vmem:[#allocation2 + $0x3c] sm:$0xe] }
 0x32f   : > { %12649 = vmatmul.mubr.msk.bf16.gmra.mxu1 %vm690_vm3, %v11604_v63  ;;  %v16398_v49 = vsel %vm13369_vm9, %v11690_v34, %v8710_v41  ;;  %v8712_v27 = vrot.slane %v8710_v41, 4  ;;  %v8717_v30 = vrot.slane %v16313_v19, 5  ;;  %v16407_v16 = vcombine.low %v8044_v6, %v8054_v15 }
 0x330   : > { %12652 = vmatprep.mubr.msk.bf16.mxu1 %vm690_vm3, %v11605_v52  ;;  %v8063_v54 = vrot.slane %v8062_v39, 4  ;;  %v8073_v63 = vrot.slane %v8072_v40, 4  ;;  %v8720_v17 = vrot.slane %v16323_v9, 5  ;;  %v8080_v29 = vshrl.u32 %v7926_v46, 16  ;;  %v12962_v52 = vld [vmem:[#allocation2 + $0x90] sm:$0xff]  }
 0x331   : > { %v16414_v23 = vsel %vm13369_vm9, %v8712_v27, %v8713_v11  ;;  %v16418_v19 = vsel %vm13369_vm9, %v11691_v32, %v8717_v30  ;;  %v8719_v2 = vrot.slane %v8717_v30, 4  ;;  %v8083_v61 = vshll.u32 %v7926_v46, 16  ;;  %v7932_v32 = vld [vmem:[#allocation2 + $0x60] sm:$0xf] }
 0x332   : > { %v8068_v33 = vsel %vm13160_vm6, %v8063_v54, %v8067_v59  ;;  %v8078_v9 = vsel %vm13160_vm6, %v8073_v63, %v8077_v43  ;;  %v11707_v60 = vcombine.low %v16398_v49, %v16414_v23  ;;  %v8082_v44 = vrot.slane %v8080_v29, 4 }
 0x333   : > { %v16428_v14 = vcombine.low %v8068_v33, %v8078_v9  ;;  %v16432_v62 = vsel %vm13369_vm9, %v8719_v2, %v8720_v17  ;;  %v8089_v56 = vshll.u32 %v16401_v55, 16  ;;  %v8085_v38 = vrot.slane %v8083_v61, 5 }
 0x334   : > { %v11708_v10 = vcombine.low %v16418_v19, %v16432_v62  ;;  %v8093_v18 = vshrl.u32 %v16401_v55, 16  ;;  %v8099_v34 = vshll.u32 %v16410_v0, 16  ;;  %v8104_v51 = vshrl.u32 %v7929_v20, 16 }
 0x335   : > { %v8091_v35 = vrot.slane %v8089_v56, 5  ;;  %v8107_v28 = vshll.u32 %v7929_v20, 16  ;;  %v8113_v59 = vshll.u32 %v16426_v57, 16  ;;  %12679 = vmatmul.mubr.msk.bf16.gmra.mxu0 %vm690_vm3, %v12962_v52  ;;  %v8086_v12 = vor.u32 %v8085_v38, %v8082_v44  ;;  %v16463_v20 = vld [vmem:[#allocation2 + $0x64] sm:$0xf]  ;;  %v12965_v52 = vld [vmem:[#allocation2 + $0xb4] sm:$0xff]  }
 0x336   : > { %v8095_v36 = vrot.slane %v8093_v18, 4  ;;  %v8101_v43 = vrot.slane %v8099_v34, 5  ;;  %v8117_v41 = vshrl.u32 %v16426_v57, 16  ;;  %12682 = vmatprep.mubr.msk.bf16.mxu0 %vm690_vm3, %v12963_v31  ;;  %v8106_v11 = vrot.slane %v8104_v51, 4  ;;  %v12964_v44 = vld [vmem:[#allocation2 + $0xa8] sm:$0xff]  }
 0x337   : > { %12653 = vmatmul.mubr.msk.bf16.gmra.mxu1 %vm690_vm3, %v11606_v26  ;;  %v8109_v6 = vrot.slane %v8107_v28, 5  ;;  %v8115_v39 = vrot.slane %v8113_v59, 5  ;;  %v8123_v40 = vshll.u32 %v16435_v37, 16  ;;  %v8087_v46 = vrot.slane %v8086_v12, 4 }
 0x338   : > { %12692 = vmatprep.mubr.msk.bf16.mxu1 %vm690_vm3, %v16333_v45  ;;  %v8096_v15 = vor.u32 %v8095_v36, %v8091_v35  ;;  %v8119_v27 = vrot.slane %v8117_v41, 4  ;;  %v11692_v30 = vrot.slane %v8640_v25, 9  ;;  %v8724_v17 = vrot.slane %v16340_v21, 5  ;;  %v16470_v21 = vld [vmem:[#allocation2 + $0x68] sm:$0x1] }
 0x339   : > { %v8110_v54 = vor.u32 %v8109_v6, %v8106_v11  ;;  %v8125_v63 = vrot.slane %v8123_v40, 5  ;;  %v8727_v53 = vrot.slane %v16344_v47, 5  ;;  %v8092_v8 = vsel %vm13160_vm6, %v8087_v46, %v8091_v35  ;;  %v7935_v47 = vld [vmem:[#allocation2 + $0x6c] sm:$0xf]  ;;  %v16504_v11 = vld [vmem:[#allocation2 + $0x70] sm:$0xf] }
 0x33a   : > { %v8097_v26 = vrot.slane %v8096_v15, 4  ;;  %v8120_v2 = vor.u32 %v8119_v27, %v8115_v39  ;;  %v11693_v29 = vrot.slane %v8641_v24, 9  ;;  %v16467_v33 = vsel %vm13369_vm9, %v11692_v30, %v8724_v17  ;;  %v16495_v24 = vld [vmem:[%s18231_s3 + $0x10] sm:$0x3] }
 0x33b   : > { %v8111_v45 = vrot.slane %v8110_v54, 4  ;;  %v8726_v9 = vrot.slane %v8724_v17, 4  ;;  %v8731_v61 = vrot.slane %v16367_v1, 5  ;;  %v8734_v38 = vrot.slane %v16377_v22, 5 }
 0x33c   : > { %v8102_v56 = vsel %vm13160_vm6, %v8097_v26, %v8101_v43  ;;  %v8121_v31 = vrot.slane %v8120_v2, 4  ;;  %v8128_v18 = vshrl.u32 %v7932_v32, 16  ;;  %v8131_v36 = vshll.u32 %v7932_v32, 16 }
 0x33d   : > { %v16475_v34 = vcombine.low %v8092_v8, %v8102_v56  ;;  %v8116_v25 = vsel %vm13160_vm6, %v8111_v45, %v8115_v39  ;;  %v16481_v35 = vsel %vm13369_vm9, %v8726_v9, %v8727_v53  ;;  %v16485_v1 = vsel %vm13369_vm9, %v11693_v29, %v8731_v61  ;;  %12683 = vmatmul.mubr.msk.bf16.gmra.mxu0 %vm690_vm3, %v12964_v44  ;;  %v16514_v39 = vld [vmem:[#allocation2 + $0x74] sm:$0x1]  ;;  %v8643_v53 = vld [vmem:[#allocation2 + $0x54] sm:$0xe] }
 0x33e   : > { %v8126_v51 = vsel %vm13160_vm6, %v8121_v31, %v8125_v63  ;;  %v11709_v22 = vcombine.low %v16467_v33, %v16481_v35  ;;  %v8733_v28 = vrot.slane %v8731_v61, 4  ;;  %v8130_v59 = vrot.slane %v8128_v18, 4  ;;  %12686 = vmatprep.mubr.msk.bf16.mxu0 %vm690_vm3, %v12965_v52  ;;  %v12966_v52 = vld [vmem:[#allocation2 + $0xc0] sm:$0xff]  }
 0x33f   : > { %12693 = vmatmul.mubr.msk.bf16.vlgmr.msra.gmra.mxu1 %vm690_vm3, %v16346_v48  ;;  %v16500_v12 = vcombine.low %v8116_v25, %v8126_v51  ;;  %v8137_v43 = vshll.u32 %v16463_v20, 16  ;;  %v8141_v41 = vshrl.u32 %v16463_v20, 16  ;;  %v8147_v48 = vshll.u32 %v16470_v21, 16 }
 0x340   : > { %12759 = vmatpush3.bf16.msra.mxu1 %v16311_v42  ;;  %12696 = vmatprep.mubr.msk.bf16.mxu1 %vm690_vm3, %v16379_v5  ;;  %v16511_v6 = vsel %vm13369_vm9, %v8733_v28, %v8734_v38  ;;  %v8152_v40 = vshrl.u32 %v7935_v47, 16  ;;  %v8155_v32 = vshll.u32 %v7935_v47, 16  ;;  %v8133_v15 = vrot.slane %v8131_v36, 5  ;;  %v8642_v42 = vld [vmem:[#allocation2 + $0x48] sm:$0xe] }
 0x341   : > { %v11710_v46 = vcombine.low %v16485_v1, %v16511_v6  ;;  %v8139_v27 = vrot.slane %v8137_v43, 5  ;;  %v8143_v30 = vrot.slane %v8141_v41, 4  ;;  %12877 = vmatprep.subr.msk.bf16.mxu1 %vm739_vm0, %v16495_v24  ;;  %v8149_v5 = vrot.slane %v8147_v48, 5  ;;  %v16540_v48 = vld [vmem:[#allocation2 + $0x7c] sm:$0xf] }
 0x342   : > { %v8154_v54 = vrot.slane %v8152_v40, 4  ;;  %v8157_v63 = vrot.slane %v8155_v32, 5  ;;  %v8161_v17 = vshll.u32 %v16504_v11, 16  ;;  %v8134_v8 = vor.u32 %v8133_v15, %v8130_v59  ;;  %v7938_v59 = vld [vmem:[#allocation2 + $0x78] sm:$0xf] }
 0x343   : > { %v8144_v26 = vor.u32 %v8143_v30, %v8139_v27  ;;  %v8165_v2 = vshrl.u32 %v16504_v11, 16  ;;  %v8171_v29 = vshll.u32 %v16514_v39, 16  ;;  %v11694_v61 = vrot.slane %v8642_v42, 9  ;;  %v7941_v40 = vld [vmem:[#allocation2 + $0x84] sm:$0xf] }
 0x344   : > { %v8158_v45 = vor.u32 %v8157_v63, %v8154_v54  ;;  %v8163_v9 = vrot.slane %v8161_v17, 5  ;;  %v8738_v47 = vrot.slane %v16401_v55, 5  ;;  %v8135_v44 = vrot.slane %v8134_v8, 4  ;;  %v16558_v30 = vld [vmem:[#allocation2 + $0x88] sm:$0xf] }
 0x345   : > { %v8145_v56 = vrot.slane %v8144_v26, 4  ;;  %v8167_v31 = vrot.slane %v8165_v2, 4  ;;  %v8173_v38 = vrot.slane %v8171_v29, 5  ;;  %12687 = vmatmul.mubr.msk.bf16.gmra.mxu0 %vm690_vm3, %v12966_v52  ;;  %v8741_v28 = vrot.slane %v16410_v0, 5  ;;  %v16565_v63 = vld [vmem:[#allocation2 + $0x8c] sm:$0x1] }
 0x346   : > { %v8159_v18 = vrot.slane %v8158_v45, 4  ;;  %v16527_v25 = vsel %vm13369_vm9, %v11694_v61, %v8738_v47  ;;  %v8740_v51 = vrot.slane %v8738_v47, 4  ;;  %12726 = vmatprep.mubr.msk.bf16.mxu0 %vm690_vm3, %v11706_v50  ;;  %v8140_v55 = vsel %vm13160_vm6, %v8135_v44, %v8139_v27  ;;  %v8644_v17 = vld [vmem:[#allocation2 + $0x60] sm:$0xe] }
 0x347   : > { %12697 = vmatmul.mubr.msk.bf16.gmra.mxu1 %vm690_vm3, %v16407_v16  ;;  %v8150_v36 = vsel %vm13160_vm6, %v8145_v56, %v8149_v5  ;;  %v8168_v43 = vor.u32 %v8167_v31, %v8163_v9  ;;  %v11695_v41 = vrot.slane %v8643_v53, 9  ;;  %v8745_v50 = vrot.slane %v16426_v57, 5  ;;  %v16553_v16 = vld [vmem:[#allocation2 + $0x80] sm:$0x1] }
 0x348   : > { %12700 = vmatprep.mubr.msk.bf16.mxu1 %vm690_vm3, %v16428_v14  ;;  %v16544_v0 = vcombine.low %v8140_v55, %v8150_v36  ;;  %v8164_v13 = vsel %vm13160_vm6, %v8159_v18, %v8163_v9  ;;  %v16550_v4 = vsel %vm13369_vm9, %v8740_v51, %v8741_v28  ;;  %v8748_v14 = vrot.slane %v16435_v37, 5 }
 0x349   : > { %v8169_v32 = vrot.slane %v8168_v43, 4  ;;  %v11711_v15 = vcombine.low %v16527_v25, %v16550_v4  ;;  %v8176_v27 = vshrl.u32 %v7938_v59, 16  ;;  %v16562_v42 = vsel %vm13369_vm9, %v11695_v41, %v8745_v50 }
 0x34a   : > { %v8747_v5 = vrot.slane %v8745_v50, 4  ;;  %v8179_v54 = vshll.u32 %v7938_v59, 16  ;;  %v8185_v57 = vshll.u32 %v16540_v48, 16  ;;  %v8189_v37 = vshrl.u32 %v16540_v48, 16 }
 0x34b   : > { %v8174_v53 = vsel %vm13160_vm6, %v8169_v32, %v8173_v38  ;;  %v8178_v8 = vrot.slane %v8176_v27, 4  ;;  %v8195_v26 = vshll.u32 %v16553_v16, 16  ;;  %v8200_v44 = vshrl.u32 %v7941_v40, 16 }
 0x34c   : > { %v16571_v2 = vcombine.low %v8164_v13, %v8174_v53  ;;  %v16575_v29 = vsel %vm13369_vm9, %v8747_v5, %v8748_v14  ;;  %v8181_v52 = vrot.slane %v8179_v54, 5  ;;  %v8187_v45 = vrot.slane %v8185_v57, 5  ;;  %v16598_v14 = vld [vmem:[#allocation2 + $0x94] sm:$0xf] }
 0x34d   : > { %v11712_v9 = vcombine.low %v16562_v42, %v16575_v29  ;;  %v8191_v61 = vrot.slane %v8189_v37, 4  ;;  %v8197_v47 = vrot.slane %v8195_v26, 5  ;;  %12727 = vmatmul.mubr.msk.bf16.vlgmr.msra.gmra.mxu0 %vm690_vm3, %v11707_v60  ;;  %v8203_v31 = vshll.u32 %v7941_v40, 16  ;;  %v8645_v60 = vld [vmem:[#allocation2 + $0x6c] sm:$0xe] }
 0x34e   : > { %v8182_v56 = vor.u32 %v8181_v52, %v8178_v8  ;;  %v8209_v38 = vshll.u32 %v16558_v30, 16  ;;  %v8213_v18 = vshrl.u32 %v16558_v30, 16  ;;  %12730 = vmatprep.mubr.msk.bf16.mxu0 %vm690_vm3, %v11708_v10  ;;  %v8202_v28 = vrot.slane %v8200_v44, 4  ;;  %v16616_v26 = vld [vmem:[#allocation2 + $0x98] sm:$0x1] }
 0x34f   : > { %12701 = vmatmul.mubr.msk.bf16.gmra.mxu1 %vm690_vm3, %v16475_v34  ;;  %v8192_v51 = vor.u32 %v8191_v61, %v8187_v45  ;;  %v8219_v49 = vshll.u32 %v16565_v63, 16  ;;  %v11696_v23 = vrot.slane %v8644_v17, 9  ;;  %v8205_v55 = vrot.slane %v8203_v31, 5  ;;  %v7944_v34 = vld [vmem:[#allocation2 + $0x90] sm:$0xf] }
 0x350   : > { %12704 = vmatprep.mubr.msk.bf16.mxu1 %vm690_vm3, %v16500_v12  ;;  %v8183_v59 = vrot.slane %v8182_v56, 4  ;;  %v8211_v36 = vrot.slane %v8209_v38, 5  ;;  %v8215_v43 = vrot.slane %v8213_v18, 4  ;;  %v8752_v62 = vrot.slane %v16463_v20, 5  ;;  %v16628_v44 = vld [vmem:[#allocation2 + $0xa0] sm:$0xf] }
 0x351   : > { %v8193_v41 = vrot.slane %v8192_v51, 4  ;;  %v8221_v19 = vrot.slane %v8219_v49, 5  ;;  %v8755_v10 = vrot.slane %v16470_v21, 5  ;;  %v8206_v50 = vor.u32 %v8205_v55, %v8202_v28  ;;  %v16641_v31 = vld [vmem:[#allocation2 + $0xa4] sm:$0x1] }
 0x352   : > { %v8188_v13 = vsel %vm13160_vm6, %v8183_v59, %v8187_v45  ;;  %v8216_v40 = vor.u32 %v8215_v43, %v8211_v36  ;;  %v11697_v32 = vrot.slane %v8645_v60, 9  ;;  %v16604_v27 = vsel %vm13369_vm9, %v11696_v23, %v8752_v62  ;;  %v8646_v38 = vld [vmem:[#allocation2 + $0x78] sm:$0xe]  ;;  %v8647_v23 = vld [vmem:[#allocation2 + $0x84] sm:$0xe] }
 0x353   : > { %v8198_v12 = vsel %vm13160_vm6, %v8193_v41, %v8197_v47  ;;  %v8754_v5 = vrot.slane %v8752_v62, 4  ;;  %v8759_v20 = vrot.slane %v16504_v11, 5  ;;  %v8207_v54 = vrot.slane %v8206_v50, 4  ;;  %v7947_v47 = vld [vmem:[#allocation2 + $0x9c] sm:$0xf] }
 0x354   : > { %v11666_v21 = vcombine.low %v8188_v13, %v8198_v12  ;;  %v8217_v57 = vrot.slane %v8216_v40, 4  ;;  %v8762_v17 = vrot.slane %v16514_v39, 5  ;;  %v8224_v52 = vshrl.u32 %v7944_v34, 16 }
 0x355   : > { %v16610_v53 = vsel %vm13369_vm9, %v8754_v5, %v8755_v10  ;;  %v16614_v8 = vsel %vm13369_vm9, %v11697_v32, %v8759_v20  ;;  %v8761_v37 = vrot.slane %v8759_v20, 4  ;;  %12731 = vmatmul.mubr.msk.bf16.gmra.mxu0 %vm690_vm3, %v11709_v22  ;;  %v8212_v11 = vsel %vm13160_vm6, %v8207_v54, %v8211_v36  ;;  %v7950_v5 = vld [vmem:[#allocation2 + $0xa8] sm:$0xf] }
 0x356   : > { %v8222_v39 = vsel %vm13160_vm6, %v8217_v57, %v8221_v19  ;;  %v11713_v45 = vcombine.low %v16604_v27, %v16610_v53  ;;  %v8227_v61 = vshll.u32 %v7944_v34, 16  ;;  %12734 = vmatprep.mubr.msk.bf16.mxu0 %vm690_vm3, %v11710_v46  ;;  %v8226_v22 = vrot.slane %v8224_v52, 4 }
 0x357   : > { %12705 = vmatmul.mubr.msk.bf16.gmra.mxu1 %vm690_vm3, %v16544_v0  ;;  %v11667_v33 = vcombine.low %v8212_v11, %v8222_v39  ;;  %v16638_v35 = vsel %vm13369_vm9, %v8761_v37, %v8762_v17  ;;  %v8233_v56 = vshll.u32 %v16598_v14, 16  ;;  %v8237_v46 = vshrl.u32 %v16598_v14, 16 }
 0x358   : > { %12708 = vmatprep.mubr.msk.bf16.mxu1 %vm690_vm3, %v16571_v2  ;;  %v11714_v1 = vcombine.low %v16614_v8, %v16638_v35  ;;  %v8229_v6 = vrot.slane %v8227_v61, 5  ;;  %v8243_v0 = vshll.u32 %v16616_v26, 16  ;;  %v8248_v51 = vshrl.u32 %v7947_v47, 16  ;;  %v7953_v61 = vld [vmem:[#allocation2 + $0xb4] sm:$0xf] }
 0x359   : > { %v8235_v18 = vrot.slane %v8233_v56, 5  ;;  %v8251_v28 = vshll.u32 %v7947_v47, 16  ;;  %v8257_v49 = vshll.u32 %v16628_v44, 16  ;;  %v8239_v59 = vrot.slane %v8237_v46, 4 }
 0x35a   : > { %v8230_v60 = vor.u32 %v8229_v6, %v8226_v22  ;;  %v8245_v55 = vrot.slane %v8243_v0, 5  ;;  %v8261_v36 = vshrl.u32 %v16628_v44, 16  ;;  %v8250_v2 = vrot.slane %v8248_v51, 4  ;;  %v16694_v0 = vld [vmem:[#allocation2 + $0xb8] sm:$0xf] }
 0x35b   : > { %v8253_v43 = vrot.slane %v8251_v28, 5  ;;  %v8259_v41 = vrot.slane %v8257_v49, 5  ;;  %v8267_v19 = vshll.u32 %v16641_v31, 16  ;;  %v8240_v10 = vor.u32 %v8239_v59, %v8235_v18  ;;  %v16699_v28 = vld [vmem:[#allocation2 + $0xbc] sm:$0x1] }
 0x35c   : > { %v8231_v62 = vrot.slane %v8230_v60, 4  ;;  %v8263_v34 = vrot.slane %v8261_v36, 4  ;;  %v11698_v13 = vrot.slane %v8646_v38, 9  ;;  %v8766_v32 = vrot.slane %v16540_v48, 5 }
 0x35d   : > { %v8254_v50 = vor.u32 %v8253_v43, %v8250_v2  ;;  %v8269_v40 = vrot.slane %v8267_v19, 5  ;;  %v8769_v12 = vrot.slane %v16553_v16, 5  ;;  %12735 = vmatmul.mubr.msk.bf16.gmra.mxu0 %vm690_vm3, %v11711_v15  ;;  %v8241_v54 = vrot.slane %v8240_v10, 4  ;;  %v16670_v15 = vld [vmem:[#allocation2 + $0xac] sm:$0xf] }
 0x35e   : > { %v8236_v20 = vsel %vm13160_vm6, %v8231_v62, %v8235_v18  ;;  %v8264_v57 = vor.u32 %v8263_v34, %v8259_v41  ;;  %v11699_v17 = vrot.slane %v8647_v23, 9  ;;  %12738 = vmatprep.mubr.msk.bf16.mxu0 %vm690_vm3, %v11712_v9  ;;  %v16667_v16 = vsel %vm13369_vm9, %v11698_v13, %v8766_v32  ;;  %v16676_v9 = vld [vmem:[#allocation2 + $0xb0] sm:$0x1]  ;;  %v8648_v2 = vld [vmem:[#allocation2 + $0x90] sm:$0xe] }
 0x35f   : > { %12709 = vmatmul.mubr.msk.bf16.gmra.mxu1 %vm690_vm3, %v11666_v21  ;;  %v8255_v48 = vrot.slane %v8254_v50, 4  ;;  %v8768_v25 = vrot.slane %v8766_v32, 4  ;;  %v8773_v4 = vrot.slane %v16558_v30, 5  ;;  %v8246_v37 = vsel %vm13160_vm6, %v8241_v54, %v8245_v55  ;;  %v8649_v32 = vld [vmem:[#allocation2 + $0x9c] sm:$0xe] }
 0x360   : > { %12712 = vmatprep.mubr.msk.bf16.mxu1 %vm690_vm3, %v11667_v33  ;;  %v8265_v42 = vrot.slane %v8264_v57, 4  ;;  %v8776_v29 = vrot.slane %v16565_v63, 5  ;;  %v8272_v21 = vshrl.u32 %v7950_v5, 16  ;;  %v11668_v52 = vcombine.low %v8236_v20, %v8246_v37 }
 0x361   : > { %v8260_v11 = vsel %vm13160_vm6, %v8255_v48, %v8259_v41  ;;  %v16682_v30 = vsel %vm13369_vm9, %v8768_v25, %v8769_v12  ;;  %v16686_v39 = vsel %vm13369_vm9, %v11699_v17, %v8773_v4  ;;  %v8775_v33 = vrot.slane %v8773_v4, 4  ;;  %v7956_v17 = vld [vmem:[#allocation2 + $0xc0] sm:$0xf]  ;;  %v16723_v4 = vld [vmem:[#allocation2 + $0xc4] sm:$0xf] }
 0x362   : > { %v8270_v47 = vsel %vm13160_vm6, %v8265_v42, %v8269_v40  ;;  %v11715_v63 = vcombine.low %v16667_v16, %v16682_v30  ;;  %v8274_v22 = vrot.slane %v8272_v21, 4  ;;  %v8275_v38 = vshll.u32 %v7950_v5, 16  ;;  %v16730_v21 = vld [vmem:[#allocation2 + $0xc8] sm:$0x1] }
 0x363   : > { %v11669_v56 = vcombine.low %v8260_v11, %v8270_v47  ;;  %v8281_v6 = vshll.u32 %v16670_v15, 16  ;;  %v8285_v46 = vshrl.u32 %v16670_v15, 16  ;;  %v8777_v18 = vsel %vm13369_vm9, %v8775_v33, %v8776_v29 }
 0x364   : > { %v8291_v51 = vshll.u32 %v16676_v9, 16  ;;  %v8296_v49 = vshrl.u32 %v7953_v61, 16  ;;  %v8299_v23 = vshll.u32 %v7953_v61, 16  ;;  %v11716_v60 = vcombine.low %v16686_v39, %v8777_v18 }
 0x365   : > { %v8277_v59 = vrot.slane %v8275_v38, 5  ;;  %v8283_v55 = vrot.slane %v8281_v6, 5  ;;  %v8287_v36 = vrot.slane %v8285_v46, 4  ;;  %12739 = vmatmul.mubr.msk.bf16.gmra.mxu0 %vm690_vm3, %v11713_v45  ;;  %v8305_v62 = vshll.u32 %v16694_v0, 16  ;;  %v8651_v6 = vld [vmem:[#allocation2 + $0xb4] sm:$0xe] }
 0x366   : > { %v8293_v43 = vrot.slane %v8291_v51, 5  ;;  %v8298_v41 = vrot.slane %v8296_v49, 4  ;;  %v8301_v19 = vrot.slane %v8299_v23, 5  ;;  %12742 = vmatprep.mubr.msk.bf16.mxu0 %vm690_vm3, %v11714_v1  ;;  %v8309_v13 = vshrl.u32 %v16694_v0, 16 }
 0x367   : > { %12713 = vmatmul.mubr.msk.bf16.gmra.mxu1 %vm690_vm3, %v11668_v52  ;;  %v8278_v10 = vor.u32 %v8277_v59, %v8274_v22  ;;  %v8288_v34 = vor.u32 %v8287_v36, %v8283_v55  ;;  %v8315_v27 = vshll.u32 %v16699_v28, 16  ;;  %v8307_v45 = vrot.slane %v8305_v62, 5 }
 0x368   : > { %12716 = vmatprep.mubr.msk.bf16.mxu1 %vm690_vm3, %v11669_v56  ;;  %v8302_v53 = vor.u32 %v8301_v19, %v8298_v41  ;;  %v11700_v50 = vrot.slane %v8648_v2, 9  ;;  %v8780_v40 = vrot.slane %v16598_v14, 5  ;;  %v8311_v35 = vrot.slane %v8309_v13, 4  ;;  %v8650_v56 = vld [vmem:[#allocation2 + $0xa8] sm:$0xe] }
 0x369   : > { %v8279_v12 = vrot.slane %v8278_v10, 4  ;;  %v8289_v8 = vrot.slane %v8288_v34, 4  ;;  %v8317_v1 = vrot.slane %v8315_v27, 5  ;;  %v8783_v57 = vrot.slane %v16616_v26, 5  ;;  %v8652_v19 = vld [vmem:[#allocation2 + $0xc0] sm:$0xe] }
 0x36a   : > { %v8303_v5 = vrot.slane %v8302_v53, 4  ;;  %v8781_v20 = vsel %vm13369_vm9, %v11700_v50, %v8780_v40  ;;  %v8782_v54 = vrot.slane %v8780_v40, 4  ;;  %v8312_v14 = vor.u32 %v8311_v35, %v8307_v45  ;;  %v9465_v35 = vld [vmem:[#allocation2 + $0x18] sm:$0xf] }
 0x36b   : > { %v8284_v48 = vsel %vm13160_vm6, %v8279_v12, %v8283_v55  ;;  %v8294_v16 = vsel %vm13160_vm6, %v8289_v8, %v8293_v43  ;;  %v11701_v25 = vrot.slane %v8649_v32, 9  ;;  %v8787_v26 = vrot.slane %v16628_v44, 5 }
 0x36c   : > { %v11670_v37 = vcombine.low %v8284_v48, %v8294_v16  ;;  %v8308_v42 = vsel %vm13160_vm6, %v8303_v5, %v8307_v45  ;;  %v8784_v29 = vsel %vm13369_vm9, %v8782_v54, %v8783_v57  ;;  %v8313_v52 = vrot.slane %v8312_v14, 4  ;;  %v9468_v48 = vld [vmem:[#allocation2 + $0x24] sm:$0xf] }
 0x36d   : > { %v11717_v11 = vcombine.low %v8781_v20, %v8784_v29  ;;  %v8790_v30 = vrot.slane %v16641_v31, 5  ;;  %v8320_v39 = vshrl.u32 %v7956_v17, 16  ;;  %12743 = vmatmul.mubr.msk.bf16.gmra.mxu0 %vm690_vm3, %v11715_v63  ;;  %v8788_v61 = vsel %vm13369_vm9, %v11701_v25, %v8787_v26 }
 0x36e   : > { %v8789_v47 = vrot.slane %v8787_v26, 4  ;;  %v8323_v33 = vshll.u32 %v7956_v17, 16  ;;  %v8329_v22 = vshll.u32 %v16723_v4, 16  ;;  %12746 = vmatprep.mubr.msk.bf16.mxu0 %vm690_vm3, %v11716_v60  ;;  %v8318_v44 = vsel %vm13160_vm6, %v8313_v52, %v8317_v1  ;;  %v16772_v1 = vld [vmem:[#allocation2 + $0x1c] sm:$0xf] }
 0x36f   : > { %12717 = vmatmul.mubr.msk.bf16.gmra.mxu1 %vm690_vm3, %v11670_v37  ;;  %v8322_v38 = vrot.slane %v8320_v39, 4  ;;  %v8333_v31 = vshrl.u32 %v16723_v4, 16  ;;  %v8339_v63 = vshll.u32 %v16730_v21, 16  ;;  %v11671_v46 = vcombine.low %v8308_v42, %v8318_v44  ;;  %v16782_v17 = vld [vmem:[#allocation2 + $0x20] sm:$0x1]  ;;  %v12967_v42 = vld [vmem:[#allocation2 + $0x18] sm:$0xff]  }
 0x370   : > { %v8791_v18 = vsel %vm13369_vm9, %v8789_v47, %v8790_v30  ;;  %v8325_v51 = vrot.slane %v8323_v33, 5  ;;  %v8331_v49 = vrot.slane %v8329_v22, 5  ;;  %v11702_v55 = vrot.slane %v8650_v56, 9  ;;  %v12558_v12 = vpop.f32.mrf.mxu1  ;;  %v16801_v33 = vld [vmem:[#allocation2 + $0x2c] sm:$0x1] }
 0x371   : > { %v11718_v23 = vcombine.low %v8788_v61, %v8791_v18  ;;  %v8335_v59 = vrot.slane %v8333_v31, 4  ;;  %v8341_v60 = vrot.slane %v8339_v63, 5  ;;  %12720 = vmatprep.mubr.msk.bf16.mxu1 %vm690_vm3, %v11671_v46  ;;  %v8794_v2 = vrot.slane %v16670_v15, 5  ;;  %v16757_v15 = vld [vmem:[%s18232_s4] ss:$0 sm:$0xff] }
 0x372   : > { %v8326_v36 = vor.u32 %v8325_v51, %v8322_v38  ;;  %v8797_v43 = vrot.slane %v16676_v9, 5  ;;  %v11703_v41 = vrot.slane %v8651_v6, 9  ;;  %v8801_v10 = vrot.slane %v16694_v0, 5  ;;  %v6198_v37 = vpop.f32.mrf.mxu1  ;;  %v9471_v63 = vld [vmem:[#allocation2 + $0x30] sm:$0xf] }
 0x373   : > { %v8336_v62 = vor.u32 %v8335_v59, %v8331_v49  ;;  %v8804_v34 = vrot.slane %v16699_v28, 5  ;;  %v9996_v13 = vsel %vm739_vm0, %v16440_v7, 0  ;;  %v8795_v53 = vsel %vm13369_vm9, %v11702_v55, %v8794_v2 }
 0x374   : > { %v8327_v27 = vrot.slane %v8326_v36, 4  ;;  %v8796_v45 = vrot.slane %v8794_v2, 4  ;;  %12793 = vmatpush3.bf16.msra.mxu0 %v9996_v13  ;;  %v16761_v9 = vsel %vm739_vm0, %v16495_v24, 0  ;;  %v8802_v28 = vsel %vm13369_vm9, %v11703_v41, %v8801_v10  ;;  %v12559_v47 = vpop.f32.mrf.mxu1 }
 0x375   : > { %v8337_v0 = vrot.slane %v8336_v62, 4  ;;  %v8803_v7 = vrot.slane %v8801_v10, 4  ;;  %v11704_v50 = vrot.slane %v8652_v19, 9  ;;  %12747 = vmatmul.mubr.msk.bf16.gmra.mxu0 %vm690_vm3, %v11717_v11  ;;  %v8808_v8 = vrot.slane %v16723_v4, 5  ;;  %v16792_v11 = vld [vmem:[#allocation2 + $0x28] sm:$0xf] }
 0x376   : > { %v8332_v40 = vsel %vm13160_vm6, %v8327_v27, %v8331_v49  ;;  %v8798_v32 = vsel %vm13369_vm9, %v8796_v45, %v8797_v43  ;;  %v8811_v24 = vrot.slane %v16730_v21, 5  ;;  %12750 = vmatprep.mubr.msk.bf16.mxu0 %vm690_vm3, %v11718_v23  ;;  %v16780_v57 = vadd.f32 %v12558_v12, %v16757_v15  ;;  %v6201_v51 = vpop.f32.mrf.mxu1  ;;  %v12968_v62 = vld [vmem:[#allocation2 + $0x24] sm:$0xff]  }
 0x377   : > { %v8342_v5 = vsel %vm13160_vm6, %v8337_v0, %v8341_v60  ;;  %v11719_v20 = vcombine.low %v8795_v53, %v8798_v32  ;;  %v8805_v54 = vsel %vm13369_vm9, %v8803_v7, %v8804_v34  ;;  %v16786_v25 = vsel %vm13369_vm9, %v11704_v50, %v8808_v8  ;;  %v16820_v53 = vld [vmem:[#allocation2 + $0x34] sm:$0xf]  ;;  %v16822_v50 = vld [vmem:[#allocation2 + $0x38] sm:$0x1] }
 0x378   : > { %v11672_v16 = vcombine.low %v8332_v40, %v8342_v5  ;;  %v11720_v14 = vcombine.low %v8802_v28, %v8805_v54  ;;  %v8810_v4 = vrot.slane %v8808_v8, 4  ;;  %v16789_v29 = vadd.f32 %v16757_v15, %v6198_v37  ;;  %v12969_v32 = vld [vmem:[#allocation2 + $0x30] sm:$0xff]  }
 0x379   : > { %v9514_v26 = vshrl.u32 %v9465_v35, 16  ;;  %v9517_v21 = vshll.u32 %v9465_v35, 16  ;;  %v9523_v52 = vshll.u32 %v16772_v1, 16  ;;  %v9527_v39 = vshrl.u32 %v16772_v1, 16  ;;  %v12562_v2 = vpop.f32.mrf.mxu1 }
 0x37a   : > { %12721 = vmatmul.mubr.msk.bf16.gmra.mxu1 %vm690_vm3, %v11672_v16  ;;  %v16797_v30 = vsel %vm13369_vm9, %v8810_v4, %v8811_v24  ;;  %v9533_v61 = vshll.u32 %v16782_v17, 16  ;;  %v9538_v22 = vshrl.u32 %v9468_v48, 16  ;;  %v16807_v18 = vadd.f32 %v12559_v47, %v16757_v15 }
 0x37b   : > { %12760 = vmatprep.mubr.msk.bf16.mxu1 %vm690_vm3, %v12967_v42  ;;  %v11721_v56 = vcombine.low %v16786_v25, %v16797_v30  ;;  %v9516_v44 = vrot.slane %v9514_v26, 4  ;;  %v9519_v38 = vrot.slane %v9517_v21, 5  ;;  %v9525_v31 = vrot.slane %v9523_v52, 5  ;;  %v6214_v7 = vpop.f32.mrf.mxu1  ;;  %v9474_v42 = vld [vmem:[#allocation2 + $0x3c] sm:$0xf] }
 0x37c   : > { %v9529_v6 = vrot.slane %v9527_v39, 4  ;;  %v9535_v46 = vrot.slane %v9533_v61, 5  ;;  %v9540_v49 = vrot.slane %v9538_v22, 4  ;;  %v16810_v59 = vadd.f32 %v16757_v15, %v6201_v51  ;;  %v16853_v51 = vld [vmem:[#allocation2 + $0x44] sm:$0x1] }
 0x37d   : > { %v9520_v23 = vor.u32 %v9519_v38, %v9516_v44  ;;  %v9541_v60 = vshll.u32 %v9468_v48, 16  ;;  %v9547_v55 = vshll.u32 %v16792_v11, 16  ;;  %12751 = vmatmul.mubr.msk.bf16.gmra.mxu0 %vm690_vm3, %v11719_v20  ;;  %v9551_v43 = vshrl.u32 %v16792_v11, 16  ;;  %v12563_v16 = vpop.f32.mrf.mxu1  ;;  %v16845_v38 = vld [vmem:[#allocation2 + $0x40] sm:$0xf] }
 0x37e   : > { %v9530_v36 = vor.u32 %v9529_v6, %v9525_v31  ;;  %v9557_v41 = vshll.u32 %v16801_v33, 16  ;;  %v9562_v19 = vshrl.u32 %v9471_v63, 16  ;;  %12754 = vmatprep.mubr.msk.bf16.mxu0 %vm690_vm3, %v11720_v14  ;;  %v16818_v34 = vadd.f32 %v12562_v2, %v16757_v15  ;;  %v12970_v2 = vld [vmem:[#allocation2 + $0x3c] sm:$0xff]  }
 0x37f   : > { %v9521_v10 = vrot.slane %v9520_v23, 4  ;;  %v9543_v13 = vrot.slane %v9541_v60, 5  ;;  %v9549_v27 = vrot.slane %v9547_v55, 5  ;;  %v9553_v0 = vrot.slane %v9551_v43, 4  ;;  %v6217_v39 = vpop.f32.mrf.mxu1 }
 0x380   : > { %v9531_v45 = vrot.slane %v9530_v36, 4  ;;  %v9559_v28 = vrot.slane %v9557_v41, 5  ;;  %v9564_v40 = vrot.slane %v9562_v19, 4  ;;  %v16827_v24 = vadd.f32 %v16757_v15, %v6214_v7 }
 0x381   : > { %v9526_v12 = vsel %vm13160_vm6, %v9521_v10, %v9525_v31  ;;  %v9544_v8 = vor.u32 %v9543_v13, %v9540_v49  ;;  %v9565_v35 = vshll.u32 %v9471_v63, 16  ;;  %v9554_v20 = vor.u32 %v9553_v0, %v9549_v27  ;;  %v9477_v10 = vld [vmem:[#allocation2 + $0x48] sm:$0xf] }
 0x382   : > { %12761 = vmatmul.mubr.msk.bf16.vlgmr.msra.gmra.mxu1 %vm690_vm3, %v12968_v62  ;;  %v9536_v5 = vsel %vm13160_vm6, %v9531_v45, %v9535_v46  ;;  %v9571_v54 = vshll.u32 %v16820_v53, 16  ;;  %v9575_v48 = vshrl.u32 %v16820_v53, 16  ;;  %v9581_v37 = vshll.u32 %v16822_v50, 16  ;;  %v12566_v46 = vpop.f32.mrf.mxu1  ;;  %v12971_v13 = vld [vmem:[#allocation2 + $0x48] sm:$0xff]  }
 0x383   : > { %12827 = vmatpush3.bf16.msra.mxu1 %v16761_v9  ;;  %12764 = vmatprep.mubr.msk.bf16.mxu1 %vm690_vm3, %v12969_v32  ;;  %v11772_v14 = vcombine.low %v9526_v12, %v9536_v5  ;;  %v9545_v25 = vrot.slane %v9544_v8, 4  ;;  %v9567_v4 = vrot.slane %v9565_v35, 5  ;;  %v9555_v26 = vrot.slane %v9554_v20, 4  ;;  %v16878_v35 = vld [vmem:[#allocation2 + $0x50] sm:$0x1] }
 0x384   : > { %v9573_v21 = vrot.slane %v9571_v54, 5  ;;  %v9577_v52 = vrot.slane %v9575_v48, 4  ;;  %v16838_v30 = vadd.f32 %v12563_v16, %v16757_v15  ;;  %v9583_v22 = vrot.slane %v9581_v37, 5  ;;  %v6230_v62 = vpop.f32.mrf.mxu1 }
 0x385   : > { %v12592_v61 = vpop.f32.mrf.mxu0  ;;  %v9550_v47 = vsel %vm13160_vm6, %v9545_v25, %v9549_v27  ;;  %v9568_v9 = vor.u32 %v9567_v4, %v9564_v40  ;;  %v16843_v44 = vadd.f32 %v16757_v15, %v6217_v39  ;;  %12755 = vmatmul.mubr.msk.bf16.gmra.mxu0 %vm690_vm3, %v11721_v56  ;;  %v9560_v63 = vsel %vm13160_vm6, %v9555_v26, %v9559_v28  ;;  %v16867_v40 = vld [vmem:[#allocation2 + $0x4c] sm:$0xf] }
 0x386   : > { %v16849_v31 = vadd.f32 %v12592_v61, %v16780_v57  ;;  %v9578_v6 = vor.u32 %v9577_v52, %v9573_v21  ;;  %v9586_v49 = vshrl.u32 %v9474_v42, 16  ;;  %12794 = vmatprep.mubr.msk.bf16.mxu0 %vm690_vm3, %v11772_v14  ;;  %v11773_v23 = vcombine.low %v9550_v47, %v9560_v63  ;;  %v12567_v5 = vpop.f32.mrf.mxu1  ;;  %v9480_v63 = vld [vmem:[#allocation2 + $0x54] sm:$0xf] }
 0x387   : > { %v9569_v60 = vrot.slane %v9568_v9, 4  ;;  %v6924_v55 = vpop.f32.mrf.mxu0  ;;  %v16857_v36 = vadd.f32 %v12566_v46, %v16757_v15  ;;  %v9589_v56 = vshll.u32 %v9474_v42, 16  ;;  %v9595_v19 = vshll.u32 %v16845_v38, 16 }
 0x388   : > { %v9579_v57 = vrot.slane %v9578_v6, 4  ;;  %v16860_v43 = vadd.f32 %v6924_v55, %v16789_v29  ;;  %v9588_v41 = vrot.slane %v9586_v49, 4  ;;  %v9599_v28 = vshrl.u32 %v16845_v38, 16  ;;  %v6233_v42 = vpop.f32.mrf.mxu1 }
 0x389   : > { %v9574_v27 = vsel %vm13160_vm6, %v9569_v60, %v9573_v21  ;;  %v12593_v45 = vpop.f32.mrf.mxu0  ;;  %v9591_v0 = vrot.slane %v9589_v56, 5  ;;  %v9605_v7 = vshll.u32 %v16853_v51, 16  ;;  %v9597_v12 = vrot.slane %v9595_v19, 5  ;;  %v16894_v56 = vld [vmem:[#allocation2 + $0x58] sm:$0xf] }
 0x38a   : > { %12765 = vmatmul.mubr.msk.bf16.gmra.mxu1 %vm690_vm3, %v12970_v2  ;;  %v9584_v29 = vsel %vm13160_vm6, %v9579_v57, %v9583_v22  ;;  %v16873_v32 = vadd.f32 %v12593_v45, %v16807_v18  ;;  %v16876_v8 = vadd.f32 %v16757_v15, %v6230_v62  ;;  %v9601_v16 = vrot.slane %v9599_v28, 4 }
 0x38b   : > { %12768 = vmatprep.mubr.msk.bf16.mxu1 %vm690_vm3, %v12971_v13  ;;  %v11774_v20 = vcombine.low %v9574_v27, %v9584_v29  ;;  %v6927_v54 = vpop.f32.mrf.mxu0  ;;  %v9592_v48 = vor.u32 %v9591_v0, %v9588_v41  ;;  %v9607_v14 = vrot.slane %v9605_v7, 5  ;;  %v9610_v4 = vshrl.u32 %v9477_v10, 16  ;;  %v16907_v0 = vld [vmem:[#allocation2 + $0x5c] sm:$0x1] }
 0x38c   : > { %v16882_v25 = vadd.f32 %v6927_v54, %v16810_v59  ;;  %v9613_v18 = vshll.u32 %v9477_v10, 16  ;;  %v9619_v37 = vshll.u32 %v16867_v40, 16  ;;  %v9602_v21 = vor.u32 %v9601_v16, %v9597_v12  ;;  %v12570_v59 = vpop.f32.mrf.mxu1  ;;  %v12973_v10 = vld [vmem:[#allocation2 + $0x60] sm:$0xff]  }
 0x38d   : > { %v9593_v26 = vrot.slane %v9592_v48, 4  ;;  %v9623_v52 = vshrl.u32 %v16867_v40, 16  ;;  %v9629_v39 = vshll.u32 %v16878_v35, 16  ;;  %12795 = vmatmul.mubr.msk.bf16.vlgmr.msra.gmra.mxu0 %vm690_vm3, %v11773_v23  ;;  %v9612_v61 = vrot.slane %v9610_v4, 4  ;;  %v12972_v23 = vld [vmem:[#allocation2 + $0x54] sm:$0xff]  }
 0x38e   : > { %v9615_v47 = vrot.slane %v9613_v18, 5  ;;  %v9621_v9 = vrot.slane %v9619_v37, 5  ;;  %v16889_v22 = vadd.f32 %v12567_v5, %v16757_v15  ;;  %12798 = vmatprep.mubr.msk.bf16.mxu0 %vm690_vm3, %v11774_v20  ;;  %v9603_v49 = vrot.slane %v9602_v21, 4  ;;  %v6246_v62 = vpop.f32.mrf.mxu1  ;;  %v9483_v18 = vld [vmem:[#allocation2 + $0x60] sm:$0xf] }
 0x38f   : > { %v12596_v6 = vpop.f32.mrf.mxu0  ;;  %v9598_v46 = vsel %vm13160_vm6, %v9593_v26, %v9597_v12  ;;  %v9625_v60 = vrot.slane %v9623_v52, 4  ;;  %v9631_v55 = vrot.slane %v9629_v39, 5  ;;  %v16900_v41 = vadd.f32 %v16757_v15, %v6233_v42  ;;  %v16922_v21 = vld [vmem:[#allocation2 + $0x64] sm:$0xf] }
 0x390   : > { %v16897_v2 = vadd.f32 %v12596_v6, %v16818_v34  ;;  %v9616_v57 = vor.u32 %v9615_v47, %v9612_v61  ;;  %v16903_v19 = vadd.f32 %v12570_v59, %v16757_v15  ;;  %v9608_v13 = vsel %vm13160_vm6, %v9603_v49, %v9607_v14  ;;  %v12571_v20 = vpop.f32.mrf.mxu1  ;;  %v16929_v6 = vld [vmem:[#allocation2 + $0x68] sm:$0x1] }
 0x391   : > { %v9626_v27 = vor.u32 %v9625_v60, %v9621_v9  ;;  %v6940_v45 = vpop.f32.mrf.mxu0  ;;  %v9634_v28 = vshrl.u32 %v9480_v63, 16  ;;  %v9637_v7 = vshll.u32 %v9480_v63, 16  ;;  %v11775_v34 = vcombine.low %v9598_v46, %v9608_v13 }
 0x392   : > { %12769 = vmatmul.mubr.msk.bf16.gmra.mxu1 %vm690_vm3, %v12972_v23  ;;  %v9617_v29 = vrot.slane %v9616_v57, 4  ;;  %v16911_v12 = vadd.f32 %v6940_v45, %v16827_v24  ;;  %v9643_v5 = vshll.u32 %v16894_v56, 16  ;;  %v9647_v4 = vshrl.u32 %v16894_v56, 16  ;;  %v6249_v52 = vpop.f32.mrf.mxu1 }
 0x393   : > { %12772 = vmatprep.mubr.msk.bf16.mxu1 %vm690_vm3, %v12973_v10  ;;  %v9627_v54 = vrot.slane %v9626_v27, 4  ;;  %v12597_v48 = vpop.f32.mrf.mxu0  ;;  %v9636_v16 = vrot.slane %v9634_v28, 4  ;;  %v9639_v14 = vrot.slane %v9637_v7, 5  ;;  %v9653_v26 = vshll.u32 %v16907_v0, 16 }
 0x394   : > { %v9622_v37 = vsel %vm13160_vm6, %v9617_v29, %v9621_v9  ;;  %v16919_v42 = vadd.f32 %v12597_v48, %v16838_v30  ;;  %v9645_v24 = vrot.slane %v9643_v5, 5  ;;  %v9649_v59 = vrot.slane %v9647_v4, 4  ;;  %v12574_v60 = vpop.f32.mrf.mxu1 }
 0x395   : > { %v9632_v39 = vsel %vm13160_vm6, %v9627_v54, %v9631_v55  ;;  %v6943_v61 = vpop.f32.mrf.mxu0  ;;  %v9640_v47 = vor.u32 %v9639_v14, %v9636_v16  ;;  %v16927_v63 = vadd.f32 %v16757_v15, %v6246_v62  ;;  %12799 = vmatmul.mubr.msk.bf16.gmra.mxu0 %vm690_vm3, %v11775_v34  ;;  %v9655_v46 = vrot.slane %v9653_v26, 5  ;;  %v12974_v62 = vld [vmem:[#allocation2 + $0x6c] sm:$0xff]   ;;  %v12975_v34 = vld [vmem:[#allocation2 + $0x78] sm:$0xff]  }
 0x396   : > { %v11776_v30 = vcombine.low %v9622_v37, %v9632_v39  ;;  %v16933_v9 = vadd.f32 %v6943_v61, %v16843_v44  ;;  %v9658_v49 = vshrl.u32 %v9483_v18, 16  ;;  %v9650_v55 = vor.u32 %v9649_v59, %v9645_v24  ;;  %v6262_v7 = vpop.f32.mrf.mxu1  ;;  %v9486_v14 = vld [vmem:[#allocation2 + $0x6c] sm:$0xf]  ;;  %v16951_v26 = vld [vmem:[#allocation2 + $0x70] sm:$0xf] }
 0x397   : > { %v12600_v23 = vpop.f32.mrf.mxu0  ;;  %v9641_v57 = vrot.slane %v9640_v47, 4  ;;  %v9661_v10 = vshll.u32 %v9483_v18, 16  ;;  %v9667_v13 = vshll.u32 %v16922_v21, 16  ;;  %v9671_v28 = vshrl.u32 %v16922_v21, 16  ;;  %18510 = vst [vmem:[#allocation46_spill] sm:$0xff] %v16951_v26 }
 0x398   : > { %12802 = vmatprep.mubr.msk.bf16.mxu0 %vm690_vm3, %v11776_v30  ;;  %v16938_v27 = vadd.f32 %v12600_v23, %v16857_v36  ;;  %v9660_v45 = vrot.slane %v9658_v49, 4  ;;  %v9677_v44 = vshll.u32 %v16929_v6, 16  ;;  %v9651_v5 = vrot.slane %v9650_v55, 4  ;;  %v16953_v39 = vpop.f32.mrf.mxu1  ;;  %v16964_v30 = vld [vmem:[#allocation2 + $0x74] sm:$0x1] }
 0x399   : > { %v9646_v29 = vsel %vm13160_vm6, %v9641_v57, %v9645_v24  ;;  %v9663_v54 = vrot.slane %v9661_v10, 5  ;;  %v9669_v48 = vrot.slane %v9667_v13, 5  ;;  %v6956_v16 = vpop.f32.mrf.mxu0  ;;  %v9673_v4 = vrot.slane %v9671_v28, 4  ;;  %18511 = vst [vmem:[#allocation15_spill] sm:$0xff] %v16964_v30 }
 0x39a   : > { %12773 = vmatmul.mubr.msk.bf16.gmra.mxu1 %vm690_vm3, %v12974_v62  ;;  %v9679_v36 = vrot.slane %v9677_v44, 5  ;;  %v16946_v18 = vadd.f32 %v6956_v16, %v16876_v8  ;;  %v16949_v37 = vadd.f32 %v12571_v20, %v16757_v15  ;;  %v9656_v24 = vsel %vm13160_vm6, %v9651_v5, %v9655_v46  ;;  %v6265_v55 = vpop.f32.mrf.mxu1 }
 0x39b   : > { %12776 = vmatprep.mubr.msk.bf16.mxu1 %vm690_vm3, %v12975_v34  ;;  %v9664_v61 = vor.u32 %v9663_v54, %v9660_v45  ;;  %v12601_v47 = vpop.f32.mrf.mxu0  ;;  %v16959_v59 = vadd.f32 %v16757_v15, %v6249_v52  ;;  %v16962_v8 = vadd.f32 %v12574_v60, %v16757_v15  ;;  %v11777_v20 = vcombine.low %v9646_v29, %v9656_v24  ;;  %v9489_v45 = vld [vmem:[#allocation2 + $0x78] sm:$0xf]  ;;  %v16976_v34 = vld [vmem:[#allocation2 + $0x7c] sm:$0xf]  ;;  %v16980_v24 = vld [vmem:[#allocation2 + $0x80] sm:$0x1] }
 0x39c   : > { %v9674_v49 = vor.u32 %v9673_v4, %v9669_v48  ;;  %v16967_v23 = vadd.f32 %v12601_v47, %v16889_v22  ;;  %v9682_v57 = vshrl.u32 %v9486_v14, 16  ;;  %v9685_v46 = vshll.u32 %v9486_v14, 16  ;;  %18513 = vst [vmem:[#allocation33_spill] sm:$0xff] %v16976_v34  ;;  %v12578_v29 = vpop.f32.mrf.mxu1  ;;  %18514 = vst [vmem:[#allocation25_spill] sm:$0xff] %v16980_v24 }
 0x39d   : > { %v9665_v10 = vrot.slane %v9664_v61, 4  ;;  %v6959_v13 = vpop.f32.mrf.mxu0  ;;  %v9691_v62 = vshll.u32 %v16951_v26, 16  ;;  %v9695_v52 = vshrl.u32 %v16951_v26, 16  ;;  %12803 = vmatmul.mubr.msk.bf16.gmra.mxu0 %vm690_vm3, %v11777_v20  ;;  %v9701_v22 = vshll.u32 %v16964_v30, 16 }
 0x39e   : > { %v9675_v60 = vrot.slane %v9674_v49, 4  ;;  %v16973_v28 = vadd.f32 %v6959_v13, %v16900_v41  ;;  %v9684_v44 = vrot.slane %v9682_v57, 4  ;;  %v9687_v16 = vrot.slane %v9685_v46, 5  ;;  %v12976_v41 = vld [vmem:[#allocation2 + $0x84] sm:$0xff]   ;;  %v6278_v57 = vpop.f32.mrf.mxu1 }
 0x39f   : > { %v9670_v5 = vsel %vm13160_vm6, %v9665_v10, %v9669_v48  ;;  %v12604_v54 = vpop.f32.mrf.mxu0  ;;  %v9693_v14 = vrot.slane %v9691_v62, 5  ;;  %v9697_v4 = vrot.slane %v9695_v52, 4  ;;  %v9703_v20 = vrot.slane %v9701_v22, 5  ;;  %v12977_v48 = vld [vmem:[#allocation2 + $0x90] sm:$0xff]  }
 0x3a0   : > { %18512 = vst [vmem:[#allocation32_spill] sm:$0xff] %v16973_v28  ;;  %v9680_v61 = vsel %vm13160_vm6, %v9675_v60, %v9679_v36  ;;  %v16985_v47 = vadd.f32 %v12604_v54, %v16903_v19  ;;  %v16988_v49 = vadd.f32 %v16757_v15, %v6262_v7  ;;  %v9688_v10 = vor.u32 %v9687_v16, %v9684_v44  ;;  %v16994_v22 = vpop.f32.mrf.mxu1 }
 0x3a1   : > { %v11778_v13 = vcombine.low %v9670_v5, %v9680_v61  ;;  %v9698_v46 = vor.u32 %v9697_v4, %v9693_v14  ;;  %v9706_v62 = vshrl.u32 %v9489_v45, 16  ;;  %v6972_v52 = vpop.f32.mrf.mxu0  ;;  %v9709_v30 = vshll.u32 %v9489_v45, 16 }
 0x3a2   : > { %18515 = vst [vmem:[#allocation43_spill] sm:$0xff] %v16985_v47  ;;  %12777 = vmatmul.mubr.msk.bf16.gmra.mxu1 %vm690_vm3, %v12976_v41  ;;  %v9715_v36 = vshll.u32 %v16976_v34, 16  ;;  %v9719_v60 = vshrl.u32 %v16976_v34, 16  ;;  %v9725_v19 = vshll.u32 %v16980_v24, 16  ;;  %v9689_v7 = vrot.slane %v9688_v10, 4  ;;  %v17001_v26 = vpop.f32.mrf.mxu1 }
 0x3a3   : > { %12806 = vmatprep.mubr.msk.bf16.mxu0 %vm690_vm3, %v11778_v13  ;;  %12780 = vmatprep.mubr.msk.bf16.mxu1 %vm690_vm3, %v12977_v48  ;;  %v9699_v44 = vrot.slane %v9698_v46, 4  ;;  %v9708_v5 = vrot.slane %v9706_v62, 4  ;;  %v16999_v54 = vadd.f32 %v6972_v52, %v16927_v63  ;;  %v12605_v16 = vpop.f32.mrf.mxu0  ;;  %v9711_v45 = vrot.slane %v9709_v30, 5  ;;  %v9492_v34 = vld [vmem:[#allocation2 + $0x84] sm:$0xf] }
 0x3a4   : > { %v9717_v4 = vrot.slane %v9715_v36, 5  ;;  %v9721_v61 = vrot.slane %v9719_v60, 4  ;;  %v9727_v41 = vrot.slane %v9725_v19, 5  ;;  %v9694_v24 = vsel %vm13160_vm6, %v9689_v7, %v9693_v14  ;;  %v17014_v10 = vld [vmem:[#allocation2 + $0x88] sm:$0xf]  ;;  %v17021_v60 = vpop.f32.mrf.mxu1 }
 0x3a5   : > { %18516 = vst [vmem:[#allocation27_spill] sm:$0xff] %v16999_v54  ;;  %v9704_v13 = vsel %vm13160_vm6, %v9699_v44, %v9703_v20  ;;  %v17009_v48 = vadd.f32 %v16953_v39, %v16757_v15  ;;  %v17012_v63 = vadd.f32 %v12605_v16, %v16949_v37  ;;  %v6975_v30 = vpop.f32.mrf.mxu0  ;;  %18518 = vst [vmem:[#allocation51_spill] sm:$0xff] %v17014_v10  ;;  %v17019_v14 = vld [vmem:[#allocation2 + $0x8c] sm:$0x1]  ;;  %v12978_v37 = vld [vmem:[#allocation2 + $0x9c] sm:$0xff]   ;;  %v9730_v19 = vshrl.u32 %v9492_v34, 16 }
 0x3a6   : > { %v11779_v46 = vcombine.low %v9694_v24, %v9704_v13  ;;  %v9712_v62 = vor.u32 %v9711_v45, %v9708_v5  ;;  %v9722_v52 = vor.u32 %v9721_v61, %v9717_v4  ;;  %v17017_v36 = vadd.f32 %v16757_v15, %v6265_v55  ;;  %18519 = vst [vmem:[#allocation7_spill] sm:$0xff] %v17019_v14  ;;  %v9495_v16 = vld [vmem:[#allocation2 + $0x90] sm:$0xf]  ;;  %v17032_v45 = vpop.f32.mrf.mxu1 }
 0x3a7   : > { %18517 = vst [vmem:[#allocation49_spill] sm:$0xff] %v17012_v63  ;;  %v17024_v20 = vadd.f32 %v6975_v30, %v16959_v59  ;;  %v17027_v39 = vadd.f32 %v12578_v29, %v16757_v15  ;;  %v9733_v7 = vshll.u32 %v9492_v34, 16  ;;  %v9739_v55 = vshll.u32 %v17014_v10, 16  ;;  %v12979_v59 = vld [vmem:[#allocation2 + $0xa8] sm:$0xff]   ;;  %v17038_v34 = vld [vmem:[#allocation2 + $0x94] sm:$0xf] }
 0x3a8   : > { %12807 = vmatmul.mubr.msk.bf16.gmra.mxu0 %vm690_vm3, %v11779_v46  ;;  %v9713_v24 = vrot.slane %v9712_v62, 4  ;;  %v9723_v44 = vrot.slane %v9722_v52, 4  ;;  %v9743_v5 = vshrl.u32 %v17014_v10, 16  ;;  %v9732_v13 = vrot.slane %v9730_v19, 4  ;;  %18521 = vst [vmem:[#allocation54_spill] sm:$0xff] %v17038_v34 }
 0x3a9   : > { %18520 = vst [vmem:[#allocation17_spill] sm:$0xff] %v17024_v20  ;;  %v12608_v61 = vpop.f32.mrf.mxu0  ;;  %v9735_v30 = vrot.slane %v9733_v7, 5  ;;  %v9749_v29 = vshll.u32 %v17019_v14, 16  ;;  %v17036_v20 = vadd.f32 %v16757_v15, %v6278_v57  ;;  %v9741_v19 = vrot.slane %v9739_v55, 5  ;;  %v17048_v7 = vld [vmem:[#allocation2 + $0x98] sm:$0x1]  ;;  %v17050_v14 = vpop.f32.mrf.mxu1 }
 0x3aa   : > { %v9718_v46 = vsel %vm13160_vm6, %v9713_v24, %v9717_v4  ;;  %v9728_v62 = vsel %vm13160_vm6, %v9723_v44, %v9727_v41  ;;  %12781 = vmatmul.mubr.msk.bf16.gmra.mxu1 %vm690_vm3, %v12978_v37  ;;  %v17046_v52 = vadd.f32 %v12608_v61, %v16962_v8  ;;  %18523 = vst [vmem:[#allocation35_spill] sm:$0xff] %v17048_v7  ;;  %v9745_v63 = vrot.slane %v9743_v5, 4 }
 0x3ab   : > { %v11780_v57 = vcombine.low %v9718_v46, %v9728_v62  ;;  %12784 = vmatprep.mubr.msk.bf16.mxu1 %vm690_vm3, %v12979_v59  ;;  %v9736_v10 = vor.u32 %v9735_v30, %v9732_v13  ;;  %v9751_v54 = vrot.slane %v9749_v29, 5  ;;  %v6988_v4 = vpop.f32.mrf.mxu0  ;;  %v9754_v24 = vshrl.u32 %v9495_v16, 16  ;;  %v17055_v8 = vpop.f32.mrf.mxu1  ;;  %v9498_v46 = vld [vmem:[#allocation2 + $0x9c] sm:$0xf] }
 0x3ac   : > { %18522 = vst [vmem:[#allocation14_spill] sm:$0xff] %v17046_v52  ;;  %v9757_v47 = vshll.u32 %v9495_v16, 16  ;;  %v9763_v41 = vshll.u32 %v17038_v34, 16  ;;  %v9767_v37 = vshrl.u32 %v17038_v34, 16  ;;  %v9746_v55 = vor.u32 %v9745_v63, %v9741_v19 }
 0x3ad   : > { %12810 = vmatprep.mubr.msk.bf16.mxu0 %vm690_vm3, %v11780_v57  ;;  %v9737_v44 = vrot.slane %v9736_v10, 4  ;;  %v9773_v61 = vshll.u32 %v17048_v7, 16  ;;  %v17060_v59 = vadd.f32 %v6988_v4, %v16988_v49  ;;  %v12609_v5 = vpop.f32.mrf.mxu0  ;;  %v9756_v13 = vrot.slane %v9754_v24, 4  ;;  %v17068_v57 = vpop.f32.mrf.mxu1  ;;  %v17097_v7 = vld [vmem:[#allocation2 + $0xac] sm:$0xf] }
 0x3ae   : > { %v9759_v30 = vrot.slane %v9757_v47, 5  ;;  %v9765_v29 = vrot.slane %v9763_v41, 5  ;;  %v9769_v16 = vrot.slane %v9767_v37, 4  ;;  %v9747_v34 = vrot.slane %v9746_v55, 4  ;;  %v12980_v41 = vld [vmem:[#allocation2 + $0xb4] sm:$0xff]   ;;  %18530 = vst [vmem:[#allocation10_spill] sm:$0xff] %v17097_v7 }
 0x3af   : > { %18524 = vst [vmem:[#allocation30_spill] sm:$0xff] %v17060_v59  ;;  %v9742_v62 = vsel %vm13160_vm6, %v9737_v44, %v9741_v19  ;;  %v9775_v52 = vrot.slane %v9773_v61, 5  ;;  %v17066_v10 = vadd.f32 %v16994_v22, %v16757_v15  ;;  %v6991_v63 = vpop.f32.mrf.mxu0  ;;  %v17071_v24 = vadd.f32 %v12609_v5, %v17009_v48  ;;  %v17077_v19 = vld [vmem:[#allocation2 + $0xa0] sm:$0xf]  ;;  %v17088_v61 = vld [vmem:[#allocation2 + $0xa4] sm:$0x1] }
 0x3b0   : > { %v9760_v49 = vor.u32 %v9759_v30, %v9756_v13  ;;  %v9770_v4 = vor.u32 %v9769_v16, %v9765_v29  ;;  %v17075_v47 = vadd.f32 %v16757_v15, %v17001_v26  ;;  %18526 = vst [vmem:[#allocation38_spill] sm:$0xff] %v17077_v19  ;;  %v9752_v37 = vsel %vm13160_vm6, %v9747_v34, %v9751_v54  ;;  %v12981_v48 = vld [vmem:[#allocation2 + $0xc0] sm:$0xff]   ;;  %v9501_v54 = vld [vmem:[#allocation2 + $0xa8] sm:$0xf] }
 0x3b1   : > { %18525 = vst [vmem:[#allocation52_spill] sm:$0xff] %v17071_v24  ;;  %v17082_v22 = vadd.f32 %v6991_v63, %v17017_v36  ;;  %v17086_v44 = vadd.f32 %v17021_v60, %v16757_v15  ;;  %v12612_v55 = vpop.f32.mrf.mxu0  ;;  %18528 = vst [vmem:[#allocation57_spill] sm:$0xff] %v17088_v61  ;;  %v9778_v5 = vshrl.u32 %v9498_v46, 16  ;;  %v11781_v26 = vcombine.low %v9742_v62, %v9752_v37  ;;  %v17099_v62 = vpop.f32.mrf.mxu1 }
 0x3b2   : > { %v9761_v13 = vrot.slane %v9760_v49, 4  ;;  %v9771_v30 = vrot.slane %v9770_v4, 4  ;;  %12785 = vmatmul.mubr.msk.bf16.gmra.mxu1 %vm690_vm3, %v12980_v41  ;;  %v17092_v16 = vadd.f32 %v12612_v55, %v17027_v39  ;;  %v9781_v34 = vshll.u32 %v9498_v46, 16  ;;  %v17111_v41 = vld [vmem:[#allocation2 + $0xb0] sm:$0x1] }
 0x3b3   : > { %18527 = vst [vmem:[#allocation31_spill] sm:$0xff] %v17082_v22  ;;  %12788 = vmatprep.mubr.msk.bf16.mxu1 %vm690_vm3, %v12981_v48  ;;  %v9780_v36 = vrot.slane %v9778_v5, 4  ;;  %v9787_v60 = vshll.u32 %v17077_v19, 16  ;;  %v9791_v63 = vshrl.u32 %v17077_v19, 16  ;;  %v7004_v22 = vpop.f32.mrf.mxu0  ;;  %12811 = vmatmul.mubr.msk.bf16.gmra.mxu0 %vm690_vm3, %v11781_v26  ;;  %v9797_v4 = vshll.u32 %v17088_v61, 16  ;;  %18531 = vst [vmem:[#allocation18_spill] sm:$0xff] %v17111_v41  ;;  %v17117_v59 = vpop.f32.mrf.mxu1 }
 0x3b4   : > { %18529 = vst [vmem:[#allocation59_spill] sm:$0xff] %v17092_v16  ;;  %v9766_v39 = vsel %vm13160_vm6, %v9761_v13, %v9765_v29  ;;  %v9776_v49 = vsel %vm13160_vm6, %v9771_v30, %v9775_v52  ;;  %v17109_v46 = vadd.f32 %v16757_v15, %v17032_v45  ;;  %v9783_v55 = vrot.slane %v9781_v34, 5 }
 0x3b5   : > { %v11782_v37 = vcombine.low %v9766_v39, %v9776_v49  ;;  %v9789_v48 = vrot.slane %v9787_v60, 5  ;;  %v9793_v5 = vrot.slane %v9791_v63, 4  ;;  %v12613_v19 = vpop.f32.mrf.mxu0  ;;  %v9799_v26 = vrot.slane %v9797_v4, 5 }
 0x3b6   : > { %v9802_v16 = vshrl.u32 %v9501_v54, 16  ;;  %v9805_v24 = vshll.u32 %v9501_v54, 16  ;;  %v9811_v29 = vshll.u32 %v17097_v7, 16  ;;  %v9784_v52 = vor.u32 %v9783_v55, %v9780_v36  ;;  %v12982_v54 = vld [vmem:[#allocation2 + $0xcc] sm:$0xff]  }
 0x3b7   : > { %12814 = vmatprep.mubr.msk.bf16.mxu0 %vm690_vm3, %v11782_v37  ;;  %v9794_v13 = vor.u32 %v9793_v5, %v9789_v48  ;;  %v9815_v30 = vshrl.u32 %v17097_v7, 16  ;;  %v9821_v45 = vshll.u32 %v17111_v41, 16  ;;  %v7007_v61 = vpop.f32.mrf.mxu0  ;;  %v17120_v39 = vadd.f32 %v7004_v22, %v17036_v20  ;;  %v9504_v20 = vld [vmem:[#allocation2 + $0xb4] sm:$0xf]  ;;  %v17134_v22 = vld [vmem:[#allocation2 + $0xb8] sm:$0xf] }
 0x3b8   : > { %v9804_v34 = vrot.slane %v9802_v16, 4  ;;  %v9807_v60 = vrot.slane %v9805_v24, 5  ;;  %v9813_v63 = vrot.slane %v9811_v29, 5  ;;  %v9785_v49 = vrot.slane %v9784_v52, 4  ;;  %18533 = vst [vmem:[#allocation40_spill] sm:$0xff] %v17134_v22 }
 0x3b9   : > { %v9795_v4 = vrot.slane %v9794_v13, 4  ;;  %v9817_v28 = vrot.slane %v9815_v30, 4  ;;  %v9823_v37 = vrot.slane %v9821_v45, 5  ;;  %v12616_v36 = vpop.f32.mrf.mxu0  ;;  %v17124_v5 = vadd.f32 %v17050_v14, %v16757_v15  ;;  %v17145_v13 = vpop.f32.mrf.mxu1 }
 0x3ba   : > { %v9808_v55 = vor.u32 %v9807_v60, %v9804_v34  ;;  %v17127_v41 = vadd.f32 %v12613_v19, %v17066_v10  ;;  %v17131_v24 = vadd.f32 %v16757_v15, %v17055_v8  ;;  %12789 = vmatmul.mubr.msk.bf16.gmra.mxu1 %vm690_vm3, %v12982_v54  ;;  %v9790_v16 = vsel %vm13160_vm6, %v9785_v49, %v9789_v48  ;;  %v17143_v10 = vld [vmem:[#allocation2 + $0xbc] sm:$0x1]  ;;  %v10191_v19 = vld [vmem:[#allocation2 + $0x18] sm:$0xe] }
 0x3bb   : > { %v9800_v29 = vsel %vm13160_vm6, %v9795_v4, %v9799_v26  ;;  %v9818_v14 = vor.u32 %v9817_v28, %v9813_v63  ;;  %v17141_v52 = vadd.f32 %v7007_v61, %v17075_v47  ;;  %18535 = vst [vmem:[#allocation42_spill] sm:$0xff] %v17143_v10  ;;  %v7020_v8 = vpop.f32.mrf.mxu0  ;;  %v17149_v34 = vadd.f32 %v17068_v57, %v16757_v15  ;;  %v9507_v57 = vld [vmem:[#allocation2 + $0xc0] sm:$0xf] }
 0x3bc   : > { %18532 = vst [vmem:[#allocation23_spill] sm:$0xff] %v17127_v41  ;;  %v11783_v30 = vcombine.low %v9790_v16, %v9800_v29  ;;  %v9809_v45 = vrot.slane %v9808_v55, 4  ;;  %v17152_v48 = vadd.f32 %v12616_v36, %v17086_v44  ;;  %v9826_v28 = vshrl.u32 %v9504_v20, 16 }
 0x3bd   : > { %18534 = vst [vmem:[#allocation37_spill] sm:$0xff] %v17141_v52  ;;  %v9819_v26 = vrot.slane %v9818_v14, 4  ;;  %v9829_v60 = vshll.u32 %v9504_v20, 16  ;;  %v9835_v47 = vshll.u32 %v17134_v22, 16  ;;  %v9839_v54 = vshrl.u32 %v17134_v22, 16  ;;  %v12617_v55 = vpop.f32.mrf.mxu0 }
 0x3be   : > { %18536 = vst [vmem:[#allocation39_spill] sm:$0xff] %v17152_v48  ;;  %12815 = vmatmul.mubr.msk.bf16.gmra.mxu0 %vm690_vm3, %v11783_v30  ;;  %v9814_v61 = vsel %vm13160_vm6, %v9809_v45, %v9813_v63  ;;  %v9845_v49 = vshll.u32 %v17143_v10, 16  ;;  %v11804_v4 = vrot.slane %v10191_v19, 9  ;;  %v9828_v36 = vrot.slane %v9826_v28, 4  ;;  %v17163_v63 = vld [vmem:[#allocation2 + $0xc4] sm:$0xf] }
 0x3bf   : > { %v9824_v44 = vsel %vm13160_vm6, %v9819_v26, %v9823_v37  ;;  %v9831_v16 = vrot.slane %v9829_v60, 5  ;;  %v9837_v20 = vrot.slane %v9835_v47, 5  ;;  %v12626_v29 = vpop.f32.mrf.mxu1  ;;  %v9841_v48 = vrot.slane %v9839_v54, 4  ;;  %18537 = vst [vmem:[#allocation45_spill] sm:$0xff] %v17163_v63  ;;  %v17170_v22 = vld [vmem:[#allocation2 + $0xc8] sm:$0x1] }
 0x3c0   : > { %v11784_v14 = vcombine.low %v9814_v61, %v9824_v44  ;;  %v9847_v30 = vrot.slane %v9845_v49, 5  ;;  %v10257_v52 = vrot.slane %v16772_v1, 5  ;;  %v10260_v10 = vrot.slane %v16782_v17, 5  ;;  %18538 = vst [vmem:[#allocation41_spill] sm:$0xff] %v17170_v22  ;;  %v7023_v61 = vpop.f32.mrf.mxu0 }
 0x3c1   : > { %v9832_v45 = vor.u32 %v9831_v16, %v9828_v36  ;;  %v17168_v19 = vadd.f32 %v16757_v15, %v17099_v62  ;;  %v9850_v37 = vshrl.u32 %v9507_v57, 16  ;;  %v17172_v26 = vpop.f32.mrf.mxu1  ;;  %v9842_v28 = vor.u32 %v9841_v48, %v9837_v20 }
 0x3c2   : > { %12818 = vmatprep.mubr.msk.bf16.mxu0 %vm690_vm3, %v11784_v14  ;;  %v10258_v1 = vsel %vm13369_vm9, %v11804_v4, %v10257_v52  ;;  %v10259_v60 = vrot.slane %v10257_v52, 4  ;;  %v9853_v47 = vshll.u32 %v9507_v57, 16  ;;  %v9859_v49 = vshll.u32 %v17163_v63, 16 }
 0x3c3   : > { %v9833_v54 = vrot.slane %v9832_v45, 4  ;;  %v9852_v17 = vrot.slane %v9850_v37, 4  ;;  %v9863_v62 = vshrl.u32 %v17163_v63, 16  ;;  %v17179_v44 = vpop.f32.mrf.mxu1  ;;  %v9843_v36 = vrot.slane %v9842_v28, 4 }
 0x3c4   : > { %v10261_v16 = vsel %vm13369_vm9, %v10259_v60, %v10260_v10  ;;  %v9855_v14 = vrot.slane %v9853_v47, 5  ;;  %v9869_v48 = vshll.u32 %v17170_v22, 16  ;;  %v9861_v57 = vrot.slane %v9859_v49, 5  ;;  %v10192_v10 = vld [vmem:[#allocation2 + $0x24] sm:$0xe] }
 0x3c5   : > { %v9838_v52 = vsel %vm13160_vm6, %v9833_v54, %v9837_v20  ;;  %v11821_v4 = vcombine.low %v10258_v1, %v10261_v16  ;;  %v9865_v45 = vrot.slane %v9863_v62, 4  ;;  %v17186_v37 = vpop.f32.mrf.mxu1  ;;  %v9848_v63 = vsel %vm13160_vm6, %v9843_v36, %v9847_v30  ;;  %v12620_v60 = vpop.f32.mrf.mxu0  ;;  %v9510_v54 = vld [vmem:[#allocation2 + $0xcc] sm:$0xf] }
 0x3c6   : > { %v9856_v7 = vor.u32 %v9855_v14, %v9852_v17  ;;  %v9871_v41 = vrot.slane %v9869_v48, 5  ;;  %v17191_v28 = vadd.f32 %v7020_v8, %v17109_v46  ;;  %v11785_v47 = vcombine.low %v9838_v52, %v9848_v63  ;;  %v17209_v17 = vld [vmem:[#allocation2 + $0xd0] sm:$0xf] }
 0x3c7   : > { %12828 = vmatprep.mubr.msk.bf16.mxu1 %vm690_vm3, %v11821_v4  ;;  %v9866_v22 = vor.u32 %v9865_v45, %v9861_v57  ;;  %v6356_v20 = vadd.f32 %v17117_v59, %v16757_v15  ;;  %v17197_v1 = vadd.f32 %v12617_v55, %v17124_v5  ;;  %v17199_v49 = vpop.f32.mrf.mxu1  ;;  %v6354_v46 = vadd.f32 %v16757_v15, %v17145_v13  ;;  %v7036_v62 = vpop.f32.mrf.mxu0 }
 0x3c8   : > { %v9857_v30 = vrot.slane %v9856_v7, 4  ;;  %v17204_v8 = vadd.f32 %v7023_v61, %v17131_v24  ;;  %v17207_v63 = vadd.f32 %v12626_v29, %v16849_v31  ;;  %12819 = vmatmul.mubr.msk.bf16.gmra.mxu0 %vm690_vm3, %v11785_v47  ;;  %v11805_v5 = vrot.slane %v10192_v10, 9  ;;  %v17221_v31 = vld [vmem:[#allocation2 + $0xd4] sm:$0x1]  ;;  %v10193_v61 = vld [vmem:[#allocation2 + $0x30] sm:$0xe] }
 0x3c9   : > { %v9867_v59 = vrot.slane %v9866_v22, 4  ;;  %v10264_v55 = vrot.slane %v16792_v11, 5  ;;  %v10267_v7 = vrot.slane %v16801_v33, 5  ;;  %v17214_v36 = vpop.f32.mrf.mxu1  ;;  %v17219_v24 = vadd.f32 %v12620_v60, %v17149_v34  ;;  %v12621_v16 = vpop.f32.mrf.mxu0 }
 0x3ca   : > { %v9862_v15 = vsel %vm13160_vm6, %v9857_v30, %v9861_v57  ;;  %v9874_v13 = vshrl.u32 %v9510_v54, 16  ;;  %v9877_v29 = vshll.u32 %v9510_v54, 16  ;;  %v9883_v14 = vshll.u32 %v17209_v17, 16 }
 0x3cb   : > { %v9872_v22 = vsel %vm13160_vm6, %v9867_v59, %v9871_v41  ;;  %v10265_v11 = vsel %vm13369_vm9, %v11805_v5, %v10264_v55  ;;  %v10266_v33 = vrot.slane %v10264_v55, 4  ;;  %v17228_v48 = vpop.f32.mrf.mxu1  ;;  %v9887_v57 = vshrl.u32 %v17209_v17, 16  ;;  %v7039_v45 = vpop.f32.mrf.mxu0 }
 0x3cc   : > { %v11786_v52 = vcombine.low %v9862_v15, %v9872_v22  ;;  %v9876_v34 = vrot.slane %v9874_v13, 4  ;;  %v9879_v4 = vrot.slane %v9877_v29, 5  ;;  %v9885_v60 = vrot.slane %v9883_v14, 5 }
 0x3cd   : > { %v10268_v10 = vsel %vm13369_vm9, %v10266_v33, %v10267_v7  ;;  %v9893_v41 = vshll.u32 %v17221_v31, 16  ;;  %v11806_v47 = vrot.slane %v10193_v61, 9  ;;  %v7413_v54 = vpop.f32.mrf.mxu1  ;;  %v9889_v5 = vrot.slane %v9887_v57, 4  ;;  %v12660_v15 = vpop.f32.mrf.mxu0 }
 0x3ce   : > { %12822 = vmatprep.mubr.msk.bf16.mxu0 %vm690_vm3, %v11786_v52  ;;  %v11822_v30 = vcombine.low %v10265_v11, %v10268_v10  ;;  %v9880_v59 = vor.u32 %v9879_v4, %v9876_v34  ;;  %v10271_v55 = vrot.slane %v16820_v53, 5  ;;  %v10274_v29 = vrot.slane %v16822_v50, 5  ;;  %v10194_v53 = vld [vmem:[#allocation2 + $0x3c] sm:$0xe] }
 0x3cf   : > { %v9895_v13 = vrot.slane %v9893_v41, 5  ;;  %v7521_v22 = vadd.f32 %v17172_v26, %v16860_v43  ;;  %v17240_v7 = vadd.f32 %v7036_v62, %v17168_v19  ;;  %v12634_v33 = vpop.f32.mrf.mxu1  ;;  %v9890_v14 = vor.u32 %v9889_v5, %v9885_v60  ;;  %v7752_v34 = vpop.f32.mrf.mxu0  ;;  %v10195_v26 = vld [vmem:[#allocation2 + $0x48] sm:$0xe] }
 0x3d0   : > { %12829 = vmatmul.mubr.msk.bf16.vlgmr.msra.gmra.mxu1 %vm690_vm3, %v11822_v30  ;;  %v9881_v61 = vrot.slane %v9880_v59, 4  ;;  %v10272_v11 = vsel %vm13369_vm9, %v11806_v47, %v10271_v55  ;;  %v10273_v52 = vrot.slane %v10271_v55, 4  ;;  %v7524_v50 = vadd.f32 %v17179_v44, %v16873_v32 }
 0x3d1   : > { %v17247_v4 = vadd.f32 %v12621_v16, %v6356_v20  ;;  %v7522_v43 = vadd.f32 %v17186_v37, %v16882_v25  ;;  %v17251_v19 = vadd.f32 %v7039_v45, %v6354_v46  ;;  %v7426_v62 = vpop.f32.mrf.mxu1  ;;  %v9891_v10 = vrot.slane %v9890_v14, 4  ;;  %v12661_v32 = vpop.f32.mrf.mxu0  ;;  %v10196_v14 = vld [vmem:[#allocation2 + $0x54] sm:$0xe] }
 0x3d2   : > { %v9886_v57 = vsel %vm13160_vm6, %v9881_v61, %v9885_v60  ;;  %v10275_v41 = vsel %vm13369_vm9, %v10273_v52, %v10274_v29  ;;  %v7527_v47 = vadd.f32 %v17199_v49, %v16897_v2  ;;  %v11807_v20 = vrot.slane %v10194_v53, 9  ;;  %v10197_v53 = vld [vmem:[#allocation2 + $0x60] sm:$0xe] }
 0x3d3   : > { %v11823_v44 = vcombine.low %v10272_v11, %v10275_v41  ;;  %v10278_v16 = vrot.slane %v16845_v38, 5  ;;  %v10281_v25 = vrot.slane %v16853_v51, 5  ;;  %v12635_v37 = vpop.f32.mrf.mxu1  ;;  %v9896_v46 = vsel %vm13160_vm6, %v9891_v10, %v9895_v13  ;;  %v7755_v59 = vpop.f32.mrf.mxu0 }
 0x3d4   : > { %v17264_v45 = vadd.f32 %v12660_v15, %v17207_v63  ;;  %v11808_v60 = vrot.slane %v10195_v26, 9  ;;  %v10285_v30 = vrot.slane %v16867_v40, 5  ;;  %v11787_v5 = vcombine.low %v9886_v57, %v9896_v46 }
 0x3d5   : > { %12832 = vmatprep.mubr.msk.bf16.mxu1 %vm690_vm3, %v11823_v44  ;;  %v10279_v2 = vsel %vm13369_vm9, %v11807_v20, %v10278_v16  ;;  %v10280_v38 = vrot.slane %v10278_v16, 4  ;;  %v10288_v51 = vrot.slane %v16878_v35, 5  ;;  %v7429_v49 = vpop.f32.mrf.mxu1  ;;  %v7525_v63 = vadd.f32 %v17214_v36, %v16911_v12  ;;  %v12664_v40 = vpop.f32.mrf.mxu0  ;;  %v10198_v16 = vld [vmem:[#allocation2 + $0x6c] sm:$0xe] }
 0x3d6   : > { %v10286_v3 = vsel %vm13369_vm9, %v11808_v60, %v10285_v30  ;;  %v10287_v55 = vrot.slane %v10285_v30, 4  ;;  %v17275_v15 = vadd.f32 %v7752_v34, %v7521_v22  ;;  %12823 = vmatmul.mubr.msk.bf16.gmra.mxu0 %vm690_vm3, %v11787_v5  ;;  %v7528_v29 = vadd.f32 %v17228_v48, %v16919_v42  ;;  %v10199_v30 = vld [vmem:[#allocation2 + $0x78] sm:$0xe] }
 0x3d7   : > { %v10282_v13 = vsel %vm13369_vm9, %v10280_v38, %v10281_v25  ;;  %v17282_v35 = vadd.f32 %v12661_v32, %v7524_v50  ;;  %v7526_v61 = vadd.f32 %v7413_v54, %v16933_v9  ;;  %v12638_v11 = vpop.f32.mrf.mxu1  ;;  %v17287_v36 = vadd.f32 %v7755_v59, %v7522_v43  ;;  %v7768_v34 = vpop.f32.mrf.mxu0  ;;  %v18539_v25 = vld [vmem:[#allocation32_spill] sm:$0xff] }
 0x3d8   : > { %v11824_v52 = vcombine.low %v10279_v2, %v10282_v13  ;;  %v10289_v12 = vsel %vm13369_vm9, %v10287_v55, %v10288_v51  ;;  %v7531_v22 = vadd.f32 %v12634_v33, %v16938_v27  ;;  %v10292_v57 = vrot.slane %v16894_v56, 5 }
 0x3d9   : > { %v11825_v26 = vcombine.low %v10286_v3, %v10289_v12  ;;  %v7442_v42 = vpop.f32.mrf.mxu1  ;;  %v11809_v48 = vrot.slane %v10196_v14, 9  ;;  %v10295_v9 = vrot.slane %v16907_v0, 5  ;;  %v17293_v54 = vadd.f32 %v12664_v40, %v7527_v47  ;;  %v12665_v10 = vpop.f32.mrf.mxu0 }
 0x3da   : > { %12833 = vmatmul.mubr.msk.bf16.gmra.mxu1 %vm690_vm3, %v11824_v52  ;;  %v10299_v50 = vrot.slane %v16922_v21, 5  ;;  %v10294_v43 = vrot.slane %v10292_v57, 4  ;;  %v11810_v27 = vrot.slane %v10197_v53, 9  ;;  %v7529_v33 = vadd.f32 %v7426_v62, %v16946_v18  ;;  %v18540_v18 = vld [vmem:[#allocation43_spill] sm:$0xff] }
 0x3db   : > { %12836 = vmatprep.mubr.msk.bf16.mxu1 %vm690_vm3, %v11825_v26  ;;  %v17298_v41 = vadd.f32 %v7768_v34, %v7525_v63  ;;  %v12639_v56 = vpop.f32.mrf.mxu1  ;;  %v10302_v44 = vrot.slane %v16929_v6, 5  ;;  %v7532_v20 = vadd.f32 %v12635_v37, %v16967_v23  ;;  %v17302_v0 = vadd.f32 %v12665_v10, %v7528_v29  ;;  %v7771_v47 = vpop.f32.mrf.mxu0  ;;  %v18541_v37 = vld [vmem:[#allocation46_spill] sm:$0xff]  ;;  %v18542_v29 = vld [vmem:[#allocation33_spill] sm:$0xff]  ;;  %v18543_v52 = vld [vmem:[#allocation27_spill] sm:$0xff] }
 0x3dc   : > { %v10301_v32 = vrot.slane %v10299_v50, 4  ;;  %v10296_v21 = vsel %vm13369_vm9, %v10294_v43, %v10295_v9  ;;  %v7530_v46 = vadd.f32 %v7429_v49, %v18539_v25  ;;  %v17307_v60 = vadd.f32 %v7771_v47, %v7526_v61  ;;  %v18544_v34 = vld [vmem:[#allocation49_spill] sm:$0xff] }
 0x3dd   : > { %v7535_v62 = vadd.f32 %v12638_v11, %v18540_v18  ;;  %v7445_v59 = vpop.f32.mrf.mxu1  ;;  %v10293_v6 = vsel %vm13369_vm9, %v11809_v48, %v10292_v57  ;;  %v10306_v5 = vrot.slane %v18541_v37, 5  ;;  %v12668_v2 = vpop.f32.mrf.mxu0  ;;  %v10300_v51 = vsel %vm13369_vm9, %v11810_v27, %v10299_v50  ;;  %v10200_v11 = vld [vmem:[#allocation2 + $0x84] sm:$0xe]  ;;  %v18545_v57 = vld [vmem:[#allocation17_spill] sm:$0xff] }
 0x3de   : > { %v10303_v23 = vsel %vm13369_vm9, %v10301_v32, %v10302_v44  ;;  %v11826_v38 = vcombine.low %v10293_v6, %v10296_v21  ;;  %v11811_v49 = vrot.slane %v10198_v16, 9  ;;  %v17317_v3 = vadd.f32 %v12668_v2, %v7531_v22  ;;  %v18546_v22 = vld [vmem:[#allocation15_spill] sm:$0xff]  ;;  %v18547_v43 = vld [vmem:[#allocation25_spill] sm:$0xff]  ;;  %v18548_v44 = vld [vmem:[#allocation14_spill] sm:$0xff] }
 0x3df   : > { %v12642_v55 = vpop.f32.mrf.mxu1  ;;  %v11827_v63 = vcombine.low %v10300_v51, %v10303_v23  ;;  %v10308_v40 = vrot.slane %v10306_v5, 4  ;;  %v11812_v13 = vrot.slane %v10199_v30, 9  ;;  %v10313_v61 = vrot.slane %v18542_v29, 5  ;;  %v7784_v14 = vpop.f32.mrf.mxu0  ;;  %v18549_v16 = vld [vmem:[#allocation51_spill] sm:$0xff]  ;;  %v18552_v29 = vld [vmem:[#allocation30_spill] sm:$0xff] }
 0x3e0   : > { %v7533_v12 = vadd.f32 %v7442_v42, %v18543_v52  ;;  %v17321_v53 = vadd.f32 %v7784_v14, %v7529_v33  ;;  %v7536_v26 = vadd.f32 %v12639_v56, %v18544_v34  ;;  %v7534_v48 = vadd.f32 %v7445_v59, %v18545_v57  ;;  %v18554_v34 = vld [vmem:[#allocation31_spill] sm:$0xff] }
 0x3e1   : > { %v7458_v9 = vpop.f32.mrf.mxu1  ;;  %v10309_v50 = vrot.slane %v18546_v22, 5  ;;  %v10315_v10 = vrot.slane %v10313_v61, 4  ;;  %v10316_v27 = vrot.slane %v18547_v43, 5  ;;  %v12669_v32 = vpop.f32.mrf.mxu0  ;;  %v7539_v47 = vadd.f32 %v12642_v55, %v18548_v44 }
 0x3e2   : > { %12837 = vmatmul.mubr.msk.bf16.gmra.mxu1 %vm690_vm3, %v11826_v38  ;;  %v17330_v42 = vadd.f32 %v12669_v32, %v7532_v20  ;;  %v11813_v33 = vrot.slane %v10200_v11, 9  ;;  %v10320_v56 = vrot.slane %v18549_v16, 5  ;;  %v10314_v18 = vsel %vm13369_vm9, %v11812_v13, %v10313_v61  ;;  %v18550_v20 = vld [vmem:[#allocation7_spill] sm:$0xff]  ;;  %v18553_v11 = vld [vmem:[#allocation52_spill] sm:$0xff] }
 0x3e3   : > { %12840 = vmatprep.mubr.msk.bf16.mxu1 %vm690_vm3, %v11827_v63  ;;  %v12643_v21 = vpop.f32.mrf.mxu1  ;;  %v10310_v25 = vsel %vm13369_vm9, %v10308_v40, %v10309_v50  ;;  %v10317_v30 = vsel %vm13369_vm9, %v10315_v10, %v10316_v27  ;;  %v7787_v59 = vpop.f32.mrf.mxu0  ;;  %v10323_v2 = vrot.slane %v18550_v20, 5  ;;  %v10307_v51 = vsel %vm13369_vm9, %v11811_v49, %v10306_v5  ;;  %v18551_v40 = vld [vmem:[#allocation54_spill] sm:$0xff]  ;;  %v18555_v10 = vld [vmem:[#allocation59_spill] sm:$0xff] }
 0x3e4   : > { %v11829_v6 = vcombine.low %v10314_v18, %v10317_v30  ;;  %v17339_v23 = vadd.f32 %v7787_v59, %v7530_v46  ;;  %v10322_v37 = vrot.slane %v10320_v56, 4  ;;  %v10321_v55 = vsel %vm13369_vm9, %v11813_v33, %v10320_v56  ;;  %v10201_v27 = vld [vmem:[#allocation2 + $0x90] sm:$0xe]  ;;  %v18557_v59 = vld [vmem:[#allocation23_spill] sm:$0xff] }
 0x3e5   : > { %v7461_v38 = vpop.f32.mrf.mxu1  ;;  %v12672_v63 = vpop.f32.mrf.mxu0  ;;  %v10327_v13 = vrot.slane %v18551_v40, 5  ;;  %v7537_v61 = vadd.f32 %v7458_v9, %v18552_v29  ;;  %v7540_v52 = vadd.f32 %v12643_v21, %v18553_v11  ;;  %v11828_v50 = vcombine.low %v10307_v51, %v10310_v25  ;;  %v18556_v25 = vld [vmem:[#allocation35_spill] sm:$0xff]  ;;  %v18558_v20 = vld [vmem:[#allocation38_spill] sm:$0xff] }
 0x3e6   : > { %v10324_v14 = vsel %vm13369_vm9, %v10322_v37, %v10323_v2  ;;  %v17350_v46 = vadd.f32 %v12672_v63, %v7535_v62  ;;  %v7538_v57 = vadd.f32 %v7461_v38, %v18554_v34  ;;  %v11814_v21 = vrot.slane %v10201_v27, 9  ;;  %v10202_v11 = vld [vmem:[#allocation2 + $0x9c] sm:$0xe] }
 0x3e7   : > { %v12646_v22 = vpop.f32.mrf.mxu1  ;;  %v11830_v5 = vcombine.low %v10321_v55, %v10324_v14  ;;  %v7800_v49 = vpop.f32.mrf.mxu0  ;;  %v10329_v9 = vrot.slane %v10327_v13, 4  ;;  %v10330_v18 = vrot.slane %v18556_v25, 5  ;;  %v10334_v2 = vrot.slane %v18558_v20, 5  ;;  %v18559_v55 = vld [vmem:[#allocation10_spill] sm:$0xff]  ;;  %v18561_v34 = vld [vmem:[#allocation39_spill] sm:$0xff] }
 0x3e8   : > { %v7543_v43 = vadd.f32 %v12646_v22, %v18555_v10  ;;  %v17355_v32 = vadd.f32 %v7800_v49, %v7533_v12  ;;  %v10328_v14 = vsel %vm13369_vm9, %v11814_v21, %v10327_v13  ;;  %v10203_v10 = vld [vmem:[#allocation2 + $0xa8] sm:$0xe] }
 0x3e9   : > { %v7474_v44 = vpop.f32.mrf.mxu1  ;;  %v12673_v33 = vpop.f32.mrf.mxu0  ;;  %v10331_v51 = vsel %vm13369_vm9, %v10329_v9, %v10330_v18  ;;  %v10336_v49 = vrot.slane %v10334_v2, 4  ;;  %v18562_v13 = vld [vmem:[#allocation57_spill] sm:$0xff] }
 0x3ea   : > { %12841 = vmatmul.mubr.msk.bf16.gmra.mxu1 %vm690_vm3, %v11828_v50  ;;  %v7541_v62 = vadd.f32 %v7474_v44, %v17120_v39  ;;  %v17360_v16 = vadd.f32 %v12673_v33, %v7536_v26  ;;  %v18560_v26 = vld [vmem:[#allocation37_spill] sm:$0xff]  ;;  %v11831_v50 = vcombine.low %v10328_v14, %v10331_v51  ;;  %v10337_v21 = vrot.slane %v18562_v13, 5  ;;  %v10205_v13 = vld [vmem:[#allocation2 + $0xc0] sm:$0xe] }
 0x3eb   : > { %12844 = vmatprep.mubr.msk.bf16.mxu1 %vm690_vm3, %v11829_v6  ;;  %v12647_v56 = vpop.f32.mrf.mxu1  ;;  %v7803_v30 = vpop.f32.mrf.mxu0  ;;  %v10341_v6 = vrot.slane %v18559_v55, 5 }
 0x3ec   : > { %v7544_v37 = vadd.f32 %v12647_v56, %v18557_v59  ;;  %v17364_v12 = vadd.f32 %v7803_v30, %v7534_v48  ;;  %v11815_v56 = vrot.slane %v10202_v11, 9  ;;  %v11816_v30 = vrot.slane %v10203_v10, 9  ;;  %v18563_v59 = vld [vmem:[#allocation18_spill] sm:$0xff] }
 0x3ed   : > { %v7477_v38 = vpop.f32.mrf.mxu1  ;;  %v12676_v39 = vpop.f32.mrf.mxu0  ;;  %v10343_v9 = vrot.slane %v10341_v6, 4  ;;  %v10344_v20 = vrot.slane %v18563_v59, 5 }
 0x3ee   : > { %v7542_v63 = vadd.f32 %v7477_v38, %v18560_v26  ;;  %v17371_v40 = vadd.f32 %v12676_v39, %v7539_v47 }
 0x3ef   : > { %v12650_v29 = vpop.f32.mrf.mxu1  ;;  %v7816_v48 = vpop.f32.mrf.mxu0  ;;  %v10345_v26 = vsel %vm13369_vm9, %v10343_v9, %v10344_v20  ;;  %v11818_v20 = vrot.slane %v10205_v13, 9 }
 0x3f0   : > { %v7547_v22 = vadd.f32 %v12650_v29, %v18561_v34  ;;  %v17376_v27 = vadd.f32 %v7816_v48, %v7537_v61  ;;  %v18565_v29 = vld [vmem:[#allocation45_spill] sm:$0xff]  ;;  %v10335_v48 = vsel %vm13369_vm9, %v11815_v56, %v10334_v2 }
 0x3f1   : > { %v7490_v44 = vpop.f32.mrf.mxu1  ;;  %v12677_v33 = vpop.f32.mrf.mxu0  ;;  %v10355_v14 = vrot.slane %v18565_v29, 5 }
 0x3f2   : > { %12845 = vmatmul.mubr.msk.bf16.gmra.mxu1 %vm690_vm3, %v11830_v5  ;;  %v7545_v47 = vadd.f32 %v7490_v44, %v17191_v28  ;;  %v17382_v25 = vadd.f32 %v12677_v33, %v7540_v52  ;;  %v10338_v5 = vsel %vm13369_vm9, %v10336_v49, %v10337_v21  ;;  %v18564_v28 = vld [vmem:[#allocation40_spill] sm:$0xff]  ;;  %v10204_v49 = vld [vmem:[#allocation2 + $0xb4] sm:$0xe] }
 0x3f3   : > { %12848 = vmatprep.mubr.msk.bf16.mxu1 %vm690_vm3, %v11831_v50  ;;  %v12651_v18 = vpop.f32.mrf.mxu1  ;;  %v7819_v61 = vpop.f32.mrf.mxu0  ;;  %v10348_v39 = vrot.slane %v18564_v28, 5  ;;  %v11832_v50 = vcombine.low %v10335_v48, %v10338_v5  ;;  %v10357_v2 = vrot.slane %v10355_v14, 4 }
 0x3f4   : > { %v7548_v38 = vadd.f32 %v12651_v18, %v17197_v1  ;;  %v17388_v51 = vadd.f32 %v7819_v61, %v7538_v57  ;;  %v10342_v57 = vsel %vm13369_vm9, %v11816_v30, %v10341_v6  ;;  %v11817_v18 = vrot.slane %v10204_v49, 9  ;;  %v18566_v6 = vld [vmem:[#allocation42_spill] sm:$0xff]  ;;  %v18567_v61 = vld [vmem:[#allocation41_spill] sm:$0xff] }
 0x3f5   : > { %v7493_v55 = vpop.f32.mrf.mxu1  ;;  %v12680_v52 = vpop.f32.mrf.mxu0  ;;  %v11833_v9 = vcombine.low %v10342_v57, %v10345_v26  ;;  %v10350_v33 = vrot.slane %v10348_v39, 4  ;;  %v10351_v30 = vrot.slane %v18566_v6, 5  ;;  %v10358_v5 = vrot.slane %v18567_v61, 5  ;;  %v10206_v49 = vld [vmem:[#allocation2 + $0xcc] sm:$0xe] }
 0x3f6   : > { %v7546_v11 = vadd.f32 %v7493_v55, %v17204_v8  ;;  %v17397_v1 = vadd.f32 %v12680_v52, %v7543_v43 }
 0x3f7   : > { %v12654_v34 = vpop.f32.mrf.mxu1  ;;  %v7832_v10 = vpop.f32.mrf.mxu0  ;;  %v10352_v55 = vsel %vm13369_vm9, %v10350_v33, %v10351_v30  ;;  %v10359_v29 = vsel %vm13369_vm9, %v10357_v2, %v10358_v5  ;;  %v10365_v2 = vrot.slane %v17221_v31, 5 }
 0x3f8   : > { %v7551_v44 = vadd.f32 %v12654_v34, %v17219_v24  ;;  %v17402_v21 = vadd.f32 %v7832_v10, %v7541_v62  ;;  %v10349_v34 = vsel %vm13369_vm9, %v11817_v18, %v10348_v39  ;;  %v11819_v39 = vrot.slane %v10206_v49, 9 }
 0x3f9   : > { %v7506_v8 = vpop.f32.mrf.mxu1  ;;  %v12681_v43 = vpop.f32.mrf.mxu0  ;;  %v11834_v57 = vcombine.low %v10349_v34, %v10352_v55 }
 0x3fa   : > { %12849 = vmatmul.mubr.msk.bf16.gmra.mxu1 %vm690_vm3, %v11832_v50  ;;  %v7549_v56 = vadd.f32 %v7506_v8, %v17240_v7  ;;  %v17408_v59 = vadd.f32 %v12681_v43, %v7544_v37  ;;  %v10362_v7 = vrot.slane %v17209_v17, 5 }
 0x3fb   : > { %12852 = vmatprep.mubr.msk.bf16.mxu1 %vm690_vm3, %v11833_v9  ;;  %v12655_v24 = vpop.f32.mrf.mxu1  ;;  %v7835_v62 = vpop.f32.mrf.mxu0 }
 0x3fc   : > { %v7552_v28 = vadd.f32 %v12655_v24, %v17247_v4  ;;  %v17414_v26 = vadd.f32 %v7835_v62, %v7542_v63  ;;  %v10356_v63 = vsel %vm13369_vm9, %v11818_v20, %v10355_v14  ;;  %v10364_v33 = vrot.slane %v10362_v7, 4 }
 0x3fd   : > { %v7509_v52 = vpop.f32.mrf.mxu1  ;;  %v12684_v37 = vpop.f32.mrf.mxu0  ;;  %v11835_v9 = vcombine.low %v10356_v63, %v10359_v29  ;;  %v10363_v20 = vsel %vm13369_vm9, %v11819_v39, %v10362_v7 }
 0x3fe   : > { %v7550_v48 = vadd.f32 %v7509_v52, %v17251_v19  ;;  %v17422_v50 = vadd.f32 %v12684_v37, %v7547_v22 }
 0x3ff   : > { %v12694_v4 = vpop.f32.mrf.mxu1  ;;  %v7848_v10 = vpop.f32.mrf.mxu0 }
 0x400   : > { %v8607_v17 = vadd.f32 %v12694_v4, %v17264_v45  ;;  %v17427_v13 = vadd.f32 %v7848_v10, %v7545_v47  ;;  %v10366_v47 = vsel %vm13369_vm9, %v10364_v33, %v10365_v2 }
 0x401   : > { %v8478_v8 = vpop.f32.mrf.mxu1  ;;  %v12685_v19 = vpop.f32.mrf.mxu0  ;;  %v11836_v61 = vcombine.low %v10363_v20, %v10366_v47 }
 0x402   : > { %12853 = vmatmul.mubr.msk.bf16.gmra.mxu1 %vm690_vm3, %v11834_v57  ;;  %v8605_v22 = vadd.f32 %v8478_v8, %v17275_v15  ;;  %v17433_v14 = vadd.f32 %v12685_v19, %v7548_v38 }
 0x403   : > { %12856 = vmatprep.mubr.msk.bf16.mxu1 %vm690_vm3, %v11835_v9  ;;  %v12695_v43 = vpop.f32.mrf.mxu1  ;;  %v7851_v18 = vpop.f32.mrf.mxu0 }
 0x404   : > { %v8608_v45 = vadd.f32 %v12695_v43, %v17282_v35  ;;  %v17438_v6 = vadd.f32 %v7851_v18, %v7546_v11 }
 0x405   : > { %v8481_v30 = vpop.f32.mrf.mxu1  ;;  %v12688_v24 = vpop.f32.mrf.mxu0 }
 0x406   : > { %v17441_v15 = vadd.f32 %v8481_v30, %v17287_v36  ;;  %v17445_v31 = vadd.f32 %v12688_v24, %v7551_v44 }
 0x407   : > { %v12698_v38 = vpop.f32.mrf.mxu1  ;;  %v7864_v5 = vpop.f32.mrf.mxu0 }
 0x408   : > { %v8611_v35 = vadd.f32 %v12698_v38, %v17293_v54  ;;  %v17448_v62 = vadd.f32 %v7864_v5, %v7549_v56 }
 0x409   : > { %v8494_v55 = vpop.f32.mrf.mxu1  ;;  %v12689_v11 = vpop.f32.mrf.mxu0 }
 0x40a   : > { %12857 = vmatmul.mubr.msk.bf16.gmra.mxu1 %vm690_vm3, %v11836_v61  ;;  %v17452_v52 = vadd.f32 %v8494_v55, %v17298_v41  ;;  %v17454_v36 = vadd.f32 %v12689_v11, %v7552_v28 }
 0x40b   : > { %v12699_v58 = vpop.f32.mrf.mxu1  ;;  %v7867_v7 = vpop.f32.mrf.mxu0 }
 0x40c   : > { %v8612_v44 = vadd.f32 %v12699_v58, %v17302_v0  ;;  %v17457_v29 = vadd.f32 %v7867_v7, %v7550_v48 }
 0x40d   : > { %v8497_v37 = vpop.f32.mrf.mxu1  ;;  %v12728_v34 = vpop.f32.mrf.mxu0 }
 0x40e   : > { %v17460_v54 = vadd.f32 %v8497_v37, %v17307_v60  ;;  %v17462_v56 = vadd.f32 %v12728_v34, %v8607_v17 }
 0x40f   : > { %v12702_v4 = vpop.f32.mrf.mxu1  ;;  %v8948_v57 = vpop.f32.mrf.mxu0 }
 0x410   : > { %v8615_v41 = vadd.f32 %v12702_v4, %v17317_v3  ;;  %v17465_v63 = vadd.f32 %v8948_v57, %v8605_v22 }
 0x411   : > { %v8510_v28 = vpop.f32.mrf.mxu1  ;;  %v12729_v49 = vpop.f32.mrf.mxu0 }
 0x412   : > { %v17468_v10 = vadd.f32 %v8510_v28, %v17321_v53  ;;  %v17470_v0 = vadd.f32 %v12729_v49, %v8608_v45 }
 0x413   : > { %v12703_v48 = vpop.f32.mrf.mxu1  ;;  %v17472_v9 = vpop.f32.mrf.mxu0 }
 0x414   : > { %v8616_v60 = vadd.f32 %v12703_v48, %v17330_v42 }
 0x415   : > { %v8513_v17 = vpop.f32.mrf.mxu1  ;;  %v12732_v33 = vpop.f32.mrf.mxu0 }
 0x416   : > { %v17476_v8 = vadd.f32 %v8513_v17, %v17339_v23  ;;  %v17478_v3 = vadd.f32 %v12732_v33, %v8611_v35 }
 0x417   : > { %v12706_v19 = vpop.f32.mrf.mxu1  ;;  %v17480_v22 = vpop.f32.mrf.mxu0 }
 0x418   : > { %v8619_v53 = vadd.f32 %v12706_v19, %v17350_v46 }
 0x419   : > { %v8526_v39 = vpop.f32.mrf.mxu1  ;;  %v12733_v2 = vpop.f32.mrf.mxu0 }
 0x41a   : > { %v17484_v43 = vadd.f32 %v8526_v39, %v17355_v32  ;;  %v17486_v18 = vadd.f32 %v12733_v2, %v8612_v44 }
 0x41b   : > { %v12707_v42 = vpop.f32.mrf.mxu1  ;;  %v17488_v45 = vpop.f32.mrf.mxu0 }
 0x41c   : > { %v8620_v23 = vadd.f32 %v12707_v42, %v17360_v16 }
 0x41d   : > { %v8529_v47 = vpop.f32.mrf.mxu1  ;;  %v12736_v30 = vpop.f32.mrf.mxu0 }
 0x41e   : > { %v17492_v24 = vadd.f32 %v8529_v47, %v17364_v12  ;;  %v17494_v20 = vadd.f32 %v12736_v30, %v8615_v41 }
 0x41f   : > { %v12710_v46 = vpop.f32.mrf.mxu1  ;;  %v17496_v38 = vpop.f32.mrf.mxu0 }
 0x420   : > { %v8623_v32 = vadd.f32 %v12710_v46, %v17371_v40 }
 0x421   : > { %v8542_v61 = vpop.f32.mrf.mxu1  ;;  %v12737_v5 = vpop.f32.mrf.mxu0 }
 0x422   : > { %v17500_v35 = vadd.f32 %v8542_v61, %v17376_v27  ;;  %v17502_v55 = vadd.f32 %v12737_v5, %v8616_v60 }
 0x423   : > { %v12711_v16 = vpop.f32.mrf.mxu1  ;;  %v17504_v11 = vpop.f32.mrf.mxu0 }
 0x424   : > { %v8624_v12 = vadd.f32 %v12711_v16, %v17382_v25 }
 0x425   : > { %v8545_v58 = vpop.f32.mrf.mxu1  ;;  %v12740_v7 = vpop.f32.mrf.mxu0 }
 0x426   : > { %v17508_v44 = vadd.f32 %v8545_v58, %v17388_v51  ;;  %v17510_v37 = vadd.f32 %v12740_v7, %v8619_v53 }
 0x427   : > { %v12714_v40 = vpop.f32.mrf.mxu1  ;;  %v17512_v34 = vpop.f32.mrf.mxu0 }
 0x428   : > { %v8627_v27 = vadd.f32 %v12714_v40, %v17397_v1 }
 0x429   : > { %v8558_v4 = vpop.f32.mrf.mxu1  ;;  %v12741_v57 = vpop.f32.mrf.mxu0 }
 0x42a   : > { %v17516_v41 = vadd.f32 %v8558_v4, %v17402_v21  ;;  %v17518_v28 = vadd.f32 %v12741_v57, %v8620_v23 }
 0x42b   : > { %v12715_v25 = vpop.f32.mrf.mxu1  ;;  %v17520_v49 = vpop.f32.mrf.mxu0 }
 0x42c   : > { %v8628_v51 = vadd.f32 %v12715_v25, %v17408_v59 }
 0x42d   : > { %v8561_v48 = vpop.f32.mrf.mxu1  ;;  %v12744_v60 = vpop.f32.mrf.mxu0 }
 0x42e   : > { %v17524_v17 = vadd.f32 %v8561_v48, %v17414_v26  ;;  %v17526_v33 = vadd.f32 %v12744_v60, %v8623_v32 }
 0x42f   : > { %v12718_v1 = vpop.f32.mrf.mxu1  ;;  %v17528_v19 = vpop.f32.mrf.mxu0 }
 0x430   : > { %18568 = vst [vmem:[#allocation48_spill] sm:$0xff] %v17524_v17  ;;  %v8631_v21 = vadd.f32 %v12718_v1, %v17422_v50 }
 0x431   : > { %v8574_v53 = vpop.f32.mrf.mxu1  ;;  %v12745_v39 = vpop.f32.mrf.mxu0 }
 0x432   : > { %v17532_v2 = vadd.f32 %v8574_v53, %v17427_v13  ;;  %v17534_v42 = vadd.f32 %v12745_v39, %v8624_v12 }
 0x433   : > { %v12719_v59 = vpop.f32.mrf.mxu1  ;;  %v17536_v23 = vpop.f32.mrf.mxu0 }
 0x434   : > { %18569 = vst [vmem:[#allocation44_spill] sm:$0xff] %v17532_v2  ;;  %v8632_v26 = vadd.f32 %v12719_v59, %v17433_v14 }
 0x435   : > { %v8577_v47 = vpop.f32.mrf.mxu1  ;;  %v12748_v30 = vpop.f32.mrf.mxu0 }
 0x436   : > { %v17540_v46 = vadd.f32 %v8577_v47, %v17438_v6  ;;  %v17542_v32 = vadd.f32 %v12748_v30, %v8627_v27 }
 0x437   : > { %v17544_v50 = vpop.f32.mrf.mxu0 }
 0x438   : > { %18570 = vst [vmem:[#allocation21_spill] sm:$0xff] %v17540_v46  ;;  %18571 = vst [vmem:[#allocation16_spill] sm:$0xff] %v17544_v50 }
 0x439   : > { %v12749_v61 = vpop.f32.mrf.mxu0 }
 0x43a   : > { %v12722_v5 = vpop.f32.mrf.mxu1  ;;  %v17546_v13 = vadd.f32 %v12749_v61, %v8628_v51 }
 0x43b   : > { %v8635_v16 = vadd.f32 %v12722_v5, %v17445_v31  ;;  %v17549_v12 = vpop.f32.mrf.mxu0 }
 0x43c   : > { %18572 = vst [vmem:[#allocation24_spill] sm:$0xff] %v17549_v12  ;;  %v8590_v58 = vpop.f32.mrf.mxu1 }
 0x43d   : > { %v17552_v14 = vadd.f32 %v8590_v58, %v17448_v62  ;;  %v12752_v7 = vpop.f32.mrf.mxu0 }
 0x43e   : > { %v12723_v40 = vpop.f32.mrf.mxu1  ;;  %v9101_v6 = vadd.f32 %v12752_v7, %v8631_v21 }
 0x43f   : > { %18573 = vst [vmem:[#allocation53_spill] sm:$0xff] %v17552_v14  ;;  %v8636_v27 = vadd.f32 %v12723_v40, %v17454_v36  ;;  %v17555_v4 = vpop.f32.mrf.mxu0 }
 0x440   : > { %18574 = vst [vmem:[#allocation47_spill] sm:$0xff] %v17555_v4  ;;  %v8593_v57 = vpop.f32.mrf.mxu1 }
 0x441   : > { %v17558_v25 = vadd.f32 %v8593_v57, %v17457_v29  ;;  %v12753_v51 = vpop.f32.mrf.mxu0 }
 0x442   : > { %v12762_v48 = vpop.f32.mrf.mxu1  ;;  %v9102_v31 = vadd.f32 %v12753_v51, %v8632_v26 }
 0x443   : > { %18575 = vst [vmem:[#allocation56_spill] sm:$0xff] %v17558_v25  ;;  %v17561_v60 = vadd.f32 %v12762_v48, %v17462_v56  ;;  %v17563_v1 = vpop.f32.mrf.mxu0 }
 0x444   : > { %18576 = vst [vmem:[#allocation50_spill] sm:$0xff] %v17563_v1  ;;  %v9306_v62 = vpop.f32.mrf.mxu1 }
 0x445   : > { %v17566_v53 = vadd.f32 %v9306_v62, %v17465_v63  ;;  %v12756_v21 = vpop.f32.mrf.mxu0 }
 0x446   : > { %v12763_v36 = vpop.f32.mrf.mxu1  ;;  %v9105_v39 = vadd.f32 %v12756_v21, %v8635_v16 }
 0x447   : > { %v17569_v59 = vadd.f32 %v12763_v36, %v17470_v0  ;;  %v17571_v29 = vpop.f32.mrf.mxu0 }
 0x448   : > { %18577 = vst [vmem:[#allocation26_spill] sm:$0xff] %v17571_v29  ;;  %v17573_v47 = vpop.f32.mrf.mxu1 }
 0x449   : > { %v12757_v26 = vpop.f32.mrf.mxu0 }
 0x44a   : > { %v12766_v30 = vpop.f32.mrf.mxu1  ;;  %v9106_v56 = vadd.f32 %v12757_v26, %v8636_v27 }
 0x44b   : > { %v17576_v61 = vadd.f32 %v12766_v30, %v17478_v3  ;;  %v17578_v5 = vpop.f32.mrf.mxu0 }
 0x44c   : > { %18578 = vst [vmem:[#allocation60_spill] sm:$0xff] %v17578_v5  ;;  %v17580_v63 = vpop.f32.mrf.mxu1 }
 0x44d   : > { %v12796_v7 = vpop.f32.mrf.mxu0 }
 0x44e   : > { %v12767_v58 = vpop.f32.mrf.mxu1 }
 0x44f   : > { %v17583_v16 = vadd.f32 %v12767_v58, %v17486_v18  ;;  %v10032_v57 = vpop.f32.mrf.mxu0 }
 0x450   : > { %v17585_v0 = vpop.f32.mrf.mxu1 }
 0x451   : > { %v12797_v48 = vpop.f32.mrf.mxu0 }
 0x452   : > { %v12770_v40 = vpop.f32.mrf.mxu1 }
 0x453   : > { %v17588_v51 = vadd.f32 %v12770_v40, %v17494_v20  ;;  %v10035_v26 = vpop.f32.mrf.mxu0 }
 0x454   : > { %v17590_v27 = vpop.f32.mrf.mxu1 }
 0x455   : > { %v17602_v5 = vpop.f32.mrf.mxu0 }
 0x456   : > { %v12771_v3 = vpop.f32.mrf.mxu1 }
 0x457   : > { %v17593_v62 = vadd.f32 %v12771_v3, %v17502_v55  ;;  %v10048_v55 = vpop.f32.mrf.mxu0 }
 0x458   : > { %v17595_v21 = vpop.f32.mrf.mxu1 }
 0x45a   : > { %v12774_v36 = vpop.f32.mrf.mxu1 }
 0x45b   : > { %v17598_v18 = vadd.f32 %v12774_v36, %v17510_v37  ;;  %v17614_v37 = vpop.f32.mrf.mxu0 }
 0x45c   : > { %v17600_v30 = vpop.f32.mrf.mxu1 }
 0x45e   : > { %v12775_v58 = vpop.f32.mrf.mxu1 }
 0x45f   : > { %v17605_v20 = vadd.f32 %v12775_v58, %v17518_v28  ;;  %v17621_v28 = vpop.f32.mrf.mxu0 }
 0x460   : > { %v17607_v40 = vpop.f32.mrf.mxu1 }
 0x462   : > { %v12778_v25 = vpop.f32.mrf.mxu1 }
 0x463   : > { %v17610_v3 = vadd.f32 %v12778_v25, %v17526_v33  ;;  %v17628_v25 = vpop.f32.mrf.mxu0 }
 0x464   : > { %v17612_v29 = vpop.f32.mrf.mxu1 }
 0x465   : > { %18579 = vst [vmem:[#allocation55_spill] sm:$0xff] %v17610_v3 }
 0x466   : > { %v12779_v14 = vpop.f32.mrf.mxu1 }
 0x467   : > { %v17617_v36 = vadd.f32 %v12779_v14, %v17534_v42  ;;  %v17635_v14 = vpop.f32.mrf.mxu0 }
 0x468   : > { %v17619_v1 = vpop.f32.mrf.mxu1 }
 0x469   : > { %18580 = vst [vmem:[#allocation58_spill] sm:$0xff] %v17617_v36  ;;  %18581 = vst [vmem:[#allocation12_spill] sm:$0xff] %v17619_v1 }
 0x46a   : > { %v12782_v46 = vpop.f32.mrf.mxu1 }
 0x46b   : > { %v17624_v58 = vadd.f32 %v12782_v46, %v17542_v32  ;;  %v17641_v46 = vpop.f32.mrf.mxu0 }
 0x46c   : > { %v17626_v4 = vpop.f32.mrf.mxu1 }
 0x46d   : > { %18582 = vst [vmem:[#allocation20_spill] sm:$0xff] %v17624_v58  ;;  %18583 = vst [vmem:[#allocation19_spill] sm:$0xff] %v17626_v4  ;;  %v17647_v1 = vpop.f32.mrf.mxu0 }
 0x46e   : > { %v12783_v33 = vpop.f32.mrf.mxu1 }
 0x46f   : > { %v17631_v2 = vadd.f32 %v12783_v33, %v17546_v13 }
 0x470   : > { %v17633_v12 = vpop.f32.mrf.mxu1 }
 0x471   : > { %18584 = vst [vmem:[#allocation29_spill] sm:$0xff] %v17631_v2  ;;  %18585 = vst [vmem:[#allocation28_spill] sm:$0xff] %v17633_v12  ;;  %v17653_v12 = vpop.f32.mrf.mxu0 }
 0x472   : > { %v12786_v42 = vpop.f32.mrf.mxu1 }
 0x473   : > { %v17637_v17 = vadd.f32 %v12786_v42, %v9101_v6  ;;  %v17657_v42 = vpop.f32.mrf.mxu0 }
 0x474   : > { %v17639_v36 = vpop.f32.mrf.mxu1 }
 0x475   : > { %18586 = vst [vmem:[#allocation34_spill] sm:$0xff] %v17637_v17  ;;  %18587 = vst [vmem:[#allocation36_spill] sm:$0xff] %v17639_v36  ;;  %v17659_v17 = vpop.f32.mrf.mxu0 }
 0x476   : > { %v12787_v3 = vpop.f32.mrf.mxu1 }
 0x477   : > { %v17643_v32 = vadd.f32 %v12787_v3, %v9102_v31  ;;  %v17661_v31 = vpop.f32.mrf.mxu0 }
 0x478   : > { %v17645_v58 = vpop.f32.mrf.mxu1 }
 0x479   : > { %18588 = vst [vmem:[#allocation8_spill] sm:$0xff] %v17643_v32  ;;  %18589 = vst [vmem:[#allocation22_spill] sm:$0xff] %v17645_v58  ;;  %v17665_v32 = vpop.f32.mrf.mxu0 }
 0x47a   : > { %v12790_v4 = vpop.f32.mrf.mxu1  ;;  %18594 = vst [vmem:[#allocation5_spill] sm:$0xff] %v17665_v32 }
 0x47b   : > { %v17649_v13 = vadd.f32 %v12790_v4, %v9105_v39  ;;  %v9076_v4 = vadd.f32 %v17472_v9, %v17441_v15  ;;  %v10159_v39 = vadd.f32 %v10032_v57, %v17566_v53  ;;  %v9079_v15 = vadd.f32 %v17480_v22, %v17452_v52 }
 0x47c   : > { %v17651_v33 = vpop.f32.mrf.mxu1 }
 0x47d   : > { %18590 = vst [vmem:[#allocation11_spill] sm:$0xff] %v17649_v13  ;;  %18591 = vst [vmem:[#allocation6_spill] sm:$0xff] %v17651_v33  ;;  %v9437_v57 = vadd.f32 %v17580_v63, %v9079_v15  ;;  %v10165_v15 = vadd.f32 %v17602_v5, %v17576_v61 }
 0x47e   : > { %v12791_v2 = vpop.f32.mrf.mxu1 }
 0x47f   : > { %v17655_v6 = vadd.f32 %v12791_v2, %v9106_v56  ;;  %v9434_v2 = vadd.f32 %v17573_v47, %v9076_v4  ;;  %v10161_v56 = vadd.f32 %v12796_v7, %v17561_v60 }
 0x480   : > { %v17663_v3 = vpop.f32.mrf.mxu1 }
 0x481   : > { %18592 = vst [vmem:[#allocation9_spill] sm:$0xff] %v17655_v6  ;;  %18593 = vst [vmem:[#allocation13_spill] sm:$0xff] %v17663_v3  ;;  %v17672_v6 = vpop.f32.mrf.mxu0  ;;  %v10162_v3 = vadd.f32 %v12797_v48, %v17569_v59  ;;  %v10160_v50 = vadd.f32 %v10035_v26, %v9434_v2  ;;  %v9080_v26 = vadd.f32 %v17488_v45, %v17460_v54 }
 0x482   : > { %v9083_v2 = vadd.f32 %v17496_v38, %v17468_v10 }
 0x483   : > { %v17681_v53 = vpop.f32.mrf.mxu0  ;;  %v9438_v54 = vadd.f32 %v17585_v0, %v9080_v26 }
 0x485   : > { %v10164_v10 = vadd.f32 %v17621_v28, %v9438_v54 }
 0x490   : > { %v12830_v58 = vpop.f32.mrf.mxu1 }
 0x491   : > { %v17677_v32 = vadd.f32 %v12830_v58, %v10161_v56 }
 0x492   : > { %v10502_v13 = vpop.f32.mrf.mxu1 }
 0x493   : > { %v17674_v33 = vadd.f32 %v10502_v13, %v10159_v39  ;;  %v10732_v59 = vmul.f32 %v17677_v32, %v17677_v32  ;;  %v17700_v13 = vpop.f32.mrf.mxu0  ;;  %v10664_v63 = vsel %vm690_vm3, %v17677_v32, 0.0 }
 0x494   : > { %v12831_v36 = vpop.f32.mrf.mxu1 }
 0x495   : > { %v10730_v47 = vmul.f32 %v17674_v33, %v17674_v33  ;;  %v17685_v60 = vadd.f32 %v12831_v36, %v10162_v3  ;;  %v10661_v48 = vsel %vm690_vm3, %v17674_v33, 0.0  ;;  %v10163_v36 = vadd.f32 %v10048_v55, %v9437_v57 }
 0x496   : > { %v10505_v9 = vpop.f32.mrf.mxu1 }
 0x497   : > { %v17687_v7 = vadd.f32 %v10505_v9, %v10160_v50  ;;  %v10762_v3 = vsel %vm690_vm3, %v10730_v47, 0.0  ;;  %v10733_v4 = vmul.f32 %v17685_v60, %v17685_v60  ;;  %v10765_v9 = vsel %vm690_vm3, %v10732_v59, 0.0 }
 0x498   : > { %v10666_v47 = vsel %vm690_vm3, %v17685_v60, 0.0 }
 0x499   : > { %v10662_v52 = vsel %vm690_vm3, %v17687_v7, 0.0  ;;  %v10731_v22 = vmul.f32 %v17687_v7, %v17687_v7  ;;  %v10767_v26 = vsel %vm690_vm3, %v10733_v4, 0.0 }
 0x49a   : > { %v10663_v50 = vadd.f32 %v10662_v52, %v10661_v48  ;;  %v12834_v58 = vpop.f32.mrf.mxu1  ;;  %v10166_v48 = vadd.f32 %v17614_v37, %v17583_v16  ;;  %v9441_v37 = vadd.f32 %v17590_v27, %v9083_v2 }
 0x49b   : > { %v10763_v39 = vsel %vm690_vm3, %v10731_v22, 0.0  ;;  %v17721_v22 = vpop.f32.mrf.mxu0  ;;  %v17724_v61 = vadd.f32 %v12834_v58, %v10165_v15  ;;  %v9084_v58 = vadd.f32 %v17504_v11, %v17476_v8  ;;  %v10169_v11 = vadd.f32 %v17628_v25, %v17588_v51 }
 0x49c   : > { %v10665_v45 = vadd.f32 %v10664_v63, %v10663_v50  ;;  %v10764_v55 = vadd.f32 %v10763_v39, %v10762_v3  ;;  %v10518_v56 = vpop.f32.mrf.mxu1  ;;  %v10167_v54 = vadd.f32 %v17635_v14, %v9441_v37 }
 0x49d   : > { %v17716_v57 = vadd.f32 %v10518_v56, %v10163_v36  ;;  %v9087_v56 = vadd.f32 %v17512_v34, %v17484_v43  ;;  %v9442_v8 = vadd.f32 %v17595_v21, %v9084_v58  ;;  %v10170_v43 = vadd.f32 %v17641_v46, %v17593_v62 }
 0x49e   : > { %v10766_v38 = vadd.f32 %v10765_v9, %v10764_v55  ;;  %v10667_v0 = vadd.f32 %v10666_v47, %v10665_v45  ;;  %v12835_v52 = vpop.f32.mrf.mxu1  ;;  %v17739_v45 = vpop.f32.mrf.mxu0  ;;  %v10736_v55 = vmul.f32 %v17724_v61, %v17724_v61  ;;  %v10672_v9 = vsel %vm690_vm3, %v17724_v61, 0.0 }
 0x49f   : > { %v10668_v5 = vsel %vm690_vm3, %v17716_v57, 0.0  ;;  %v10734_v59 = vmul.f32 %v17716_v57, %v17716_v57  ;;  %v17732_v63 = vadd.f32 %v12835_v52, %v10166_v48  ;;  %v10168_v34 = vadd.f32 %v17647_v1, %v9442_v8 }
 0x4a0   : > { %v10669_v36 = vadd.f32 %v10668_v5, %v10667_v0  ;;  %v10768_v50 = vadd.f32 %v10767_v26, %v10766_v38  ;;  %v10521_v16 = vpop.f32.mrf.mxu1  ;;  %v17762_v25 = vpop.f32.mrf.mxu0  ;;  %v10773_v0 = vsel %vm690_vm3, %v10736_v55, 0.0  ;;  %v9088_v62 = vadd.f32 %v17520_v49, %v17492_v24 }
 0x4a1   : > { %v10769_v28 = vsel %vm690_vm3, %v10734_v59, 0.0  ;;  %v17734_v3 = vadd.f32 %v10521_v16, %v10164_v10  ;;  %v10737_v47 = vmul.f32 %v17732_v63, %v17732_v63  ;;  %v10674_v52 = vsel %vm690_vm3, %v17732_v63, 0.0 }
 0x4a2   : > { %v10770_v4 = vadd.f32 %v10769_v28, %v10768_v50  ;;  %v12838_v39 = vpop.f32.mrf.mxu1  ;;  %v9445_v1 = vadd.f32 %v17600_v30, %v9087_v56  ;;  %v9091_v58 = vadd.f32 %v17528_v19, %v17500_v35  ;;  %v9446_v35 = vadd.f32 %v17607_v40, %v9088_v62 }
 0x4a3   : > { %v10670_v27 = vsel %vm690_vm3, %v17734_v3, 0.0  ;;  %v10735_v2 = vmul.f32 %v17734_v3, %v17734_v3  ;;  %v17767_v26 = vadd.f32 %v12838_v39, %v10169_v11  ;;  %v10775_v50 = vsel %vm690_vm3, %v10737_v47, 0.0  ;;  %v17784_v39 = vpop.f32.mrf.mxu0 }
 0x4a4   : > { %v10671_v14 = vadd.f32 %v10670_v27, %v10669_v36  ;;  %v10534_v15 = vpop.f32.mrf.mxu1  ;;  %v10173_v19 = vadd.f32 %v17653_v12, %v17598_v18  ;;  %v10174_v47 = vadd.f32 %v17659_v17, %v17605_v20  ;;  %v10172_v40 = vadd.f32 %v17661_v31, %v9446_v35 }
 0x4a5   : > { %v10771_v48 = vsel %vm690_vm3, %v10735_v2, 0.0  ;;  %v17757_v10 = vadd.f32 %v10534_v15, %v10167_v54  ;;  %v10740_v54 = vmul.f32 %v17767_v26, %v17767_v26  ;;  %v10680_v11 = vsel %vm690_vm3, %v17767_v26, 0.0 }
 0x4a6   : > { %v10673_v21 = vadd.f32 %v10672_v9, %v10671_v14  ;;  %v10772_v38 = vadd.f32 %v10771_v48, %v10770_v4  ;;  %v12839_v51 = vpop.f32.mrf.mxu1  ;;  %v10171_v4 = vadd.f32 %v17657_v42, %v9445_v1  ;;  %v9092_v17 = vadd.f32 %v17536_v23, %v17508_v44 }
 0x4a7   : > { %v10738_v5 = vmul.f32 %v17757_v10, %v17757_v10  ;;  %v10676_v16 = vsel %vm690_vm3, %v17757_v10, 0.0  ;;  %v17777_v37 = vadd.f32 %v12839_v51, %v10170_v43  ;;  %v17806_v43 = vpop.f32.mrf.mxu0  ;;  %v9449_v20 = vadd.f32 %v17612_v29, %v9091_v58 }
 0x4a8   : > { %v10774_v46 = vadd.f32 %v10773_v0, %v10772_v38  ;;  %v10675_v59 = vadd.f32 %v10674_v52, %v10673_v21  ;;  %v10537_v36 = vpop.f32.mrf.mxu1 }
 0x4a9   : > { %v17779_v28 = vadd.f32 %v10537_v36, %v10168_v34  ;;  %v10777_v55 = vsel %vm690_vm3, %v10738_v5, 0.0  ;;  %v10741_v14 = vmul.f32 %v17777_v37, %v17777_v37  ;;  %v10781_v34 = vsel %vm690_vm3, %v10740_v54, 0.0  ;;  %v18597_v54 = vld [vmem:[#allocation55_spill] sm:$0xff] }
 0x4aa   : > { %v10677_v24 = vadd.f32 %v10676_v16, %v10675_v59  ;;  %v10776_v49 = vadd.f32 %v10775_v50, %v10774_v46  ;;  %v12842_v30 = vpop.f32.mrf.mxu1  ;;  %v10682_v21 = vsel %vm690_vm3, %v17777_v37, 0.0  ;;  %v18595_v59 = vld [vmem:[#allocation16_spill] sm:$0xff]  ;;  %v10175_v50 = vadd.f32 %v17672_v6, %v9449_v20  ;;  %v17828_v16 = vpop.f32.mrf.mxu0  ;;  %v18598_v6 = vld [vmem:[#allocation5_spill] sm:$0xff] }
 0x4ab   : > { %v10678_v27 = vsel %vm690_vm3, %v17779_v28, 0.0  ;;  %v10739_v2 = vmul.f32 %v17779_v28, %v17779_v28  ;;  %v17811_v38 = vadd.f32 %v12842_v30, %v10173_v19  ;;  %v10783_v5 = vsel %vm690_vm3, %v10741_v14, 0.0  ;;  %v18596_v30 = vld [vmem:[#allocation12_spill] sm:$0xff] }
 0x4ac   : > { %v10778_v42 = vadd.f32 %v10777_v55, %v10776_v49  ;;  %v10679_v56 = vadd.f32 %v10678_v27, %v10677_v24  ;;  %v10550_v8 = vpop.f32.mrf.mxu1  ;;  %v9095_v36 = vadd.f32 %v18595_v59, %v17516_v41  ;;  %v9450_v41 = vadd.f32 %v18596_v30, %v9092_v17  ;;  %v18600_v17 = vld [vmem:[#allocation48_spill] sm:$0xff] }
 0x4ad   : > { %v10779_v15 = vsel %vm690_vm3, %v10739_v2, 0.0  ;;  %v17801_v9 = vadd.f32 %v10550_v8, %v10171_v4  ;;  %v10744_v58 = vmul.f32 %v17811_v38, %v17811_v38  ;;  %v10177_v55 = vadd.f32 %v18598_v6, %v18597_v54  ;;  %v18601_v20 = vld [vmem:[#allocation24_spill] sm:$0xff] }
 0x4ae   : > { %v10681_v48 = vadd.f32 %v10680_v11, %v10679_v56  ;;  %v10780_v12 = vadd.f32 %v10779_v15, %v10778_v42  ;;  %v12843_v18 = vpop.f32.mrf.mxu1  ;;  %v10688_v19 = vsel %vm690_vm3, %v17811_v38, 0.0  ;;  %v18599_v11 = vld [vmem:[#allocation58_spill] sm:$0xff]  ;;  %v10176_v15 = vadd.f32 %v17700_v13, %v9450_v41 }
 0x4af   : > { %v10742_v51 = vmul.f32 %v17801_v9, %v17801_v9  ;;  %v10684_v62 = vsel %vm690_vm3, %v17801_v9, 0.0  ;;  %v17821_v1 = vadd.f32 %v12843_v18, %v10174_v47  ;;  %v10178_v14 = vadd.f32 %v17681_v53, %v18599_v11 }
 0x4b0   : > { %v10782_v31 = vadd.f32 %v10781_v34, %v10780_v12  ;;  %v10683_v0 = vadd.f32 %v10682_v21, %v10681_v48  ;;  %v10553_v52 = vpop.f32.mrf.mxu1  ;;  %v17850_v12 = vpop.f32.mrf.mxu0  ;;  %v10789_v18 = vsel %vm690_vm3, %v10744_v58, 0.0  ;;  %v9096_v53 = vadd.f32 %v18601_v20, %v18600_v17 }
 0x4b1   : > { %v17823_v46 = vadd.f32 %v10553_v52, %v10172_v40  ;;  %v10785_v4 = vsel %vm690_vm3, %v10742_v51, 0.0  ;;  %v10745_v42 = vmul.f32 %v17821_v1, %v17821_v1  ;;  %v10690_v34 = vsel %vm690_vm3, %v17821_v1, 0.0 }
 0x4b2   : > { %v10685_v44 = vadd.f32 %v10684_v62, %v10683_v0  ;;  %v10784_v23 = vadd.f32 %v10783_v5, %v10782_v31  ;;  %v12846_v29 = vpop.f32.mrf.mxu1  ;;  %v18602_v31 = vld [vmem:[#allocation19_spill] sm:$0xff]  ;;  %v10131_v30 = vpop.f32.mrf.mxu0 }
 0x4b3   : > { %v10686_v24 = vsel %vm690_vm3, %v17823_v46, 0.0  ;;  %v10743_v49 = vmul.f32 %v17823_v46, %v17823_v46  ;;  %v17855_v21 = vadd.f32 %v12846_v29, %v10177_v55  ;;  %v9453_v13 = vadd.f32 %v18602_v31, %v9095_v36  ;;  %v18604_v29 = vld [vmem:[#allocation47_spill] sm:$0xff] }
 0x4b4   : > { %v10786_v27 = vadd.f32 %v10785_v4, %v10784_v23  ;;  %v10687_v2 = vadd.f32 %v10686_v24, %v10685_v44  ;;  %v10566_v35 = vpop.f32.mrf.mxu1  ;;  %v10791_v62 = vsel %vm690_vm3, %v10745_v42, 0.0  ;;  %v18603_v23 = vld [vmem:[#allocation44_spill] sm:$0xff]  ;;  %v12824_v17 = vpop.f32.mrf.mxu0 }
 0x4b5   : > { %v10787_v56 = vsel %vm690_vm3, %v10743_v49, 0.0  ;;  %v17845_v8 = vadd.f32 %v10566_v35, %v10175_v50  ;;  %v9099_v58 = vadd.f32 %v18604_v29, %v18603_v23  ;;  %v10179_v4 = vadd.f32 %v17739_v45, %v9453_v13  ;;  %v18606_v35 = vld [vmem:[#allocation20_spill] sm:$0xff] }
 0x4b6   : > { %v10689_v47 = vadd.f32 %v10688_v19, %v10687_v2  ;;  %v10788_v40 = vadd.f32 %v10787_v56, %v10786_v27  ;;  %v12847_v48 = vpop.f32.mrf.mxu1  ;;  %v10748_v41 = vmul.f32 %v17855_v21, %v17855_v21  ;;  %v18605_v27 = vld [vmem:[#allocation28_spill] sm:$0xff]  ;;  %v10181_v45 = vadd.f32 %v17721_v22, %v18606_v35 }
 0x4b7   : > { %v10746_v51 = vmul.f32 %v17845_v8, %v17845_v8  ;;  %v10692_v59 = vsel %vm690_vm3, %v17845_v8, 0.0  ;;  %v17865_v50 = vadd.f32 %v12847_v48, %v10178_v14  ;;  %v9454_v2 = vadd.f32 %v18605_v27, %v9096_v53 }
 0x4b8   : > { %v10790_v0 = vadd.f32 %v10789_v18, %v10788_v40  ;;  %v10691_v52 = vadd.f32 %v10690_v34, %v10689_v47  ;;  %v10569_v5 = vpop.f32.mrf.mxu1  ;;  %v10696_v11 = vsel %vm690_vm3, %v17855_v21, 0.0  ;;  %v18607_v40 = vld [vmem:[#allocation29_spill] sm:$0xff]  ;;  %v10797_v20 = vsel %vm690_vm3, %v10748_v41, 0.0  ;;  %v18612_v41 = vld [vmem:[#allocation26_spill] sm:$0xff] }
 0x4b9   : > { %v17867_v44 = vadd.f32 %v10569_v5, %v10176_v15  ;;  %v10793_v54 = vsel %vm690_vm3, %v10746_v51, 0.0  ;;  %v10749_v14 = vmul.f32 %v17865_v50, %v17865_v50  ;;  %v10182_v48 = vadd.f32 %v17762_v25, %v18607_v40  ;;  %v18610_v25 = vld [vmem:[#allocation36_spill] sm:$0xff] }
 0x4ba   : > { %v10693_v24 = vadd.f32 %v10692_v59, %v10691_v52  ;;  %v10792_v49 = vadd.f32 %v10791_v62, %v10790_v0  ;;  %v12850_v36 = vpop.f32.mrf.mxu1  ;;  %v10180_v18 = vadd.f32 %v17784_v39, %v9454_v2  ;;  %v10698_v53 = vsel %vm690_vm3, %v17865_v50, 0.0  ;;  %v18608_v0 = vld [vmem:[#allocation21_spill] sm:$0xff]  ;;  %v18609_v52 = vld [vmem:[#allocation50_spill] sm:$0xff]  ;;  %v10144_v2 = vpop.f32.mrf.mxu0 }
 0x4bb   : > { %v10694_v6 = vsel %vm690_vm3, %v17867_v44, 0.0  ;;  %v10747_v55 = vmul.f32 %v17867_v44, %v17867_v44  ;;  %v17895_v31 = vadd.f32 %v12850_v36, %v10181_v45  ;;  %v9100_v5 = vadd.f32 %v18609_v52, %v18608_v0  ;;  %v18611_v36 = vld [vmem:[#allocation53_spill] sm:$0xff] }
 0x4bc   : > { %v10794_v19 = vadd.f32 %v10793_v54, %v10792_v49  ;;  %v10695_v42 = vadd.f32 %v10694_v6, %v10693_v24  ;;  %v10582_v56 = vpop.f32.mrf.mxu1  ;;  %v9457_v62 = vadd.f32 %v18610_v25, %v9099_v58  ;;  %v10799_v29 = vsel %vm690_vm3, %v10749_v14, 0.0  ;;  %v18614_v14 = vld [vmem:[#allocation34_spill] sm:$0xff] }
 0x4bd   : > { %v10795_v15 = vsel %vm690_vm3, %v10747_v55, 0.0  ;;  %v17887_v47 = vadd.f32 %v10582_v56, %v10179_v4  ;;  %v9103_v54 = vadd.f32 %v18612_v41, %v18611_v36  ;;  %v10752_v35 = vmul.f32 %v17895_v31, %v17895_v31  ;;  %v18613_v56 = vld [vmem:[#allocation22_spill] sm:$0xff] }
 0x4be   : > { %v10697_v34 = vadd.f32 %v10696_v11, %v10695_v42  ;;  %v10796_v22 = vadd.f32 %v10795_v15, %v10794_v19  ;;  %v12851_v51 = vpop.f32.mrf.mxu1  ;;  %v10183_v6 = vadd.f32 %v17828_v16, %v9457_v62  ;;  %v9458_v11 = vadd.f32 %v18613_v56, %v9100_v5  ;;  %v12825_v5 = vpop.f32.mrf.mxu0 }
 0x4bf   : > { %v10750_v13 = vmul.f32 %v17887_v47, %v17887_v47  ;;  %v10700_v4 = vsel %vm690_vm3, %v17887_v47, 0.0  ;;  %v17905_v24 = vadd.f32 %v12851_v51, %v10182_v48  ;;  %v10185_v16 = vadd.f32 %v17806_v43, %v18614_v14 }
 0x4c0   : > { %v10798_v39 = vadd.f32 %v10797_v20, %v10796_v22  ;;  %v10699_v59 = vadd.f32 %v10698_v53, %v10697_v34  ;;  %v10585_v23 = vpop.f32.mrf.mxu1  ;;  %v18615_v20 = vld [vmem:[#allocation8_spill] sm:$0xff]  ;;  %v10805_v25 = vsel %vm690_vm3, %v10752_v35, 0.0 }
 0x4c1   : > { %v17907_v49 = vadd.f32 %v10585_v23, %v10180_v18  ;;  %v10801_v45 = vsel %vm690_vm3, %v10750_v13, 0.0  ;;  %v10704_v18 = vsel %vm690_vm3, %v17895_v31, 0.0  ;;  %v10753_v34 = vmul.f32 %v17905_v24, %v17905_v24  ;;  %v18616_v23 = vld [vmem:[#allocation6_spill] sm:$0xff] }
 0x4c2   : > { %v10701_v55 = vadd.f32 %v10700_v4, %v10699_v59  ;;  %v10800_v27 = vadd.f32 %v10799_v29, %v10798_v39  ;;  %v12854_v58 = vpop.f32.mrf.mxu1  ;;  %v10186_v53 = vadd.f32 %v17850_v12, %v18615_v20  ;;  %v10184_v13 = vadd.f32 %v10131_v30, %v9458_v11 }
 0x4c3   : > { %v10702_v19 = vsel %vm690_vm3, %v17907_v49, 0.0  ;;  %v10751_v42 = vmul.f32 %v17907_v49, %v17907_v49  ;;  %v10706_v62 = vsel %vm690_vm3, %v17905_v24, 0.0  ;;  %v17934_v39 = vadd.f32 %v12854_v58, %v10185_v16  ;;  %v18618_v58 = vld [vmem:[#allocation60_spill] sm:$0xff] }
 0x4c4   : > { %v10802_v15 = vadd.f32 %v10801_v45, %v10800_v27  ;;  %v10703_v40 = vadd.f32 %v10702_v19, %v10701_v55  ;;  %v10598_v48 = vpop.f32.mrf.mxu1  ;;  %v9461_v29 = vadd.f32 %v18616_v23, %v9103_v54  ;;  %v10807_v30 = vsel %vm690_vm3, %v10753_v34, 0.0  ;;  %v18617_v27 = vld [vmem:[#allocation56_spill] sm:$0xff]  ;;  %v10147_v54 = vpop.f32.mrf.mxu0 }
 0x4c5   : > { %v10803_v22 = vsel %vm690_vm3, %v10751_v42, 0.0  ;;  %v17927_v51 = vadd.f32 %v10598_v48, %v10183_v6  ;;  %v9104_v35 = vadd.f32 %v18618_v58, %v18617_v27  ;;  %v10756_v11 = vmul.f32 %v17934_v39, %v17934_v39 }
 0x4c6   : > { %v10705_v0 = vadd.f32 %v10704_v18, %v10703_v40  ;;  %v10804_v52 = vadd.f32 %v10803_v22, %v10802_v15  ;;  %v12855_v43 = vpop.f32.mrf.mxu1  ;;  %v10187_v45 = vadd.f32 %v10144_v2, %v9461_v29  ;;  %v18619_v40 = vld [vmem:[#allocation13_spill] sm:$0xff]  ;;  %v18620_v18 = vld [vmem:[#allocation11_spill] sm:$0xff] }
 0x4c7   : > { %v10754_v59 = vmul.f32 %v17927_v51, %v17927_v51  ;;  %v10708_v41 = vsel %vm690_vm3, %v17927_v51, 0.0  ;;  %v17942_v6 = vadd.f32 %v12855_v43, %v10186_v53  ;;  %v9462_v48 = vadd.f32 %v18619_v40, %v9104_v35  ;;  %v18621_v43 = vld [vmem:[#allocation9_spill] sm:$0xff] }
 0x4c8   : > { %v10806_v4 = vadd.f32 %v10805_v25, %v10804_v52  ;;  %v10707_v36 = vadd.f32 %v10706_v62, %v10705_v0  ;;  %v10601_v12 = vpop.f32.mrf.mxu1  ;;  %v10189_v34 = vadd.f32 %v12824_v17, %v18620_v18  ;;  %v10712_v53 = vsel %vm690_vm3, %v17934_v39, 0.0 }
 0x4c9   : > { %v17944_v55 = vadd.f32 %v10601_v12, %v10184_v13  ;;  %v10809_v14 = vsel %vm690_vm3, %v10754_v59, 0.0  ;;  %v10757_v13 = vmul.f32 %v17942_v6, %v17942_v6  ;;  %v10190_v25 = vadd.f32 %v12825_v5, %v18621_v43 }
 0x4ca   : > { %v10709_v19 = vadd.f32 %v10708_v41, %v10707_v36  ;;  %v10808_v42 = vadd.f32 %v10807_v30, %v10806_v4  ;;  %v12858_v56 = vpop.f32.mrf.mxu1  ;;  %v10188_v62 = vadd.f32 %v10147_v54, %v9462_v48  ;;  %v10813_v17 = vsel %vm690_vm3, %v10756_v11, 0.0 }
 0x4cb   : > { %v10710_v16 = vsel %vm690_vm3, %v17944_v55, 0.0  ;;  %v10755_v15 = vmul.f32 %v17944_v55, %v17944_v55  ;;  %v10714_v4 = vsel %vm690_vm3, %v17942_v6, 0.0  ;;  %v17968_v36 = vadd.f32 %v12858_v56, %v10189_v34 }
 0x4cc   : > { %v10810_v2 = vadd.f32 %v10809_v14, %v10808_v42  ;;  %v10711_v22 = vadd.f32 %v10710_v16, %v10709_v19  ;;  %v10614_v20 = vpop.f32.mrf.mxu1  ;;  %v10815_v58 = vsel %vm690_vm3, %v10757_v13, 0.0 }
 0x4cd   : > { %v10811_v0 = vsel %vm690_vm3, %v10755_v15, 0.0  ;;  %v17962_v52 = vadd.f32 %v10614_v20, %v10187_v45  ;;  %v10760_v56 = vmul.f32 %v17968_v36, %v17968_v36  ;;  %v10720_v40 = vsel %vm690_vm3, %v17968_v36, 0.0 }
 0x4ce   : > { %v10713_v59 = vadd.f32 %v10712_v53, %v10711_v22  ;;  %v10812_v23 = vadd.f32 %v10811_v0, %v10810_v2  ;;  %v12859_v29 = vpop.f32.mrf.mxu1 }
 0x4cf   : > { %v10758_v12 = vmul.f32 %v17962_v52, %v17962_v52  ;;  %v10716_v5 = vsel %vm690_vm3, %v17962_v52, 0.0  ;;  %v17975_v35 = vadd.f32 %v12859_v29, %v10190_v25  ;;  %v10821_v22 = vsel %vm690_vm3, %v10760_v56, 0.0 }
 0x4d0   : > { %v10814_v30 = vadd.f32 %v10813_v17, %v10812_v23  ;;  %v10715_v41 = vadd.f32 %v10714_v4, %v10713_v59  ;;  %v10617_v27 = vpop.f32.mrf.mxu1 }
 0x4d1   : > { %v17977_v45 = vadd.f32 %v10617_v27, %v10188_v62  ;;  %v10817_v54 = vsel %vm690_vm3, %v10758_v12, 0.0  ;;  %v10761_v48 = vmul.f32 %v17975_v35, %v17975_v35  ;;  %v10722_v20 = vsel %vm690_vm3, %v17975_v35, 0.0 }
 0x4d2   : > { %v10717_v19 = vadd.f32 %v10716_v5, %v10715_v41  ;;  %v10816_v42 = vadd.f32 %v10815_v58, %v10814_v30 }
 0x4d3   : > { %v10718_v11 = vsel %vm690_vm3, %v17977_v45, 0.0  ;;  %v10759_v14 = vmul.f32 %v17977_v45, %v17977_v45  ;;  %v10823_v0 = vsel %vm690_vm3, %v10761_v48, 0.0 }
 0x4d4   : > { %v10818_v16 = vadd.f32 %v10817_v54, %v10816_v42  ;;  %v10719_v15 = vadd.f32 %v10718_v11, %v10717_v19 }
 0x4d5   : > { %v10819_v18 = vsel %vm690_vm3, %v10759_v14, 0.0 }
 0x4d6   : > { %v10721_v34 = vadd.f32 %v10720_v40, %v10719_v15  ;;  %v10820_v2 = vadd.f32 %v10819_v18, %v10818_v16 }
 0x4d8   : > { %v10723_v53 = vadd.f32 %v10722_v20, %v10721_v34  ;;  %v10822_v13 = vadd.f32 %v10821_v22, %v10820_v2 }
 0x4da   : > { %v10724_v43 = vrot.slane %v10723_v53, 4  ;;  %v10824_v25 = vadd.f32 %v10823_v0, %v10822_v13 }
 0x4dc   : > { %v10725_v62 = vadd.f32 %v10724_v43, %v10723_v53  ;;  %v10825_v59 = vrot.slane %v10824_v25, 4 }
 0x4de   : > { %v10726_v23 = vrot.slane %v10725_v62, 2  ;;  %v10826_v29 = vadd.f32 %v10825_v59, %v10824_v25  ;;  %v11853_v59 = vld [vmem:[%s13065_s6 + $0x19] sm:$0xff] }
 0x4e0   : > { %v10727_v17 = vadd.f32 %v10726_v23, %v10725_v62  ;;  %v10827_v4 = vrot.slane %v10826_v29, 2  ;;  %v11854_v23 = vld [vmem:[%s13065_s6 + $0x21] sm:$0xff] }
 0x4e2   : > { %v10728_v12 = vrot.slane %v10727_v17, 1  ;;  %v10828_v30 = vadd.f32 %v10827_v4, %v10826_v29  ;;  %v11855_v29 = vld [vmem:[%s13065_s6 + $0x31] sm:$0xff] }
 0x4e4   : > { %v10729_v41 = vadd.f32 %v10728_v12, %v10727_v17  ;;  %v10829_v27 = vrot.slane %v10828_v30, 1  ;;  %v11856_v17 = vld [vmem:[%s13065_s6 + $0x39] sm:$0xff] }
 0x4e6   : > { %v10830_v58 = vadd.f32 %v10829_v27, %v10828_v30  ;;  %v17995_v5 = vmul.f32 0.00390625, %v10729_v41  ;;  %v11857_v27 = vld [vmem:[%s13065_s6 + $0x49] sm:$0xff] }
 0x4e8   : > { %v10832_v19 = vmul.f32 0.00390625, %v10830_v58  ;;  %v10833_v42 = vmul.f32 %v17995_v5, %v17995_v5  ;;  %v10844_v54 = vsub.f32 %v17779_v28, %v17995_v5  ;;  %v10847_v11 = vsub.f32 %v17801_v9, %v17995_v5  ;;  %v11858_v58 = vld [vmem:[%s13065_s6 + $0x51] sm:$0xff] }
 0x4e9   : > { %v10848_v14 = vsub.f32 %v17823_v46, %v17995_v5  ;;  %v10849_v16 = vsub.f32 %v17811_v38, %v17995_v5  ;;  %v10850_v15 = vsub.f32 %v17821_v1, %v17995_v5  ;;  %v10851_v40 = vsub.f32 %v17845_v8, %v17995_v5 }
 0x4ea   : > { %v10834_v56 = vsub.f32 %v10832_v19, %v10833_v42  ;;  %v10852_v48 = vsub.f32 %v17867_v44, %v17995_v5  ;;  %v10853_v28 = vsub.f32 %v17855_v21, %v17995_v5  ;;  %v10854_v9 = vsub.f32 %v17865_v50, %v17995_v5  ;;  %v11860_v19 = vld [vmem:[%s13065_s6 + $0x69] sm:$0xff] }
 0x4eb   : > { %v10855_v46 = vsub.f32 %v17887_v47, %v17995_v5  ;;  %v10856_v38 = vsub.f32 %v17907_v49, %v17995_v5  ;;  %v10857_v1 = vsub.f32 %v17895_v31, %v17995_v5  ;;  %v10858_v8 = vsub.f32 %v17905_v24, %v17995_v5 }
 0x4ec   : > { %v10859_v44 = vsub.f32 %v17927_v51, %v17995_v5  ;;  %v10860_v21 = vsub.f32 %v17944_v55, %v17995_v5  ;;  %v10861_v50 = vsub.f32 %v17934_v39, %v17995_v5  ;;  %v10862_v47 = vsub.f32 %v17942_v6, %v17995_v5 }
 0x4ed   : > { %v10863_v49 = vsub.f32 %v17962_v52, %v17995_v5  ;;  %v10864_v31 = vsub.f32 %v17977_v45, %v17995_v5  ;;  %v10865_v24 = vsub.f32 %v17968_v36, %v17995_v5  ;;  %v10866_v51 = vsub.f32 %v17975_v35, %v17995_v5 }
 0x4ee   : > { %v10867_v18 = vadd.f32 1e-05, %v10834_v56  ;;  %v10835_v39 = vsub.f32 %v17674_v33, %v17995_v5  ;;  %v10836_v6 = vsub.f32 %v17687_v7, %v17995_v5  ;;  %v10837_v55 = vsub.f32 %v17677_v32, %v17995_v5 }
 0x4ef   : > { %v10838_v52 = vsub.f32 %v17685_v60, %v17995_v5  ;;  %v10839_v36 = vsub.f32 %v17716_v57, %v17995_v5  ;;  %v10840_v35 = vsub.f32 %v17734_v3, %v17995_v5  ;;  %v10841_v45 = vsub.f32 %v17724_v61, %v17995_v5 }
 0x4f0   : > { %12985 = vrsqrt.f32 %v10867_v18  ;;  %v10842_v33 = vsub.f32 %v17732_v63, %v17995_v5  ;;  %v10843_v7 = vsub.f32 %v17757_v10, %v17995_v5  ;;  %v10845_v32 = vsub.f32 %v17767_v26, %v17995_v5  ;;  %v11868_v18 = vld [vmem:[%s13065_s6 + $0xc9] sm:$0xff] }
 0x4f1   : > { %v10846_v60 = vsub.f32 %v17777_v37, %v17995_v5  ;;  %v11859_v5 = vld [vmem:[%s13065_s6 + $0x61] sm:$0xff] }
 0x4fd   : > { %v12986_v34 = vpop.eup %12985 }
 0x4fe   : > { %v10869_v57 = vmul.f32 %v12986_v34, %v10835_v39  ;;  %v10870_v2 = vmul.f32 %v12986_v34, %v10836_v6  ;;  %v10871_v3 = vmul.f32 %v12986_v34, %v10837_v55  ;;  %v10872_v61 = vmul.f32 %v12986_v34, %v10838_v52  ;;  %v11869_v39 = vld [vmem:[%s13065_s6 + $0xd9] sm:$0xff]  ;;  %v11870_v6 = vld [vmem:[%s13065_s6 + $0xe1] sm:$0xff]  ;;  %v11871_v55 = vld [vmem:[%s13065_s6 + $0xf1] sm:$0xff] }
 0x4ff   : > { %v10873_v22 = vmul.f32 %v12986_v34, %v10839_v36  ;;  %v10874_v63 = vmul.f32 %v12986_v34, %v10840_v35  ;;  %v10875_v20 = vmul.f32 %v12986_v34, %v10841_v45  ;;  %v10876_v53 = vmul.f32 %v12986_v34, %v10842_v33  ;;  %v11872_v52 = vld [vmem:[%s13065_s6 + $0xf9] sm:$0xff] }
 0x500   : > { %v10877_v10 = vmul.f32 %v12986_v34, %v10843_v7  ;;  %v10878_v13 = vmul.f32 %v12986_v34, %v10844_v54  ;;  %v10879_v26 = vmul.f32 %v12986_v34, %v10845_v32  ;;  %v10880_v0 = vmul.f32 %v12986_v34, %v10846_v60  ;;  %v11876_v60 = vld [vmem:[%s13065_s6 + $0x129] sm:$0xff] }
 0x501   : > { %v18063_v37 = vmul.f32 %v12986_v34, %v10847_v11  ;;  %v18065_v43 = vmul.f32 %v12986_v34, %v10848_v14  ;;  %v18067_v25 = vmul.f32 %v12986_v34, %v10849_v16  ;;  %v18069_v62 = vmul.f32 %v12986_v34, %v10850_v15  ;;  %v11861_v14 = vld [vmem:[%s13065_s6 + $0x79] sm:$0xff]  ;;  %v11862_v16 = vld [vmem:[%s13065_s6 + $0x81] sm:$0xff]  ;;  %v11863_v15 = vld [vmem:[%s13065_s6 + $0x91] sm:$0xff] }
 0x502   : > { %v18076_v4 = vmul.f32 %v12986_v34, %v10851_v40  ;;  %v18078_v12 = vmul.f32 %v12986_v34, %v10852_v48  ;;  %v18080_v30 = vmul.f32 %v12986_v34, %v10853_v28  ;;  %v18082_v41 = vmul.f32 %v12986_v34, %v10854_v9 }
 0x503   : > { %v18088_v42 = vmul.f32 %v12986_v34, %v10855_v46  ;;  %v18090_v56 = vmul.f32 %v12986_v34, %v10856_v38  ;;  %v18092_v54 = vmul.f32 %v12986_v34, %v10857_v1  ;;  %v18094_v11 = vmul.f32 %v12986_v34, %v10858_v8  ;;  %v11864_v46 = vld [vmem:[%s13065_s6 + $0x99] sm:$0xff]  ;;  %v11865_v38 = vld [vmem:[%s13065_s6 + $0xa9] sm:$0xff]  ;;  %v11866_v1 = vld [vmem:[%s13065_s6 + $0xb1] sm:$0xff] }
 0x504   : > { %v18099_v40 = vmul.f32 %v12986_v34, %v10859_v44  ;;  %v18101_v48 = vmul.f32 %v12986_v34, %v10860_v21  ;;  %v18103_v28 = vmul.f32 %v12986_v34, %v10861_v50  ;;  %v18105_v9 = vmul.f32 %v12986_v34, %v10862_v47  ;;  %v11867_v47 = vld [vmem:[%s13065_s6 + $0xc1] sm:$0xff] }
 0x505   : > { %v18115_v8 = vmul.f32 %v12986_v34, %v10863_v49  ;;  %v18117_v44 = vmul.f32 %v12986_v34, %v10864_v31  ;;  %v18119_v21 = vmul.f32 %v12986_v34, %v10865_v24  ;;  %v18121_v50 = vmul.f32 %v12986_v34, %v10866_v51  ;;  %v11873_v31 = vld [vmem:[%s13065_s6 + $0x109] sm:$0xff]  ;;  %v11874_v24 = vld [vmem:[%s13065_s6 + $0x111] sm:$0xff]  ;;  %v11875_v51 = vld [vmem:[%s13065_s6 + $0x121] sm:$0xff] }
 0x506   : > { %v10934_v36 = vadd.f32 %v11853_v59, %v10869_v57  ;;  %v10935_v35 = vadd.f32 %v11854_v23, %v10870_v2  ;;  %v10936_v49 = vadd.f32 %v11855_v29, %v10871_v3  ;;  %v10937_v45 = vadd.f32 %v11856_v17, %v10872_v61  ;;  %v11878_v57 = vld [vmem:[%s13065_s6 + $0x141] sm:$0xff] }
 0x507   : > { %18622 = vst [vmem:[#allocation3_spill] sm:$0xff] %v18121_v50  ;;  %v10938_v34 = vadd.f32 %v11857_v27, %v10873_v22  ;;  %v10939_v33 = vadd.f32 %v11858_v58, %v10874_v63  ;;  %v10940_v7 = vadd.f32 %v11859_v5, %v10875_v20  ;;  %v10941_v32 = vadd.f32 %v11860_v19, %v10876_v53  ;;  %v11877_v50 = vld [vmem:[%s13065_s6 + $0x139] sm:$0xff]  ;;  %v11879_v22 = vld [vmem:[%s13065_s6 + $0x151] sm:$0xff]  ;;  %v11881_v20 = vld [vmem:[%s13065_s6 + $0x169] sm:$0xff] }
 0x508   : > { %v10942_v2 = vadd.f32 %v11861_v14, %v10877_v10  ;;  %v10943_v3 = vadd.f32 %v11862_v16, %v10878_v13  ;;  %v10944_v61 = vadd.f32 %v11863_v15, %v10879_v26  ;;  %v10945_v59 = vadd.f32 %v11864_v46, %v10880_v0  ;;  %10966 = vst.msk [vmem:[%s18113_s25] sm:$0xff] %vm690_vm3, %v10934_v36  ;;  %v11880_v63 = vld [vmem:[%s13065_s6 + $0x159] sm:$0xff]  ;;  %v11882_v0 = vld [vmem:[%s13065_s6 + $0x171] sm:$0xff] }
 0x509   : > { %10967 = vst.msk [vmem:[%s18113_s25 + $0x8] sm:$0xff] %vm690_vm3, %v10935_v35  ;;  %10968 = vst.msk [vmem:[%s18113_s25 + $0x10] sm:$0xff] %vm690_vm3, %v10936_v49  ;;  %v10946_v53 = vadd.f32 %v11865_v38, %v18063_v37  ;;  %v10947_v10 = vadd.f32 %v11866_v1, %v18065_v43  ;;  %v10948_v13 = vadd.f32 %v11867_v47, %v18067_v25  ;;  %v11883_v37 = vld [vmem:[%s13065_s6 + $0x181] sm:$0xff]  ;;  %v11884_v43 = vld [vmem:[%s13065_s6 + $0x189] sm:$0xff] }
 0x50a   : > { %10969 = vst.msk [vmem:[%s18113_s25 + $0x18] sm:$0xff] %vm690_vm3, %v10937_v45  ;;  %v10949_v26 = vadd.f32 %v11868_v18, %v18069_v62  ;;  %10970 = vst.msk [vmem:[%s18113_s25 + $0x20] sm:$0xff] %vm690_vm3, %v10938_v34  ;;  %v10950_v25 = vadd.f32 %v11869_v39, %v18076_v4  ;;  %v10951_v23 = vadd.f32 %v11870_v6, %v18078_v12 }
 0x50b   : > { %10971 = vst.msk [vmem:[%s18113_s25 + $0x28] sm:$0xff] %vm690_vm3, %v10939_v33  ;;  %10972 = vst.msk [vmem:[%s18113_s25 + $0x30] sm:$0xff] %vm690_vm3, %v10940_v7  ;;  %v10952_v62 = vadd.f32 %v11871_v55, %v18080_v30  ;;  %v10953_v29 = vadd.f32 %v11872_v52, %v18082_v41  ;;  %v10954_v17 = vadd.f32 %v11873_v31, %v18088_v42 }
 0x50c   : > { %10973 = vst.msk [vmem:[%s18113_s25 + $0x38] sm:$0xff] %vm690_vm3, %v10941_v32  ;;  %10974 = vst.msk [vmem:[%s18113_s25 + $0x40] sm:$0xff] %vm690_vm3, %v10942_v2  ;;  %v10955_v4 = vadd.f32 %v11874_v24, %v18090_v56  ;;  %v10956_v12 = vadd.f32 %v11875_v51, %v18092_v54  ;;  %v10957_v30 = vadd.f32 %v11876_v60, %v18094_v11 }
 0x50d   : > { %10975 = vst.msk [vmem:[%s18113_s25 + $0x48] sm:$0xff] %vm690_vm3, %v10943_v3  ;;  %10976 = vst.msk [vmem:[%s18113_s25 + $0x50] sm:$0xff] %vm690_vm3, %v10944_v61  ;;  %v10958_v41 = vadd.f32 %v11877_v50, %v18099_v40  ;;  %v10959_v27 = vadd.f32 %v11878_v57, %v18101_v48  ;;  %v10960_v58 = vadd.f32 %v11879_v22, %v18103_v28 }
 0x50e   : > { %10977 = vst.msk [vmem:[%s18113_s25 + $0x58] sm:$0xff] %vm690_vm3, %v10945_v59  ;;  %10978 = vst.msk [vmem:[%s18113_s25 + $0x60] sm:$0xff] %vm690_vm3, %v10946_v53  ;;  %v10961_v5 = vadd.f32 %v11880_v63, %v18105_v9  ;;  %v10962_v19 = vadd.f32 %v11881_v20, %v18115_v8  ;;  %v10963_v42 = vadd.f32 %v11882_v0, %v18117_v44  ;;  %v18623_v54 = vld [vmem:[#allocation3_spill] sm:$0xff] }
 0x50f   : > { %10979 = vst.msk [vmem:[%s18113_s25 + $0x68] sm:$0xff] %vm690_vm3, %v10947_v10  ;;  %10980 = vst.msk [vmem:[%s18113_s25 + $0x70] sm:$0xff] %vm690_vm3, %v10948_v13  ;;  %v10964_v56 = vadd.f32 %v11883_v37, %v18119_v21  ;;  %v10965_v11 = vadd.f32 %v11884_v43, %v18623_v54 }
 0x510   : > { %10981 = vst.msk [vmem:[%s18113_s25 + $0x78] sm:$0xff] %vm690_vm3, %v10949_v26  ;;  %10982 = vst.msk [vmem:[%s18113_s25 + $0x80] sm:$0xff] %vm690_vm3, %v10950_v25 }
 0x511   : > { %10983 = vst.msk [vmem:[%s18113_s25 + $0x88] sm:$0xff] %vm690_vm3, %v10951_v23  ;;  %10984 = vst.msk [vmem:[%s18113_s25 + $0x90] sm:$0xff] %vm690_vm3, %v10952_v62 }
 0x512   : > { %10985 = vst.msk [vmem:[%s18113_s25 + $0x98] sm:$0xff] %vm690_vm3, %v10953_v29  ;;  %10986 = vst.msk [vmem:[%s18113_s25 + $0xa0] sm:$0xff] %vm690_vm3, %v10954_v17 }
 0x513   : > { %10987 = vst.msk [vmem:[%s18113_s25 + $0xa8] sm:$0xff] %vm690_vm3, %v10955_v4  ;;  %10988 = vst.msk [vmem:[%s18113_s25 + $0xb0] sm:$0xff] %vm690_vm3, %v10956_v12 }
 0x514   : > { %10989 = vst.msk [vmem:[%s18113_s25 + $0xb8] sm:$0xff] %vm690_vm3, %v10957_v30  ;;  %10990 = vst.msk [vmem:[%s18113_s25 + $0xc0] sm:$0xff] %vm690_vm3, %v10958_v41 }
 0x515   : > { %10991 = vst.msk [vmem:[%s18113_s25 + $0xc8] sm:$0xff] %vm690_vm3, %v10959_v27  ;;  %10992 = vst.msk [vmem:[%s18113_s25 + $0xd0] sm:$0xff] %vm690_vm3, %v10960_v58 }
 0x516   : > { %10993 = vst.msk [vmem:[%s18113_s25 + $0xd8] sm:$0xff] %vm690_vm3, %v10961_v5  ;;  %10994 = vst.msk [vmem:[%s18113_s25 + $0xe0] sm:$0xff] %vm690_vm3, %v10962_v19 }
 0x517   : > { %10995 = vst.msk [vmem:[%s18113_s25 + $0xe8] sm:$0xff] %vm690_vm3, %v10963_v42  ;;  %10996 = vst.msk [vmem:[%s18113_s25 + $0xf0] sm:$0xff] %vm690_vm3, %v10964_v56 }
 0x518   : > { %10997 = vst.msk [vmem:[%s18113_s25 + $0xf8] sm:$0xff] %vm690_vm3, %v10965_v11 }
 0x519 PF: > { %s15_s18 = sadd.s32 1, %s12995_s18  }
 0x51a   : > { %p12_p4 = scmp.ge.s32.totalorder %s15_s18, 4  }
 0x51c   :  { %14 = sbr.rel (!%p12_p4) target bundleno = 1 (0x1), region = 89 }

</bundles_post_ra>
